<compile_context>
chip_gen: v5e
topology: v5e:2x2
jax: 0.10.0
libtpu: 0.0.40
codegen_flags: <defaults>
</compile_context>

<pallas_src>
import functools
import jax
import jax.numpy as jnp
from jax.experimental import pallas as pl
from jax.experimental.pallas import tpu as pltpu


def _round_up(x, m):
    return (x + m - 1) // m * m


def _full_spec(shape):
    nd = len(shape)
    return pl.BlockSpec(shape, lambda i, _nd=nd: (0,) * _nd)


# ----------------------------------------------------------------------------
# Pallas kernel 1: fused matmul + folded-BN affine + activation  (conv1 path)
# ----------------------------------------------------------------------------
def _matmul_affine_act_kernel(a_ref, b_ref, s_ref, c_ref, o_ref, *, act):
    acc = jnp.dot(a_ref[...], b_ref[...], preferred_element_type=jnp.float32)
    acc = acc * s_ref[...] + c_ref[...]          # folded BatchNorm
    if act == "relu":
        acc = jnp.maximum(acc, 0.0)
    elif act == "sigmoid":
        acc = jax.nn.sigmoid(acc)
    o_ref[...] = acc


def matmul_affine_act(a, b_p, s_p, c_p, *, act, tm):
    """(M,K) f32 @ pre-padded (Kp,Np) bf16 weights, + BN affine + activation."""
    M, K = a.shape
    Kp, Np = b_p.shape
    tm = min(tm, _round_up(M, 16))
    Mp = _round_up(M, tm)
    a_p = jnp.pad(a, ((0, Mp - M), (0, Kp - K))).astype(jnp.bfloat16)
    out = pl.pallas_call(
        functools.partial(_matmul_affine_act_kernel, act=act),
        out_shape=jax.ShapeDtypeStruct((Mp, Np), jnp.float32),
        grid=(Mp // tm,),
        in_specs=[
            pl.BlockSpec((tm, Kp), lambda i: (i, 0)),
            pl.BlockSpec((Kp, Np), lambda i: (0, 0)),
            pl.BlockSpec((1, Np), lambda i: (0, 0)),
            pl.BlockSpec((1, Np), lambda i: (0, 0)),
        ],
        out_specs=pl.BlockSpec((tm, Np), lambda i: (i, 0)),
        compiler_params=pltpu.CompilerParams(dimension_semantics=("parallel",)),
    )(a_p, b_p, s_p, c_p)
    return out[:M, :]


# ----------------------------------------------------------------------------
# Pallas kernel 2: direct 3x3 conv (+BN +act, optional fused concat / multiply)
# ----------------------------------------------------------------------------
def _direct_conv_kernel(*refs, offs, act, n_in, fuse_mul):
    """refs = x_flat[0..n_in-1], w_taps[0..n_in-1], scale, bias, (mul), out.

    Each x_flat is a 2-D (rows, Cin_i) f32 array where every conv tap occupies
    a contiguous block of `o_ref.shape[0]` rows starting at a static offset in
    `offs` (stride handled by a space-to-depth phase layout in the wrapper).
    Each w_taps is (9, Cin_i, Coutp) bf16.  Accumulation is f32 on the MXU."""
    x_refs = refs[:n_in]
    w_refs = refs[n_in:2 * n_in]
    s_ref = refs[2 * n_in]
    b_ref = refs[2 * n_in + 1]
    m_ref = refs[2 * n_in + 2] if fuse_mul else None
    o_ref = refs[-1]
    rows = o_ref.shape[0]

    acc = jnp.zeros(o_ref.shape, jnp.float32)
    for t, off in enumerate(offs):
        for xi in range(n_in):
            v = x_refs[xi][off:off + rows, :].astype(jnp.bfloat16)
            acc = acc + jnp.dot(v, w_refs[xi][t],
                                preferred_element_type=jnp.float32)
    acc = acc * s_ref[...] + b_ref[...]          # folded BatchNorm
    if act == "relu":
        acc = jnp.maximum(acc, 0.0)
    elif act == "sigmoid":
        acc = jax.nn.sigmoid(acc)
    if fuse_mul:
        acc = acc * m_ref[...]                   # fused attention multiply
    o_ref[...] = acc


def direct_conv(xs, wts, scale, bias, *, stride, pad, act, cout, mul=None):
    """3x3 Conv2d(bias=False)+BN+activation without im2col in HBM.

    xs : list of NHWC f32 inputs sharing (N,H,W); >1 entries = fused channel
         concat (each has its own weight half in `wts`).
    wts: list of (9, Cin_i, Coutp) bf16 tap weights.  scale/bias: (1,Coutp) f32.
    mul: optional NHWC tensor, fused as  out = act(BN(conv)) * mul.
    Returns (N, OH, OW, cout) f32."""
    k = 3
    N, H, W, _ = xs[0].shape
    OH = (H + 2 * pad - k) // stride + 1
    OW = (W + 2 * pad - k) // stride + 1
    coutp = scale.shape[-1]

    if stride == 1:
        P, Ph, Pw = 1, H + 2 * pad, W + 2 * pad
        taps = [(0, di, dj) for di in range(k) for dj in range(k)]
    else:  # stride == 2: space-to-depth phases -> every tap is unit-stride
        Hp2 = _round_up(H + 2 * pad, 2)
        Wp2 = _round_up(W + 2 * pad, 2)
        P, Ph, Pw = 4, Hp2 // 2, Wp2 // 2
        taps = [((di % 2) * 2 + (dj % 2), di // 2, dj // 2)
                for di in range(k) for dj in range(k)]

    rows = OH * Pw                     # valid output rows (extra cols discarded)
    rows_p = _round_up(rows, 8)
    offs = tuple(p * Ph * Pw + ro * Pw + co for p, ro, co in taps)
    extra = max(0, max(o + rows_p for o in offs) - P * Ph * Pw)

    kern = functools.partial(_direct_conv_kernel, offs=offs, act=act,
                             n_in=len(xs), fuse_mul=mul is not None)
    outs = []
    for n in range(N):
        flats = []
        for x in xs:
            C = x.shape[-1]
            xp = jnp.pad(x[n], ((pad, pad), (pad, pad), (0, 0)))
            if stride == 2:
                h_pad, w_pad, _ = xp.shape
                xp = jnp.pad(xp, ((0, Hp2 - h_pad), (0, Wp2 - w_pad), (0, 0)))
                xp = xp.reshape(Ph, 2, Pw, 2, C).transpose(1, 3, 0, 2, 4)
            flat = xp.reshape(P * Ph * Pw, C)
            flats.append(jnp.pad(flat, ((0, extra), (0, 0))))
        ins = flats + list(wts) + [scale, bias]
        if mul is not None:
            m = jnp.pad(mul[n], ((0, 0), (0, Pw - OW), (0, coutp - mul.shape[-1])))
            m = jnp.pad(m.reshape(rows, coutp), ((0, rows_p - rows), (0, 0)))
            ins.append(m)
        out = pl.pallas_call(
            kern,
            out_shape=jax.ShapeDtypeStruct((rows_p, coutp), jnp.float32),
            grid=(1,),
            in_specs=[_full_spec(a.shape) for a in ins],
            out_specs=_full_spec((rows_p, coutp)),
        )(*ins)
        outs.append(out[:rows].reshape(OH, Pw, coutp)[None, :, :OW, :cout])
    return outs[0] if N == 1 else jnp.concatenate(outs, axis=0)


# ----------------------------------------------------------------------------
# Plain-JAX glue (fused by XLA under jit)
# ----------------------------------------------------------------------------
def _im2col(x, k, stride, pad):
    """x: (N,H,W,C) -> (N*OH*OW, k*k*C), feature order (di, dj, c)."""
    N, H, W, C = x.shape
    xp = jnp.pad(x, ((0, 0), (pad, pad), (pad, pad), (0, 0)))
    OH = (H + 2 * pad - k) // stride + 1
    OW = (W + 2 * pad - k) // stride + 1
    cols = []
    for di in range(k):
        for dj in range(k):
            cols.append(xp[:, di:di + (OH - 1) * stride + 1:stride,
                             dj:dj + (OW - 1) * stride + 1:stride, :])
    patches = jnp.concatenate(cols, axis=-1)
    return patches.reshape(N * OH * OW, k * k * C), OH, OW


def maxpool_3x3_s2(x):
    """MaxPool2d(3, stride=2, padding=0) as a fused max tree (NHWC)."""
    N, H, W, C = x.shape
    OH = (H - 3) // 2 + 1
    OW = (W - 3) // 2 + 1
    out = None
    for di in range(3):
        for dj in range(3):
            v = x[:, di:di + 2 * OH - 1:2, dj:dj + 2 * OW - 1:2, :]
            out = v if out is None else jnp.maximum(out, v)
    return out


def bilinear_resize_align_corners(x, out_h, out_w):
    """F.interpolate(mode='bilinear', align_corners=True), NHWC."""
    N, H, W, C = x.shape

    def coords(out_s, in_s):
        if out_s == 1 or in_s == 1:
            src = jnp.zeros((out_s,), jnp.float32)
        else:
            src = jnp.arange(out_s, dtype=jnp.float32) * (in_s - 1) / (out_s - 1)
        i0 = jnp.clip(jnp.floor(src).astype(jnp.int32), 0, in_s - 1)
        i1 = jnp.clip(i0 + 1, 0, in_s - 1)
        return i0, i1, src - i0.astype(jnp.float32)

    y0, y1, wy = coords(out_h, H)
    x0, x1, wx = coords(out_w, W)
    wx = wx[None, None, :, None]
    wy = wy[None, :, None, None]
    row0 = x[:, y0]
    row1 = x[:, y1]
    top = row0[:, :, x0] * (1 - wx) + row0[:, :, x1] * wx
    bot = row1[:, :, x0] * (1 - wx) + row1[:, :, x1] * wx
    return top * (1 - wy) + bot * wy


# ----------------------------------------------------------------------------
# Parameters (deterministic, synthetic) + one-time pre-folding
# ----------------------------------------------------------------------------
def make_params(key):
    def conv_block(key, cin, cout, k):
        fan_in = cin * k * k
        w = jax.random.normal(key, (cout, cin, k, k), jnp.float32) * jnp.sqrt(2.0 / fan_in)
        # BatchNorm at PyTorch default init: gamma=1, beta=0, mean=0, var=1
        return dict(w=w,
                    gamma=jnp.ones((cout,), jnp.float32),
                    beta=jnp.zeros((cout,), jnp.float32),
                    mean=jnp.zeros((cout,), jnp.float32),
                    var=jnp.ones((cout,), jnp.float32))

    ks = jax.random.split(key, 8)
    return dict(
        conv1=conv_block(ks[0], 1, 64, 7),
        conv2=conv_block(ks[1], 64, 64, 3),
        conv3=conv_block(ks[2], 64, 64, 3),
        conv4=conv_block(ks[3], 64, 128, 3),
        conv5=conv_block(ks[4], 128, 128, 3),
        conv55=conv_block(ks[5], 128, 128, 3),
        conv54=conv_block(ks[6], 256, 64, 3),
        conv43=conv_block(ks[7], 128, 64, 3),
    )


def _fold_bn(p, eps=1e-5):
    scale = p["gamma"] / jnp.sqrt(p["var"] + eps)
    bias = p["beta"] - p["mean"] * scale
    return scale, bias


def prepare_params(params):
    """Pre-fold BN, pre-transpose/pad weights, cast weights to bf16 (once)."""
    prep = {}

    # conv1 (k=7, Cin=1): im2col + matmul path.
    p = params["conv1"]
    cout, cin, k, _ = p["w"].shape
    K = k * k * cin
    Kp, Np = _round_up(K, 128), _round_up(cout, 128)
    w2 = jnp.transpose(p["w"], (2, 3, 1, 0)).reshape(K, cout)   # (di,dj,cin) order
    scale, bias = _fold_bn(p)
    prep["conv1"] = dict(
        w=jnp.pad(w2, ((0, Kp - K), (0, Np - cout))).astype(jnp.bfloat16),
        scale=jnp.pad(scale, (0, Np - cout)).reshape(1, Np),
        bias=jnp.pad(bias, (0, Np - cout)).reshape(1, Np),
        cout=cout)

    # 3x3 convs: per-tap weights (9, Cin_i, Coutp); splits implement fused concat.
    for name, splits in (("conv2", (64,)), ("conv3", (64,)), ("conv4", (64,)),
                         ("conv5", (128,)), ("conv55", (128,)),
                         ("conv54", (128, 128)), ("conv43", (64, 64))):
        p = params[name]
        cout = p["w"].shape[0]
        coutp = _round_up(cout, 128)
        wt = jnp.transpose(p["w"], (2, 3, 1, 0)).reshape(9, p["w"].shape[1], cout)
        wt = jnp.pad(wt, ((0, 0), (0, 0), (0, coutp - cout))).astype(jnp.bfloat16)
        parts, off = [], 0
        for c in splits:
            parts.append(wt[:, off:off + c, :])
            off += c
        scale, bias = _fold_bn(p)
        prep[name] = dict(
            w=parts,
            scale=jnp.pad(scale, (0, coutp - cout)).reshape(1, coutp),
            bias=jnp.pad(bias, (0, coutp - cout)).reshape(1, coutp),
            cout=cout)
    return prep


# ----------------------------------------------------------------------------
# Graphfeat forward
# ----------------------------------------------------------------------------
def graphfeat_forward(prep, x_nchw):
    x = jnp.transpose(x_nchw, (0, 2, 3, 1))                    # NCHW -> NHWC
    N = x.shape[0]

    # conv1 (7x7/s2/p3, Cin=1) + BN + ReLU via im2col + fused matmul kernel.
    p = prep["conv1"]
    patches, OH, OW = _im2col(x, 7, 2, 3)
    x0 = matmul_affine_act(patches, p["w"], p["scale"], p["bias"],
                           act="relu", tm=512)
    x0 = x0[:, :p["cout"]].reshape(N, OH, OW, p["cout"])

    x = maxpool_3x3_s2(x0)

    def dconv(name, xs, *, stride, act, mul=None):
        pp = prep[name]
        return direct_conv(xs, pp["w"], pp["scale"], pp["bias"], stride=stride,
                           pad=1, act=act, cout=pp["cout"], mul=mul)

    x1 = dconv("conv2", [x], stride=2, act="relu")
    x2 = dconv("conv3", [x1], stride=2, act="relu")
    x3 = dconv("conv4", [x2], stride=2, act="relu")
    x4 = dconv("conv5", [x3], stride=2, act="relu")

    # TODO(synk): the PyTorch avg_pool2d(x4,(6,6)) + nearest interpolate result
    # is immediately overwritten (dead code) -> skipped.
    # conv55 + BN + sigmoid, with the attention multiply x4*sigmoid(.) fused.
    x4 = dconv("conv55", [x4], stride=1, act="sigmoid", mul=x4)

    xu = bilinear_resize_align_corners(x4, x3.shape[1], x3.shape[2])
    x = dconv("conv54", [xu, x3], stride=1, act="relu")        # concat fused (2 K-halves)
    xu = bilinear_resize_align_corners(x, x2.shape[1], x2.shape[2])
    x2 = dconv("conv43", [xu, x2], stride=1, act="relu")

    # TODO(synk): PyTorch returns (x2, _) where `_` is undefined (NameError);
    # we return only x2, in NCHW.
    return jnp.transpose(x2, (0, 3, 1, 2))


if __name__ == "__main__":
    key = jax.random.PRNGKey(0)
    pkey, xkey = jax.random.split(key)
    params = make_params(pkey)
    prep = prepare_params(params)

    # Module's first conv takes 1 input channel; 128x128 survives the 5 stride-2
    # stages + maxpool (output ends up at 8x8).
    x = jax.random.normal(xkey, (1, 1, 128, 128), jnp.float32)   # NCHW like PyTorch

    fwd = jax.jit(functools.partial(graphfeat_forward, prep))
    out = jax.block_until_ready(fwd(x))
    assert out.shape == (1, 64, 8, 8), out.shape
    assert bool(jnp.all(jnp.isfinite(out)))
    print("KERNEL_OK")
</pallas_src>

<mosaic_0001>
module attributes {stable_mosaic.version = 11 : i64} {
  func.func @_matmul_affine_act_kernel(%arg0: i32, %arg1: memref<512x128xbf16, #tpu.memory_space<vmem>>, %arg2: memref<128x128xbf16, #tpu.memory_space<vmem>>, %arg3: memref<1x128xf32, #tpu.memory_space<vmem>>, %arg4: memref<1x128xf32, #tpu.memory_space<vmem>>, %arg5: memref<512x128xf32, #tpu.memory_space<vmem>>) attributes {dimension_semantics = [#tpu.dimension_semantics<parallel>], iteration_bounds = array<i64: 8>, scalar_prefetch = 0 : i64, scratch_operands = 0 : i64, tpu.core_type = #tpu.core_type<tc>, window_params = [{transform_indices = @transform_0, window_bounds = array<i64: 512, 128>}, {pipeline_mode = #tpu.pipeline_mode<synchronous>, transform_indices = @transform_1, window_bounds = array<i64: 128, 128>}, {pipeline_mode = #tpu.pipeline_mode<synchronous>, transform_indices = @transform_2, window_bounds = array<i64: 1, 128>}, {pipeline_mode = #tpu.pipeline_mode<synchronous>, transform_indices = @transform_3, window_bounds = array<i64: 1, 128>}, {transform_indices = @transform_4, window_bounds = array<i64: 512, 128>}]} {
    %c0 = arith.constant 0 : index
    %c0_0 = arith.constant 0 : index
    %0 = vector.load %arg1[%c0, %c0_0] : memref<512x128xbf16, #tpu.memory_space<vmem>>, vector<512x128xbf16>
    %c0_1 = arith.constant 0 : index
    %c0_2 = arith.constant 0 : index
    %1 = vector.load %arg2[%c0_1, %c0_2] : memref<128x128xbf16, #tpu.memory_space<vmem>>, vector<128x128xbf16>
    %cst = arith.constant dense<0.000000e+00> : vector<512x128xf32>
    %2 = tpu.matmul %0, %1, %cst {dimension_numbers = #tpu.dot_dimension_numbers<[1], [0], [0], [1], [0, 0, 1, 1], [], []>} : vector<512x128xbf16>, vector<128x128xbf16>, vector<512x128xf32> -> vector<512x128xf32>
    %c0_3 = arith.constant 0 : index
    %c0_4 = arith.constant 0 : index
    %3 = vector.load %arg3[%c0_3, %c0_4] : memref<1x128xf32, #tpu.memory_space<vmem>>, vector<1x128xf32>
    %4 = vector.broadcast %3 : vector<1x128xf32> to vector<512x128xf32>
    %5 = arith.mulf %2, %4 : vector<512x128xf32>
    %c0_5 = arith.constant 0 : index
    %c0_6 = arith.constant 0 : index
    %6 = vector.load %arg4[%c0_5, %c0_6] : memref<1x128xf32, #tpu.memory_space<vmem>>, vector<1x128xf32>
    %7 = vector.broadcast %6 : vector<1x128xf32> to vector<512x128xf32>
    %8 = arith.addf %5, %7 : vector<512x128xf32>
    %cst_7 = arith.constant 0.000000e+00 : f32
    %9 = vector.broadcast %cst_7 : f32 to vector<512x128xf32>
    %10 = arith.maximumf %8, %9 : vector<512x128xf32>
    %c0_8 = arith.constant 0 : index
    %c0_9 = arith.constant 0 : index
    %11 = vector.load %arg5[%c0_8, %c0_9] : memref<512x128xf32, #tpu.memory_space<vmem>>, vector<512x128xf32>
    tpu.vector_store %arg5[%c0_8, %c0_9], %10 {strides = array<i32>} : memref<512x128xf32, #tpu.memory_space<vmem>>, vector<512x128xf32>,
    return
  }
  func.func @transform_0(%arg0: i32) -> (i32, i32) {
    %c0_i32 = arith.constant 0 : i32
    %c0_i32_0 = arith.constant 0 : i32
    return %arg0, %c0_i32 : i32, i32
  }
  func.func @transform_1(%arg0: i32) -> (i32, i32) {
    %c0_i32 = arith.constant 0 : i32
    %c0_i32_0 = arith.constant 0 : i32
    %c0_i32_1 = arith.constant 0 : i32
    return %c0_i32, %c0_i32_0 : i32, i32
  }
  func.func @transform_2(%arg0: i32) -> (i32, i32) {
    %c0_i32 = arith.constant 0 : i32
    %c0_i32_0 = arith.constant 0 : i32
    %c0_i32_1 = arith.constant 0 : i32
    return %c0_i32, %c0_i32_0 : i32, i32
  }
  func.func @transform_3(%arg0: i32) -> (i32, i32) {
    %c0_i32 = arith.constant 0 : i32
    %c0_i32_0 = arith.constant 0 : i32
    %c0_i32_1 = arith.constant 0 : i32
    return %c0_i32, %c0_i32_0 : i32, i32
  }
  func.func @transform_4(%arg0: i32) -> (i32, i32) {
    %c0_i32 = arith.constant 0 : i32
    %c0_i32_0 = arith.constant 0 : i32
    return %arg0, %c0_i32 : i32, i32
  }
}

module attributes {stable_mosaic.version = 11 : i64} {
  func.func @_direct_conv_kernel(%arg0: i32, %arg1: memref<1156x64xf32, #tpu.memory_space<vmem>>, %arg2: memref<9x64x128xbf16, #tpu.memory_space<vmem>>, %arg3: memref<1x128xf32, #tpu.memory_space<vmem>>, %arg4: memref<1x128xf32, #tpu.memory_space<vmem>>, %arg5: memref<272x128xf32, #tpu.memory_space<vmem>>) attributes {dimension_semantics = [#tpu.dimension_semantics<arbitrary>], iteration_bounds = array<i64: 1>, scalar_prefetch = 0 : i64, scratch_operands = 0 : i64, tpu.core_type = #tpu.core_type<tc>, window_params = [{pipeline_mode = #tpu.pipeline_mode<synchronous>, transform_indices = @transform_0, window_bounds = array<i64: 1156, 64>}, {pipeline_mode = #tpu.pipeline_mode<synchronous>, transform_indices = @transform_1, window_bounds = array<i64: 9, 64, 128>}, {pipeline_mode = #tpu.pipeline_mode<synchronous>, transform_indices = @transform_2, window_bounds = array<i64: 1, 128>}, {pipeline_mode = #tpu.pipeline_mode<synchronous>, transform_indices = @transform_3, window_bounds = array<i64: 1, 128>}, {pipeline_mode = #tpu.pipeline_mode<synchronous>, transform_indices = @transform_4, window_bounds = array<i64: 272, 128>}]} {
    %cst = arith.constant 0.000000e+00 : f32
    %0 = vector.broadcast %cst : f32 to vector<272x128xf32>
    %c0 = arith.constant 0 : index
    %c0_0 = arith.constant 0 : index
    %1 = vector.load %arg1[%c0, %c0_0] : memref<1156x64xf32, #tpu.memory_space<vmem>>, vector<272x64xf32>
    %2 = arith.truncf %1 : vector<272x64xf32> to vector<272x64xbf16>
    %c0_1 = arith.constant 0 : index
    %c0_2 = arith.constant 0 : index
    %c0_3 = arith.constant 0 : index
    %3 = vector.load %arg2[%c0_1, %c0_2, %c0_3] : memref<9x64x128xbf16, #tpu.memory_space<vmem>>, vector<1x64x128xbf16>
    %4 = vector.shape_cast %3 : vector<1x64x128xbf16> to vector<64x128xbf16>
    %cst_4 = arith.constant dense<0.000000e+00> : vector<272x128xf32>
    %5 = tpu.matmul %2, %4, %cst_4 {dimension_numbers = #tpu.dot_dimension_numbers<[1], [0], [0], [1], [0, 0, 1, 1], [], []>} : vector<272x64xbf16>, vector<64x128xbf16>, vector<272x128xf32> -> vector<272x128xf32>
    %6 = arith.addf %0, %5 : vector<272x128xf32>
    %c289 = arith.constant 289 : index
    %c0_5 = arith.constant 0 : index
    %7 = vector.load %arg1[%c289, %c0_5] : memref<1156x64xf32, #tpu.memory_space<vmem>>, vector<272x64xf32>
    %8 = arith.truncf %7 : vector<272x64xf32> to vector<272x64xbf16>
    %c1 = arith.constant 1 : index
    %c0_6 = arith.constant 0 : index
    %c0_7 = arith.constant 0 : index
    %9 = vector.load %arg2[%c1, %c0_6, %c0_7] : memref<9x64x128xbf16, #tpu.memory_space<vmem>>, vector<1x64x128xbf16>
    %10 = vector.shape_cast %9 : vector<1x64x128xbf16> to vector<64x128xbf16>
    %cst_8 = arith.constant dense<0.000000e+00> : vector<272x128xf32>
    %11 = tpu.matmul %8, %10, %cst_8 {dimension_numbers = #tpu.dot_dimension_numbers<[1], [0], [0], [1], [0, 0, 1, 1], [], []>} : vector<272x64xbf16>, vector<64x128xbf16>, vector<272x128xf32> -> vector<272x128xf32>
    %12 = arith.addf %6, %11 : vector<272x128xf32>
    %c1_9 = arith.constant 1 : index
    %c0_10 = arith.constant 0 : index
    %13 = vector.load %arg1[%c1_9, %c0_10] : memref<1156x64xf32, #tpu.memory_space<vmem>>, vector<272x64xf32>
    %14 = arith.truncf %13 : vector<272x64xf32> to vector<272x64xbf16>
    %c2 = arith.constant 2 : index
    %c0_11 = arith.constant 0 : index
    %c0_12 = arith.constant 0 : index
    %15 = vector.load %arg2[%c2, %c0_11, %c0_12] : memref<9x64x128xbf16, #tpu.memory_space<vmem>>, vector<1x64x128xbf16>
    %16 = vector.shape_cast %15 : vector<1x64x128xbf16> to vector<64x128xbf16>
    %cst_13 = arith.constant dense<0.000000e+00> : vector<272x128xf32>
    %17 = tpu.matmul %14, %16, %cst_13 {dimension_numbers = #tpu.dot_dimension_numbers<[1], [0], [0], [1], [0, 0, 1, 1], [], []>} : vector<272x64xbf16>, vector<64x128xbf16>, vector<272x128xf32> -> vector<272x128xf32>
    %18 = arith.addf %12, %17 : vector<272x128xf32>
    %c578 = arith.constant 578 : index
    %c0_14 = arith.constant 0 : index
    %19 = vector.load %arg1[%c578, %c0_14] : memref<1156x64xf32, #tpu.memory_space<vmem>>, vector<272x64xf32>
    %20 = arith.truncf %19 : vector<272x64xf32> to vector<272x64xbf16>
    %c3 = arith.constant 3 : index
    %c0_15 = arith.constant 0 : index
    %c0_16 = arith.constant 0 : index
    %21 = vector.load %arg2[%c3, %c0_15, %c0_16] : memref<9x64x128xbf16, #tpu.memory_space<vmem>>, vector<1x64x128xbf16>
    %22 = vector.shape_cast %21 : vector<1x64x128xbf16> to vector<64x128xbf16>
    %cst_17 = arith.constant dense<0.000000e+00> : vector<272x128xf32>
    %23 = tpu.matmul %20, %22, %cst_17 {dimension_numbers = #tpu.dot_dimension_numbers<[1], [0], [0], [1], [0, 0, 1, 1], [], []>} : vector<272x64xbf16>, vector<64x128xbf16>, vector<272x128xf32> -> vector<272x128xf32>
    %24 = arith.addf %18, %23 : vector<272x128xf32>
    %c867 = arith.constant 867 : index
    %c0_18 = arith.constant 0 : index
    %25 = vector.load %arg1[%c867, %c0_18] : memref<1156x64xf32, #tpu.memory_space<vmem>>, vector<272x64xf32>
    %26 = arith.truncf %25 : vector<272x64xf32> to vector<272x64xbf16>
    %c4 = arith.constant 4 : index
    %c0_19 = arith.constant 0 : index
    %c0_20 = arith.constant 0 : index
    %27 = vector.load %arg2[%c4, %c0_19, %c0_20] : memref<9x64x128xbf16, #tpu.memory_space<vmem>>, vector<1x64x128xbf16>
    %28 = vector.shape_cast %27 : vector<1x64x128xbf16> to vector<64x128xbf16>
    %cst_21 = arith.constant dense<0.000000e+00> : vector<272x128xf32>
    %29 = tpu.matmul %26, %28, %cst_21 {dimension_numbers = #tpu.dot_dimension_numbers<[1], [0], [0], [1], [0, 0, 1, 1], [], []>} : vector<272x64xbf16>, vector<64x128xbf16>, vector<272x128xf32> -> vector<272x128xf32>
    %30 = arith.addf %24, %29 : vector<272x128xf32>
    %c579 = arith.constant 579 : index
    %c0_22 = arith.constant 0 : index
    %31 = vector.load %arg1[%c579, %c0_22] : memref<1156x64xf32, #tpu.memory_space<vmem>>, vector<272x64xf32>
    %32 = arith.truncf %31 : vector<272x64xf32> to vector<272x64xbf16>
    %c5 = arith.constant 5 : index
    %c0_23 = arith.constant 0 : index
    %c0_24 = arith.constant 0 : index
    %33 = vector.load %arg2[%c5, %c0_23, %c0_24] : memref<9x64x128xbf16, #tpu.memory_space<vmem>>, vector<1x64x128xbf16>
    %34 = vector.shape_cast %33 : vector<1x64x128xbf16> to vector<64x128xbf16>
    %cst_25 = arith.constant dense<0.000000e+00> : vector<272x128xf32>
    %35 = tpu.matmul %32, %34, %cst_25 {dimension_numbers = #tpu.dot_dimension_numbers<[1], [0], [0], [1], [0, 0, 1, 1], [], []>} : vector<272x64xbf16>, vector<64x128xbf16>, vector<272x128xf32> -> vector<272x128xf32>
    %36 = arith.addf %30, %35 : vector<272x128xf32>
    %c17 = arith.constant 17 : index
    %c0_26 = arith.constant 0 : index
    %37 = vector.load %arg1[%c17, %c0_26] : memref<1156x64xf32, #tpu.memory_space<vmem>>, vector<272x64xf32>
    %38 = arith.truncf %37 : vector<272x64xf32> to vector<272x64xbf16>
    %c6 = arith.constant 6 : index
    %c0_27 = arith.constant 0 : index
    %c0_28 = arith.constant 0 : index
    %39 = vector.load %arg2[%c6, %c0_27, %c0_28] : memref<9x64x128xbf16, #tpu.memory_space<vmem>>, vector<1x64x128xbf16>
    %40 = vector.shape_cast %39 : vector<1x64x128xbf16> to vector<64x128xbf16>
    %cst_29 = arith.constant dense<0.000000e+00> : vector<272x128xf32>
    %41 = tpu.matmul %38, %40, %cst_29 {dimension_numbers = #tpu.dot_dimension_numbers<[1], [0], [0], [1], [0, 0, 1, 1], [], []>} : vector<272x64xbf16>, vector<64x128xbf16>, vector<272x128xf32> -> vector<272x128xf32>
    %42 = arith.addf %36, %41 : vector<272x128xf32>
    %c306 = arith.constant 306 : index
    %c0_30 = arith.constant 0 : index
    %43 = vector.load %arg1[%c306, %c0_30] : memref<1156x64xf32, #tpu.memory_space<vmem>>, vector<272x64xf32>
    %44 = arith.truncf %43 : vector<272x64xf32> to vector<272x64xbf16>
    %c7 = arith.constant 7 : index
    %c0_31 = arith.constant 0 : index
    %c0_32 = arith.constant 0 : index
    %45 = vector.load %arg2[%c7, %c0_31, %c0_32] : memref<9x64x128xbf16, #tpu.memory_space<vmem>>, vector<1x64x128xbf16>
    %46 = vector.shape_cast %45 : vector<1x64x128xbf16> to vector<64x128xbf16>
    %cst_33 = arith.constant dense<0.000000e+00> : vector<272x128xf32>
    %47 = tpu.matmul %44, %46, %cst_33 {dimension_numbers = #tpu.dot_dimension_numbers<[1], [0], [0], [1], [0, 0, 1, 1], [], []>} : vector<272x64xbf16>, vector<64x128xbf16>, vector<272x128xf32> -> vector<272x128xf32>
    %48 = arith.addf %42, %47 : vector<272x128xf32>
    %c18 = arith.constant 18 : index
    %c0_34 = arith.constant 0 : index
    %49 = vector.load %arg1[%c18, %c0_34] : memref<1156x64xf32, #tpu.memory_space<vmem>>, vector<272x64xf32>
    %50 = arith.truncf %49 : vector<272x64xf32> to vector<272x64xbf16>
    %c8 = arith.constant 8 : index
    %c0_35 = arith.constant 0 : index
    %c0_36 = arith.constant 0 : index
    %51 = vector.load %arg2[%c8, %c0_35, %c0_36] : memref<9x64x128xbf16, #tpu.memory_space<vmem>>, vector<1x64x128xbf16>
    %52 = vector.shape_cast %51 : vector<1x64x128xbf16> to vector<64x128xbf16>
    %cst_37 = arith.constant dense<0.000000e+00> : vector<272x128xf32>
    %53 = tpu.matmul %50, %52, %cst_37 {dimension_numbers = #tpu.dot_dimension_numbers<[1], [0], [0], [1], [0, 0, 1, 1], [], []>} : vector<272x64xbf16>, vector<64x128xbf16>, vector<272x128xf32> -> vector<272x128xf32>
    %54 = arith.addf %48, %53 : vector<272x128xf32>
    %c0_38 = arith.constant 0 : index
    %c0_39 = arith.constant 0 : index
    %55 = vector.load %arg3[%c0_38, %c0_39] : memref<1x128xf32, #tpu.memory_space<vmem>>, vector<1x128xf32>
    %56 = vector.broadcast %55 : vector<1x128xf32> to vector<272x128xf32>
    %57 = arith.mulf %54, %56 : vector<272x128xf32>
    %c0_40 = arith.constant 0 : index
    %c0_41 = arith.constant 0 : index
    %58 = vector.load %arg4[%c0_40, %c0_41] : memref<1x128xf32, #tpu.memory_space<vmem>>, vector<1x128xf32>
    %59 = vector.broadcast %58 : vector<1x128xf32> to vector<272x128xf32>
    %60 = arith.addf %57, %59 : vector<272x128xf32>
    %cst_42 = arith.constant 0.000000e+00 : f32
    %61 = vector.broadcast %cst_42 : f32 to vector<272x128xf32>
    %62 = arith.maximumf %60, %61 : vector<272x128xf32>
    %c0_43 = arith.constant 0 : index
    %c0_44 = arith.constant 0 : index
    %63 = vector.load %arg5[%c0_43, %c0_44] : memref<272x128xf32, #tpu.memory_space<vmem>>, vector<272x128xf32>
    tpu.vector_store %arg5[%c0_43, %c0_44], %62 {strides = array<i32>} : memref<272x128xf32, #tpu.memory_space<vmem>>, vector<272x128xf32>,
    return
  }
  func.func @transform_0(%arg0: i32) -> (i32, i32) {
    %c0_i32 = arith.constant 0 : i32
    %c0_i32_0 = arith.constant 0 : i32
    %c0_i32_1 = arith.constant 0 : i32
    return %c0_i32, %c0_i32_0 : i32, i32
  }
  func.func @transform_1(%arg0: i32) -> (i32, i32, i32) {
    %c0_i32 = arith.constant 0 : i32
    %c0_i32_0 = arith.constant 0 : i32
    %c0_i32_1 = arith.constant 0 : i32
    %c0_i32_2 = arith.constant 0 : i32
    return %c0_i32, %c0_i32_0, %c0_i32_1 : i32, i32, i32
  }
  func.func @transform_2(%arg0: i32) -> (i32, i32) {
    %c0_i32 = arith.constant 0 : i32
    %c0_i32_0 = arith.constant 0 : i32
    %c0_i32_1 = arith.constant 0 : i32
    return %c0_i32, %c0_i32_0 : i32, i32
  }
  func.func @transform_3(%arg0: i32) -> (i32, i32) {
    %c0_i32 = arith.constant 0 : i32
    %c0_i32_0 = arith.constant 0 : i32
    %c0_i32_1 = arith.constant 0 : i32
    return %c0_i32, %c0_i32_0 : i32, i32
  }
  func.func @transform_4(%arg0: i32) -> (i32, i32) {
    %c0_i32 = arith.constant 0 : i32
    %c0_i32_0 = arith.constant 0 : i32
    %c0_i32_1 = arith.constant 0 : i32
    return %c0_i32, %c0_i32_0 : i32, i32
  }
}

module attributes {stable_mosaic.version = 11 : i64} {
  func.func @_direct_conv_kernel(%arg0: i32, %arg1: memref<324x64xf32, #tpu.memory_space<vmem>>, %arg2: memref<9x64x128xbf16, #tpu.memory_space<vmem>>, %arg3: memref<1x128xf32, #tpu.memory_space<vmem>>, %arg4: memref<1x128xf32, #tpu.memory_space<vmem>>, %arg5: memref<72x128xf32, #tpu.memory_space<vmem>>) attributes {dimension_semantics = [#tpu.dimension_semantics<arbitrary>], iteration_bounds = array<i64: 1>, scalar_prefetch = 0 : i64, scratch_operands = 0 : i64, tpu.core_type = #tpu.core_type<tc>, window_params = [{pipeline_mode = #tpu.pipeline_mode<synchronous>, transform_indices = @transform_0, window_bounds = array<i64: 324, 64>}, {pipeline_mode = #tpu.pipeline_mode<synchronous>, transform_indices = @transform_1, window_bounds = array<i64: 9, 64, 128>}, {pipeline_mode = #tpu.pipeline_mode<synchronous>, transform_indices = @transform_2, window_bounds = array<i64: 1, 128>}, {pipeline_mode = #tpu.pipeline_mode<synchronous>, transform_indices = @transform_3, window_bounds = array<i64: 1, 128>}, {pipeline_mode = #tpu.pipeline_mode<synchronous>, transform_indices = @transform_4, window_bounds = array<i64: 72, 128>}]} {
    %cst = arith.constant 0.000000e+00 : f32
    %0 = vector.broadcast %cst : f32 to vector<72x128xf32>
    %c0 = arith.constant 0 : index
    %c0_0 = arith.constant 0 : index
    %1 = vector.load %arg1[%c0, %c0_0] : memref<324x64xf32, #tpu.memory_space<vmem>>, vector<72x64xf32>
    %2 = arith.truncf %1 : vector<72x64xf32> to vector<72x64xbf16>
    %c0_1 = arith.constant 0 : index
    %c0_2 = arith.constant 0 : index
    %c0_3 = arith.constant 0 : index
    %3 = vector.load %arg2[%c0_1, %c0_2, %c0_3] : memref<9x64x128xbf16, #tpu.memory_space<vmem>>, vector<1x64x128xbf16>
    %4 = vector.shape_cast %3 : vector<1x64x128xbf16> to vector<64x128xbf16>
    %cst_4 = arith.constant dense<0.000000e+00> : vector<72x128xf32>
    %5 = tpu.matmul %2, %4, %cst_4 {dimension_numbers = #tpu.dot_dimension_numbers<[1], [0], [0], [1], [0, 0, 1, 1], [], []>} : vector<72x64xbf16>, vector<64x128xbf16>, vector<72x128xf32> -> vector<72x128xf32>
    %6 = arith.addf %0, %5 : vector<72x128xf32>
    %c81 = arith.constant 81 : index
    %c0_5 = arith.constant 0 : index
    %7 = vector.load %arg1[%c81, %c0_5] : memref<324x64xf32, #tpu.memory_space<vmem>>, vector<72x64xf32>
    %8 = arith.truncf %7 : vector<72x64xf32> to vector<72x64xbf16>
    %c1 = arith.constant 1 : index
    %c0_6 = arith.constant 0 : index
    %c0_7 = arith.constant 0 : index
    %9 = vector.load %arg2[%c1, %c0_6, %c0_7] : memref<9x64x128xbf16, #tpu.memory_space<vmem>>, vector<1x64x128xbf16>
    %10 = vector.shape_cast %9 : vector<1x64x128xbf16> to vector<64x128xbf16>
    %cst_8 = arith.constant dense<0.000000e+00> : vector<72x128xf32>
    %11 = tpu.matmul %8, %10, %cst_8 {dimension_numbers = #tpu.dot_dimension_numbers<[1], [0], [0], [1], [0, 0, 1, 1], [], []>} : vector<72x64xbf16>, vector<64x128xbf16>, vector<72x128xf32> -> vector<72x128xf32>
    %12 = arith.addf %6, %11 : vector<72x128xf32>
    %c1_9 = arith.constant 1 : index
    %c0_10 = arith.constant 0 : index
    %13 = vector.load %arg1[%c1_9, %c0_10] : memref<324x64xf32, #tpu.memory_space<vmem>>, vector<72x64xf32>
    %14 = arith.truncf %13 : vector<72x64xf32> to vector<72x64xbf16>
    %c2 = arith.constant 2 : index
    %c0_11 = arith.constant 0 : index
    %c0_12 = arith.constant 0 : index
    %15 = vector.load %arg2[%c2, %c0_11, %c0_12] : memref<9x64x128xbf16, #tpu.memory_space<vmem>>, vector<1x64x128xbf16>
    %16 = vector.shape_cast %15 : vector<1x64x128xbf16> to vector<64x128xbf16>
    %cst_13 = arith.constant dense<0.000000e+00> : vector<72x128xf32>
    %17 = tpu.matmul %14, %16, %cst_13 {dimension_numbers = #tpu.dot_dimension_numbers<[1], [0], [0], [1], [0, 0, 1, 1], [], []>} : vector<72x64xbf16>, vector<64x128xbf16>, vector<72x128xf32> -> vector<72x128xf32>
    %18 = arith.addf %12, %17 : vector<72x128xf32>
    %c162 = arith.constant 162 : index
    %c0_14 = arith.constant 0 : index
    %19 = vector.load %arg1[%c162, %c0_14] : memref<324x64xf32, #tpu.memory_space<vmem>>, vector<72x64xf32>
    %20 = arith.truncf %19 : vector<72x64xf32> to vector<72x64xbf16>
    %c3 = arith.constant 3 : index
    %c0_15 = arith.constant 0 : index
    %c0_16 = arith.constant 0 : index
    %21 = vector.load %arg2[%c3, %c0_15, %c0_16] : memref<9x64x128xbf16, #tpu.memory_space<vmem>>, vector<1x64x128xbf16>
    %22 = vector.shape_cast %21 : vector<1x64x128xbf16> to vector<64x128xbf16>
    %cst_17 = arith.constant dense<0.000000e+00> : vector<72x128xf32>
    %23 = tpu.matmul %20, %22, %cst_17 {dimension_numbers = #tpu.dot_dimension_numbers<[1], [0], [0], [1], [0, 0, 1, 1], [], []>} : vector<72x64xbf16>, vector<64x128xbf16>, vector<72x128xf32> -> vector<72x128xf32>
    %24 = arith.addf %18, %23 : vector<72x128xf32>
    %c243 = arith.constant 243 : index
    %c0_18 = arith.constant 0 : index
    %25 = vector.load %arg1[%c243, %c0_18] : memref<324x64xf32, #tpu.memory_space<vmem>>, vector<72x64xf32>
    %26 = arith.truncf %25 : vector<72x64xf32> to vector<72x64xbf16>
    %c4 = arith.constant 4 : index
    %c0_19 = arith.constant 0 : index
    %c0_20 = arith.constant 0 : index
    %27 = vector.load %arg2[%c4, %c0_19, %c0_20] : memref<9x64x128xbf16, #tpu.memory_space<vmem>>, vector<1x64x128xbf16>
    %28 = vector.shape_cast %27 : vector<1x64x128xbf16> to vector<64x128xbf16>
    %cst_21 = arith.constant dense<0.000000e+00> : vector<72x128xf32>
    %29 = tpu.matmul %26, %28, %cst_21 {dimension_numbers = #tpu.dot_dimension_numbers<[1], [0], [0], [1], [0, 0, 1, 1], [], []>} : vector<72x64xbf16>, vector<64x128xbf16>, vector<72x128xf32> -> vector<72x128xf32>
    %30 = arith.addf %24, %29 : vector<72x128xf32>
    %c163 = arith.constant 163 : index
    %c0_22 = arith.constant 0 : index
    %31 = vector.load %arg1[%c163, %c0_22] : memref<324x64xf32, #tpu.memory_space<vmem>>, vector<72x64xf32>
    %32 = arith.truncf %31 : vector<72x64xf32> to vector<72x64xbf16>
    %c5 = arith.constant 5 : index
    %c0_23 = arith.constant 0 : index
    %c0_24 = arith.constant 0 : index
    %33 = vector.load %arg2[%c5, %c0_23, %c0_24] : memref<9x64x128xbf16, #tpu.memory_space<vmem>>, vector<1x64x128xbf16>
    %34 = vector.shape_cast %33 : vector<1x64x128xbf16> to vector<64x128xbf16>
    %cst_25 = arith.constant dense<0.000000e+00> : vector<72x128xf32>
    %35 = tpu.matmul %32, %34, %cst_25 {dimension_numbers = #tpu.dot_dimension_numbers<[1], [0], [0], [1], [0, 0, 1, 1], [], []>} : vector<72x64xbf16>, vector<64x128xbf16>, vector<72x128xf32> -> vector<72x128xf32>
    %36 = arith.addf %30, %35 : vector<72x128xf32>
    %c9 = arith.constant 9 : index
    %c0_26 = arith.constant 0 : index
    %37 = vector.load %arg1[%c9, %c0_26] : memref<324x64xf32, #tpu.memory_space<vmem>>, vector<72x64xf32>
    %38 = arith.truncf %37 : vector<72x64xf32> to vector<72x64xbf16>
    %c6 = arith.constant 6 : index
    %c0_27 = arith.constant 0 : index
    %c0_28 = arith.constant 0 : index
    %39 = vector.load %arg2[%c6, %c0_27, %c0_28] : memref<9x64x128xbf16, #tpu.memory_space<vmem>>, vector<1x64x128xbf16>
    %40 = vector.shape_cast %39 : vector<1x64x128xbf16> to vector<64x128xbf16>
    %cst_29 = arith.constant dense<0.000000e+00> : vector<72x128xf32>
    %41 = tpu.matmul %38, %40, %cst_29 {dimension_numbers = #tpu.dot_dimension_numbers<[1], [0], [0], [1], [0, 0, 1, 1], [], []>} : vector<72x64xbf16>, vector<64x128xbf16>, vector<72x128xf32> -> vector<72x128xf32>
    %42 = arith.addf %36, %41 : vector<72x128xf32>
    %c90 = arith.constant 90 : index
    %c0_30 = arith.constant 0 : index
    %43 = vector.load %arg1[%c90, %c0_30] : memref<324x64xf32, #tpu.memory_space<vmem>>, vector<72x64xf32>
    %44 = arith.truncf %43 : vector<72x64xf32> to vector<72x64xbf16>
    %c7 = arith.constant 7 : index
    %c0_31 = arith.constant 0 : index
    %c0_32 = arith.constant 0 : index
    %45 = vector.load %arg2[%c7, %c0_31, %c0_32] : memref<9x64x128xbf16, #tpu.memory_space<vmem>>, vector<1x64x128xbf16>
    %46 = vector.shape_cast %45 : vector<1x64x128xbf16> to vector<64x128xbf16>
    %cst_33 = arith.constant dense<0.000000e+00> : vector<72x128xf32>
    %47 = tpu.matmul %44, %46, %cst_33 {dimension_numbers = #tpu.dot_dimension_numbers<[1], [0], [0], [1], [0, 0, 1, 1], [], []>} : vector<72x64xbf16>, vector<64x128xbf16>, vector<72x128xf32> -> vector<72x128xf32>
    %48 = arith.addf %42, %47 : vector<72x128xf32>
    %c10 = arith.constant 10 : index
    %c0_34 = arith.constant 0 : index
    %49 = vector.load %arg1[%c10, %c0_34] : memref<324x64xf32, #tpu.memory_space<vmem>>, vector<72x64xf32>
    %50 = arith.truncf %49 : vector<72x64xf32> to vector<72x64xbf16>
    %c8 = arith.constant 8 : index
    %c0_35 = arith.constant 0 : index
    %c0_36 = arith.constant 0 : index
    %51 = vector.load %arg2[%c8, %c0_35, %c0_36] : memref<9x64x128xbf16, #tpu.memory_space<vmem>>, vector<1x64x128xbf16>
    %52 = vector.shape_cast %51 : vector<1x64x128xbf16> to vector<64x128xbf16>
    %cst_37 = arith.constant dense<0.000000e+00> : vector<72x128xf32>
    %53 = tpu.matmul %50, %52, %cst_37 {dimension_numbers = #tpu.dot_dimension_numbers<[1], [0], [0], [1], [0, 0, 1, 1], [], []>} : vector<72x64xbf16>, vector<64x128xbf16>, vector<72x128xf32> -> vector<72x128xf32>
    %54 = arith.addf %48, %53 : vector<72x128xf32>
    %c0_38 = arith.constant 0 : index
    %c0_39 = arith.constant 0 : index
    %55 = vector.load %arg3[%c0_38, %c0_39] : memref<1x128xf32, #tpu.memory_space<vmem>>, vector<1x128xf32>
    %56 = vector.broadcast %55 : vector<1x128xf32> to vector<72x128xf32>
    %57 = arith.mulf %54, %56 : vector<72x128xf32>
    %c0_40 = arith.constant 0 : index
    %c0_41 = arith.constant 0 : index
    %58 = vector.load %arg4[%c0_40, %c0_41] : memref<1x128xf32, #tpu.memory_space<vmem>>, vector<1x128xf32>
    %59 = vector.broadcast %58 : vector<1x128xf32> to vector<72x128xf32>
    %60 = arith.addf %57, %59 : vector<72x128xf32>
    %cst_42 = arith.constant 0.000000e+00 : f32
    %61 = vector.broadcast %cst_42 : f32 to vector<72x128xf32>
    %62 = arith.maximumf %60, %61 : vector<72x128xf32>
    %c0_43 = arith.constant 0 : index
    %c0_44 = arith.constant 0 : index
    %63 = vector.load %arg5[%c0_43, %c0_44] : memref<72x128xf32, #tpu.memory_space<vmem>>, vector<72x128xf32>
    tpu.vector_store %arg5[%c0_43, %c0_44], %62 {strides = array<i32>} : memref<72x128xf32, #tpu.memory_space<vmem>>, vector<72x128xf32>,
    return
  }
  func.func @transform_0(%arg0: i32) -> (i32, i32) {
    %c0_i32 = arith.constant 0 : i32
    %c0_i32_0 = arith.constant 0 : i32
    %c0_i32_1 = arith.constant 0 : i32
    return %c0_i32, %c0_i32_0 : i32, i32
  }
  func.func @transform_1(%arg0: i32) -> (i32, i32, i32) {
    %c0_i32 = arith.constant 0 : i32
    %c0_i32_0 = arith.constant 0 : i32
    %c0_i32_1 = arith.constant 0 : i32
    %c0_i32_2 = arith.constant 0 : i32
    return %c0_i32, %c0_i32_0, %c0_i32_1 : i32, i32, i32
  }
  func.func @transform_2(%arg0: i32) -> (i32, i32) {
    %c0_i32 = arith.constant 0 : i32
    %c0_i32_0 = arith.constant 0 : i32
    %c0_i32_1 = arith.constant 0 : i32
    return %c0_i32, %c0_i32_0 : i32, i32
  }
  func.func @transform_3(%arg0: i32) -> (i32, i32) {
    %c0_i32 = arith.constant 0 : i32
    %c0_i32_0 = arith.constant 0 : i32
    %c0_i32_1 = arith.constant 0 : i32
    return %c0_i32, %c0_i32_0 : i32, i32
  }
  func.func @transform_4(%arg0: i32) -> (i32, i32) {
    %c0_i32 = arith.constant 0 : i32
    %c0_i32_0 = arith.constant 0 : i32
    %c0_i32_1 = arith.constant 0 : i32
    return %c0_i32, %c0_i32_0 : i32, i32
  }
}

module attributes {stable_mosaic.version = 11 : i64} {
  func.func @_direct_conv_kernel(%arg0: i32, %arg1: memref<100x64xf32, #tpu.memory_space<vmem>>, %arg2: memref<9x64x128xbf16, #tpu.memory_space<vmem>>, %arg3: memref<1x128xf32, #tpu.memory_space<vmem>>, %arg4: memref<1x128xf32, #tpu.memory_space<vmem>>, %arg5: memref<24x128xf32, #tpu.memory_space<vmem>>) attributes {dimension_semantics = [#tpu.dimension_semantics<arbitrary>], iteration_bounds = array<i64: 1>, scalar_prefetch = 0 : i64, scratch_operands = 0 : i64, tpu.core_type = #tpu.core_type<tc>, window_params = [{pipeline_mode = #tpu.pipeline_mode<synchronous>, transform_indices = @transform_0, window_bounds = array<i64: 100, 64>}, {pipeline_mode = #tpu.pipeline_mode<synchronous>, transform_indices = @transform_1, window_bounds = array<i64: 9, 64, 128>}, {pipeline_mode = #tpu.pipeline_mode<synchronous>, transform_indices = @transform_2, window_bounds = array<i64: 1, 128>}, {pipeline_mode = #tpu.pipeline_mode<synchronous>, transform_indices = @transform_3, window_bounds = array<i64: 1, 128>}, {pipeline_mode = #tpu.pipeline_mode<synchronous>, transform_indices = @transform_4, window_bounds = array<i64: 24, 128>}]} {
    %cst = arith.constant 0.000000e+00 : f32
    %0 = vector.broadcast %cst : f32 to vector<24x128xf32>
    %c0 = arith.constant 0 : index
    %c0_0 = arith.constant 0 : index
    %1 = vector.load %arg1[%c0, %c0_0] : memref<100x64xf32, #tpu.memory_space<vmem>>, vector<24x64xf32>
    %2 = arith.truncf %1 : vector<24x64xf32> to vector<24x64xbf16>
    %c0_1 = arith.constant 0 : index
    %c0_2 = arith.constant 0 : index
    %c0_3 = arith.constant 0 : index
    %3 = vector.load %arg2[%c0_1, %c0_2, %c0_3] : memref<9x64x128xbf16, #tpu.memory_space<vmem>>, vector<1x64x128xbf16>
    %4 = vector.shape_cast %3 : vector<1x64x128xbf16> to vector<64x128xbf16>
    %cst_4 = arith.constant dense<0.000000e+00> : vector<24x128xf32>
    %5 = tpu.matmul %2, %4, %cst_4 {dimension_numbers = #tpu.dot_dimension_numbers<[1], [0], [0], [1], [0, 0, 1, 1], [], []>} : vector<24x64xbf16>, vector<64x128xbf16>, vector<24x128xf32> -> vector<24x128xf32>
    %6 = arith.addf %0, %5 : vector<24x128xf32>
    %c25 = arith.constant 25 : index
    %c0_5 = arith.constant 0 : index
    %7 = vector.load %arg1[%c25, %c0_5] : memref<100x64xf32, #tpu.memory_space<vmem>>, vector<24x64xf32>
    %8 = arith.truncf %7 : vector<24x64xf32> to vector<24x64xbf16>
    %c1 = arith.constant 1 : index
    %c0_6 = arith.constant 0 : index
    %c0_7 = arith.constant 0 : index
    %9 = vector.load %arg2[%c1, %c0_6, %c0_7] : memref<9x64x128xbf16, #tpu.memory_space<vmem>>, vector<1x64x128xbf16>
    %10 = vector.shape_cast %9 : vector<1x64x128xbf16> to vector<64x128xbf16>
    %cst_8 = arith.constant dense<0.000000e+00> : vector<24x128xf32>
    %11 = tpu.matmul %8, %10, %cst_8 {dimension_numbers = #tpu.dot_dimension_numbers<[1], [0], [0], [1], [0, 0, 1, 1], [], []>} : vector<24x64xbf16>, vector<64x128xbf16>, vector<24x128xf32> -> vector<24x128xf32>
    %12 = arith.addf %6, %11 : vector<24x128xf32>
    %c1_9 = arith.constant 1 : index
    %c0_10 = arith.constant 0 : index
    %13 = vector.load %arg1[%c1_9, %c0_10] : memref<100x64xf32, #tpu.memory_space<vmem>>, vector<24x64xf32>
    %14 = arith.truncf %13 : vector<24x64xf32> to vector<24x64xbf16>
    %c2 = arith.constant 2 : index
    %c0_11 = arith.constant 0 : index
    %c0_12 = arith.constant 0 : index
    %15 = vector.load %arg2[%c2, %c0_11, %c0_12] : memref<9x64x128xbf16, #tpu.memory_space<vmem>>, vector<1x64x128xbf16>
    %16 = vector.shape_cast %15 : vector<1x64x128xbf16> to vector<64x128xbf16>
    %cst_13 = arith.constant dense<0.000000e+00> : vector<24x128xf32>
    %17 = tpu.matmul %14, %16, %cst_13 {dimension_numbers = #tpu.dot_dimension_numbers<[1], [0], [0], [1], [0, 0, 1, 1], [], []>} : vector<24x64xbf16>, vector<64x128xbf16>, vector<24x128xf32> -> vector<24x128xf32>
    %18 = arith.addf %12, %17 : vector<24x128xf32>
    %c50 = arith.constant 50 : index
    %c0_14 = arith.constant 0 : index
    %19 = vector.load %arg1[%c50, %c0_14] : memref<100x64xf32, #tpu.memory_space<vmem>>, vector<24x64xf32>
    %20 = arith.truncf %19 : vector<24x64xf32> to vector<24x64xbf16>
    %c3 = arith.constant 3 : index
    %c0_15 = arith.constant 0 : index
    %c0_16 = arith.constant 0 : index
    %21 = vector.load %arg2[%c3, %c0_15, %c0_16] : memref<9x64x128xbf16, #tpu.memory_space<vmem>>, vector<1x64x128xbf16>
    %22 = vector.shape_cast %21 : vector<1x64x128xbf16> to vector<64x128xbf16>
    %cst_17 = arith.constant dense<0.000000e+00> : vector<24x128xf32>
    %23 = tpu.matmul %20, %22, %cst_17 {dimension_numbers = #tpu.dot_dimension_numbers<[1], [0], [0], [1], [0, 0, 1, 1], [], []>} : vector<24x64xbf16>, vector<64x128xbf16>, vector<24x128xf32> -> vector<24x128xf32>
    %24 = arith.addf %18, %23 : vector<24x128xf32>
    %c75 = arith.constant 75 : index
    %c0_18 = arith.constant 0 : index
    %25 = vector.load %arg1[%c75, %c0_18] : memref<100x64xf32, #tpu.memory_space<vmem>>, vector<24x64xf32>
    %26 = arith.truncf %25 : vector<24x64xf32> to vector<24x64xbf16>
    %c4 = arith.constant 4 : index
    %c0_19 = arith.constant 0 : index
    %c0_20 = arith.constant 0 : index
    %27 = vector.load %arg2[%c4, %c0_19, %c0_20] : memref<9x64x128xbf16, #tpu.memory_space<vmem>>, vector<1x64x128xbf16>
    %28 = vector.shape_cast %27 : vector<1x64x128xbf16> to vector<64x128xbf16>
    %cst_21 = arith.constant dense<0.000000e+00> : vector<24x128xf32>
    %29 = tpu.matmul %26, %28, %cst_21 {dimension_numbers = #tpu.dot_dimension_numbers<[1], [0], [0], [1], [0, 0, 1, 1], [], []>} : vector<24x64xbf16>, vector<64x128xbf16>, vector<24x128xf32> -> vector<24x128xf32>
    %30 = arith.addf %24, %29 : vector<24x128xf32>
    %c51 = arith.constant 51 : index
    %c0_22 = arith.constant 0 : index
    %31 = vector.load %arg1[%c51, %c0_22] : memref<100x64xf32, #tpu.memory_space<vmem>>, vector<24x64xf32>
    %32 = arith.truncf %31 : vector<24x64xf32> to vector<24x64xbf16>
    %c5 = arith.constant 5 : index
    %c0_23 = arith.constant 0 : index
    %c0_24 = arith.constant 0 : index
    %33 = vector.load %arg2[%c5, %c0_23, %c0_24] : memref<9x64x128xbf16, #tpu.memory_space<vmem>>, vector<1x64x128xbf16>
    %34 = vector.shape_cast %33 : vector<1x64x128xbf16> to vector<64x128xbf16>
    %cst_25 = arith.constant dense<0.000000e+00> : vector<24x128xf32>
    %35 = tpu.matmul %32, %34, %cst_25 {dimension_numbers = #tpu.dot_dimension_numbers<[1], [0], [0], [1], [0, 0, 1, 1], [], []>} : vector<24x64xbf16>, vector<64x128xbf16>, vector<24x128xf32> -> vector<24x128xf32>
    %36 = arith.addf %30, %35 : vector<24x128xf32>
    %c5_26 = arith.constant 5 : index
    %c0_27 = arith.constant 0 : index
    %37 = vector.load %arg1[%c5_26, %c0_27] : memref<100x64xf32, #tpu.memory_space<vmem>>, vector<24x64xf32>
    %38 = arith.truncf %37 : vector<24x64xf32> to vector<24x64xbf16>
    %c6 = arith.constant 6 : index
    %c0_28 = arith.constant 0 : index
    %c0_29 = arith.constant 0 : index
    %39 = vector.load %arg2[%c6, %c0_28, %c0_29] : memref<9x64x128xbf16, #tpu.memory_space<vmem>>, vector<1x64x128xbf16>
    %40 = vector.shape_cast %39 : vector<1x64x128xbf16> to vector<64x128xbf16>
    %cst_30 = arith.constant dense<0.000000e+00> : vector<24x128xf32>
    %41 = tpu.matmul %38, %40, %cst_30 {dimension_numbers = #tpu.dot_dimension_numbers<[1], [0], [0], [1], [0, 0, 1, 1], [], []>} : vector<24x64xbf16>, vector<64x128xbf16>, vector<24x128xf32> -> vector<24x128xf32>
    %42 = arith.addf %36, %41 : vector<24x128xf32>
    %c30 = arith.constant 30 : index
    %c0_31 = arith.constant 0 : index
    %43 = vector.load %arg1[%c30, %c0_31] : memref<100x64xf32, #tpu.memory_space<vmem>>, vector<24x64xf32>
    %44 = arith.truncf %43 : vector<24x64xf32> to vector<24x64xbf16>
    %c7 = arith.constant 7 : index
    %c0_32 = arith.constant 0 : index
    %c0_33 = arith.constant 0 : index
    %45 = vector.load %arg2[%c7, %c0_32, %c0_33] : memref<9x64x128xbf16, #tpu.memory_space<vmem>>, vector<1x64x128xbf16>
    %46 = vector.shape_cast %45 : vector<1x64x128xbf16> to vector<64x128xbf16>
    %cst_34 = arith.constant dense<0.000000e+00> : vector<24x128xf32>
    %47 = tpu.matmul %44, %46, %cst_34 {dimension_numbers = #tpu.dot_dimension_numbers<[1], [0], [0], [1], [0, 0, 1, 1], [], []>} : vector<24x64xbf16>, vector<64x128xbf16>, vector<24x128xf32> -> vector<24x128xf32>
    %48 = arith.addf %42, %47 : vector<24x128xf32>
    %c6_35 = arith.constant 6 : index
    %c0_36 = arith.constant 0 : index
    %49 = vector.load %arg1[%c6_35, %c0_36] : memref<100x64xf32, #tpu.memory_space<vmem>>, vector<24x64xf32>
    %50 = arith.truncf %49 : vector<24x64xf32> to vector<24x64xbf16>
    %c8 = arith.constant 8 : index
    %c0_37 = arith.constant 0 : index
    %c0_38 = arith.constant 0 : index
    %51 = vector.load %arg2[%c8, %c0_37, %c0_38] : memref<9x64x128xbf16, #tpu.memory_space<vmem>>, vector<1x64x128xbf16>
    %52 = vector.shape_cast %51 : vector<1x64x128xbf16> to vector<64x128xbf16>
    %cst_39 = arith.constant dense<0.000000e+00> : vector<24x128xf32>
    %53 = tpu.matmul %50, %52, %cst_39 {dimension_numbers = #tpu.dot_dimension_numbers<[1], [0], [0], [1], [0, 0, 1, 1], [], []>} : vector<24x64xbf16>, vector<64x128xbf16>, vector<24x128xf32> -> vector<24x128xf32>
    %54 = arith.addf %48, %53 : vector<24x128xf32>
    %c0_40 = arith.constant 0 : index
    %c0_41 = arith.constant 0 : index
    %55 = vector.load %arg3[%c0_40, %c0_41] : memref<1x128xf32, #tpu.memory_space<vmem>>, vector<1x128xf32>
    %56 = vector.broadcast %55 : vector<1x128xf32> to vector<24x128xf32>
    %57 = arith.mulf %54, %56 : vector<24x128xf32>
    %c0_42 = arith.constant 0 : index
    %c0_43 = arith.constant 0 : index
    %58 = vector.load %arg4[%c0_42, %c0_43] : memref<1x128xf32, #tpu.memory_space<vmem>>, vector<1x128xf32>
    %59 = vector.broadcast %58 : vector<1x128xf32> to vector<24x128xf32>
    %60 = arith.addf %57, %59 : vector<24x128xf32>
    %cst_44 = arith.constant 0.000000e+00 : f32
    %61 = vector.broadcast %cst_44 : f32 to vector<24x128xf32>
    %62 = arith.maximumf %60, %61 : vector<24x128xf32>
    %c0_45 = arith.constant 0 : index
    %c0_46 = arith.constant 0 : index
    %63 = vector.load %arg5[%c0_45, %c0_46] : memref<24x128xf32, #tpu.memory_space<vmem>>, vector<24x128xf32>
    tpu.vector_store %arg5[%c0_45, %c0_46], %62 {strides = array<i32>} : memref<24x128xf32, #tpu.memory_space<vmem>>, vector<24x128xf32>,
    return
  }
  func.func @transform_0(%arg0: i32) -> (i32, i32) {
    %c0_i32 = arith.constant 0 : i32
    %c0_i32_0 = arith.constant 0 : i32
    %c0_i32_1 = arith.constant 0 : i32
    return %c0_i32, %c0_i32_0 : i32, i32
  }
  func.func @transform_1(%arg0: i32) -> (i32, i32, i32) {
    %c0_i32 = arith.constant 0 : i32
    %c0_i32_0 = arith.constant 0 : i32
    %c0_i32_1 = arith.constant 0 : i32
    %c0_i32_2 = arith.constant 0 : i32
    return %c0_i32, %c0_i32_0, %c0_i32_1 : i32, i32, i32
  }
  func.func @transform_2(%arg0: i32) -> (i32, i32) {
    %c0_i32 = arith.constant 0 : i32
    %c0_i32_0 = arith.constant 0 : i32
    %c0_i32_1 = arith.constant 0 : i32
    return %c0_i32, %c0_i32_0 : i32, i32
  }
  func.func @transform_3(%arg0: i32) -> (i32, i32) {
    %c0_i32 = arith.constant 0 : i32
    %c0_i32_0 = arith.constant 0 : i32
    %c0_i32_1 = arith.constant 0 : i32
    return %c0_i32, %c0_i32_0 : i32, i32
  }
  func.func @transform_4(%arg0: i32) -> (i32, i32) {
    %c0_i32 = arith.constant 0 : i32
    %c0_i32_0 = arith.constant 0 : i32
    %c0_i32_1 = arith.constant 0 : i32
    return %c0_i32, %c0_i32_0 : i32, i32
  }
}

module attributes {stable_mosaic.version = 11 : i64} {
  func.func @_direct_conv_kernel(%arg0: i32, %arg1: memref<36x128xf32, #tpu.memory_space<vmem>>, %arg2: memref<9x128x128xbf16, #tpu.memory_space<vmem>>, %arg3: memref<1x128xf32, #tpu.memory_space<vmem>>, %arg4: memref<1x128xf32, #tpu.memory_space<vmem>>, %arg5: memref<8x128xf32, #tpu.memory_space<vmem>>) attributes {dimension_semantics = [#tpu.dimension_semantics<arbitrary>], iteration_bounds = array<i64: 1>, scalar_prefetch = 0 : i64, scratch_operands = 0 : i64, tpu.core_type = #tpu.core_type<tc>, window_params = [{pipeline_mode = #tpu.pipeline_mode<synchronous>, transform_indices = @transform_0, window_bounds = array<i64: 36, 128>}, {pipeline_mode = #tpu.pipeline_mode<synchronous>, transform_indices = @transform_1, window_bounds = array<i64: 9, 128, 128>}, {pipeline_mode = #tpu.pipeline_mode<synchronous>, transform_indices = @transform_2, window_bounds = array<i64: 1, 128>}, {pipeline_mode = #tpu.pipeline_mode<synchronous>, transform_indices = @transform_3, window_bounds = array<i64: 1, 128>}, {pipeline_mode = #tpu.pipeline_mode<synchronous>, transform_indices = @transform_4, window_bounds = array<i64: 8, 128>}]} {
    %cst = arith.constant 0.000000e+00 : f32
    %0 = vector.broadcast %cst : f32 to vector<8x128xf32>
    %c0 = arith.constant 0 : index
    %c0_0 = arith.constant 0 : index
    %1 = vector.load %arg1[%c0, %c0_0] : memref<36x128xf32, #tpu.memory_space<vmem>>, vector<8x128xf32>
    %2 = arith.truncf %1 : vector<8x128xf32> to vector<8x128xbf16>
    %c0_1 = arith.constant 0 : index
    %c0_2 = arith.constant 0 : index
    %c0_3 = arith.constant 0 : index
    %3 = vector.load %arg2[%c0_1, %c0_2, %c0_3] : memref<9x128x128xbf16, #tpu.memory_space<vmem>>, vector<1x128x128xbf16>
    %4 = vector.shape_cast %3 : vector<1x128x128xbf16> to vector<128x128xbf16>
    %cst_4 = arith.constant dense<0.000000e+00> : vector<8x128xf32>
    %5 = tpu.matmul %2, %4, %cst_4 {dimension_numbers = #tpu.dot_dimension_numbers<[1], [0], [0], [1], [0, 0, 1, 1], [], []>} : vector<8x128xbf16>, vector<128x128xbf16>, vector<8x128xf32> -> vector<8x128xf32>
    %6 = arith.addf %0, %5 : vector<8x128xf32>
    %c9 = arith.constant 9 : index
    %c0_5 = arith.constant 0 : index
    %7 = vector.load %arg1[%c9, %c0_5] : memref<36x128xf32, #tpu.memory_space<vmem>>, vector<8x128xf32>
    %8 = arith.truncf %7 : vector<8x128xf32> to vector<8x128xbf16>
    %c1 = arith.constant 1 : index
    %c0_6 = arith.constant 0 : index
    %c0_7 = arith.constant 0 : index
    %9 = vector.load %arg2[%c1, %c0_6, %c0_7] : memref<9x128x128xbf16, #tpu.memory_space<vmem>>, vector<1x128x128xbf16>
    %10 = vector.shape_cast %9 : vector<1x128x128xbf16> to vector<128x128xbf16>
    %cst_8 = arith.constant dense<0.000000e+00> : vector<8x128xf32>
    %11 = tpu.matmul %8, %10, %cst_8 {dimension_numbers = #tpu.dot_dimension_numbers<[1], [0], [0], [1], [0, 0, 1, 1], [], []>} : vector<8x128xbf16>, vector<128x128xbf16>, vector<8x128xf32> -> vector<8x128xf32>
    %12 = arith.addf %6, %11 : vector<8x128xf32>
    %c1_9 = arith.constant 1 : index
    %c0_10 = arith.constant 0 : index
    %13 = vector.load %arg1[%c1_9, %c0_10] : memref<36x128xf32, #tpu.memory_space<vmem>>, vector<8x128xf32>
    %14 = arith.truncf %13 : vector<8x128xf32> to vector<8x128xbf16>
    %c2 = arith.constant 2 : index
    %c0_11 = arith.constant 0 : index
    %c0_12 = arith.constant 0 : index
    %15 = vector.load %arg2[%c2, %c0_11, %c0_12] : memref<9x128x128xbf16, #tpu.memory_space<vmem>>, vector<1x128x128xbf16>
    %16 = vector.shape_cast %15 : vector<1x128x128xbf16> to vector<128x128xbf16>
    %cst_13 = arith.constant dense<0.000000e+00> : vector<8x128xf32>
    %17 = tpu.matmul %14, %16, %cst_13 {dimension_numbers = #tpu.dot_dimension_numbers<[1], [0], [0], [1], [0, 0, 1, 1], [], []>} : vector<8x128xbf16>, vector<128x128xbf16>, vector<8x128xf32> -> vector<8x128xf32>
    %18 = arith.addf %12, %17 : vector<8x128xf32>
    %c18 = arith.constant 18 : index
    %c0_14 = arith.constant 0 : index
    %19 = vector.load %arg1[%c18, %c0_14] : memref<36x128xf32, #tpu.memory_space<vmem>>, vector<8x128xf32>
    %20 = arith.truncf %19 : vector<8x128xf32> to vector<8x128xbf16>
    %c3 = arith.constant 3 : index
    %c0_15 = arith.constant 0 : index
    %c0_16 = arith.constant 0 : index
    %21 = vector.load %arg2[%c3, %c0_15, %c0_16] : memref<9x128x128xbf16, #tpu.memory_space<vmem>>, vector<1x128x128xbf16>
    %22 = vector.shape_cast %21 : vector<1x128x128xbf16> to vector<128x128xbf16>
    %cst_17 = arith.constant dense<0.000000e+00> : vector<8x128xf32>
    %23 = tpu.matmul %20, %22, %cst_17 {dimension_numbers = #tpu.dot_dimension_numbers<[1], [0], [0], [1], [0, 0, 1, 1], [], []>} : vector<8x128xbf16>, vector<128x128xbf16>, vector<8x128xf32> -> vector<8x128xf32>
    %24 = arith.addf %18, %23 : vector<8x128xf32>
    %c27 = arith.constant 27 : index
    %c0_18 = arith.constant 0 : index
    %25 = vector.load %arg1[%c27, %c0_18] : memref<36x128xf32, #tpu.memory_space<vmem>>, vector<8x128xf32>
    %26 = arith.truncf %25 : vector<8x128xf32> to vector<8x128xbf16>
    %c4 = arith.constant 4 : index
    %c0_19 = arith.constant 0 : index
    %c0_20 = arith.constant 0 : index
    %27 = vector.load %arg2[%c4, %c0_19, %c0_20] : memref<9x128x128xbf16, #tpu.memory_space<vmem>>, vector<1x128x128xbf16>
    %28 = vector.shape_cast %27 : vector<1x128x128xbf16> to vector<128x128xbf16>
    %cst_21 = arith.constant dense<0.000000e+00> : vector<8x128xf32>
    %29 = tpu.matmul %26, %28, %cst_21 {dimension_numbers = #tpu.dot_dimension_numbers<[1], [0], [0], [1], [0, 0, 1, 1], [], []>} : vector<8x128xbf16>, vector<128x128xbf16>, vector<8x128xf32> -> vector<8x128xf32>
    %30 = arith.addf %24, %29 : vector<8x128xf32>
    %c19 = arith.constant 19 : index
    %c0_22 = arith.constant 0 : index
    %31 = vector.load %arg1[%c19, %c0_22] : memref<36x128xf32, #tpu.memory_space<vmem>>, vector<8x128xf32>
    %32 = arith.truncf %31 : vector<8x128xf32> to vector<8x128xbf16>
    %c5 = arith.constant 5 : index
    %c0_23 = arith.constant 0 : index
    %c0_24 = arith.constant 0 : index
    %33 = vector.load %arg2[%c5, %c0_23, %c0_24] : memref<9x128x128xbf16, #tpu.memory_space<vmem>>, vector<1x128x128xbf16>
    %34 = vector.shape_cast %33 : vector<1x128x128xbf16> to vector<128x128xbf16>
    %cst_25 = arith.constant dense<0.000000e+00> : vector<8x128xf32>
    %35 = tpu.matmul %32, %34, %cst_25 {dimension_numbers = #tpu.dot_dimension_numbers<[1], [0], [0], [1], [0, 0, 1, 1], [], []>} : vector<8x128xbf16>, vector<128x128xbf16>, vector<8x128xf32> -> vector<8x128xf32>
    %36 = arith.addf %30, %35 : vector<8x128xf32>
    %c3_26 = arith.constant 3 : index
    %c0_27 = arith.constant 0 : index
    %37 = vector.load %arg1[%c3_26, %c0_27] : memref<36x128xf32, #tpu.memory_space<vmem>>, vector<8x128xf32>
    %38 = arith.truncf %37 : vector<8x128xf32> to vector<8x128xbf16>
    %c6 = arith.constant 6 : index
    %c0_28 = arith.constant 0 : index
    %c0_29 = arith.constant 0 : index
    %39 = vector.load %arg2[%c6, %c0_28, %c0_29] : memref<9x128x128xbf16, #tpu.memory_space<vmem>>, vector<1x128x128xbf16>
    %40 = vector.shape_cast %39 : vector<1x128x128xbf16> to vector<128x128xbf16>
    %cst_30 = arith.constant dense<0.000000e+00> : vector<8x128xf32>
    %41 = tpu.matmul %38, %40, %cst_30 {dimension_numbers = #tpu.dot_dimension_numbers<[1], [0], [0], [1], [0, 0, 1, 1], [], []>} : vector<8x128xbf16>, vector<128x128xbf16>, vector<8x128xf32> -> vector<8x128xf32>
    %42 = arith.addf %36, %41 : vector<8x128xf32>
    %c12 = arith.constant 12 : index
    %c0_31 = arith.constant 0 : index
    %43 = vector.load %arg1[%c12, %c0_31] : memref<36x128xf32, #tpu.memory_space<vmem>>, vector<8x128xf32>
    %44 = arith.truncf %43 : vector<8x128xf32> to vector<8x128xbf16>
    %c7 = arith.constant 7 : index
    %c0_32 = arith.constant 0 : index
    %c0_33 = arith.constant 0 : index
    %45 = vector.load %arg2[%c7, %c0_32, %c0_33] : memref<9x128x128xbf16, #tpu.memory_space<vmem>>, vector<1x128x128xbf16>
    %46 = vector.shape_cast %45 : vector<1x128x128xbf16> to vector<128x128xbf16>
    %cst_34 = arith.constant dense<0.000000e+00> : vector<8x128xf32>
    %47 = tpu.matmul %44, %46, %cst_34 {dimension_numbers = #tpu.dot_dimension_numbers<[1], [0], [0], [1], [0, 0, 1, 1], [], []>} : vector<8x128xbf16>, vector<128x128xbf16>, vector<8x128xf32> -> vector<8x128xf32>
    %48 = arith.addf %42, %47 : vector<8x128xf32>
    %c4_35 = arith.constant 4 : index
    %c0_36 = arith.constant 0 : index
    %49 = vector.load %arg1[%c4_35, %c0_36] : memref<36x128xf32, #tpu.memory_space<vmem>>, vector<8x128xf32>
    %50 = arith.truncf %49 : vector<8x128xf32> to vector<8x128xbf16>
    %c8 = arith.constant 8 : index
    %c0_37 = arith.constant 0 : index
    %c0_38 = arith.constant 0 : index
    %51 = vector.load %arg2[%c8, %c0_37, %c0_38] : memref<9x128x128xbf16, #tpu.memory_space<vmem>>, vector<1x128x128xbf16>
    %52 = vector.shape_cast %51 : vector<1x128x128xbf16> to vector<128x128xbf16>
    %cst_39 = arith.constant dense<0.000000e+00> : vector<8x128xf32>
    %53 = tpu.matmul %50, %52, %cst_39 {dimension_numbers = #tpu.dot_dimension_numbers<[1], [0], [0], [1], [0, 0, 1, 1], [], []>} : vector<8x128xbf16>, vector<128x128xbf16>, vector<8x128xf32> -> vector<8x128xf32>
    %54 = arith.addf %48, %53 : vector<8x128xf32>
    %c0_40 = arith.constant 0 : index
    %c0_41 = arith.constant 0 : index
    %55 = vector.load %arg3[%c0_40, %c0_41] : memref<1x128xf32, #tpu.memory_space<vmem>>, vector<1x128xf32>
    %56 = vector.broadcast %55 : vector<1x128xf32> to vector<8x128xf32>
    %57 = arith.mulf %54, %56 : vector<8x128xf32>
    %c0_42 = arith.constant 0 : index
    %c0_43 = arith.constant 0 : index
    %58 = vector.load %arg4[%c0_42, %c0_43] : memref<1x128xf32, #tpu.memory_space<vmem>>, vector<1x128xf32>
    %59 = vector.broadcast %58 : vector<1x128xf32> to vector<8x128xf32>
    %60 = arith.addf %57, %59 : vector<8x128xf32>
    %cst_44 = arith.constant 0.000000e+00 : f32
    %61 = vector.broadcast %cst_44 : f32 to vector<8x128xf32>
    %62 = arith.maximumf %60, %61 : vector<8x128xf32>
    %c0_45 = arith.constant 0 : index
    %c0_46 = arith.constant 0 : index
    %63 = vector.load %arg5[%c0_45, %c0_46] : memref<8x128xf32, #tpu.memory_space<vmem>>, vector<8x128xf32>
    tpu.vector_store %arg5[%c0_45, %c0_46], %62 {strides = array<i32>} : memref<8x128xf32, #tpu.memory_space<vmem>>, vector<8x128xf32>,
    return
  }
  func.func @transform_0(%arg0: i32) -> (i32, i32) {
    %c0_i32 = arith.constant 0 : i32
    %c0_i32_0 = arith.constant 0 : i32
    %c0_i32_1 = arith.constant 0 : i32
    return %c0_i32, %c0_i32_0 : i32, i32
  }
  func.func @transform_1(%arg0: i32) -> (i32, i32, i32) {
    %c0_i32 = arith.constant 0 : i32
    %c0_i32_0 = arith.constant 0 : i32
    %c0_i32_1 = arith.constant 0 : i32
    %c0_i32_2 = arith.constant 0 : i32
    return %c0_i32, %c0_i32_0, %c0_i32_1 : i32, i32, i32
  }
  func.func @transform_2(%arg0: i32) -> (i32, i32) {
    %c0_i32 = arith.constant 0 : i32
    %c0_i32_0 = arith.constant 0 : i32
    %c0_i32_1 = arith.constant 0 : i32
    return %c0_i32, %c0_i32_0 : i32, i32
  }
  func.func @transform_3(%arg0: i32) -> (i32, i32) {
    %c0_i32 = arith.constant 0 : i32
    %c0_i32_0 = arith.constant 0 : i32
    %c0_i32_1 = arith.constant 0 : i32
    return %c0_i32, %c0_i32_0 : i32, i32
  }
  func.func @transform_4(%arg0: i32) -> (i32, i32) {
    %c0_i32 = arith.constant 0 : i32
    %c0_i32_0 = arith.constant 0 : i32
    %c0_i32_1 = arith.constant 0 : i32
    return %c0_i32, %c0_i32_0 : i32, i32
  }
}

module attributes {stable_mosaic.version = 11 : i64} {
  func.func @_direct_conv_kernel(%arg0: i32, %arg1: memref<18x128xf32, #tpu.memory_space<vmem>>, %arg2: memref<9x128x128xbf16, #tpu.memory_space<vmem>>, %arg3: memref<1x128xf32, #tpu.memory_space<vmem>>, %arg4: memref<1x128xf32, #tpu.memory_space<vmem>>, %arg5: memref<8x128xf32, #tpu.memory_space<vmem>>, %arg6: memref<8x128xf32, #tpu.memory_space<vmem>>) attributes {dimension_semantics = [#tpu.dimension_semantics<arbitrary>], iteration_bounds = array<i64: 1>, scalar_prefetch = 0 : i64, scratch_operands = 0 : i64, tpu.core_type = #tpu.core_type<tc>, window_params = [{pipeline_mode = #tpu.pipeline_mode<synchronous>, transform_indices = @transform_0, window_bounds = array<i64: 18, 128>}, {pipeline_mode = #tpu.pipeline_mode<synchronous>, transform_indices = @transform_1, window_bounds = array<i64: 9, 128, 128>}, {pipeline_mode = #tpu.pipeline_mode<synchronous>, transform_indices = @transform_2, window_bounds = array<i64: 1, 128>}, {pipeline_mode = #tpu.pipeline_mode<synchronous>, transform_indices = @transform_3, window_bounds = array<i64: 1, 128>}, {pipeline_mode = #tpu.pipeline_mode<synchronous>, transform_indices = @transform_4, window_bounds = array<i64: 8, 128>}, {pipeline_mode = #tpu.pipeline_mode<synchronous>, transform_indices = @transform_5, window_bounds = array<i64: 8, 128>}]} {
    %cst = arith.constant 0.000000e+00 : f32
    %0 = vector.broadcast %cst : f32 to vector<8x128xf32>
    %c0 = arith.constant 0 : index
    %c0_0 = arith.constant 0 : index
    %1 = vector.load %arg1[%c0, %c0_0] : memref<18x128xf32, #tpu.memory_space<vmem>>, vector<8x128xf32>
    %2 = arith.truncf %1 : vector<8x128xf32> to vector<8x128xbf16>
    %c0_1 = arith.constant 0 : index
    %c0_2 = arith.constant 0 : index
    %c0_3 = arith.constant 0 : index
    %3 = vector.load %arg2[%c0_1, %c0_2, %c0_3] : memref<9x128x128xbf16, #tpu.memory_space<vmem>>, vector<1x128x128xbf16>
    %4 = vector.shape_cast %3 : vector<1x128x128xbf16> to vector<128x128xbf16>
    %cst_4 = arith.constant dense<0.000000e+00> : vector<8x128xf32>
    %5 = tpu.matmul %2, %4, %cst_4 {dimension_numbers = #tpu.dot_dimension_numbers<[1], [0], [0], [1], [0, 0, 1, 1], [], []>} : vector<8x128xbf16>, vector<128x128xbf16>, vector<8x128xf32> -> vector<8x128xf32>
    %6 = arith.addf %0, %5 : vector<8x128xf32>
    %c1 = arith.constant 1 : index
    %c0_5 = arith.constant 0 : index
    %7 = vector.load %arg1[%c1, %c0_5] : memref<18x128xf32, #tpu.memory_space<vmem>>, vector<8x128xf32>
    %8 = arith.truncf %7 : vector<8x128xf32> to vector<8x128xbf16>
    %c1_6 = arith.constant 1 : index
    %c0_7 = arith.constant 0 : index
    %c0_8 = arith.constant 0 : index
    %9 = vector.load %arg2[%c1_6, %c0_7, %c0_8] : memref<9x128x128xbf16, #tpu.memory_space<vmem>>, vector<1x128x128xbf16>
    %10 = vector.shape_cast %9 : vector<1x128x128xbf16> to vector<128x128xbf16>
    %cst_9 = arith.constant dense<0.000000e+00> : vector<8x128xf32>
    %11 = tpu.matmul %8, %10, %cst_9 {dimension_numbers = #tpu.dot_dimension_numbers<[1], [0], [0], [1], [0, 0, 1, 1], [], []>} : vector<8x128xbf16>, vector<128x128xbf16>, vector<8x128xf32> -> vector<8x128xf32>
    %12 = arith.addf %6, %11 : vector<8x128xf32>
    %c2 = arith.constant 2 : index
    %c0_10 = arith.constant 0 : index
    %13 = vector.load %arg1[%c2, %c0_10] : memref<18x128xf32, #tpu.memory_space<vmem>>, vector<8x128xf32>
    %14 = arith.truncf %13 : vector<8x128xf32> to vector<8x128xbf16>
    %c2_11 = arith.constant 2 : index
    %c0_12 = arith.constant 0 : index
    %c0_13 = arith.constant 0 : index
    %15 = vector.load %arg2[%c2_11, %c0_12, %c0_13] : memref<9x128x128xbf16, #tpu.memory_space<vmem>>, vector<1x128x128xbf16>
    %16 = vector.shape_cast %15 : vector<1x128x128xbf16> to vector<128x128xbf16>
    %cst_14 = arith.constant dense<0.000000e+00> : vector<8x128xf32>
    %17 = tpu.matmul %14, %16, %cst_14 {dimension_numbers = #tpu.dot_dimension_numbers<[1], [0], [0], [1], [0, 0, 1, 1], [], []>} : vector<8x128xbf16>, vector<128x128xbf16>, vector<8x128xf32> -> vector<8x128xf32>
    %18 = arith.addf %12, %17 : vector<8x128xf32>
    %c4 = arith.constant 4 : index
    %c0_15 = arith.constant 0 : index
    %19 = vector.load %arg1[%c4, %c0_15] : memref<18x128xf32, #tpu.memory_space<vmem>>, vector<8x128xf32>
    %20 = arith.truncf %19 : vector<8x128xf32> to vector<8x128xbf16>
    %c3 = arith.constant 3 : index
    %c0_16 = arith.constant 0 : index
    %c0_17 = arith.constant 0 : index
    %21 = vector.load %arg2[%c3, %c0_16, %c0_17] : memref<9x128x128xbf16, #tpu.memory_space<vmem>>, vector<1x128x128xbf16>
    %22 = vector.shape_cast %21 : vector<1x128x128xbf16> to vector<128x128xbf16>
    %cst_18 = arith.constant dense<0.000000e+00> : vector<8x128xf32>
    %23 = tpu.matmul %20, %22, %cst_18 {dimension_numbers = #tpu.dot_dimension_numbers<[1], [0], [0], [1], [0, 0, 1, 1], [], []>} : vector<8x128xbf16>, vector<128x128xbf16>, vector<8x128xf32> -> vector<8x128xf32>
    %24 = arith.addf %18, %23 : vector<8x128xf32>
    %c5 = arith.constant 5 : index
    %c0_19 = arith.constant 0 : index
    %25 = vector.load %arg1[%c5, %c0_19] : memref<18x128xf32, #tpu.memory_space<vmem>>, vector<8x128xf32>
    %26 = arith.truncf %25 : vector<8x128xf32> to vector<8x128xbf16>
    %c4_20 = arith.constant 4 : index
    %c0_21 = arith.constant 0 : index
    %c0_22 = arith.constant 0 : index
    %27 = vector.load %arg2[%c4_20, %c0_21, %c0_22] : memref<9x128x128xbf16, #tpu.memory_space<vmem>>, vector<1x128x128xbf16>
    %28 = vector.shape_cast %27 : vector<1x128x128xbf16> to vector<128x128xbf16>
    %cst_23 = arith.constant dense<0.000000e+00> : vector<8x128xf32>
    %29 = tpu.matmul %26, %28, %cst_23 {dimension_numbers = #tpu.dot_dimension_numbers<[1], [0], [0], [1], [0, 0, 1, 1], [], []>} : vector<8x128xbf16>, vector<128x128xbf16>, vector<8x128xf32> -> vector<8x128xf32>
    %30 = arith.addf %24, %29 : vector<8x128xf32>
    %c6 = arith.constant 6 : index
    %c0_24 = arith.constant 0 : index
    %31 = vector.load %arg1[%c6, %c0_24] : memref<18x128xf32, #tpu.memory_space<vmem>>, vector<8x128xf32>
    %32 = arith.truncf %31 : vector<8x128xf32> to vector<8x128xbf16>
    %c5_25 = arith.constant 5 : index
    %c0_26 = arith.constant 0 : index
    %c0_27 = arith.constant 0 : index
    %33 = vector.load %arg2[%c5_25, %c0_26, %c0_27] : memref<9x128x128xbf16, #tpu.memory_space<vmem>>, vector<1x128x128xbf16>
    %34 = vector.shape_cast %33 : vector<1x128x128xbf16> to vector<128x128xbf16>
    %cst_28 = arith.constant dense<0.000000e+00> : vector<8x128xf32>
    %35 = tpu.matmul %32, %34, %cst_28 {dimension_numbers = #tpu.dot_dimension_numbers<[1], [0], [0], [1], [0, 0, 1, 1], [], []>} : vector<8x128xbf16>, vector<128x128xbf16>, vector<8x128xf32> -> vector<8x128xf32>
    %36 = arith.addf %30, %35 : vector<8x128xf32>
    %c8 = arith.constant 8 : index
    %c0_29 = arith.constant 0 : index
    %37 = vector.load %arg1[%c8, %c0_29] : memref<18x128xf32, #tpu.memory_space<vmem>>, vector<8x128xf32>
    %38 = arith.truncf %37 : vector<8x128xf32> to vector<8x128xbf16>
    %c6_30 = arith.constant 6 : index
    %c0_31 = arith.constant 0 : index
    %c0_32 = arith.constant 0 : index
    %39 = vector.load %arg2[%c6_30, %c0_31, %c0_32] : memref<9x128x128xbf16, #tpu.memory_space<vmem>>, vector<1x128x128xbf16>
    %40 = vector.shape_cast %39 : vector<1x128x128xbf16> to vector<128x128xbf16>
    %cst_33 = arith.constant dense<0.000000e+00> : vector<8x128xf32>
    %41 = tpu.matmul %38, %40, %cst_33 {dimension_numbers = #tpu.dot_dimension_numbers<[1], [0], [0], [1], [0, 0, 1, 1], [], []>} : vector<8x128xbf16>, vector<128x128xbf16>, vector<8x128xf32> -> vector<8x128xf32>
    %42 = arith.addf %36, %41 : vector<8x128xf32>
    %c9 = arith.constant 9 : index
    %c0_34 = arith.constant 0 : index
    %43 = vector.load %arg1[%c9, %c0_34] : memref<18x128xf32, #tpu.memory_space<vmem>>, vector<8x128xf32>
    %44 = arith.truncf %43 : vector<8x128xf32> to vector<8x128xbf16>
    %c7 = arith.constant 7 : index
    %c0_35 = arith.constant 0 : index
    %c0_36 = arith.constant 0 : index
    %45 = vector.load %arg2[%c7, %c0_35, %c0_36] : memref<9x128x128xbf16, #tpu.memory_space<vmem>>, vector<1x128x128xbf16>
    %46 = vector.shape_cast %45 : vector<1x128x128xbf16> to vector<128x128xbf16>
    %cst_37 = arith.constant dense<0.000000e+00> : vector<8x128xf32>
    %47 = tpu.matmul %44, %46, %cst_37 {dimension_numbers = #tpu.dot_dimension_numbers<[1], [0], [0], [1], [0, 0, 1, 1], [], []>} : vector<8x128xbf16>, vector<128x128xbf16>, vector<8x128xf32> -> vector<8x128xf32>
    %48 = arith.addf %42, %47 : vector<8x128xf32>
    %c10 = arith.constant 10 : index
    %c0_38 = arith.constant 0 : index
    %49 = vector.load %arg1[%c10, %c0_38] : memref<18x128xf32, #tpu.memory_space<vmem>>, vector<8x128xf32>
    %50 = arith.truncf %49 : vector<8x128xf32> to vector<8x128xbf16>
    %c8_39 = arith.constant 8 : index
    %c0_40 = arith.constant 0 : index
    %c0_41 = arith.constant 0 : index
    %51 = vector.load %arg2[%c8_39, %c0_40, %c0_41] : memref<9x128x128xbf16, #tpu.memory_space<vmem>>, vector<1x128x128xbf16>
    %52 = vector.shape_cast %51 : vector<1x128x128xbf16> to vector<128x128xbf16>
    %cst_42 = arith.constant dense<0.000000e+00> : vector<8x128xf32>
    %53 = tpu.matmul %50, %52, %cst_42 {dimension_numbers = #tpu.dot_dimension_numbers<[1], [0], [0], [1], [0, 0, 1, 1], [], []>} : vector<8x128xbf16>, vector<128x128xbf16>, vector<8x128xf32> -> vector<8x128xf32>
    %54 = arith.addf %48, %53 : vector<8x128xf32>
    %c0_43 = arith.constant 0 : index
    %c0_44 = arith.constant 0 : index
    %55 = vector.load %arg3[%c0_43, %c0_44] : memref<1x128xf32, #tpu.memory_space<vmem>>, vector<1x128xf32>
    %56 = vector.broadcast %55 : vector<1x128xf32> to vector<8x128xf32>
    %57 = arith.mulf %54, %56 : vector<8x128xf32>
    %c0_45 = arith.constant 0 : index
    %c0_46 = arith.constant 0 : index
    %58 = vector.load %arg4[%c0_45, %c0_46] : memref<1x128xf32, #tpu.memory_space<vmem>>, vector<1x128xf32>
    %59 = vector.broadcast %58 : vector<1x128xf32> to vector<8x128xf32>
    %60 = arith.addf %57, %59 : vector<8x128xf32>
    %61 = arith.negf %60 : vector<8x128xf32>
    %62 = math.exp %61 : vector<8x128xf32>
    %cst_47 = arith.constant 1.000000e+00 : f32
    %63 = vector.broadcast %cst_47 : f32 to vector<8x128xf32>
    %64 = arith.addf %63, %62 : vector<8x128xf32>
    %65 = arith.divf %63, %64 : vector<8x128xf32>
    %c0_48 = arith.constant 0 : index
    %c0_49 = arith.constant 0 : index
    %66 = vector.load %arg5[%c0_48, %c0_49] : memref<8x128xf32, #tpu.memory_space<vmem>>, vector<8x128xf32>
    %67 = arith.mulf %65, %66 : vector<8x128xf32>
    %c0_50 = arith.constant 0 : index
    %c0_51 = arith.constant 0 : index
    %68 = vector.load %arg6[%c0_50, %c0_51] : memref<8x128xf32, #tpu.memory_space<vmem>>, vector<8x128xf32>
    tpu.vector_store %arg6[%c0_50, %c0_51], %67 {strides = array<i32>} : memref<8x128xf32, #tpu.memory_space<vmem>>, vector<8x128xf32>,
    return
  }
  func.func @transform_0(%arg0: i32) -> (i32, i32) {
    %c0_i32 = arith.constant 0 : i32
    %c0_i32_0 = arith.constant 0 : i32
    %c0_i32_1 = arith.constant 0 : i32
    return %c0_i32, %c0_i32_0 : i32, i32
  }
  func.func @transform_1(%arg0: i32) -> (i32, i32, i32) {
    %c0_i32 = arith.constant 0 : i32
    %c0_i32_0 = arith.constant 0 : i32
    %c0_i32_1 = arith.constant 0 : i32
    %c0_i32_2 = arith.constant 0 : i32
    return %c0_i32, %c0_i32_0, %c0_i32_1 : i32, i32, i32
  }
  func.func @transform_2(%arg0: i32) -> (i32, i32) {
    %c0_i32 = arith.constant 0 : i32
    %c0_i32_0 = arith.constant 0 : i32
    %c0_i32_1 = arith.constant 0 : i32
    return %c0_i32, %c0_i32_0 : i32, i32
  }
  func.func @transform_3(%arg0: i32) -> (i32, i32) {
    %c0_i32 = arith.constant 0 : i32
    %c0_i32_0 = arith.constant 0 : i32
    %c0_i32_1 = arith.constant 0 : i32
    return %c0_i32, %c0_i32_0 : i32, i32
  }
  func.func @transform_4(%arg0: i32) -> (i32, i32) {
    %c0_i32 = arith.constant 0 : i32
    %c0_i32_0 = arith.constant 0 : i32
    %c0_i32_1 = arith.constant 0 : i32
    return %c0_i32, %c0_i32_0 : i32, i32
  }
  func.func @transform_5(%arg0: i32) -> (i32, i32) {
    %c0_i32 = arith.constant 0 : i32
    %c0_i32_0 = arith.constant 0 : i32
    %c0_i32_1 = arith.constant 0 : i32
    return %c0_i32, %c0_i32_0 : i32, i32
  }
}

module attributes {stable_mosaic.version = 11 : i64} {
  func.func @_direct_conv_kernel(%arg0: i32, %arg1: memref<38x128xf32, #tpu.memory_space<vmem>>, %arg2: memref<38x128xf32, #tpu.memory_space<vmem>>, %arg3: memref<9x128x128xbf16, #tpu.memory_space<vmem>>, %arg4: memref<9x128x128xbf16, #tpu.memory_space<vmem>>, %arg5: memref<1x128xf32, #tpu.memory_space<vmem>>, %arg6: memref<1x128xf32, #tpu.memory_space<vmem>>, %arg7: memref<24x128xf32, #tpu.memory_space<vmem>>) attributes {dimension_semantics = [#tpu.dimension_semantics<arbitrary>], iteration_bounds = array<i64: 1>, scalar_prefetch = 0 : i64, scratch_operands = 0 : i64, tpu.core_type = #tpu.core_type<tc>, window_params = [{pipeline_mode = #tpu.pipeline_mode<synchronous>, transform_indices = @transform_0, window_bounds = array<i64: 38, 128>}, {pipeline_mode = #tpu.pipeline_mode<synchronous>, transform_indices = @transform_1, window_bounds = array<i64: 38, 128>}, {pipeline_mode = #tpu.pipeline_mode<synchronous>, transform_indices = @transform_2, window_bounds = array<i64: 9, 128, 128>}, {pipeline_mode = #tpu.pipeline_mode<synchronous>, transform_indices = @transform_3, window_bounds = array<i64: 9, 128, 128>}, {pipeline_mode = #tpu.pipeline_mode<synchronous>, transform_indices = @transform_4, window_bounds = array<i64: 1, 128>}, {pipeline_mode = #tpu.pipeline_mode<synchronous>, transform_indices = @transform_5, window_bounds = array<i64: 1, 128>}, {pipeline_mode = #tpu.pipeline_mode<synchronous>, transform_indices = @transform_6, window_bounds = array<i64: 24, 128>}]} {
    %cst = arith.constant 0.000000e+00 : f32
    %0 = vector.broadcast %cst : f32 to vector<24x128xf32>
    %c0 = arith.constant 0 : index
    %c0_0 = arith.constant 0 : index
    %1 = vector.load %arg1[%c0, %c0_0] : memref<38x128xf32, #tpu.memory_space<vmem>>, vector<24x128xf32>
    %2 = arith.truncf %1 : vector<24x128xf32> to vector<24x128xbf16>
    %c0_1 = arith.constant 0 : index
    %c0_2 = arith.constant 0 : index
    %c0_3 = arith.constant 0 : index
    %3 = vector.load %arg3[%c0_1, %c0_2, %c0_3] : memref<9x128x128xbf16, #tpu.memory_space<vmem>>, vector<1x128x128xbf16>
    %4 = vector.shape_cast %3 : vector<1x128x128xbf16> to vector<128x128xbf16>
    %cst_4 = arith.constant dense<0.000000e+00> : vector<24x128xf32>
    %5 = tpu.matmul %2, %4, %cst_4 {dimension_numbers = #tpu.dot_dimension_numbers<[1], [0], [0], [1], [0, 0, 1, 1], [], []>} : vector<24x128xbf16>, vector<128x128xbf16>, vector<24x128xf32> -> vector<24x128xf32>
    %6 = arith.addf %0, %5 : vector<24x128xf32>
    %c0_5 = arith.constant 0 : index
    %c0_6 = arith.constant 0 : index
    %7 = vector.load %arg2[%c0_5, %c0_6] : memref<38x128xf32, #tpu.memory_space<vmem>>, vector<24x128xf32>
    %8 = arith.truncf %7 : vector<24x128xf32> to vector<24x128xbf16>
    %c0_7 = arith.constant 0 : index
    %c0_8 = arith.constant 0 : index
    %c0_9 = arith.constant 0 : index
    %9 = vector.load %arg4[%c0_7, %c0_8, %c0_9] : memref<9x128x128xbf16, #tpu.memory_space<vmem>>, vector<1x128x128xbf16>
    %10 = vector.shape_cast %9 : vector<1x128x128xbf16> to vector<128x128xbf16>
    %cst_10 = arith.constant dense<0.000000e+00> : vector<24x128xf32>
    %11 = tpu.matmul %8, %10, %cst_10 {dimension_numbers = #tpu.dot_dimension_numbers<[1], [0], [0], [1], [0, 0, 1, 1], [], []>} : vector<24x128xbf16>, vector<128x128xbf16>, vector<24x128xf32> -> vector<24x128xf32>
    %12 = arith.addf %6, %11 : vector<24x128xf32>
    %c1 = arith.constant 1 : index
    %c0_11 = arith.constant 0 : index
    %13 = vector.load %arg1[%c1, %c0_11] : memref<38x128xf32, #tpu.memory_space<vmem>>, vector<24x128xf32>
    %14 = arith.truncf %13 : vector<24x128xf32> to vector<24x128xbf16>
    %c1_12 = arith.constant 1 : index
    %c0_13 = arith.constant 0 : index
    %c0_14 = arith.constant 0 : index
    %15 = vector.load %arg3[%c1_12, %c0_13, %c0_14] : memref<9x128x128xbf16, #tpu.memory_space<vmem>>, vector<1x128x128xbf16>
    %16 = vector.shape_cast %15 : vector<1x128x128xbf16> to vector<128x128xbf16>
    %cst_15 = arith.constant dense<0.000000e+00> : vector<24x128xf32>
    %17 = tpu.matmul %14, %16, %cst_15 {dimension_numbers = #tpu.dot_dimension_numbers<[1], [0], [0], [1], [0, 0, 1, 1], [], []>} : vector<24x128xbf16>, vector<128x128xbf16>, vector<24x128xf32> -> vector<24x128xf32>
    %18 = arith.addf %12, %17 : vector<24x128xf32>
    %c1_16 = arith.constant 1 : index
    %c0_17 = arith.constant 0 : index
    %19 = vector.load %arg2[%c1_16, %c0_17] : memref<38x128xf32, #tpu.memory_space<vmem>>, vector<24x128xf32>
    %20 = arith.truncf %19 : vector<24x128xf32> to vector<24x128xbf16>
    %c1_18 = arith.constant 1 : index
    %c0_19 = arith.constant 0 : index
    %c0_20 = arith.constant 0 : index
    %21 = vector.load %arg4[%c1_18, %c0_19, %c0_20] : memref<9x128x128xbf16, #tpu.memory_space<vmem>>, vector<1x128x128xbf16>
    %22 = vector.shape_cast %21 : vector<1x128x128xbf16> to vector<128x128xbf16>
    %cst_21 = arith.constant dense<0.000000e+00> : vector<24x128xf32>
    %23 = tpu.matmul %20, %22, %cst_21 {dimension_numbers = #tpu.dot_dimension_numbers<[1], [0], [0], [1], [0, 0, 1, 1], [], []>} : vector<24x128xbf16>, vector<128x128xbf16>, vector<24x128xf32> -> vector<24x128xf32>
    %24 = arith.addf %18, %23 : vector<24x128xf32>
    %c2 = arith.constant 2 : index
    %c0_22 = arith.constant 0 : index
    %25 = vector.load %arg1[%c2, %c0_22] : memref<38x128xf32, #tpu.memory_space<vmem>>, vector<24x128xf32>
    %26 = arith.truncf %25 : vector<24x128xf32> to vector<24x128xbf16>
    %c2_23 = arith.constant 2 : index
    %c0_24 = arith.constant 0 : index
    %c0_25 = arith.constant 0 : index
    %27 = vector.load %arg3[%c2_23, %c0_24, %c0_25] : memref<9x128x128xbf16, #tpu.memory_space<vmem>>, vector<1x128x128xbf16>
    %28 = vector.shape_cast %27 : vector<1x128x128xbf16> to vector<128x128xbf16>
    %cst_26 = arith.constant dense<0.000000e+00> : vector<24x128xf32>
    %29 = tpu.matmul %26, %28, %cst_26 {dimension_numbers = #tpu.dot_dimension_numbers<[1], [0], [0], [1], [0, 0, 1, 1], [], []>} : vector<24x128xbf16>, vector<128x128xbf16>, vector<24x128xf32> -> vector<24x128xf32>
    %30 = arith.addf %24, %29 : vector<24x128xf32>
    %c2_27 = arith.constant 2 : index
    %c0_28 = arith.constant 0 : index
    %31 = vector.load %arg2[%c2_27, %c0_28] : memref<38x128xf32, #tpu.memory_space<vmem>>, vector<24x128xf32>
    %32 = arith.truncf %31 : vector<24x128xf32> to vector<24x128xbf16>
    %c2_29 = arith.constant 2 : index
    %c0_30 = arith.constant 0 : index
    %c0_31 = arith.constant 0 : index
    %33 = vector.load %arg4[%c2_29, %c0_30, %c0_31] : memref<9x128x128xbf16, #tpu.memory_space<vmem>>, vector<1x128x128xbf16>
    %34 = vector.shape_cast %33 : vector<1x128x128xbf16> to vector<128x128xbf16>
    %cst_32 = arith.constant dense<0.000000e+00> : vector<24x128xf32>
    %35 = tpu.matmul %32, %34, %cst_32 {dimension_numbers = #tpu.dot_dimension_numbers<[1], [0], [0], [1], [0, 0, 1, 1], [], []>} : vector<24x128xbf16>, vector<128x128xbf16>, vector<24x128xf32> -> vector<24x128xf32>
    %36 = arith.addf %30, %35 : vector<24x128xf32>
    %c6 = arith.constant 6 : index
    %c0_33 = arith.constant 0 : index
    %37 = vector.load %arg1[%c6, %c0_33] : memref<38x128xf32, #tpu.memory_space<vmem>>, vector<24x128xf32>
    %38 = arith.truncf %37 : vector<24x128xf32> to vector<24x128xbf16>
    %c3 = arith.constant 3 : index
    %c0_34 = arith.constant 0 : index
    %c0_35 = arith.constant 0 : index
    %39 = vector.load %arg3[%c3, %c0_34, %c0_35] : memref<9x128x128xbf16, #tpu.memory_space<vmem>>, vector<1x128x128xbf16>
    %40 = vector.shape_cast %39 : vector<1x128x128xbf16> to vector<128x128xbf16>
    %cst_36 = arith.constant dense<0.000000e+00> : vector<24x128xf32>
    %41 = tpu.matmul %38, %40, %cst_36 {dimension_numbers = #tpu.dot_dimension_numbers<[1], [0], [0], [1], [0, 0, 1, 1], [], []>} : vector<24x128xbf16>, vector<128x128xbf16>, vector<24x128xf32> -> vector<24x128xf32>
    %42 = arith.addf %36, %41 : vector<24x128xf32>
    %c6_37 = arith.constant 6 : index
    %c0_38 = arith.constant 0 : index
    %43 = vector.load %arg2[%c6_37, %c0_38] : memref<38x128xf32, #tpu.memory_space<vmem>>, vector<24x128xf32>
    %44 = arith.truncf %43 : vector<24x128xf32> to vector<24x128xbf16>
    %c3_39 = arith.constant 3 : index
    %c0_40 = arith.constant 0 : index
    %c0_41 = arith.constant 0 : index
    %45 = vector.load %arg4[%c3_39, %c0_40, %c0_41] : memref<9x128x128xbf16, #tpu.memory_space<vmem>>, vector<1x128x128xbf16>
    %46 = vector.shape_cast %45 : vector<1x128x128xbf16> to vector<128x128xbf16>
    %cst_42 = arith.constant dense<0.000000e+00> : vector<24x128xf32>
    %47 = tpu.matmul %44, %46, %cst_42 {dimension_numbers = #tpu.dot_dimension_numbers<[1], [0], [0], [1], [0, 0, 1, 1], [], []>} : vector<24x128xbf16>, vector<128x128xbf16>, vector<24x128xf32> -> vector<24x128xf32>
    %48 = arith.addf %42, %47 : vector<24x128xf32>
    %c7 = arith.constant 7 : index
    %c0_43 = arith.constant 0 : index
    %49 = vector.load %arg1[%c7, %c0_43] : memref<38x128xf32, #tpu.memory_space<vmem>>, vector<24x128xf32>
    %50 = arith.truncf %49 : vector<24x128xf32> to vector<24x128xbf16>
    %c4 = arith.constant 4 : index
    %c0_44 = arith.constant 0 : index
    %c0_45 = arith.constant 0 : index
    %51 = vector.load %arg3[%c4, %c0_44, %c0_45] : memref<9x128x128xbf16, #tpu.memory_space<vmem>>, vector<1x128x128xbf16>
    %52 = vector.shape_cast %51 : vector<1x128x128xbf16> to vector<128x128xbf16>
    %cst_46 = arith.constant dense<0.000000e+00> : vector<24x128xf32>
    %53 = tpu.matmul %50, %52, %cst_46 {dimension_numbers = #tpu.dot_dimension_numbers<[1], [0], [0], [1], [0, 0, 1, 1], [], []>} : vector<24x128xbf16>, vector<128x128xbf16>, vector<24x128xf32> -> vector<24x128xf32>
    %54 = arith.addf %48, %53 : vector<24x128xf32>
    %c7_47 = arith.constant 7 : index
    %c0_48 = arith.constant 0 : index
    %55 = vector.load %arg2[%c7_47, %c0_48] : memref<38x128xf32, #tpu.memory_space<vmem>>, vector<24x128xf32>
    %56 = arith.truncf %55 : vector<24x128xf32> to vector<24x128xbf16>
    %c4_49 = arith.constant 4 : index
    %c0_50 = arith.constant 0 : index
    %c0_51 = arith.constant 0 : index
    %57 = vector.load %arg4[%c4_49, %c0_50, %c0_51] : memref<9x128x128xbf16, #tpu.memory_space<vmem>>, vector<1x128x128xbf16>
    %58 = vector.shape_cast %57 : vector<1x128x128xbf16> to vector<128x128xbf16>
    %cst_52 = arith.constant dense<0.000000e+00> : vector<24x128xf32>
    %59 = tpu.matmul %56, %58, %cst_52 {dimension_numbers = #tpu.dot_dimension_numbers<[1], [0], [0], [1], [0, 0, 1, 1], [], []>} : vector<24x128xbf16>, vector<128x128xbf16>, vector<24x128xf32> -> vector<24x128xf32>
    %60 = arith.addf %54, %59 : vector<24x128xf32>
    %c8 = arith.constant 8 : index
    %c0_53 = arith.constant 0 : index
    %61 = vector.load %arg1[%c8, %c0_53] : memref<38x128xf32, #tpu.memory_space<vmem>>, vector<24x128xf32>
    %62 = arith.truncf %61 : vector<24x128xf32> to vector<24x128xbf16>
    %c5 = arith.constant 5 : index
    %c0_54 = arith.constant 0 : index
    %c0_55 = arith.constant 0 : index
    %63 = vector.load %arg3[%c5, %c0_54, %c0_55] : memref<9x128x128xbf16, #tpu.memory_space<vmem>>, vector<1x128x128xbf16>
    %64 = vector.shape_cast %63 : vector<1x128x128xbf16> to vector<128x128xbf16>
    %cst_56 = arith.constant dense<0.000000e+00> : vector<24x128xf32>
    %65 = tpu.matmul %62, %64, %cst_56 {dimension_numbers = #tpu.dot_dimension_numbers<[1], [0], [0], [1], [0, 0, 1, 1], [], []>} : vector<24x128xbf16>, vector<128x128xbf16>, vector<24x128xf32> -> vector<24x128xf32>
    %66 = arith.addf %60, %65 : vector<24x128xf32>
    %c8_57 = arith.constant 8 : index
    %c0_58 = arith.constant 0 : index
    %67 = vector.load %arg2[%c8_57, %c0_58] : memref<38x128xf32, #tpu.memory_space<vmem>>, vector<24x128xf32>
    %68 = arith.truncf %67 : vector<24x128xf32> to vector<24x128xbf16>
    %c5_59 = arith.constant 5 : index
    %c0_60 = arith.constant 0 : index
    %c0_61 = arith.constant 0 : index
    %69 = vector.load %arg4[%c5_59, %c0_60, %c0_61] : memref<9x128x128xbf16, #tpu.memory_space<vmem>>, vector<1x128x128xbf16>
    %70 = vector.shape_cast %69 : vector<1x128x128xbf16> to vector<128x128xbf16>
    %cst_62 = arith.constant dense<0.000000e+00> : vector<24x128xf32>
    %71 = tpu.matmul %68, %70, %cst_62 {dimension_numbers = #tpu.dot_dimension_numbers<[1], [0], [0], [1], [0, 0, 1, 1], [], []>} : vector<24x128xbf16>, vector<128x128xbf16>, vector<24x128xf32> -> vector<24x128xf32>
    %72 = arith.addf %66, %71 : vector<24x128xf32>
    %c12 = arith.constant 12 : index
    %c0_63 = arith.constant 0 : index
    %73 = vector.load %arg1[%c12, %c0_63] : memref<38x128xf32, #tpu.memory_space<vmem>>, vector<24x128xf32>
    %74 = arith.truncf %73 : vector<24x128xf32> to vector<24x128xbf16>
    %c6_64 = arith.constant 6 : index
    %c0_65 = arith.constant 0 : index
    %c0_66 = arith.constant 0 : index
    %75 = vector.load %arg3[%c6_64, %c0_65, %c0_66] : memref<9x128x128xbf16, #tpu.memory_space<vmem>>, vector<1x128x128xbf16>
    %76 = vector.shape_cast %75 : vector<1x128x128xbf16> to vector<128x128xbf16>
    %cst_67 = arith.constant dense<0.000000e+00> : vector<24x128xf32>
    %77 = tpu.matmul %74, %76, %cst_67 {dimension_numbers = #tpu.dot_dimension_numbers<[1], [0], [0], [1], [0, 0, 1, 1], [], []>} : vector<24x128xbf16>, vector<128x128xbf16>, vector<24x128xf32> -> vector<24x128xf32>
    %78 = arith.addf %72, %77 : vector<24x128xf32>
    %c12_68 = arith.constant 12 : index
    %c0_69 = arith.constant 0 : index
    %79 = vector.load %arg2[%c12_68, %c0_69] : memref<38x128xf32, #tpu.memory_space<vmem>>, vector<24x128xf32>
    %80 = arith.truncf %79 : vector<24x128xf32> to vector<24x128xbf16>
    %c6_70 = arith.constant 6 : index
    %c0_71 = arith.constant 0 : index
    %c0_72 = arith.constant 0 : index
    %81 = vector.load %arg4[%c6_70, %c0_71, %c0_72] : memref<9x128x128xbf16, #tpu.memory_space<vmem>>, vector<1x128x128xbf16>
    %82 = vector.shape_cast %81 : vector<1x128x128xbf16> to vector<128x128xbf16>
    %cst_73 = arith.constant dense<0.000000e+00> : vector<24x128xf32>
    %83 = tpu.matmul %80, %82, %cst_73 {dimension_numbers = #tpu.dot_dimension_numbers<[1], [0], [0], [1], [0, 0, 1, 1], [], []>} : vector<24x128xbf16>, vector<128x128xbf16>, vector<24x128xf32> -> vector<24x128xf32>
    %84 = arith.addf %78, %83 : vector<24x128xf32>
    %c13 = arith.constant 13 : index
    %c0_74 = arith.constant 0 : index
    %85 = vector.load %arg1[%c13, %c0_74] : memref<38x128xf32, #tpu.memory_space<vmem>>, vector<24x128xf32>
    %86 = arith.truncf %85 : vector<24x128xf32> to vector<24x128xbf16>
    %c7_75 = arith.constant 7 : index
    %c0_76 = arith.constant 0 : index
    %c0_77 = arith.constant 0 : index
    %87 = vector.load %arg3[%c7_75, %c0_76, %c0_77] : memref<9x128x128xbf16, #tpu.memory_space<vmem>>, vector<1x128x128xbf16>
    %88 = vector.shape_cast %87 : vector<1x128x128xbf16> to vector<128x128xbf16>
    %cst_78 = arith.constant dense<0.000000e+00> : vector<24x128xf32>
    %89 = tpu.matmul %86, %88, %cst_78 {dimension_numbers = #tpu.dot_dimension_numbers<[1], [0], [0], [1], [0, 0, 1, 1], [], []>} : vector<24x128xbf16>, vector<128x128xbf16>, vector<24x128xf32> -> vector<24x128xf32>
    %90 = arith.addf %84, %89 : vector<24x128xf32>
    %c13_79 = arith.constant 13 : index
    %c0_80 = arith.constant 0 : index
    %91 = vector.load %arg2[%c13_79, %c0_80] : memref<38x128xf32, #tpu.memory_space<vmem>>, vector<24x128xf32>
    %92 = arith.truncf %91 : vector<24x128xf32> to vector<24x128xbf16>
    %c7_81 = arith.constant 7 : index
    %c0_82 = arith.constant 0 : index
    %c0_83 = arith.constant 0 : index
    %93 = vector.load %arg4[%c7_81, %c0_82, %c0_83] : memref<9x128x128xbf16, #tpu.memory_space<vmem>>, vector<1x128x128xbf16>
    %94 = vector.shape_cast %93 : vector<1x128x128xbf16> to vector<128x128xbf16>
    %cst_84 = arith.constant dense<0.000000e+00> : vector<24x128xf32>
    %95 = tpu.matmul %92, %94, %cst_84 {dimension_numbers = #tpu.dot_dimension_numbers<[1], [0], [0], [1], [0, 0, 1, 1], [], []>} : vector<24x128xbf16>, vector<128x128xbf16>, vector<24x128xf32> -> vector<24x128xf32>
    %96 = arith.addf %90, %95 : vector<24x128xf32>
    %c14 = arith.constant 14 : index
    %c0_85 = arith.constant 0 : index
    %97 = vector.load %arg1[%c14, %c0_85] : memref<38x128xf32, #tpu.memory_space<vmem>>, vector<24x128xf32>
    %98 = arith.truncf %97 : vector<24x128xf32> to vector<24x128xbf16>
    %c8_86 = arith.constant 8 : index
    %c0_87 = arith.constant 0 : index
    %c0_88 = arith.constant 0 : index
    %99 = vector.load %arg3[%c8_86, %c0_87, %c0_88] : memref<9x128x128xbf16, #tpu.memory_space<vmem>>, vector<1x128x128xbf16>
    %100 = vector.shape_cast %99 : vector<1x128x128xbf16> to vector<128x128xbf16>
    %cst_89 = arith.constant dense<0.000000e+00> : vector<24x128xf32>
    %101 = tpu.matmul %98, %100, %cst_89 {dimension_numbers = #tpu.dot_dimension_numbers<[1], [0], [0], [1], [0, 0, 1, 1], [], []>} : vector<24x128xbf16>, vector<128x128xbf16>, vector<24x128xf32> -> vector<24x128xf32>
    %102 = arith.addf %96, %101 : vector<24x128xf32>
    %c14_90 = arith.constant 14 : index
    %c0_91 = arith.constant 0 : index
    %103 = vector.load %arg2[%c14_90, %c0_91] : memref<38x128xf32, #tpu.memory_space<vmem>>, vector<24x128xf32>
    %104 = arith.truncf %103 : vector<24x128xf32> to vector<24x128xbf16>
    %c8_92 = arith.constant 8 : index
    %c0_93 = arith.constant 0 : index
    %c0_94 = arith.constant 0 : index
    %105 = vector.load %arg4[%c8_92, %c0_93, %c0_94] : memref<9x128x128xbf16, #tpu.memory_space<vmem>>, vector<1x128x128xbf16>
    %106 = vector.shape_cast %105 : vector<1x128x128xbf16> to vector<128x128xbf16>
    %cst_95 = arith.constant dense<0.000000e+00> : vector<24x128xf32>
    %107 = tpu.matmul %104, %106, %cst_95 {dimension_numbers = #tpu.dot_dimension_numbers<[1], [0], [0], [1], [0, 0, 1, 1], [], []>} : vector<24x128xbf16>, vector<128x128xbf16>, vector<24x128xf32> -> vector<24x128xf32>
    %108 = arith.addf %102, %107 : vector<24x128xf32>
    %c0_96 = arith.constant 0 : index
    %c0_97 = arith.constant 0 : index
    %109 = vector.load %arg5[%c0_96, %c0_97] : memref<1x128xf32, #tpu.memory_space<vmem>>, vector<1x128xf32>
    %110 = vector.broadcast %109 : vector<1x128xf32> to vector<24x128xf32>
    %111 = arith.mulf %108, %110 : vector<24x128xf32>
    %c0_98 = arith.constant 0 : index
    %c0_99 = arith.constant 0 : index
    %112 = vector.load %arg6[%c0_98, %c0_99] : memref<1x128xf32, #tpu.memory_space<vmem>>, vector<1x128xf32>
    %113 = vector.broadcast %112 : vector<1x128xf32> to vector<24x128xf32>
    %114 = arith.addf %111, %113 : vector<24x128xf32>
    %cst_100 = arith.constant 0.000000e+00 : f32
    %115 = vector.broadcast %cst_100 : f32 to vector<24x128xf32>
    %116 = arith.maximumf %114, %115 : vector<24x128xf32>
    %c0_101 = arith.constant 0 : index
    %c0_102 = arith.constant 0 : index
    %117 = vector.load %arg7[%c0_101, %c0_102] : memref<24x128xf32, #tpu.memory_space<vmem>>, vector<24x128xf32>
    tpu.vector_store %arg7[%c0_101, %c0_102], %116 {strides = array<i32>} : memref<24x128xf32, #tpu.memory_space<vmem>>, vector<24x128xf32>,
    return
  }
  func.func @transform_0(%arg0: i32) -> (i32, i32) {
    %c0_i32 = arith.constant 0 : i32
    %c0_i32_0 = arith.constant 0 : i32
    %c0_i32_1 = arith.constant 0 : i32
    return %c0_i32, %c0_i32_0 : i32, i32
  }
  func.func @transform_1(%arg0: i32) -> (i32, i32) {
    %c0_i32 = arith.constant 0 : i32
    %c0_i32_0 = arith.constant 0 : i32
    %c0_i32_1 = arith.constant 0 : i32
    return %c0_i32, %c0_i32_0 : i32, i32
  }
  func.func @transform_2(%arg0: i32) -> (i32, i32, i32) {
    %c0_i32 = arith.constant 0 : i32
    %c0_i32_0 = arith.constant 0 : i32
    %c0_i32_1 = arith.constant 0 : i32
    %c0_i32_2 = arith.constant 0 : i32
    return %c0_i32, %c0_i32_0, %c0_i32_1 : i32, i32, i32
  }
  func.func @transform_3(%arg0: i32) -> (i32, i32, i32) {
    %c0_i32 = arith.constant 0 : i32
    %c0_i32_0 = arith.constant 0 : i32
    %c0_i32_1 = arith.constant 0 : i32
    %c0_i32_2 = arith.constant 0 : i32
    return %c0_i32, %c0_i32_0, %c0_i32_1 : i32, i32, i32
  }
  func.func @transform_4(%arg0: i32) -> (i32, i32) {
    %c0_i32 = arith.constant 0 : i32
    %c0_i32_0 = arith.constant 0 : i32
    %c0_i32_1 = arith.constant 0 : i32
    return %c0_i32, %c0_i32_0 : i32, i32
  }
  func.func @transform_5(%arg0: i32) -> (i32, i32) {
    %c0_i32 = arith.constant 0 : i32
    %c0_i32_0 = arith.constant 0 : i32
    %c0_i32_1 = arith.constant 0 : i32
    return %c0_i32, %c0_i32_0 : i32, i32
  }
  func.func @transform_6(%arg0: i32) -> (i32, i32) {
    %c0_i32 = arith.constant 0 : i32
    %c0_i32_0 = arith.constant 0 : i32
    %c0_i32_1 = arith.constant 0 : i32
    return %c0_i32, %c0_i32_0 : i32, i32
  }
}

module attributes {stable_mosaic.version = 11 : i64} {
  func.func @_direct_conv_kernel(%arg0: i32, %arg1: memref<102x64xf32, #tpu.memory_space<vmem>>, %arg2: memref<102x64xf32, #tpu.memory_space<vmem>>, %arg3: memref<9x64x128xbf16, #tpu.memory_space<vmem>>, %arg4: memref<9x64x128xbf16, #tpu.memory_space<vmem>>, %arg5: memref<1x128xf32, #tpu.memory_space<vmem>>, %arg6: memref<1x128xf32, #tpu.memory_space<vmem>>, %arg7: memref<80x128xf32, #tpu.memory_space<vmem>>) attributes {dimension_semantics = [#tpu.dimension_semantics<arbitrary>], iteration_bounds = array<i64: 1>, scalar_prefetch = 0 : i64, scratch_operands = 0 : i64, tpu.core_type = #tpu.core_type<tc>, window_params = [{pipeline_mode = #tpu.pipeline_mode<synchronous>, transform_indices = @transform_0, window_bounds = array<i64: 102, 64>}, {pipeline_mode = #tpu.pipeline_mode<synchronous>, transform_indices = @transform_1, window_bounds = array<i64: 102, 64>}, {pipeline_mode = #tpu.pipeline_mode<synchronous>, transform_indices = @transform_2, window_bounds = array<i64: 9, 64, 128>}, {pipeline_mode = #tpu.pipeline_mode<synchronous>, transform_indices = @transform_3, window_bounds = array<i64: 9, 64, 128>}, {pipeline_mode = #tpu.pipeline_mode<synchronous>, transform_indices = @transform_4, window_bounds = array<i64: 1, 128>}, {pipeline_mode = #tpu.pipeline_mode<synchronous>, transform_indices = @transform_5, window_bounds = array<i64: 1, 128>}, {pipeline_mode = #tpu.pipeline_mode<synchronous>, transform_indices = @transform_6, window_bounds = array<i64: 80, 128>}]} {
    %cst = arith.constant 0.000000e+00 : f32
    %0 = vector.broadcast %cst : f32 to vector<80x128xf32>
    %c0 = arith.constant 0 : index
    %c0_0 = arith.constant 0 : index
    %1 = vector.load %arg1[%c0, %c0_0] : memref<102x64xf32, #tpu.memory_space<vmem>>, vector<80x64xf32>
    %2 = arith.truncf %1 : vector<80x64xf32> to vector<80x64xbf16>
    %c0_1 = arith.constant 0 : index
    %c0_2 = arith.constant 0 : index
    %c0_3 = arith.constant 0 : index
    %3 = vector.load %arg3[%c0_1, %c0_2, %c0_3] : memref<9x64x128xbf16, #tpu.memory_space<vmem>>, vector<1x64x128xbf16>
    %4 = vector.shape_cast %3 : vector<1x64x128xbf16> to vector<64x128xbf16>
    %cst_4 = arith.constant dense<0.000000e+00> : vector<80x128xf32>
    %5 = tpu.matmul %2, %4, %cst_4 {dimension_numbers = #tpu.dot_dimension_numbers<[1], [0], [0], [1], [0, 0, 1, 1], [], []>} : vector<80x64xbf16>, vector<64x128xbf16>, vector<80x128xf32> -> vector<80x128xf32>
    %6 = arith.addf %0, %5 : vector<80x128xf32>
    %c0_5 = arith.constant 0 : index
    %c0_6 = arith.constant 0 : index
    %7 = vector.load %arg2[%c0_5, %c0_6] : memref<102x64xf32, #tpu.memory_space<vmem>>, vector<80x64xf32>
    %8 = arith.truncf %7 : vector<80x64xf32> to vector<80x64xbf16>
    %c0_7 = arith.constant 0 : index
    %c0_8 = arith.constant 0 : index
    %c0_9 = arith.constant 0 : index
    %9 = vector.load %arg4[%c0_7, %c0_8, %c0_9] : memref<9x64x128xbf16, #tpu.memory_space<vmem>>, vector<1x64x128xbf16>
    %10 = vector.shape_cast %9 : vector<1x64x128xbf16> to vector<64x128xbf16>
    %cst_10 = arith.constant dense<0.000000e+00> : vector<80x128xf32>
    %11 = tpu.matmul %8, %10, %cst_10 {dimension_numbers = #tpu.dot_dimension_numbers<[1], [0], [0], [1], [0, 0, 1, 1], [], []>} : vector<80x64xbf16>, vector<64x128xbf16>, vector<80x128xf32> -> vector<80x128xf32>
    %12 = arith.addf %6, %11 : vector<80x128xf32>
    %c1 = arith.constant 1 : index
    %c0_11 = arith.constant 0 : index
    %13 = vector.load %arg1[%c1, %c0_11] : memref<102x64xf32, #tpu.memory_space<vmem>>, vector<80x64xf32>
    %14 = arith.truncf %13 : vector<80x64xf32> to vector<80x64xbf16>
    %c1_12 = arith.constant 1 : index
    %c0_13 = arith.constant 0 : index
    %c0_14 = arith.constant 0 : index
    %15 = vector.load %arg3[%c1_12, %c0_13, %c0_14] : memref<9x64x128xbf16, #tpu.memory_space<vmem>>, vector<1x64x128xbf16>
    %16 = vector.shape_cast %15 : vector<1x64x128xbf16> to vector<64x128xbf16>
    %cst_15 = arith.constant dense<0.000000e+00> : vector<80x128xf32>
    %17 = tpu.matmul %14, %16, %cst_15 {dimension_numbers = #tpu.dot_dimension_numbers<[1], [0], [0], [1], [0, 0, 1, 1], [], []>} : vector<80x64xbf16>, vector<64x128xbf16>, vector<80x128xf32> -> vector<80x128xf32>
    %18 = arith.addf %12, %17 : vector<80x128xf32>
    %c1_16 = arith.constant 1 : index
    %c0_17 = arith.constant 0 : index
    %19 = vector.load %arg2[%c1_16, %c0_17] : memref<102x64xf32, #tpu.memory_space<vmem>>, vector<80x64xf32>
    %20 = arith.truncf %19 : vector<80x64xf32> to vector<80x64xbf16>
    %c1_18 = arith.constant 1 : index
    %c0_19 = arith.constant 0 : index
    %c0_20 = arith.constant 0 : index
    %21 = vector.load %arg4[%c1_18, %c0_19, %c0_20] : memref<9x64x128xbf16, #tpu.memory_space<vmem>>, vector<1x64x128xbf16>
    %22 = vector.shape_cast %21 : vector<1x64x128xbf16> to vector<64x128xbf16>
    %cst_21 = arith.constant dense<0.000000e+00> : vector<80x128xf32>
    %23 = tpu.matmul %20, %22, %cst_21 {dimension_numbers = #tpu.dot_dimension_numbers<[1], [0], [0], [1], [0, 0, 1, 1], [], []>} : vector<80x64xbf16>, vector<64x128xbf16>, vector<80x128xf32> -> vector<80x128xf32>
    %24 = arith.addf %18, %23 : vector<80x128xf32>
    %c2 = arith.constant 2 : index
    %c0_22 = arith.constant 0 : index
    %25 = vector.load %arg1[%c2, %c0_22] : memref<102x64xf32, #tpu.memory_space<vmem>>, vector<80x64xf32>
    %26 = arith.truncf %25 : vector<80x64xf32> to vector<80x64xbf16>
    %c2_23 = arith.constant 2 : index
    %c0_24 = arith.constant 0 : index
    %c0_25 = arith.constant 0 : index
    %27 = vector.load %arg3[%c2_23, %c0_24, %c0_25] : memref<9x64x128xbf16, #tpu.memory_space<vmem>>, vector<1x64x128xbf16>
    %28 = vector.shape_cast %27 : vector<1x64x128xbf16> to vector<64x128xbf16>
    %cst_26 = arith.constant dense<0.000000e+00> : vector<80x128xf32>
    %29 = tpu.matmul %26, %28, %cst_26 {dimension_numbers = #tpu.dot_dimension_numbers<[1], [0], [0], [1], [0, 0, 1, 1], [], []>} : vector<80x64xbf16>, vector<64x128xbf16>, vector<80x128xf32> -> vector<80x128xf32>
    %30 = arith.addf %24, %29 : vector<80x128xf32>
    %c2_27 = arith.constant 2 : index
    %c0_28 = arith.constant 0 : index
    %31 = vector.load %arg2[%c2_27, %c0_28] : memref<102x64xf32, #tpu.memory_space<vmem>>, vector<80x64xf32>
    %32 = arith.truncf %31 : vector<80x64xf32> to vector<80x64xbf16>
    %c2_29 = arith.constant 2 : index
    %c0_30 = arith.constant 0 : index
    %c0_31 = arith.constant 0 : index
    %33 = vector.load %arg4[%c2_29, %c0_30, %c0_31] : memref<9x64x128xbf16, #tpu.memory_space<vmem>>, vector<1x64x128xbf16>
    %34 = vector.shape_cast %33 : vector<1x64x128xbf16> to vector<64x128xbf16>
    %cst_32 = arith.constant dense<0.000000e+00> : vector<80x128xf32>
    %35 = tpu.matmul %32, %34, %cst_32 {dimension_numbers = #tpu.dot_dimension_numbers<[1], [0], [0], [1], [0, 0, 1, 1], [], []>} : vector<80x64xbf16>, vector<64x128xbf16>, vector<80x128xf32> -> vector<80x128xf32>
    %36 = arith.addf %30, %35 : vector<80x128xf32>
    %c10 = arith.constant 10 : index
    %c0_33 = arith.constant 0 : index
    %37 = vector.load %arg1[%c10, %c0_33] : memref<102x64xf32, #tpu.memory_space<vmem>>, vector<80x64xf32>
    %38 = arith.truncf %37 : vector<80x64xf32> to vector<80x64xbf16>
    %c3 = arith.constant 3 : index
    %c0_34 = arith.constant 0 : index
    %c0_35 = arith.constant 0 : index
    %39 = vector.load %arg3[%c3, %c0_34, %c0_35] : memref<9x64x128xbf16, #tpu.memory_space<vmem>>, vector<1x64x128xbf16>
    %40 = vector.shape_cast %39 : vector<1x64x128xbf16> to vector<64x128xbf16>
    %cst_36 = arith.constant dense<0.000000e+00> : vector<80x128xf32>
    %41 = tpu.matmul %38, %40, %cst_36 {dimension_numbers = #tpu.dot_dimension_numbers<[1], [0], [0], [1], [0, 0, 1, 1], [], []>} : vector<80x64xbf16>, vector<64x128xbf16>, vector<80x128xf32> -> vector<80x128xf32>
    %42 = arith.addf %36, %41 : vector<80x128xf32>
    %c10_37 = arith.constant 10 : index
    %c0_38 = arith.constant 0 : index
    %43 = vector.load %arg2[%c10_37, %c0_38] : memref<102x64xf32, #tpu.memory_space<vmem>>, vector<80x64xf32>
    %44 = arith.truncf %43 : vector<80x64xf32> to vector<80x64xbf16>
    %c3_39 = arith.constant 3 : index
    %c0_40 = arith.constant 0 : index
    %c0_41 = arith.constant 0 : index
    %45 = vector.load %arg4[%c3_39, %c0_40, %c0_41] : memref<9x64x128xbf16, #tpu.memory_space<vmem>>, vector<1x64x128xbf16>
    %46 = vector.shape_cast %45 : vector<1x64x128xbf16> to vector<64x128xbf16>
    %cst_42 = arith.constant dense<0.000000e+00> : vector<80x128xf32>
    %47 = tpu.matmul %44, %46, %cst_42 {dimension_numbers = #tpu.dot_dimension_numbers<[1], [0], [0], [1], [0, 0, 1, 1], [], []>} : vector<80x64xbf16>, vector<64x128xbf16>, vector<80x128xf32> -> vector<80x128xf32>
    %48 = arith.addf %42, %47 : vector<80x128xf32>
    %c11 = arith.constant 11 : index
    %c0_43 = arith.constant 0 : index
    %49 = vector.load %arg1[%c11, %c0_43] : memref<102x64xf32, #tpu.memory_space<vmem>>, vector<80x64xf32>
    %50 = arith.truncf %49 : vector<80x64xf32> to vector<80x64xbf16>
    %c4 = arith.constant 4 : index
    %c0_44 = arith.constant 0 : index
    %c0_45 = arith.constant 0 : index
    %51 = vector.load %arg3[%c4, %c0_44, %c0_45] : memref<9x64x128xbf16, #tpu.memory_space<vmem>>, vector<1x64x128xbf16>
    %52 = vector.shape_cast %51 : vector<1x64x128xbf16> to vector<64x128xbf16>
    %cst_46 = arith.constant dense<0.000000e+00> : vector<80x128xf32>
    %53 = tpu.matmul %50, %52, %cst_46 {dimension_numbers = #tpu.dot_dimension_numbers<[1], [0], [0], [1], [0, 0, 1, 1], [], []>} : vector<80x64xbf16>, vector<64x128xbf16>, vector<80x128xf32> -> vector<80x128xf32>
    %54 = arith.addf %48, %53 : vector<80x128xf32>
    %c11_47 = arith.constant 11 : index
    %c0_48 = arith.constant 0 : index
    %55 = vector.load %arg2[%c11_47, %c0_48] : memref<102x64xf32, #tpu.memory_space<vmem>>, vector<80x64xf32>
    %56 = arith.truncf %55 : vector<80x64xf32> to vector<80x64xbf16>
    %c4_49 = arith.constant 4 : index
    %c0_50 = arith.constant 0 : index
    %c0_51 = arith.constant 0 : index
    %57 = vector.load %arg4[%c4_49, %c0_50, %c0_51] : memref<9x64x128xbf16, #tpu.memory_space<vmem>>, vector<1x64x128xbf16>
    %58 = vector.shape_cast %57 : vector<1x64x128xbf16> to vector<64x128xbf16>
    %cst_52 = arith.constant dense<0.000000e+00> : vector<80x128xf32>
    %59 = tpu.matmul %56, %58, %cst_52 {dimension_numbers = #tpu.dot_dimension_numbers<[1], [0], [0], [1], [0, 0, 1, 1], [], []>} : vector<80x64xbf16>, vector<64x128xbf16>, vector<80x128xf32> -> vector<80x128xf32>
    %60 = arith.addf %54, %59 : vector<80x128xf32>
    %c12 = arith.constant 12 : index
    %c0_53 = arith.constant 0 : index
    %61 = vector.load %arg1[%c12, %c0_53] : memref<102x64xf32, #tpu.memory_space<vmem>>, vector<80x64xf32>
    %62 = arith.truncf %61 : vector<80x64xf32> to vector<80x64xbf16>
    %c5 = arith.constant 5 : index
    %c0_54 = arith.constant 0 : index
    %c0_55 = arith.constant 0 : index
    %63 = vector.load %arg3[%c5, %c0_54, %c0_55] : memref<9x64x128xbf16, #tpu.memory_space<vmem>>, vector<1x64x128xbf16>
    %64 = vector.shape_cast %63 : vector<1x64x128xbf16> to vector<64x128xbf16>
    %cst_56 = arith.constant dense<0.000000e+00> : vector<80x128xf32>
    %65 = tpu.matmul %62, %64, %cst_56 {dimension_numbers = #tpu.dot_dimension_numbers<[1], [0], [0], [1], [0, 0, 1, 1], [], []>} : vector<80x64xbf16>, vector<64x128xbf16>, vector<80x128xf32> -> vector<80x128xf32>
    %66 = arith.addf %60, %65 : vector<80x128xf32>
    %c12_57 = arith.constant 12 : index
    %c0_58 = arith.constant 0 : index
    %67 = vector.load %arg2[%c12_57, %c0_58] : memref<102x64xf32, #tpu.memory_space<vmem>>, vector<80x64xf32>
    %68 = arith.truncf %67 : vector<80x64xf32> to vector<80x64xbf16>
    %c5_59 = arith.constant 5 : index
    %c0_60 = arith.constant 0 : index
    %c0_61 = arith.constant 0 : index
    %69 = vector.load %arg4[%c5_59, %c0_60, %c0_61] : memref<9x64x128xbf16, #tpu.memory_space<vmem>>, vector<1x64x128xbf16>
    %70 = vector.shape_cast %69 : vector<1x64x128xbf16> to vector<64x128xbf16>
    %cst_62 = arith.constant dense<0.000000e+00> : vector<80x128xf32>
    %71 = tpu.matmul %68, %70, %cst_62 {dimension_numbers = #tpu.dot_dimension_numbers<[1], [0], [0], [1], [0, 0, 1, 1], [], []>} : vector<80x64xbf16>, vector<64x128xbf16>, vector<80x128xf32> -> vector<80x128xf32>
    %72 = arith.addf %66, %71 : vector<80x128xf32>
    %c20 = arith.constant 20 : index
    %c0_63 = arith.constant 0 : index
    %73 = vector.load %arg1[%c20, %c0_63] : memref<102x64xf32, #tpu.memory_space<vmem>>, vector<80x64xf32>
    %74 = arith.truncf %73 : vector<80x64xf32> to vector<80x64xbf16>
    %c6 = arith.constant 6 : index
    %c0_64 = arith.constant 0 : index
    %c0_65 = arith.constant 0 : index
    %75 = vector.load %arg3[%c6, %c0_64, %c0_65] : memref<9x64x128xbf16, #tpu.memory_space<vmem>>, vector<1x64x128xbf16>
    %76 = vector.shape_cast %75 : vector<1x64x128xbf16> to vector<64x128xbf16>
    %cst_66 = arith.constant dense<0.000000e+00> : vector<80x128xf32>
    %77 = tpu.matmul %74, %76, %cst_66 {dimension_numbers = #tpu.dot_dimension_numbers<[1], [0], [0], [1], [0, 0, 1, 1], [], []>} : vector<80x64xbf16>, vector<64x128xbf16>, vector<80x128xf32> -> vector<80x128xf32>
    %78 = arith.addf %72, %77 : vector<80x128xf32>
    %c20_67 = arith.constant 20 : index
    %c0_68 = arith.constant 0 : index
    %79 = vector.load %arg2[%c20_67, %c0_68] : memref<102x64xf32, #tpu.memory_space<vmem>>, vector<80x64xf32>
    %80 = arith.truncf %79 : vector<80x64xf32> to vector<80x64xbf16>
    %c6_69 = arith.constant 6 : index
    %c0_70 = arith.constant 0 : index
    %c0_71 = arith.constant 0 : index
    %81 = vector.load %arg4[%c6_69, %c0_70, %c0_71] : memref<9x64x128xbf16, #tpu.memory_space<vmem>>, vector<1x64x128xbf16>
    %82 = vector.shape_cast %81 : vector<1x64x128xbf16> to vector<64x128xbf16>
    %cst_72 = arith.constant dense<0.000000e+00> : vector<80x128xf32>
    %83 = tpu.matmul %80, %82, %cst_72 {dimension_numbers = #tpu.dot_dimension_numbers<[1], [0], [0], [1], [0, 0, 1, 1], [], []>} : vector<80x64xbf16>, vector<64x128xbf16>, vector<80x128xf32> -> vector<80x128xf32>
    %84 = arith.addf %78, %83 : vector<80x128xf32>
    %c21 = arith.constant 21 : index
    %c0_73 = arith.constant 0 : index
    %85 = vector.load %arg1[%c21, %c0_73] : memref<102x64xf32, #tpu.memory_space<vmem>>, vector<80x64xf32>
    %86 = arith.truncf %85 : vector<80x64xf32> to vector<80x64xbf16>
    %c7 = arith.constant 7 : index
    %c0_74 = arith.constant 0 : index
    %c0_75 = arith.constant 0 : index
    %87 = vector.load %arg3[%c7, %c0_74, %c0_75] : memref<9x64x128xbf16, #tpu.memory_space<vmem>>, vector<1x64x128xbf16>
    %88 = vector.shape_cast %87 : vector<1x64x128xbf16> to vector<64x128xbf16>
    %cst_76 = arith.constant dense<0.000000e+00> : vector<80x128xf32>
    %89 = tpu.matmul %86, %88, %cst_76 {dimension_numbers = #tpu.dot_dimension_numbers<[1], [0], [0], [1], [0, 0, 1, 1], [], []>} : vector<80x64xbf16>, vector<64x128xbf16>, vector<80x128xf32> -> vector<80x128xf32>
    %90 = arith.addf %84, %89 : vector<80x128xf32>
    %c21_77 = arith.constant 21 : index
    %c0_78 = arith.constant 0 : index
    %91 = vector.load %arg2[%c21_77, %c0_78] : memref<102x64xf32, #tpu.memory_space<vmem>>, vector<80x64xf32>
    %92 = arith.truncf %91 : vector<80x64xf32> to vector<80x64xbf16>
    %c7_79 = arith.constant 7 : index
    %c0_80 = arith.constant 0 : index
    %c0_81 = arith.constant 0 : index
    %93 = vector.load %arg4[%c7_79, %c0_80, %c0_81] : memref<9x64x128xbf16, #tpu.memory_space<vmem>>, vector<1x64x128xbf16>
    %94 = vector.shape_cast %93 : vector<1x64x128xbf16> to vector<64x128xbf16>
    %cst_82 = arith.constant dense<0.000000e+00> : vector<80x128xf32>
    %95 = tpu.matmul %92, %94, %cst_82 {dimension_numbers = #tpu.dot_dimension_numbers<[1], [0], [0], [1], [0, 0, 1, 1], [], []>} : vector<80x64xbf16>, vector<64x128xbf16>, vector<80x128xf32> -> vector<80x128xf32>
    %96 = arith.addf %90, %95 : vector<80x128xf32>
    %c22 = arith.constant 22 : index
    %c0_83 = arith.constant 0 : index
    %97 = vector.load %arg1[%c22, %c0_83] : memref<102x64xf32, #tpu.memory_space<vmem>>, vector<80x64xf32>
    %98 = arith.truncf %97 : vector<80x64xf32> to vector<80x64xbf16>
    %c8 = arith.constant 8 : index
    %c0_84 = arith.constant 0 : index
    %c0_85 = arith.constant 0 : index
    %99 = vector.load %arg3[%c8, %c0_84, %c0_85] : memref<9x64x128xbf16, #tpu.memory_space<vmem>>, vector<1x64x128xbf16>
    %100 = vector.shape_cast %99 : vector<1x64x128xbf16> to vector<64x128xbf16>
    %cst_86 = arith.constant dense<0.000000e+00> : vector<80x128xf32>
    %101 = tpu.matmul %98, %100, %cst_86 {dimension_numbers = #tpu.dot_dimension_numbers<[1], [0], [0], [1], [0, 0, 1, 1], [], []>} : vector<80x64xbf16>, vector<64x128xbf16>, vector<80x128xf32> -> vector<80x128xf32>
    %102 = arith.addf %96, %101 : vector<80x128xf32>
    %c22_87 = arith.constant 22 : index
    %c0_88 = arith.constant 0 : index
    %103 = vector.load %arg2[%c22_87, %c0_88] : memref<102x64xf32, #tpu.memory_space<vmem>>, vector<80x64xf32>
    %104 = arith.truncf %103 : vector<80x64xf32> to vector<80x64xbf16>
    %c8_89 = arith.constant 8 : index
    %c0_90 = arith.constant 0 : index
    %c0_91 = arith.constant 0 : index
    %105 = vector.load %arg4[%c8_89, %c0_90, %c0_91] : memref<9x64x128xbf16, #tpu.memory_space<vmem>>, vector<1x64x128xbf16>
    %106 = vector.shape_cast %105 : vector<1x64x128xbf16> to vector<64x128xbf16>
    %cst_92 = arith.constant dense<0.000000e+00> : vector<80x128xf32>
    %107 = tpu.matmul %104, %106, %cst_92 {dimension_numbers = #tpu.dot_dimension_numbers<[1], [0], [0], [1], [0, 0, 1, 1], [], []>} : vector<80x64xbf16>, vector<64x128xbf16>, vector<80x128xf32> -> vector<80x128xf32>
    %108 = arith.addf %102, %107 : vector<80x128xf32>
    %c0_93 = arith.constant 0 : index
    %c0_94 = arith.constant 0 : index
    %109 = vector.load %arg5[%c0_93, %c0_94] : memref<1x128xf32, #tpu.memory_space<vmem>>, vector<1x128xf32>
    %110 = vector.broadcast %109 : vector<1x128xf32> to vector<80x128xf32>
    %111 = arith.mulf %108, %110 : vector<80x128xf32>
    %c0_95 = arith.constant 0 : index
    %c0_96 = arith.constant 0 : index
    %112 = vector.load %arg6[%c0_95, %c0_96] : memref<1x128xf32, #tpu.memory_space<vmem>>, vector<1x128xf32>
    %113 = vector.broadcast %112 : vector<1x128xf32> to vector<80x128xf32>
    %114 = arith.addf %111, %113 : vector<80x128xf32>
    %cst_97 = arith.constant 0.000000e+00 : f32
    %115 = vector.broadcast %cst_97 : f32 to vector<80x128xf32>
    %116 = arith.maximumf %114, %115 : vector<80x128xf32>
    %c0_98 = arith.constant 0 : index
    %c0_99 = arith.constant 0 : index
    %117 = vector.load %arg7[%c0_98, %c0_99] : memref<80x128xf32, #tpu.memory_space<vmem>>, vector<80x128xf32>
    tpu.vector_store %arg7[%c0_98, %c0_99], %116 {strides = array<i32>} : memref<80x128xf32, #tpu.memory_space<vmem>>, vector<80x128xf32>,
    return
  }
  func.func @transform_0(%arg0: i32) -> (i32, i32) {
    %c0_i32 = arith.constant 0 : i32
    %c0_i32_0 = arith.constant 0 : i32
    %c0_i32_1 = arith.constant 0 : i32
    return %c0_i32, %c0_i32_0 : i32, i32
  }
  func.func @transform_1(%arg0: i32) -> (i32, i32) {
    %c0_i32 = arith.constant 0 : i32
    %c0_i32_0 = arith.constant 0 : i32
    %c0_i32_1 = arith.constant 0 : i32
    return %c0_i32, %c0_i32_0 : i32, i32
  }
  func.func @transform_2(%arg0: i32) -> (i32, i32, i32) {
    %c0_i32 = arith.constant 0 : i32
    %c0_i32_0 = arith.constant 0 : i32
    %c0_i32_1 = arith.constant 0 : i32
    %c0_i32_2 = arith.constant 0 : i32
    return %c0_i32, %c0_i32_0, %c0_i32_1 : i32, i32, i32
  }
  func.func @transform_3(%arg0: i32) -> (i32, i32, i32) {
    %c0_i32 = arith.constant 0 : i32
    %c0_i32_0 = arith.constant 0 : i32
    %c0_i32_1 = arith.constant 0 : i32
    %c0_i32_2 = arith.constant 0 : i32
    return %c0_i32, %c0_i32_0, %c0_i32_1 : i32, i32, i32
  }
  func.func @transform_4(%arg0: i32) -> (i32, i32) {
    %c0_i32 = arith.constant 0 : i32
    %c0_i32_0 = arith.constant 0 : i32
    %c0_i32_1 = arith.constant 0 : i32
    return %c0_i32, %c0_i32_0 : i32, i32
  }
  func.func @transform_5(%arg0: i32) -> (i32, i32) {
    %c0_i32 = arith.constant 0 : i32
    %c0_i32_0 = arith.constant 0 : i32
    %c0_i32_1 = arith.constant 0 : i32
    return %c0_i32, %c0_i32_0 : i32, i32
  }
  func.func @transform_6(%arg0: i32) -> (i32, i32) {
    %c0_i32 = arith.constant 0 : i32
    %c0_i32_0 = arith.constant 0 : i32
    %c0_i32_1 = arith.constant 0 : i32
    return %c0_i32, %c0_i32_0 : i32, i32
  }
}

</mosaic_0001>

<bundles_post_ra>
// kernel: graphfeat_forward.8
= control target key start
LH: loop header
LB: loop body
LE: loop exit
PB: predicated region body
PF: predicated region fallthrough
CT: control target
= control target key end

     0   :  { %s1288_s15 = smov 0   ;;  %s1571_s0 = inlined_call_operand.vmem [shape: bf16[4096,128], index: 0, kind: input, shape index: {}]   ;;  %s1572_s1 = inlined_call_operand.vmem [shape: bf16[128,128], index: 1, kind: input, shape index: {}]   ;;  %s1573_s2 = inlined_call_operand.vmem [shape: f32[1,128], index: 2, kind: input, shape index: {}]   ;;  %s1574_s3 = inlined_call_operand.vmem [shape: f32[1,128], index: 3, kind: input, shape index: {}]   ;;  %s1575_s4 = inlined_call_operand.vmem [shape: f32[4096,128], index: 4, kind: output, shape index: {}]  }
   0x1 LB: > { %s1010_s16 = sadd.s32 4294967295, %s1261_s15   ;;  %p1014_p0 = scmp.ge.s32.totalorder %s1261_s15, 1  ;;  %s1261_s15 = sphi %s1288_s15, %s14_s15  }
   0x2   : > { %p163_p1 = scmp.lt.s32.totalorder %s1261_s15, 9 }
   0x4   : > { %p164_p2 = pnand %p1014_p0, %p163_p1 }
   0x5   : > { %s1015_s25 = sshll.u32 (!%p164_p2), %s1010_s16, 6 }
   0x6   : > { %167 = sbr.rel (%p164_p2) target bundleno = 304 (0x130), region = 36  ;;  %p190_p3 = scmp.lt.s32.totalorder (!%p164_p2), %s1015_s25, 511 }
   0xb   : > { %v1220_v0 = vld [vmem:[%s1572_s1 + $0x38] sm:$0xff]  ;;  %v1219_v1 = vld [vmem:[%s1572_s1 + $0x30] sm:$0xff]  ;;  %v1218_v2 = vld [vmem:[%s1572_s1 + $0x28] sm:$0xff]  ;;  %s1577_s25 = smov (!%p190_p3, %s1015_s25), 511 }
   0xc   : > { %521 = vmatpush.bf16.msra.mxu0 %v1220_v0  ;;  %1221 = vmatpush.bf16.msra.mxu1 %v1220_v0  ;;  %v1217_v3 = vld [vmem:[%s1572_s1 + $0x20] sm:$0xff]  ;;  %v1216_v4 = vld [vmem:[%s1572_s1 + $0x18] sm:$0xff]  ;;  %v1215_v5 = vld [vmem:[%s1572_s1 + $0x10] sm:$0xff]  ;;  %s1016_s6 = sshll.u32 %s1577_s25, 2  ;;  %s1018_s17 = sshll.u32 %s1577_s25, 3 }
   0xd   : > { %1222 = vmatpush.bf16.msra.mxu2 %v1220_v0  ;;  %1223 = vmatpush.bf16.msra.mxu3 %v1220_v0  ;;  %v1214_v6 = vld [vmem:[%s1572_s1 + $0x8] sm:$0xff]  ;;  %v1213_v7 = vld [vmem:[%s1572_s1] sm:$0xff]  ;;  %s1326_s11 = scalar_lea.vmem %s1571_s0, %s1016_s6  ;;  %s1378_s20 = scalar_lea.vmem %s1575_s4, %s1018_s17 }
   0xe   : > { %v1181_v8 = vld [vmem:[%s1326_s11] sm:$0xff]  ;;  %v1182_v12 = vld [vmem:[%s1326_s11 + $0x8] sm:$0xff]  ;;  %v1183_v16 = vld [vmem:[%s1326_s11 + $0x10] sm:$0xff] }
   0xf   : > { %v1189_v9 = vld [vmem:[%s1326_s11 + $0x40] sm:$0xff]  ;;  %v1190_v13 = vld [vmem:[%s1326_s11 + $0x48] sm:$0xff]  ;;  %v1191_v17 = vld [vmem:[%s1326_s11 + $0x50] sm:$0xff] }
  0x10   : > { %522 = vmatpush.bf16.msra.mxu0 %v1219_v1  ;;  %1224 = vmatpush.bf16.msra.mxu1 %v1219_v1  ;;  %v1197_v10 = vld [vmem:[%s1326_s11 + $0x80] sm:$0xff]  ;;  %v1198_v14 = vld [vmem:[%s1326_s11 + $0x88] sm:$0xff]  ;;  %v1199_v18 = vld [vmem:[%s1326_s11 + $0x90] sm:$0xff] }
  0x11   : > { %1225 = vmatpush.bf16.msra.mxu2 %v1219_v1  ;;  %1226 = vmatpush.bf16.msra.mxu3 %v1219_v1  ;;  %v1205_v11 = vld [vmem:[%s1326_s11 + $0xc0] sm:$0xff]  ;;  %v1206_v15 = vld [vmem:[%s1326_s11 + $0xc8] sm:$0xff]  ;;  %v1207_v19 = vld [vmem:[%s1326_s11 + $0xd0] sm:$0xff] }
  0x12   : > { %v1184_v20 = vld [vmem:[%s1326_s11 + $0x18] sm:$0xff]  ;;  %v1185_v24 = vld [vmem:[%s1326_s11 + $0x20] sm:$0xff]  ;;  %v1186_v28 = vld [vmem:[%s1326_s11 + $0x28] sm:$0xff] }
  0x13   : > { %v1192_v21 = vld [vmem:[%s1326_s11 + $0x58] sm:$0xff]  ;;  %v1193_v25 = vld [vmem:[%s1326_s11 + $0x60] sm:$0xff]  ;;  %v1194_v29 = vld [vmem:[%s1326_s11 + $0x68] sm:$0xff] }
  0x14   : > { %523 = vmatpush.bf16.msra.mxu0 %v1218_v2  ;;  %1227 = vmatpush.bf16.msra.mxu1 %v1218_v2  ;;  %v1200_v22 = vld [vmem:[%s1326_s11 + $0x98] sm:$0xff]  ;;  %v1201_v26 = vld [vmem:[%s1326_s11 + $0xa0] sm:$0xff]  ;;  %v1202_v30 = vld [vmem:[%s1326_s11 + $0xa8] sm:$0xff] }
  0x15   : > { %1228 = vmatpush.bf16.msra.mxu2 %v1218_v2  ;;  %1229 = vmatpush.bf16.msra.mxu3 %v1218_v2  ;;  %v1208_v23 = vld [vmem:[%s1326_s11 + $0xd8] sm:$0xff]  ;;  %v1209_v27 = vld [vmem:[%s1326_s11 + $0xe0] sm:$0xff]  ;;  %v1210_v31 = vld [vmem:[%s1326_s11 + $0xe8] sm:$0xff] }
  0x16   : > { %v1187_v32 = vld [vmem:[%s1326_s11 + $0x30] sm:$0xff]  ;;  %v1188_v36 = vld [vmem:[%s1326_s11 + $0x38] sm:$0xff]  ;;  %v1363_v40 = vld [vmem:[%s1573_s2] ss:$0 sm:$0xff] }
  0x17   : > { %v1195_v33 = vld [vmem:[%s1326_s11 + $0x70] sm:$0xff]  ;;  %v1196_v37 = vld [vmem:[%s1326_s11 + $0x78] sm:$0xff]  ;;  %v1368_v41 = vld [vmem:[%s1574_s3] ss:$0 sm:$0xff] }
  0x18   : > { %524 = vmatpush.bf16.msra.mxu0 %v1217_v3  ;;  %1230 = vmatpush.bf16.msra.mxu1 %v1217_v3  ;;  %v1203_v34 = vld [vmem:[%s1326_s11 + $0xb0] sm:$0xff]  ;;  %v1204_v38 = vld [vmem:[%s1326_s11 + $0xb8] sm:$0xff] }
  0x19   : > { %1231 = vmatpush.bf16.msra.mxu2 %v1217_v3  ;;  %1232 = vmatpush.bf16.msra.mxu3 %v1217_v3  ;;  %v1211_v35 = vld [vmem:[%s1326_s11 + $0xf0] sm:$0xff]  ;;  %v1212_v39 = vld [vmem:[%s1326_s11 + $0xf8] sm:$0xff] }
  0x1c   : > { %525 = vmatpush.bf16.msra.mxu0 %v1216_v4  ;;  %1233 = vmatpush.bf16.msra.mxu1 %v1216_v4 }
  0x1d   : > { %1234 = vmatpush.bf16.msra.mxu2 %v1216_v4  ;;  %1235 = vmatpush.bf16.msra.mxu3 %v1216_v4 }
  0x20   : > { %526 = vmatpush.bf16.msra.mxu0 %v1215_v5  ;;  %1236 = vmatpush.bf16.msra.mxu1 %v1215_v5 }
  0x21   : > { %1237 = vmatpush.bf16.msra.mxu2 %v1215_v5  ;;  %1238 = vmatpush.bf16.msra.mxu3 %v1215_v5 }
  0x24   : > { %527 = vmatpush.bf16.msra.mxu0 %v1214_v6  ;;  %1239 = vmatpush.bf16.msra.mxu1 %v1214_v6 }
  0x25   : > { %1240 = vmatpush.bf16.msra.mxu2 %v1214_v6  ;;  %1241 = vmatpush.bf16.msra.mxu3 %v1214_v6 }
  0x28   : > { %528 = vmatpush.bf16.msra.mxu0 %v1213_v7  ;;  %1242 = vmatpush.bf16.msra.mxu1 %v1213_v7 }
  0x29   : > { %1243 = vmatpush.bf16.msra.mxu2 %v1213_v7  ;;  %1244 = vmatpush.bf16.msra.mxu3 %v1213_v7 }
  0x2b   : > { %529 = vmatmul.bf16.vlgmr.msra.gmra.mxu0 %v1181_v8  ;;  %569 = vmatmul.bf16.vlgmr.msra.gmra.mxu1 %v1189_v9 }
  0x2c   : > { %609 = vmatmul.bf16.vlgmr.msra.gmra.mxu2 %v1197_v10  ;;  %649 = vmatmul.bf16.vlgmr.msra.gmra.mxu3 %v1205_v11 }
  0x3b   : > { %534 = vmatmul.bf16.gmra.mxu0 %v1182_v12  ;;  %574 = vmatmul.bf16.gmra.mxu1 %v1190_v13 }
  0x3c   : > { %614 = vmatmul.bf16.gmra.mxu2 %v1198_v14  ;;  %654 = vmatmul.bf16.gmra.mxu3 %v1206_v15 }
  0x4b   : > { %539 = vmatmul.bf16.gmra.mxu0 %v1183_v16  ;;  %579 = vmatmul.bf16.gmra.mxu1 %v1191_v17 }
  0x4c   : > { %619 = vmatmul.bf16.gmra.mxu2 %v1199_v18  ;;  %659 = vmatmul.bf16.gmra.mxu3 %v1207_v19 }
  0x5b   : > { %544 = vmatmul.bf16.gmra.mxu0 %v1184_v20  ;;  %584 = vmatmul.bf16.gmra.mxu1 %v1192_v21 }
  0x5c   : > { %624 = vmatmul.bf16.gmra.mxu2 %v1200_v22  ;;  %664 = vmatmul.bf16.gmra.mxu3 %v1208_v23 }
  0x6b   : > { %549 = vmatmul.bf16.gmra.mxu0 %v1185_v24  ;;  %589 = vmatmul.bf16.gmra.mxu1 %v1193_v25 }
  0x6c   : > { %629 = vmatmul.bf16.gmra.mxu2 %v1201_v26  ;;  %669 = vmatmul.bf16.gmra.mxu3 %v1209_v27 }
  0x7b   : > { %554 = vmatmul.bf16.gmra.mxu0 %v1186_v28  ;;  %594 = vmatmul.bf16.gmra.mxu1 %v1194_v29 }
  0x7c   : > { %634 = vmatmul.bf16.gmra.mxu2 %v1202_v30  ;;  %674 = vmatmul.bf16.gmra.mxu3 %v1210_v31 }
  0x8b   : > { %559 = vmatmul.bf16.gmra.mxu0 %v1187_v32  ;;  %599 = vmatmul.bf16.gmra.mxu1 %v1195_v33 }
  0x8c   : > { %639 = vmatmul.bf16.gmra.mxu2 %v1203_v34  ;;  %679 = vmatmul.bf16.gmra.mxu3 %v1211_v35 }
  0x9b   : > { %564 = vmatmul.bf16.gmra.mxu0 %v1188_v36  ;;  %604 = vmatmul.bf16.gmra.mxu1 %v1196_v37 }
  0x9c   : > { %644 = vmatmul.bf16.gmra.mxu2 %v1204_v38  ;;  %684 = vmatmul.bf16.gmra.mxu3 %v1212_v39 }
  0xa8   : > { %v530_v42 = vpop.f32.mrf.mxu0  ;;  %v570_v43 = vpop.f32.mrf.mxu1 }
  0xa9   : > { %v694_v44 = vmul.f32 %v1363_v40, %v530_v42  ;;  %v710_v45 = vmul.f32 %v1363_v40, %v570_v43 }
  0xab   : > { %v762_v46 = vadd.f32 %v1368_v41, %v694_v44  ;;  %v778_v47 = vadd.f32 %v1368_v41, %v710_v45 }
  0xad   : > { %v826_v48 = vmax.f32 %v762_v46, 0.0  ;;  %v842_v49 = vmax.f32 %v778_v47, 0.0 }
  0xaf   : > { %890 = vst [vmem:[%s1378_s20] sm:$0xff] %v826_v48  ;;  %v610_v50 = vpop.f32.mrf.mxu2  ;;  %v650_v51 = vpop.f32.mrf.mxu3 }
  0xb0   : > { %906 = vst [vmem:[%s1378_s20 + $0x80] sm:$0xff] %v842_v49  ;;  %v726_v52 = vmul.f32 %v1363_v40, %v610_v50  ;;  %v742_v53 = vmul.f32 %v1363_v40, %v650_v51  ;;  %v532_v54 = vpop.f32.mrf.mxu0  ;;  %v572_v55 = vpop.f32.mrf.mxu1 }
  0xb1   : > { %v695_v56 = vmul.f32 %v1363_v40, %v532_v54  ;;  %v711_v57 = vmul.f32 %v1363_v40, %v572_v55 }
  0xb2   : > { %v794_v58 = vadd.f32 %v1368_v41, %v726_v52  ;;  %v810_v59 = vadd.f32 %v1368_v41, %v742_v53 }
  0xb3   : > { %v763_v60 = vadd.f32 %v1368_v41, %v695_v56  ;;  %v779_v61 = vadd.f32 %v1368_v41, %v711_v57 }
  0xb4   : > { %v858_v62 = vmax.f32 %v794_v58, 0.0  ;;  %v874_v63 = vmax.f32 %v810_v59, 0.0 }
  0xb5   : > { %v827_v0 = vmax.f32 %v763_v60, 0.0  ;;  %v843_v1 = vmax.f32 %v779_v61, 0.0 }
  0xb6   : > { %922 = vst [vmem:[%s1378_s20 + $0x100] sm:$0xff] %v858_v62 }
  0xb7   : > { %938 = vst [vmem:[%s1378_s20 + $0x180] sm:$0xff] %v874_v63  ;;  %v612_v2 = vpop.f32.mrf.mxu2  ;;  %v652_v3 = vpop.f32.mrf.mxu3 }
  0xb8   : > { %891 = vst [vmem:[%s1378_s20 + $0x8] sm:$0xff] %v827_v0  ;;  %v727_v4 = vmul.f32 %v1363_v40, %v612_v2  ;;  %v743_v5 = vmul.f32 %v1363_v40, %v652_v3  ;;  %v535_v6 = vpop.f32.mrf.mxu0  ;;  %v575_v7 = vpop.f32.mrf.mxu1 }
  0xb9   : > { %907 = vst [vmem:[%s1378_s20 + $0x88] sm:$0xff] %v843_v1  ;;  %v696_v8 = vmul.f32 %v1363_v40, %v535_v6  ;;  %v712_v9 = vmul.f32 %v1363_v40, %v575_v7 }
  0xba   : > { %v795_v10 = vadd.f32 %v1368_v41, %v727_v4  ;;  %v811_v11 = vadd.f32 %v1368_v41, %v743_v5 }
  0xbb   : > { %v764_v12 = vadd.f32 %v1368_v41, %v696_v8  ;;  %v780_v13 = vadd.f32 %v1368_v41, %v712_v9 }
  0xbc   : > { %v859_v14 = vmax.f32 %v795_v10, 0.0  ;;  %v875_v15 = vmax.f32 %v811_v11, 0.0 }
  0xbd   : > { %v828_v16 = vmax.f32 %v764_v12, 0.0  ;;  %v844_v17 = vmax.f32 %v780_v13, 0.0 }
  0xbe   : > { %923 = vst [vmem:[%s1378_s20 + $0x108] sm:$0xff] %v859_v14 }
  0xbf   : > { %939 = vst [vmem:[%s1378_s20 + $0x188] sm:$0xff] %v875_v15  ;;  %v615_v18 = vpop.f32.mrf.mxu2  ;;  %v655_v19 = vpop.f32.mrf.mxu3 }
  0xc0   : > { %892 = vst [vmem:[%s1378_s20 + $0x10] sm:$0xff] %v828_v16  ;;  %v728_v20 = vmul.f32 %v1363_v40, %v615_v18  ;;  %v744_v21 = vmul.f32 %v1363_v40, %v655_v19  ;;  %v537_v22 = vpop.f32.mrf.mxu0  ;;  %v577_v23 = vpop.f32.mrf.mxu1 }
  0xc1   : > { %908 = vst [vmem:[%s1378_s20 + $0x90] sm:$0xff] %v844_v17  ;;  %v697_v24 = vmul.f32 %v1363_v40, %v537_v22  ;;  %v713_v25 = vmul.f32 %v1363_v40, %v577_v23 }
  0xc2   : > { %v796_v26 = vadd.f32 %v1368_v41, %v728_v20  ;;  %v812_v27 = vadd.f32 %v1368_v41, %v744_v21 }
  0xc3   : > { %v765_v28 = vadd.f32 %v1368_v41, %v697_v24  ;;  %v781_v29 = vadd.f32 %v1368_v41, %v713_v25 }
  0xc4   : > { %v860_v30 = vmax.f32 %v796_v26, 0.0  ;;  %v876_v31 = vmax.f32 %v812_v27, 0.0 }
  0xc5   : > { %v829_v32 = vmax.f32 %v765_v28, 0.0  ;;  %v845_v33 = vmax.f32 %v781_v29, 0.0 }
  0xc6   : > { %924 = vst [vmem:[%s1378_s20 + $0x110] sm:$0xff] %v860_v30 }
  0xc7   : > { %940 = vst [vmem:[%s1378_s20 + $0x190] sm:$0xff] %v876_v31  ;;  %v617_v34 = vpop.f32.mrf.mxu2  ;;  %v657_v35 = vpop.f32.mrf.mxu3 }
  0xc8   : > { %893 = vst [vmem:[%s1378_s20 + $0x18] sm:$0xff] %v829_v32  ;;  %v729_v36 = vmul.f32 %v1363_v40, %v617_v34  ;;  %v745_v37 = vmul.f32 %v1363_v40, %v657_v35  ;;  %v540_v38 = vpop.f32.mrf.mxu0  ;;  %v580_v39 = vpop.f32.mrf.mxu1 }
  0xc9   : > { %909 = vst [vmem:[%s1378_s20 + $0x98] sm:$0xff] %v845_v33  ;;  %v698_v42 = vmul.f32 %v1363_v40, %v540_v38  ;;  %v714_v43 = vmul.f32 %v1363_v40, %v580_v39 }
  0xca   : > { %v797_v44 = vadd.f32 %v1368_v41, %v729_v36  ;;  %v813_v45 = vadd.f32 %v1368_v41, %v745_v37 }
  0xcb   : > { %v766_v46 = vadd.f32 %v1368_v41, %v698_v42  ;;  %v782_v47 = vadd.f32 %v1368_v41, %v714_v43 }
  0xcc   : > { %v861_v48 = vmax.f32 %v797_v44, 0.0  ;;  %v877_v49 = vmax.f32 %v813_v45, 0.0 }
  0xcd   : > { %v830_v50 = vmax.f32 %v766_v46, 0.0  ;;  %v846_v51 = vmax.f32 %v782_v47, 0.0 }
  0xce   : > { %925 = vst [vmem:[%s1378_s20 + $0x118] sm:$0xff] %v861_v48 }
  0xcf   : > { %941 = vst [vmem:[%s1378_s20 + $0x198] sm:$0xff] %v877_v49  ;;  %v620_v52 = vpop.f32.mrf.mxu2  ;;  %v660_v53 = vpop.f32.mrf.mxu3 }
  0xd0   : > { %894 = vst [vmem:[%s1378_s20 + $0x20] sm:$0xff] %v830_v50  ;;  %v730_v54 = vmul.f32 %v1363_v40, %v620_v52  ;;  %v746_v55 = vmul.f32 %v1363_v40, %v660_v53  ;;  %v542_v56 = vpop.f32.mrf.mxu0  ;;  %v582_v57 = vpop.f32.mrf.mxu1 }
  0xd1   : > { %910 = vst [vmem:[%s1378_s20 + $0xa0] sm:$0xff] %v846_v51  ;;  %v699_v58 = vmul.f32 %v1363_v40, %v542_v56  ;;  %v715_v59 = vmul.f32 %v1363_v40, %v582_v57 }
  0xd2   : > { %v798_v60 = vadd.f32 %v1368_v41, %v730_v54  ;;  %v814_v61 = vadd.f32 %v1368_v41, %v746_v55 }
  0xd3   : > { %v767_v62 = vadd.f32 %v1368_v41, %v699_v58  ;;  %v783_v63 = vadd.f32 %v1368_v41, %v715_v59 }
  0xd4   : > { %v862_v0 = vmax.f32 %v798_v60, 0.0  ;;  %v878_v1 = vmax.f32 %v814_v61, 0.0 }
  0xd5   : > { %v831_v2 = vmax.f32 %v767_v62, 0.0  ;;  %v847_v3 = vmax.f32 %v783_v63, 0.0 }
  0xd6   : > { %926 = vst [vmem:[%s1378_s20 + $0x120] sm:$0xff] %v862_v0 }
  0xd7   : > { %942 = vst [vmem:[%s1378_s20 + $0x1a0] sm:$0xff] %v878_v1  ;;  %v622_v4 = vpop.f32.mrf.mxu2  ;;  %v662_v5 = vpop.f32.mrf.mxu3 }
  0xd8   : > { %895 = vst [vmem:[%s1378_s20 + $0x28] sm:$0xff] %v831_v2  ;;  %v731_v6 = vmul.f32 %v1363_v40, %v622_v4  ;;  %v747_v7 = vmul.f32 %v1363_v40, %v662_v5  ;;  %v545_v8 = vpop.f32.mrf.mxu0  ;;  %v585_v9 = vpop.f32.mrf.mxu1 }
  0xd9   : > { %911 = vst [vmem:[%s1378_s20 + $0xa8] sm:$0xff] %v847_v3  ;;  %v700_v10 = vmul.f32 %v1363_v40, %v545_v8  ;;  %v716_v11 = vmul.f32 %v1363_v40, %v585_v9 }
  0xda   : > { %v799_v12 = vadd.f32 %v1368_v41, %v731_v6  ;;  %v815_v13 = vadd.f32 %v1368_v41, %v747_v7 }
  0xdb   : > { %v768_v14 = vadd.f32 %v1368_v41, %v700_v10  ;;  %v784_v15 = vadd.f32 %v1368_v41, %v716_v11 }
  0xdc   : > { %v863_v16 = vmax.f32 %v799_v12, 0.0  ;;  %v879_v17 = vmax.f32 %v815_v13, 0.0 }
  0xdd   : > { %v832_v18 = vmax.f32 %v768_v14, 0.0  ;;  %v848_v19 = vmax.f32 %v784_v15, 0.0 }
  0xde   : > { %927 = vst [vmem:[%s1378_s20 + $0x128] sm:$0xff] %v863_v16 }
  0xdf   : > { %943 = vst [vmem:[%s1378_s20 + $0x1a8] sm:$0xff] %v879_v17  ;;  %v625_v20 = vpop.f32.mrf.mxu2  ;;  %v665_v21 = vpop.f32.mrf.mxu3 }
  0xe0   : > { %896 = vst [vmem:[%s1378_s20 + $0x30] sm:$0xff] %v832_v18  ;;  %v732_v22 = vmul.f32 %v1363_v40, %v625_v20  ;;  %v748_v23 = vmul.f32 %v1363_v40, %v665_v21  ;;  %v547_v24 = vpop.f32.mrf.mxu0  ;;  %v587_v25 = vpop.f32.mrf.mxu1 }
  0xe1   : > { %912 = vst [vmem:[%s1378_s20 + $0xb0] sm:$0xff] %v848_v19  ;;  %v701_v26 = vmul.f32 %v1363_v40, %v547_v24  ;;  %v717_v27 = vmul.f32 %v1363_v40, %v587_v25 }
  0xe2   : > { %v800_v28 = vadd.f32 %v1368_v41, %v732_v22  ;;  %v816_v29 = vadd.f32 %v1368_v41, %v748_v23 }
  0xe3   : > { %v769_v30 = vadd.f32 %v1368_v41, %v701_v26  ;;  %v785_v31 = vadd.f32 %v1368_v41, %v717_v27 }
  0xe4   : > { %v864_v32 = vmax.f32 %v800_v28, 0.0  ;;  %v880_v33 = vmax.f32 %v816_v29, 0.0 }
  0xe5   : > { %v833_v34 = vmax.f32 %v769_v30, 0.0  ;;  %v849_v35 = vmax.f32 %v785_v31, 0.0 }
  0xe6   : > { %928 = vst [vmem:[%s1378_s20 + $0x130] sm:$0xff] %v864_v32 }
  0xe7   : > { %944 = vst [vmem:[%s1378_s20 + $0x1b0] sm:$0xff] %v880_v33  ;;  %v627_v36 = vpop.f32.mrf.mxu2  ;;  %v667_v37 = vpop.f32.mrf.mxu3 }
  0xe8   : > { %897 = vst [vmem:[%s1378_s20 + $0x38] sm:$0xff] %v833_v34  ;;  %v733_v38 = vmul.f32 %v1363_v40, %v627_v36  ;;  %v749_v39 = vmul.f32 %v1363_v40, %v667_v37  ;;  %v550_v42 = vpop.f32.mrf.mxu0  ;;  %v590_v43 = vpop.f32.mrf.mxu1 }
  0xe9   : > { %913 = vst [vmem:[%s1378_s20 + $0xb8] sm:$0xff] %v849_v35  ;;  %v702_v44 = vmul.f32 %v1363_v40, %v550_v42  ;;  %v718_v45 = vmul.f32 %v1363_v40, %v590_v43 }
  0xea   : > { %v801_v46 = vadd.f32 %v1368_v41, %v733_v38  ;;  %v817_v47 = vadd.f32 %v1368_v41, %v749_v39 }
  0xeb   : > { %v770_v48 = vadd.f32 %v1368_v41, %v702_v44  ;;  %v786_v49 = vadd.f32 %v1368_v41, %v718_v45 }
  0xec   : > { %v865_v50 = vmax.f32 %v801_v46, 0.0  ;;  %v881_v51 = vmax.f32 %v817_v47, 0.0 }
  0xed   : > { %v834_v52 = vmax.f32 %v770_v48, 0.0  ;;  %v850_v53 = vmax.f32 %v786_v49, 0.0 }
  0xee   : > { %929 = vst [vmem:[%s1378_s20 + $0x138] sm:$0xff] %v865_v50 }
  0xef   : > { %945 = vst [vmem:[%s1378_s20 + $0x1b8] sm:$0xff] %v881_v51  ;;  %v630_v54 = vpop.f32.mrf.mxu2  ;;  %v670_v55 = vpop.f32.mrf.mxu3 }
  0xf0   : > { %898 = vst [vmem:[%s1378_s20 + $0x40] sm:$0xff] %v834_v52  ;;  %v734_v56 = vmul.f32 %v1363_v40, %v630_v54  ;;  %v750_v57 = vmul.f32 %v1363_v40, %v670_v55  ;;  %v552_v58 = vpop.f32.mrf.mxu0  ;;  %v592_v59 = vpop.f32.mrf.mxu1 }
  0xf1   : > { %914 = vst [vmem:[%s1378_s20 + $0xc0] sm:$0xff] %v850_v53  ;;  %v703_v60 = vmul.f32 %v1363_v40, %v552_v58  ;;  %v719_v61 = vmul.f32 %v1363_v40, %v592_v59 }
  0xf2   : > { %v802_v62 = vadd.f32 %v1368_v41, %v734_v56  ;;  %v818_v63 = vadd.f32 %v1368_v41, %v750_v57 }
  0xf3   : > { %v771_v0 = vadd.f32 %v1368_v41, %v703_v60  ;;  %v787_v1 = vadd.f32 %v1368_v41, %v719_v61 }
  0xf4   : > { %v866_v2 = vmax.f32 %v802_v62, 0.0  ;;  %v882_v3 = vmax.f32 %v818_v63, 0.0 }
  0xf5   : > { %v835_v4 = vmax.f32 %v771_v0, 0.0  ;;  %v851_v5 = vmax.f32 %v787_v1, 0.0 }
  0xf6   : > { %930 = vst [vmem:[%s1378_s20 + $0x140] sm:$0xff] %v866_v2 }
  0xf7   : > { %946 = vst [vmem:[%s1378_s20 + $0x1c0] sm:$0xff] %v882_v3  ;;  %v632_v6 = vpop.f32.mrf.mxu2  ;;  %v672_v7 = vpop.f32.mrf.mxu3 }
  0xf8   : > { %899 = vst [vmem:[%s1378_s20 + $0x48] sm:$0xff] %v835_v4  ;;  %v735_v8 = vmul.f32 %v1363_v40, %v632_v6  ;;  %v751_v9 = vmul.f32 %v1363_v40, %v672_v7  ;;  %v555_v10 = vpop.f32.mrf.mxu0  ;;  %v595_v11 = vpop.f32.mrf.mxu1 }
  0xf9   : > { %915 = vst [vmem:[%s1378_s20 + $0xc8] sm:$0xff] %v851_v5  ;;  %v704_v12 = vmul.f32 %v1363_v40, %v555_v10  ;;  %v720_v13 = vmul.f32 %v1363_v40, %v595_v11 }
  0xfa   : > { %v803_v14 = vadd.f32 %v1368_v41, %v735_v8  ;;  %v819_v15 = vadd.f32 %v1368_v41, %v751_v9 }
  0xfb   : > { %v772_v16 = vadd.f32 %v1368_v41, %v704_v12  ;;  %v788_v17 = vadd.f32 %v1368_v41, %v720_v13 }
  0xfc   : > { %v867_v18 = vmax.f32 %v803_v14, 0.0  ;;  %v883_v19 = vmax.f32 %v819_v15, 0.0 }
  0xfd   : > { %v836_v20 = vmax.f32 %v772_v16, 0.0  ;;  %v852_v21 = vmax.f32 %v788_v17, 0.0 }
  0xfe   : > { %931 = vst [vmem:[%s1378_s20 + $0x148] sm:$0xff] %v867_v18 }
  0xff   : > { %947 = vst [vmem:[%s1378_s20 + $0x1c8] sm:$0xff] %v883_v19  ;;  %v635_v22 = vpop.f32.mrf.mxu2  ;;  %v675_v23 = vpop.f32.mrf.mxu3 }
 0x100   : > { %900 = vst [vmem:[%s1378_s20 + $0x50] sm:$0xff] %v836_v20  ;;  %v736_v24 = vmul.f32 %v1363_v40, %v635_v22  ;;  %v752_v25 = vmul.f32 %v1363_v40, %v675_v23  ;;  %v557_v26 = vpop.f32.mrf.mxu0  ;;  %v597_v27 = vpop.f32.mrf.mxu1 }
 0x101   : > { %916 = vst [vmem:[%s1378_s20 + $0xd0] sm:$0xff] %v852_v21  ;;  %v705_v28 = vmul.f32 %v1363_v40, %v557_v26  ;;  %v721_v29 = vmul.f32 %v1363_v40, %v597_v27 }
 0x102   : > { %v804_v30 = vadd.f32 %v1368_v41, %v736_v24  ;;  %v820_v31 = vadd.f32 %v1368_v41, %v752_v25 }
 0x103   : > { %v773_v32 = vadd.f32 %v1368_v41, %v705_v28  ;;  %v789_v33 = vadd.f32 %v1368_v41, %v721_v29 }
 0x104   : > { %v868_v34 = vmax.f32 %v804_v30, 0.0  ;;  %v884_v35 = vmax.f32 %v820_v31, 0.0 }
 0x105   : > { %v837_v36 = vmax.f32 %v773_v32, 0.0  ;;  %v853_v37 = vmax.f32 %v789_v33, 0.0 }
 0x106   : > { %932 = vst [vmem:[%s1378_s20 + $0x150] sm:$0xff] %v868_v34 }
 0x107   : > { %948 = vst [vmem:[%s1378_s20 + $0x1d0] sm:$0xff] %v884_v35  ;;  %v637_v38 = vpop.f32.mrf.mxu2  ;;  %v677_v39 = vpop.f32.mrf.mxu3 }
 0x108   : > { %901 = vst [vmem:[%s1378_s20 + $0x58] sm:$0xff] %v837_v36  ;;  %v737_v42 = vmul.f32 %v1363_v40, %v637_v38  ;;  %v753_v43 = vmul.f32 %v1363_v40, %v677_v39  ;;  %v560_v44 = vpop.f32.mrf.mxu0  ;;  %v600_v45 = vpop.f32.mrf.mxu1 }
 0x109   : > { %917 = vst [vmem:[%s1378_s20 + $0xd8] sm:$0xff] %v853_v37  ;;  %v706_v46 = vmul.f32 %v1363_v40, %v560_v44  ;;  %v722_v47 = vmul.f32 %v1363_v40, %v600_v45 }
 0x10a   : > { %v805_v48 = vadd.f32 %v1368_v41, %v737_v42  ;;  %v821_v49 = vadd.f32 %v1368_v41, %v753_v43 }
 0x10b   : > { %v774_v50 = vadd.f32 %v1368_v41, %v706_v46  ;;  %v790_v51 = vadd.f32 %v1368_v41, %v722_v47 }
 0x10c   : > { %v869_v52 = vmax.f32 %v805_v48, 0.0  ;;  %v885_v53 = vmax.f32 %v821_v49, 0.0 }
 0x10d   : > { %v838_v54 = vmax.f32 %v774_v50, 0.0  ;;  %v854_v55 = vmax.f32 %v790_v51, 0.0 }
 0x10e   : > { %933 = vst [vmem:[%s1378_s20 + $0x158] sm:$0xff] %v869_v52 }
 0x10f   : > { %949 = vst [vmem:[%s1378_s20 + $0x1d8] sm:$0xff] %v885_v53  ;;  %v640_v56 = vpop.f32.mrf.mxu2  ;;  %v680_v57 = vpop.f32.mrf.mxu3 }
 0x110   : > { %902 = vst [vmem:[%s1378_s20 + $0x60] sm:$0xff] %v838_v54  ;;  %v738_v58 = vmul.f32 %v1363_v40, %v640_v56  ;;  %v754_v59 = vmul.f32 %v1363_v40, %v680_v57  ;;  %v562_v60 = vpop.f32.mrf.mxu0  ;;  %v602_v61 = vpop.f32.mrf.mxu1 }
 0x111   : > { %918 = vst [vmem:[%s1378_s20 + $0xe0] sm:$0xff] %v854_v55  ;;  %v707_v62 = vmul.f32 %v1363_v40, %v562_v60  ;;  %v723_v63 = vmul.f32 %v1363_v40, %v602_v61 }
 0x112   : > { %v806_v0 = vadd.f32 %v1368_v41, %v738_v58  ;;  %v822_v1 = vadd.f32 %v1368_v41, %v754_v59 }
 0x113   : > { %v775_v2 = vadd.f32 %v1368_v41, %v707_v62  ;;  %v791_v3 = vadd.f32 %v1368_v41, %v723_v63 }
 0x114   : > { %v870_v4 = vmax.f32 %v806_v0, 0.0  ;;  %v886_v5 = vmax.f32 %v822_v1, 0.0 }
 0x115   : > { %v839_v6 = vmax.f32 %v775_v2, 0.0  ;;  %v855_v7 = vmax.f32 %v791_v3, 0.0 }
 0x116   : > { %934 = vst [vmem:[%s1378_s20 + $0x160] sm:$0xff] %v870_v4 }
 0x117   : > { %950 = vst [vmem:[%s1378_s20 + $0x1e0] sm:$0xff] %v886_v5  ;;  %v642_v8 = vpop.f32.mrf.mxu2  ;;  %v682_v9 = vpop.f32.mrf.mxu3 }
 0x118   : > { %903 = vst [vmem:[%s1378_s20 + $0x68] sm:$0xff] %v839_v6  ;;  %v739_v10 = vmul.f32 %v1363_v40, %v642_v8  ;;  %v755_v11 = vmul.f32 %v1363_v40, %v682_v9  ;;  %v565_v12 = vpop.f32.mrf.mxu0  ;;  %v605_v13 = vpop.f32.mrf.mxu1 }
 0x119   : > { %919 = vst [vmem:[%s1378_s20 + $0xe8] sm:$0xff] %v855_v7  ;;  %v708_v14 = vmul.f32 %v1363_v40, %v565_v12  ;;  %v724_v15 = vmul.f32 %v1363_v40, %v605_v13 }
 0x11a   : > { %v807_v16 = vadd.f32 %v1368_v41, %v739_v10  ;;  %v823_v17 = vadd.f32 %v1368_v41, %v755_v11 }
 0x11b   : > { %v776_v18 = vadd.f32 %v1368_v41, %v708_v14  ;;  %v792_v19 = vadd.f32 %v1368_v41, %v724_v15 }
 0x11c   : > { %v871_v20 = vmax.f32 %v807_v16, 0.0  ;;  %v887_v21 = vmax.f32 %v823_v17, 0.0 }
 0x11d   : > { %v840_v22 = vmax.f32 %v776_v18, 0.0  ;;  %v856_v23 = vmax.f32 %v792_v19, 0.0 }
 0x11e   : > { %935 = vst [vmem:[%s1378_s20 + $0x168] sm:$0xff] %v871_v20 }
 0x11f   : > { %951 = vst [vmem:[%s1378_s20 + $0x1e8] sm:$0xff] %v887_v21  ;;  %v645_v24 = vpop.f32.mrf.mxu2  ;;  %v685_v25 = vpop.f32.mrf.mxu3 }
 0x120   : > { %904 = vst [vmem:[%s1378_s20 + $0x70] sm:$0xff] %v840_v22  ;;  %v740_v26 = vmul.f32 %v1363_v40, %v645_v24  ;;  %v756_v27 = vmul.f32 %v1363_v40, %v685_v25  ;;  %v567_v28 = vpop.f32.mrf.mxu0  ;;  %v607_v29 = vpop.f32.mrf.mxu1 }
 0x121   : > { %920 = vst [vmem:[%s1378_s20 + $0xf0] sm:$0xff] %v856_v23  ;;  %v709_v30 = vmul.f32 %v1363_v40, %v567_v28  ;;  %v725_v31 = vmul.f32 %v1363_v40, %v607_v29 }
 0x122   : > { %v808_v32 = vadd.f32 %v1368_v41, %v740_v26  ;;  %v824_v33 = vadd.f32 %v1368_v41, %v756_v27 }
 0x123   : > { %v777_v34 = vadd.f32 %v1368_v41, %v709_v30  ;;  %v793_v35 = vadd.f32 %v1368_v41, %v725_v31 }
 0x124   : > { %v872_v36 = vmax.f32 %v808_v32, 0.0  ;;  %v888_v37 = vmax.f32 %v824_v33, 0.0 }
 0x125   : > { %v841_v38 = vmax.f32 %v777_v34, 0.0  ;;  %v857_v39 = vmax.f32 %v793_v35, 0.0 }
 0x126   : > { %936 = vst [vmem:[%s1378_s20 + $0x170] sm:$0xff] %v872_v36 }
 0x127   : > { %952 = vst [vmem:[%s1378_s20 + $0x1f0] sm:$0xff] %v888_v37  ;;  %v647_v42 = vpop.f32.mrf.mxu2  ;;  %v687_v43 = vpop.f32.mrf.mxu3 }
 0x128   : > { %905 = vst [vmem:[%s1378_s20 + $0x78] sm:$0xff] %v841_v38  ;;  %v741_v44 = vmul.f32 %v1363_v40, %v647_v42  ;;  %v757_v45 = vmul.f32 %v1363_v40, %v687_v43 }
 0x129   : > { %921 = vst [vmem:[%s1378_s20 + $0xf8] sm:$0xff] %v857_v39 }
 0x12a   : > { %v809_v46 = vadd.f32 %v1368_v41, %v741_v44  ;;  %v825_v47 = vadd.f32 %v1368_v41, %v757_v45 }
 0x12c   : > { %v873_v48 = vmax.f32 %v809_v46, 0.0  ;;  %v889_v49 = vmax.f32 %v825_v47, 0.0 }
 0x12e   : > { %937 = vst [vmem:[%s1378_s20 + $0x178] sm:$0xff] %v873_v48 }
 0x12f   : > { %953 = vst [vmem:[%s1378_s20 + $0x1f8] sm:$0xff] %v889_v49 }
 0x130 PF: > { %s14_s15 = sadd.s32 1, %s1261_s15  }
 0x131   : > { %p11_p4 = scmp.ge.s32.totalorder %s14_s15, 10  }
 0x133   :  { %13 = sbr.rel (!%p11_p4) target bundleno = 1 (0x1), region = 66 }

// kernel: graphfeat_forward.9
= control target key start
LH: loop header
LB: loop body
LE: loop exit
PB: predicated region body
PF: predicated region fallthrough
CT: control target
= control target key end

     0   :  { %vm161_vm0 = vcmask 523264   ;;  %s4605_s1 = inlined_call_operand.vmem [shape: bf16[9,64,128], index: 1, kind: input, shape index: {}]   ;;  %s4606_s0 = inlined_call_operand.vmem [shape: f32[1156,64], index: 0, kind: input, shape index: {}]   ;;  %s4607_s2 = inlined_call_operand.vmem [shape: f32[1,128], index: 2, kind: input, shape index: {}]   ;;  %s4608_s3 = inlined_call_operand.vmem [shape: f32[1,128], index: 3, kind: input, shape index: {}]   ;;  %s4609_s4 = inlined_call_operand.vmem [shape: f32[272,128], index: 4, kind: output, shape index: {}]  }
   0x1   :  { %v2833_v0 = vld [vmem:[%s4605_s1 + $0x38] sm:$0xff]  ;;  %v2832_v1 = vld [vmem:[%s4605_s1 + $0x30] sm:$0xff]  ;;  %v2831_v2 = vld [vmem:[%s4605_s1 + $0x28] sm:$0xff] }
   0x2   :  { %2862 = vmatpush.bf16.msra.mxu1 %v2833_v0  ;;  %2863 = vmatpush.bf16.msra.mxu2 %v2833_v0  ;;  %v2830_v3 = vld [vmem:[%s4605_s1 + $0x20] sm:$0xff]  ;;  %v87_v4 = vld [vmem:[%s4606_s0 + $0x171] sm:$0xff]  ;;  %v98_v7 = vld [vmem:[%s4606_s0 + $0x1c9] sm:$0xff] }
   0x3   :  { %217 = vmatpush.bf16.msra.mxu0 %v2833_v0  ;;  %2864 = vmatpush.bf16.msra.mxu3 %v2833_v0  ;;  %v88_v5 = vld [vmem:[%s4606_s0 + $0x179] sm:$0xff]  ;;  %v97_v6 = vld [vmem:[%s4606_s0 + $0x1c1] sm:$0xff]  ;;  %v78_v10 = vld [vmem:[%s4606_s0 + $0x129] sm:$0xff] }
   0x4   :  { %v2837_v8 = vld [vmem:[%s4605_s1 + $0x58] sm:$0xff]  ;;  %v77_v9 = vld [vmem:[%s4606_s0 + $0x121] sm:$0xff]  ;;  %v116_v13 = vpack.c.bf16 %v88_v5, %v87_v4  ;;  %v121_v14 = vpack.c.bf16 %v98_v7, %v97_v6  ;;  %v2836_v16 = vld [vmem:[%s4605_s1 + $0x50] sm:$0xff] }
   0x5   :  { %v2829_v11 = vld [vmem:[%s4605_s1 + $0x18] sm:$0xff]  ;;  %v111_v15 = vpack.c.bf16 %v78_v10, %v77_v9  ;;  %v2828_v17 = vld [vmem:[%s4605_s1 + $0x10] sm:$0xff]  ;;  %v2835_v21 = vld [vmem:[%s4605_s1 + $0x48] sm:$0xff] }
   0x6   :  { %2865 = vmatpush.bf16.msra.mxu1 %v2832_v1  ;;  %2866 = vmatpush.bf16.msra.mxu2 %v2832_v1  ;;  %v2845_v12 = vld [vmem:[%s4605_s1 + $0x98] sm:$0xff]  ;;  %v2844_v18 = vld [vmem:[%s4605_s1 + $0x90] sm:$0xff]  ;;  %v2827_v23 = vld [vmem:[%s4605_s1 + $0x8] sm:$0xff] }
   0x7   :  { %218 = vmatpush.bf16.msra.mxu0 %v2832_v1  ;;  %2867 = vmatpush.bf16.msra.mxu3 %v2832_v1  ;;  %v107_v19 = vld [vmem:[%s4606_s0 + $0x211] sm:$0xff]  ;;  %v108_v20 = vld [vmem:[%s4606_s0 + $0x219] sm:$0xff]  ;;  %v89_v24 = vld [vmem:[%s4606_s0 + $0x181] sm:$0xff] }
   0x8   :  { %v126_v22 = vpack.c.bf16 %v108_v20, %v107_v19  ;;  %v90_v25 = vld [vmem:[%s4606_s0 + $0x189] sm:$0xff]  ;;  %v99_v26 = vld [vmem:[%s4606_s0 + $0x1d1] sm:$0xff]  ;;  %v100_v27 = vld [vmem:[%s4606_s0 + $0x1d9] sm:$0xff] }
   0x9   :  { %v79_v28 = vld [vmem:[%s4606_s0 + $0x131] sm:$0xff]  ;;  %v80_v29 = vld [vmem:[%s4606_s0 + $0x139] sm:$0xff]  ;;  %v117_v30 = vpack.c.bf16 %v90_v25, %v89_v24  ;;  %v122_v31 = vpack.c.bf16 %v100_v27, %v99_v26  ;;  %v2843_v34 = vld [vmem:[%s4605_s1 + $0x88] sm:$0xff] }
   0xa   :  { %2868 = vmatpush.bf16.msra.mxu1 %v2831_v2  ;;  %2869 = vmatpush.bf16.msra.mxu2 %v2831_v2  ;;  %v112_v32 = vpack.c.bf16 %v80_v29, %v79_v28  ;;  %v2841_v33 = vld [vmem:[%s4605_s1 + $0x78] sm:$0xff]  ;;  %v109_v35 = vld [vmem:[%s4606_s0 + $0x221] sm:$0xff]  ;;  %v110_v36 = vld [vmem:[%s4606_s0 + $0x229] sm:$0xff] }
   0xb   :  { %219 = vmatpush.bf16.msra.mxu0 %v2831_v2  ;;  %2870 = vmatpush.bf16.msra.mxu3 %v2831_v2  ;;  %v2834_v37 = vld [vmem:[%s4605_s1 + $0x40] sm:$0xff]  ;;  %v127_v38 = vpack.c.bf16 %v110_v36, %v109_v35  ;;  %v2840_v39 = vld [vmem:[%s4605_s1 + $0x70] sm:$0xff]  ;;  %v2839_v50 = vld [vmem:[%s4605_s1 + $0x68] sm:$0xff] }
   0xc   :  { %v91_v40 = vld [vmem:[%s4606_s0 + $0x191] sm:$0xff]  ;;  %v92_v41 = vld [vmem:[%s4606_s0 + $0x199] sm:$0xff]  ;;  %v101_v42 = vld [vmem:[%s4606_s0 + $0x1e1] sm:$0xff] }
   0xd   :  { %v102_v43 = vld [vmem:[%s4606_s0 + $0x1e9] sm:$0xff]  ;;  %v81_v44 = vld [vmem:[%s4606_s0 + $0x141] sm:$0xff]  ;;  %v118_v46 = vpack.c.bf16 %v92_v41, %v91_v40  ;;  %v103_v58 = vld [vmem:[%s4606_s0 + $0x1f1] sm:$0xff] }
   0xe   :  { %2871 = vmatpush.bf16.msra.mxu1 %v2830_v3  ;;  %2872 = vmatpush.bf16.msra.mxu2 %v2830_v3  ;;  %v82_v45 = vld [vmem:[%s4606_s0 + $0x149] sm:$0xff]  ;;  %v123_v47 = vpack.c.bf16 %v102_v43, %v101_v42  ;;  %v2826_v49 = vld [vmem:[%s4605_s1] sm:$0xff]  ;;  %v83_v60 = vld [vmem:[%s4606_s0 + $0x151] sm:$0xff] }
   0xf   :  { %220 = vmatpush.bf16.msra.mxu0 %v2830_v3  ;;  %2873 = vmatpush.bf16.msra.mxu3 %v2830_v3  ;;  %v113_v48 = vpack.c.bf16 %v82_v45, %v81_v44  ;;  %v2842_v51 = vld [vmem:[%s4605_s1 + $0x80] sm:$0xff]  ;;  %v740_v54 = vld [vmem:[%s4606_s0 + $0x24a] sm:$0xff]  ;;  %v2853_v1 = vld [vmem:[%s4605_s1 + $0xd8] sm:$0xff] }
  0x10   :  { %v2838_v52 = vld [vmem:[%s4605_s1 + $0x60] sm:$0xff]  ;;  %v94_v57 = vld [vmem:[%s4606_s0 + $0x1a9] sm:$0xff]  ;;  %v2857_v2 = vld [vmem:[%s4605_s1 + $0xf8] sm:$0xff] }
  0x11   :  { %2494 = vmatmul.msk.bf16.vlgmr.msra.gmra.mxu1 %vm161_vm0, %v116_v13  ;;  %2499 = vmatmul.msk.bf16.vlgmr.msra.gmra.mxu2 %vm161_vm0, %v121_v14  ;;  %v739_v53 = vld [vmem:[%s4606_s0 + $0x242] sm:$0xff]  ;;  %v104_v59 = vld [vmem:[%s4606_s0 + $0x1f9] sm:$0xff]  ;;  %v1003_v25 = vld [vmem:[%s4606_s0 + $0x36b] sm:$0xff] }
  0x12   :  { %615 = vmatpush.bf16.msrb.mxu2 %v2837_v8  ;;  %386 = vmatpush.bf16.msrb.mxu1 %v2829_v11  ;;  %v773_v55 = vpack.c.bf16 %v740_v54, %v739_v53  ;;  %v93_v56 = vld [vmem:[%s4606_s0 + $0x1a1] sm:$0xff]  ;;  %v84_v61 = vld [vmem:[%s4606_s0 + $0x159] sm:$0xff]  ;;  %v124_v63 = vpack.c.bf16 %v104_v59, %v103_v58  ;;  %v95_v8 = vld [vmem:[%s4606_s0 + $0x1b1] sm:$0xff] }
  0x13   :  { %1141 = vmatpush.bf16.msrb.mxu0 %v2845_v12  ;;  %2504 = vmatmul.msk.bf16.vlgmr.msra.gmra.mxu3 %vm161_vm0, %v126_v22  ;;  %v119_v62 = vpack.c.bf16 %v94_v57, %v93_v56  ;;  %v114_v0 = vpack.c.bf16 %v84_v61, %v83_v60  ;;  %v2849_v3 = vld [vmem:[%s4605_s1 + $0xb8] sm:$0xff]  ;;  %v105_v10 = vld [vmem:[%s4606_s0 + $0x201] sm:$0xff]  ;;  %v106_v11 = vld [vmem:[%s4606_s0 + $0x209] sm:$0xff] }
  0x14   :  { %2489 = vmatmul.msk.bf16.vlgmr.msra.gmra.mxu0 %vm161_vm0, %v111_v15  ;;  %878 = vmatpush.bf16.msrb.mxu3 %v2841_v33  ;;  %v2861_v4 = vld [vmem:[%s4605_s1 + $0x118] sm:$0xff]  ;;  %v85_v12 = vld [vmem:[%s4606_s0 + $0x161] sm:$0xff]  ;;  %v86_v13 = vld [vmem:[%s4606_s0 + $0x169] sm:$0xff]  ;;  %v125_v15 = vpack.c.bf16 %v106_v11, %v105_v10 }
  0x15   :  { %v741_v5 = vld [vmem:[%s4606_s0 + $0x252] sm:$0xff]  ;;  %v742_v6 = vld [vmem:[%s4606_s0 + $0x25a] sm:$0xff]  ;;  %v1002_v24 = vld [vmem:[%s4606_s0 + $0x363] sm:$0xff] }
  0x16   :  { %616 = vmatpush.bf16.msrb.mxu2 %v2836_v16  ;;  %387 = vmatpush.bf16.msrb.mxu1 %v2828_v17  ;;  %v774_v7 = vpack.c.bf16 %v742_v6, %v741_v5  ;;  %v96_v9 = vld [vmem:[%s4606_s0 + $0x1b9] sm:$0xff]  ;;  %v115_v16 = vpack.c.bf16 %v86_v13, %v85_v12  ;;  %v743_v17 = vld [vmem:[%s4606_s0 + $0x262] sm:$0xff]  ;;  %v1036_v28 = vpack.c.bf16 %v1003_v25, %v1002_v24  ;;  %v748_v42 = vld [vmem:[%s4606_s0 + $0x28a] sm:$0xff] }
  0x17   :  { %1142 = vmatpush.bf16.msrb.mxu0 %v2844_v18  ;;  %v120_v14 = vpack.c.bf16 %v96_v9, %v95_v8  ;;  %v744_v18 = vld [vmem:[%s4606_s0 + $0x26a] sm:$0xff]  ;;  %v18_v20 = vld [vmem:[%s4606_s0] sm:$0xff]  ;;  %v745_v29 = vld [vmem:[%s4606_s0 + $0x272] sm:$0xff] }
  0x18   :  { %879 = vmatpush.bf16.msrb.mxu3 %v2840_v39  ;;  %v775_v19 = vpack.c.bf16 %v744_v18, %v743_v17  ;;  %v476_v22 = vld [vmem:[%s4606_s0 + $0x1] sm:$0xff]  ;;  %v21_v33 = vld [vmem:[%s4606_s0 + $0x18] sm:$0xff]  ;;  %v2852_v53 = vld [vmem:[%s4605_s1 + $0xd0] sm:$0xff] }
  0x19   :  { %v479_v35 = vld [vmem:[%s4606_s0 + $0x19] sm:$0xff]  ;;  %v747_v41 = vld [vmem:[%s4606_s0 + $0x282] sm:$0xff]  ;;  %v2856_v54 = vld [vmem:[%s4605_s1 + $0xf0] sm:$0xff] }
  0x1a   :  { %617 = vmatpush.bf16.msrb.mxu2 %v2835_v21  ;;  %388 = vmatpush.bf16.msrb.mxu1 %v2827_v23  ;;  %v19_v21 = vld [vmem:[%s4606_s0 + $0x8] sm:$0xff]  ;;  %v1004_v36 = vld [vmem:[%s4606_s0 + $0x373] sm:$0xff]  ;;  %v777_v43 = vpack.c.bf16 %v748_v42, %v747_v41  ;;  %v22_v44 = vld [vmem:[%s4606_s0 + $0x20] sm:$0xff] }
  0x1b   :  { %1143 = vmatpush.bf16.msrb.mxu0 %v2843_v34  ;;  %v477_v23 = vld [vmem:[%s4606_s0 + $0x9] sm:$0xff]  ;;  %v52_v26 = vpack.c.bf16 %v19_v21, %v18_v20  ;;  %v478_v34 = vld [vmem:[%s4606_s0 + $0x11] sm:$0xff]  ;;  %v750_v57 = vld [vmem:[%s4606_s0 + $0x29a] sm:$0xff] }
  0x1c   :  { %880 = vmatpush.bf16.msrb.mxu3 %v2839_v50  ;;  %v510_v27 = vpack.c.bf16 %v477_v23, %v476_v22  ;;  %v3160_v39 = vpack.c.bf16 %v479_v35, %v478_v34  ;;  %v23_v45 = vld [vmem:[%s4606_s0 + $0x28] sm:$0xff]  ;;  %v749_v56 = vld [vmem:[%s4606_s0 + $0x292] sm:$0xff]  ;;  %v26_v13 = vld [vmem:[%s4606_s0 + $0x40] sm:$0xff] }
  0x1d   :  { %v54_v50 = vpack.c.bf16 %v23_v45, %v22_v44  ;;  %v778_v58 = vpack.c.bf16 %v750_v57, %v749_v56  ;;  %v24_v59 = vld [vmem:[%s4606_s0 + $0x30] sm:$0xff]  ;;  %v25_v60 = vld [vmem:[%s4606_s0 + $0x38] sm:$0xff]  ;;  %v751_v10 = vld [vmem:[%s4606_s0 + $0x2a2] sm:$0xff] }
  0x1e   :  { %618 = vmatpush.bf16.msrb.mxu2 %v2834_v37  ;;  %389 = vmatpush.bf16.msrb.mxu1 %v2826_v49  ;;  %v1005_v37 = vld [vmem:[%s4606_s0 + $0x37b] sm:$0xff]  ;;  %v1007_v49 = vld [vmem:[%s4606_s0 + $0x38b] sm:$0xff]  ;;  %v1010_v17 = vld [vmem:[%s4606_s0 + $0x3a3] sm:$0xff] }
  0x1f   :  { %1144 = vmatpush.bf16.msrb.mxu0 %v2842_v51  ;;  %v1037_v40 = vpack.c.bf16 %v1005_v37, %v1004_v36  ;;  %v482_v61 = vld [vmem:[%s4606_s0 + $0x31] sm:$0xff]  ;;  %v487_v36 = vld [vmem:[%s4606_s0 + $0x59] sm:$0xff]  ;;  %v31_v56 = vld [vmem:[%s4606_s0 + $0x68] sm:$0xff] }
  0x20   :  { %881 = vmatpush.bf16.msrb.mxu3 %v2838_v52  ;;  %v2860_v5 = vld [vmem:[%s4605_s1 + $0x110] sm:$0xff]  ;;  %v29_v34 = vld [vmem:[%s4606_s0 + $0x58] sm:$0xff]  ;;  %v488_v57 = vld [vmem:[%s4606_s0 + $0x61] sm:$0xff] }
  0x21   :  { %2495 = vmatmul.msk.bf16.gmra.mxu1 %vm161_vm0, %v117_v30  ;;  %2500 = vmatmul.msk.bf16.gmra.mxu2 %vm161_vm0, %v122_v31  ;;  %v746_v30 = vld [vmem:[%s4606_s0 + $0x27a] sm:$0xff]  ;;  %v752_v11 = vld [vmem:[%s4606_s0 + $0x2aa] sm:$0xff] }
  0x22   :  { %1667 = vmatpush.bf16.msra.mxu2 %v2853_v1  ;;  %1404 = vmatpush.bf16.msra.mxu1 %v2849_v3  ;;  %v776_v31 = vpack.c.bf16 %v746_v30, %v745_v29  ;;  %v55_v1 = vpack.c.bf16 %v25_v60, %v24_v59  ;;  %v779_v12 = vpack.c.bf16 %v752_v11, %v751_v10  ;;  %v1011_v18 = vld [vmem:[%s4606_s0 + $0x3ab] sm:$0xff]  ;;  %v1012_v37 = vld [vmem:[%s4606_s0 + $0x3b3] sm:$0xff]  ;;  %v1014_v59 = vld [vmem:[%s4606_s0 + $0x3c3] sm:$0xff] }
  0x23   :  { %2505 = vmatmul.msk.bf16.gmra.mxu3 %vm161_vm0, %v127_v38  ;;  %2193 = vmatpush.bf16.msra.mxu0 %v2861_v4  ;;  %v1040_v23 = vpack.c.bf16 %v1011_v18, %v1010_v17  ;;  %v753_v30 = vld [vmem:[%s4606_s0 + $0x2b2] sm:$0xff]  ;;  %v2855_v18 = vld [vmem:[%s4605_s1 + $0xe8] sm:$0xff] }
  0x24   :  { %2490 = vmatmul.msk.bf16.gmra.mxu0 %vm161_vm0, %v112_v32  ;;  %1930 = vmatpush.bf16.msra.mxu3 %v2857_v2  ;;  %v20_v32 = vld [vmem:[%s4606_s0 + $0x10] sm:$0xff] }
  0x25   :  { %v53_v38 = vpack.c.bf16 %v21_v33, %v20_v32  ;;  %v28_v33 = vld [vmem:[%s4606_s0 + $0x50] sm:$0xff] }
  0x26   :  { %1668 = vmatpush.bf16.msra.mxu2 %v2852_v53  ;;  %v486_v35 = vld [vmem:[%s4606_s0 + $0x51] sm:$0xff]  ;;  %v57_v41 = vpack.c.bf16 %v29_v34, %v28_v33  ;;  %v1017_v33 = vld [vmem:[%s4606_s0 + $0x3db] sm:$0xff] }
  0x27   :  { %2194 = vmatpush.bf16.msra.mxu0 %v2860_v5  ;;  %v3324_v42 = vpack.c.bf16 %v487_v36, %v486_v35  ;;  %v756_v53 = vld [vmem:[%s4606_s0 + $0x2ca] sm:$0xff] }
  0x28   :  { %1931 = vmatpush.bf16.msra.mxu3 %v2856_v54  ;;  %v1015_v60 = vld [vmem:[%s4606_s0 + $0x3cb] sm:$0xff] }
  0x2c   :  { %1932 = vmatpush.bf16.msra.mxu3 %v2855_v18 }
  0x31   :  { %2496 = vmatmul.msk.bf16.gmra.mxu1 %vm161_vm0, %v118_v46  ;;  %2501 = vmatmul.msk.bf16.gmra.mxu2 %vm161_vm0, %v123_v47  ;;  %v480_v46 = vld [vmem:[%s4606_s0 + $0x21] sm:$0xff]  ;;  %v481_v47 = vld [vmem:[%s4606_s0 + $0x29] sm:$0xff] }
  0x32   :  { %v3191_v51 = vpack.c.bf16 %v481_v47, %v480_v46 }
  0x33   :  { %2604 = vmatmul.msk.bf16.vlgmr.msrb.gmra.mxu3 %vm161_vm0, %v773_v55  ;;  %v2848_v55 = vld [vmem:[%s4605_s1 + $0xb0] sm:$0xff] }
  0x34   :  { %2491 = vmatmul.msk.bf16.gmra.mxu0 %vm161_vm0, %v113_v48  ;;  %v1006_v48 = vld [vmem:[%s4606_s0 + $0x383] sm:$0xff]  ;;  %1405 = vmatpush.bf16.msra.mxu1 %v2848_v55 }
  0x35   :  { %v1038_v52 = vpack.c.bf16 %v1007_v49, %v1006_v48  ;;  %v30_v55 = vld [vmem:[%s4606_s0 + $0x60] sm:$0xff] }
  0x41   :  { %2497 = vmatmul.msk.bf16.gmra.mxu1 %vm161_vm0, %v119_v62  ;;  %2502 = vmatmul.msk.bf16.gmra.mxu2 %vm161_vm0, %v124_v63  ;;  %v483_v62 = vld [vmem:[%s4606_s0 + $0x39] sm:$0xff] }
  0x42   :  { %v1008_v63 = vld [vmem:[%s4606_s0 + $0x393] sm:$0xff]  ;;  %v3231_v2 = vpack.c.bf16 %v483_v62, %v482_v61  ;;  %v58_v62 = vpack.c.bf16 %v31_v56, %v30_v55 }
  0x43   :  { %2605 = vmatmul.msk.bf16.gmra.mxu3 %vm161_vm0, %v774_v7 }
  0x44   :  { %2492 = vmatmul.msk.bf16.gmra.mxu0 %vm161_vm0, %v114_v0  ;;  %v1009_v0 = vld [vmem:[%s4606_s0 + $0x39b] sm:$0xff] }
  0x45   :  { %v1039_v4 = vpack.c.bf16 %v1009_v0, %v1008_v63 }
  0x51   :  { %2498 = vmatmul.msk.bf16.gmra.mxu1 %vm161_vm0, %v120_v14  ;;  %2503 = vmatmul.msk.bf16.gmra.mxu2 %vm161_vm0, %v125_v15  ;;  %v27_v14 = vld [vmem:[%s4606_s0 + $0x48] sm:$0xff] }
  0x52   :  { %v484_v15 = vld [vmem:[%s4606_s0 + $0x41] sm:$0xff]  ;;  %v56_v20 = vpack.c.bf16 %v27_v14, %v26_v13 }
  0x53   :  { %2606 = vmatmul.msk.bf16.gmra.mxu3 %vm161_vm0, %v775_v19  ;;  %v2851_v14 = vld [vmem:[%s4605_s1 + $0xc8] sm:$0xff] }
  0x54   :  { %2493 = vmatmul.msk.bf16.gmra.mxu0 %vm161_vm0, %v115_v16  ;;  %v485_v16 = vld [vmem:[%s4606_s0 + $0x49] sm:$0xff]  ;;  %1669 = vmatpush.bf16.msra.mxu2 %v2851_v14  ;;  %v492_v14 = vld [vmem:[%s4606_s0 + $0x81] sm:$0xff] }
  0x55   :  { %v3277_v21 = vpack.c.bf16 %v485_v16, %v484_v15  ;;  %v757_v15 = vld [vmem:[%s4606_s0 + $0x2d2] sm:$0xff]  ;;  %v758_v16 = vld [vmem:[%s4606_s0 + $0x2da] sm:$0xff] }
  0x56   :  { %v782_v17 = vpack.c.bf16 %v758_v16, %v757_v15  ;;  %v493_v15 = vld [vmem:[%s4606_s0 + $0x89] sm:$0xff] }
  0x57   :  { %v1018_v16 = vld [vmem:[%s4606_s0 + $0x3e3] sm:$0xff] }
  0x61   :  { %2522 = vmatmul.msk.bf16.vlgmr.msrb.gmra.mxu1 %vm161_vm0, %v52_v26  ;;  %2563 = vmatmul.msk.bf16.vlgmr.msrb.gmra.mxu2 %vm161_vm0, %v510_v27 }
  0x63   :  { %2607 = vmatmul.msk.bf16.gmra.mxu3 %vm161_vm0, %v776_v31  ;;  %v754_v31 = vld [vmem:[%s4606_s0 + $0x2ba] sm:$0xff] }
  0x64   :  { %2645 = vmatmul.msk.bf16.vlgmr.msrb.gmra.mxu0 %vm161_vm0, %v1036_v28  ;;  %v780_v32 = vpack.c.bf16 %v754_v31, %v753_v30  ;;  %v490_v30 = vld [vmem:[%s4606_s0 + $0x71] sm:$0xff]  ;;  %v491_v31 = vld [vmem:[%s4606_s0 + $0x79] sm:$0xff] }
  0x65   :  { %v3424_v36 = vpack.c.bf16 %v491_v31, %v490_v30 }
  0x71   :  { %2523 = vmatmul.msk.bf16.gmra.mxu1 %vm161_vm0, %v53_v38  ;;  %2564 = vmatmul.msk.bf16.gmra.mxu2 %vm161_vm0, %v3160_v39  ;;  %v1013_v38 = vld [vmem:[%s4606_s0 + $0x3bb] sm:$0xff] }
  0x72   :  { %v1041_v44 = vpack.c.bf16 %v1013_v38, %v1012_v37 }
  0x73   :  { %2608 = vmatmul.msk.bf16.gmra.mxu3 %vm161_vm0, %v777_v43 }
  0x74   :  { %2646 = vmatmul.msk.bf16.gmra.mxu0 %vm161_vm0, %v1037_v40 }
  0x81   :  { %2524 = vmatmul.msk.bf16.gmra.mxu1 %vm161_vm0, %v54_v50  ;;  %2565 = vmatmul.msk.bf16.gmra.mxu2 %vm161_vm0, %v3191_v51 }
  0x83   :  { %2609 = vmatmul.msk.bf16.gmra.mxu3 %vm161_vm0, %v778_v58  ;;  %v489_v58 = vld [vmem:[%s4606_s0 + $0x69] sm:$0xff] }
  0x84   :  { %2647 = vmatmul.msk.bf16.gmra.mxu0 %vm161_vm0, %v1038_v52  ;;  %v755_v52 = vld [vmem:[%s4606_s0 + $0x2c2] sm:$0xff]  ;;  %v3371_v63 = vpack.c.bf16 %v489_v58, %v488_v57 }
  0x85   :  { %v781_v54 = vpack.c.bf16 %v756_v53, %v755_v52  ;;  %v2847_v52 = vld [vmem:[%s4605_s1 + $0xa8] sm:$0xff] }
  0x86   :  { %1406 = vmatpush.bf16.msra.mxu1 %v2847_v52  ;;  %v2859_v53 = vld [vmem:[%s4605_s1 + $0x108] sm:$0xff] }
  0x87   :  { %2195 = vmatpush.bf16.msra.mxu0 %v2859_v53  ;;  %v759_v58 = vld [vmem:[%s4606_s0 + $0x2e2] sm:$0xff] }
  0x8e   :  { %v3233_v3 = vpop.f32.mrf.mxu1 }
  0x91   :  { %v3238_v6 = vpop.f32.mrf.mxu0  ;;  %2525 = vmatmul.msk.bf16.gmra.mxu1 %vm161_vm0, %v55_v1  ;;  %2566 = vmatmul.msk.bf16.gmra.mxu2 %vm161_vm0, %v3231_v2  ;;  %v1042_v1 = vpack.c.bf16 %v1015_v60, %v1014_v59  ;;  %v760_v59 = vld [vmem:[%s4606_s0 + $0x2ea] sm:$0xff] }
  0x92   :  { %v783_v60 = vpack.c.bf16 %v760_v59, %v759_v58 }
  0x93   :  { %2610 = vmatmul.msk.bf16.gmra.mxu3 %vm161_vm0, %v779_v12 }
  0x94   :  { %2648 = vmatmul.msk.bf16.gmra.mxu0 %vm161_vm0, %v1039_v4  ;;  %v3244_v7 = vpop.f32.mrf.mxu2 }
  0x96   :  { %v3246_v8 = vpop.f32.mrf.mxu1  ;;  %v3281_v24 = vpop.f32.mrf.mxu3 }
  0x99   :  { %v3248_v9 = vpop.f32.mrf.mxu0 }
  0x9c   :  { %v3275_v19 = vpop.f32.mrf.mxu2 }
  0x9e   :  { %v3279_v22 = vpop.f32.mrf.mxu1  ;;  %v3293_v28 = vpop.f32.mrf.mxu3 }
  0xa1   :  { %v3283_v25 = vpop.f32.mrf.mxu0  ;;  %2526 = vmatmul.msk.bf16.gmra.mxu1 %vm161_vm0, %v56_v20  ;;  %2567 = vmatmul.msk.bf16.gmra.mxu2 %vm161_vm0, %v3277_v21  ;;  %v32_v20 = vld [vmem:[%s4606_s0 + $0x70] sm:$0xff] }
  0xa3   :  { %2611 = vmatmul.msk.bf16.gmra.mxu3 %vm161_vm0, %v780_v32  ;;  %v1016_v32 = vld [vmem:[%s4606_s0 + $0x3d3] sm:$0xff] }
  0xa4   :  { %2649 = vmatmul.msk.bf16.gmra.mxu0 %vm161_vm0, %v1040_v23  ;;  %v3289_v26 = vpop.f32.mrf.mxu2  ;;  %v33_v23 = vld [vmem:[%s4606_s0 + $0x78] sm:$0xff]  ;;  %v1043_v38 = vpack.c.bf16 %v1017_v33, %v1016_v32 }
  0xa5   :  { %v59_v35 = vpack.c.bf16 %v33_v23, %v32_v20  ;;  %v3477_v23 = vpack.c.bf16 %v493_v15, %v492_v14 }
  0xa6   :  { %v3291_v27 = vpop.f32.mrf.mxu1  ;;  %v3328_v45 = vpop.f32.mrf.mxu3 }
  0xa9   :  { %v3295_v29 = vpop.f32.mrf.mxu0 }
  0xac   :  { %v3322_v40 = vpop.f32.mrf.mxu2 }
  0xae   :  { %v3326_v43 = vpop.f32.mrf.mxu1  ;;  %v3340_v49 = vpop.f32.mrf.mxu3 }
  0xb1   :  { %v3330_v46 = vpop.f32.mrf.mxu0  ;;  %2527 = vmatmul.msk.bf16.gmra.mxu1 %vm161_vm0, %v57_v41  ;;  %2568 = vmatmul.msk.bf16.gmra.mxu2 %vm161_vm0, %v3324_v42 }
  0xb3   :  { %2612 = vmatmul.msk.bf16.gmra.mxu3 %vm161_vm0, %v781_v54 }
  0xb4   :  { %2650 = vmatmul.msk.bf16.gmra.mxu0 %vm161_vm0, %v1041_v44  ;;  %v3336_v47 = vpop.f32.mrf.mxu2 }
  0xb6   :  { %v3338_v48 = vpop.f32.mrf.mxu1  ;;  %v3375_v4 = vpop.f32.mrf.mxu3 }
  0xb9   :  { %v3342_v50 = vpop.f32.mrf.mxu0 }
  0xbc   :  { %v3369_v61 = vpop.f32.mrf.mxu2 }
  0xbe   :  { %v3373_v0 = vpop.f32.mrf.mxu1  ;;  %v3387_v12 = vpop.f32.mrf.mxu3 }
  0xc1   :  { %v3377_v5 = vpop.f32.mrf.mxu0  ;;  %2528 = vmatmul.msk.bf16.gmra.mxu1 %vm161_vm0, %v58_v62  ;;  %2569 = vmatmul.msk.bf16.gmra.mxu2 %vm161_vm0, %v3371_v63  ;;  %v34_v62 = vld [vmem:[%s4606_s0 + $0x80] sm:$0xff] }
  0xc3   :  { %2613 = vmatmul.msk.bf16.gmra.mxu3 %vm161_vm0, %v782_v17  ;;  %v1019_v17 = vld [vmem:[%s4606_s0 + $0x3eb] sm:$0xff] }
  0xc4   :  { %2651 = vmatmul.msk.bf16.gmra.mxu0 %vm161_vm0, %v1042_v1  ;;  %v3383_v10 = vpop.f32.mrf.mxu2  ;;  %v35_v1 = vld [vmem:[%s4606_s0 + $0x88] sm:$0xff]  ;;  %v1044_v31 = vpack.c.bf16 %v1019_v17, %v1018_v16  ;;  %v494_v16 = vld [vmem:[%s4606_s0 + $0x91] sm:$0xff]  ;;  %v495_v17 = vld [vmem:[%s4606_s0 + $0x99] sm:$0xff] }
  0xc5   :  { %v60_v20 = vpack.c.bf16 %v35_v1, %v34_v62  ;;  %v761_v62 = vld [vmem:[%s4606_s0 + $0x2f2] sm:$0xff]  ;;  %v762_v1 = vld [vmem:[%s4606_s0 + $0x2fa] sm:$0xff] }
  0xc6   :  { %v3385_v11 = vpop.f32.mrf.mxu1  ;;  %v3428_v41 = vpop.f32.mrf.mxu3  ;;  %v784_v14 = vpack.c.bf16 %v762_v1, %v761_v62 }
  0xc9   :  { %v3389_v13 = vpop.f32.mrf.mxu0 }
  0xcc   :  { %v3422_v34 = vpop.f32.mrf.mxu2 }
  0xce   :  { %v3426_v37 = vpop.f32.mrf.mxu1  ;;  %v3446_v56 = vpop.f32.mrf.mxu3 }
  0xd1   :  { %v3430_v44 = vpop.f32.mrf.mxu0  ;;  %2529 = vmatmul.msk.bf16.gmra.mxu1 %vm161_vm0, %v59_v35  ;;  %2570 = vmatmul.msk.bf16.gmra.mxu2 %vm161_vm0, %v3424_v36 }
  0xd3   :  { %2614 = vmatmul.msk.bf16.gmra.mxu3 %vm161_vm0, %v783_v60 }
  0xd4   :  { %2652 = vmatmul.msk.bf16.gmra.mxu0 %vm161_vm0, %v1043_v38  ;;  %v3442_v54 = vpop.f32.mrf.mxu2 }
  0xd6   :  { %v3444_v55 = vpop.f32.mrf.mxu1  ;;  %v3479_v32 = vpop.f32.mrf.mxu3 }
  0xd9   :  { %v3448_v57 = vpop.f32.mrf.mxu0 }
  0xdc   :  { %v3475_v18 = vpop.f32.mrf.mxu2 }
  0xde   :  { %v391_v30 = vpop.f32.mrf.mxu1  ;;  %v3486_v58 = vpop.f32.mrf.mxu3 }
  0xdf   :  { %v392_v35 = vadd.f32 %v391_v30, %v3238_v6  ;;  %v36_v6 = vld [vmem:[%s4606_s0 + $0x90] sm:$0xff] }
  0xe0   :  { %v1020_v30 = vld [vmem:[%s4606_s0 + $0x3f3] sm:$0xff] }
  0xe1   :  { %v1146_v33 = vpop.f32.mrf.mxu0  ;;  %2530 = vmatmul.msk.bf16.gmra.mxu1 %vm161_vm0, %v60_v20  ;;  %2571 = vmatmul.msk.bf16.gmra.mxu2 %vm161_vm0, %v3477_v23 }
  0xe3   :  { %2615 = vmatmul.msk.bf16.gmra.mxu3 %vm161_vm0, %v784_v14 }
  0xe4   :  { %2653 = vmatmul.msk.bf16.gmra.mxu0 %vm161_vm0, %v1044_v31  ;;  %v620_v38 = vpop.f32.mrf.mxu2  ;;  %v1021_v31 = vld [vmem:[%s4606_s0 + $0x3fb] sm:$0xff] }
  0xe5   :  { %v705_v52 = vadd.f32 %v620_v38, %v392_v35  ;;  %v1045_v62 = vpack.c.bf16 %v1021_v31, %v1020_v30  ;;  %v763_v30 = vld [vmem:[%s4606_s0 + $0x302] sm:$0xff] }
  0xe6   :  { %v393_v53 = vpop.f32.mrf.mxu1  ;;  %v3519_v1 = vpop.f32.mrf.mxu3 }
  0xe7   :  { %v968_v59 = vadd.f32 %v3375_v4, %v705_v52  ;;  %v37_v4 = vld [vmem:[%s4606_s0 + $0x98] sm:$0xff]  ;;  %v394_v20 = vadd.f32 %v393_v53, %v3248_v9  ;;  %v3517_v52 = vpack.c.bf16 %v495_v17, %v494_v16 }
  0xe8   :  { %v61_v38 = vpack.c.bf16 %v37_v4, %v36_v6 }
  0xe9   :  { %v1148_v60 = vpop.f32.mrf.mxu0  ;;  %v3498_v15 = vadd.f32 %v1146_v33, %v968_v59 }
  0xeb   :  { %4610 = vst [vmem:[#allocation2_spill] sm:$0xff] %v3498_v15 }
  0xec   :  { %v622_v33 = vpop.f32.mrf.mxu2 }
  0xed   :  { %v706_v35 = vadd.f32 %v622_v33, %v394_v20 }
  0xee   :  { %v396_v59 = vpop.f32.mrf.mxu1  ;;  %v3529_v17 = vpop.f32.mrf.mxu3 }
  0xef   :  { %v969_v9 = vadd.f32 %v3387_v12, %v706_v35  ;;  %v397_v14 = vadd.f32 %v396_v59, %v3283_v25  ;;  %v38_v25 = vld [vmem:[%s4606_s0 + $0xa0] sm:$0xff] }
  0xf0   :  { %v496_v35 = vld [vmem:[%s4606_s0 + $0xa1] sm:$0xff] }
  0xf1   :  { %v1151_v53 = vpop.f32.mrf.mxu0  ;;  %2531 = vmatmul.msk.bf16.gmra.mxu1 %vm161_vm0, %v61_v38  ;;  %2572 = vmatmul.msk.bf16.gmra.mxu2 %vm161_vm0, %v3517_v52  ;;  %v3525_v15 = vadd.f32 %v1148_v60, %v969_v9  ;;  %v764_v60 = vld [vmem:[%s4606_s0 + $0x30a] sm:$0xff] }
  0xf2   :  { %v785_v31 = vpack.c.bf16 %v764_v60, %v763_v30  ;;  %v497_v38 = vld [vmem:[%s4606_s0 + $0xa9] sm:$0xff] }
  0xf3   :  { %v1023_v9 = vld [vmem:[%s4606_s0 + $0x40b] sm:$0xff] }
  0xf4   :  { %2654 = vmatmul.msk.bf16.gmra.mxu0 %vm161_vm0, %v1045_v62  ;;  %v625_v6 = vpop.f32.mrf.mxu2  ;;  %v1022_v62 = vld [vmem:[%s4606_s0 + $0x403] sm:$0xff]  ;;  %2616 = vmatmul.msk.bf16.gmra.mxu3 %vm161_vm0, %v785_v31 }
  0xf5   :  { %v707_v4 = vadd.f32 %v625_v6, %v397_v14  ;;  %v1046_v30 = vpack.c.bf16 %v1023_v9, %v1022_v62 }
  0xf6   :  { %v398_v16 = vpop.f32.mrf.mxu1  ;;  %v3560_v60 = vpop.f32.mrf.mxu3 }
  0xf7   :  { %v970_v20 = vadd.f32 %v3428_v41, %v707_v4  ;;  %v39_v41 = vld [vmem:[%s4606_s0 + $0xa8] sm:$0xff]  ;;  %v399_v59 = vadd.f32 %v398_v16, %v3295_v29  ;;  %v520_v4 = vpack.c.bf16 %v497_v38, %v496_v35 }
  0xf8   :  { %v62_v6 = vpack.c.bf16 %v39_v41, %v38_v25 }
  0xf9   :  { %v1153_v12 = vpop.f32.mrf.mxu0  ;;  %v3541_v33 = vadd.f32 %v1151_v53, %v970_v20 }
  0xfb   :  { %4611 = vst [vmem:[#allocation3_spill] sm:$0xff] %v3541_v33 }
  0xfc   :  { %v627_v53 = vpop.f32.mrf.mxu2 }
  0xfd   :  { %v708_v14 = vadd.f32 %v627_v53, %v399_v59 }
  0xfe   :  { %v401_v20 = vpop.f32.mrf.mxu1  ;;  %v3569_v35 = vpop.f32.mrf.mxu3 }
  0xff   :  { %v971_v29 = vadd.f32 %v3446_v56, %v708_v14  ;;  %v402_v31 = vadd.f32 %v401_v20, %v3330_v46  ;;  %v765_v56 = vld [vmem:[%s4606_s0 + $0x312] sm:$0xff] }
 0x100   :  { %v40_v46 = vld [vmem:[%s4606_s0 + $0xb0] sm:$0xff] }
 0x101   :  { %v1156_v16 = vpop.f32.mrf.mxu0  ;;  %2532 = vmatmul.msk.bf16.gmra.mxu1 %vm161_vm0, %v62_v6  ;;  %2573 = vmatmul.msk.bf16.gmra.mxu2 %vm161_vm0, %v520_v4  ;;  %v3565_v33 = vadd.f32 %v1153_v12, %v971_v29  ;;  %v766_v12 = vld [vmem:[%s4606_s0 + $0x31a] sm:$0xff]  ;;  %v498_v14 = vld [vmem:[%s4606_s0 + $0xb1] sm:$0xff] }
 0x102   :  { %v786_v9 = vpack.c.bf16 %v766_v12, %v765_v56  ;;  %v499_v6 = vld [vmem:[%s4606_s0 + $0xb9] sm:$0xff] }
 0x103   :  { %v1024_v20 = vld [vmem:[%s4606_s0 + $0x413] sm:$0xff]  ;;  %v2850_v12 = vld [vmem:[%s4605_s1 + $0xc0] sm:$0xff] }
 0x104   :  { %2655 = vmatmul.msk.bf16.gmra.mxu0 %vm161_vm0, %v1046_v30  ;;  %v630_v59 = vpop.f32.mrf.mxu2  ;;  %v1025_v30 = vld [vmem:[%s4606_s0 + $0x41b] sm:$0xff]  ;;  %2617 = vmatmul.msk.bf16.gmra.mxu3 %vm161_vm0, %v786_v9 }
 0x105   :  { %v709_v25 = vadd.f32 %v630_v59, %v402_v31  ;;  %v521_v59 = vpack.c.bf16 %v499_v6, %v498_v14  ;;  %v2846_v9 = vld [vmem:[%s4605_s1 + $0xa0] sm:$0xff]  ;;  %1670 = vmatpush.bf16.msra.mxu2 %v2850_v12 }
 0x106   :  { %v403_v41 = vpop.f32.mrf.mxu1  ;;  %v3600_v56 = vpop.f32.mrf.mxu3  ;;  %1407 = vmatpush.bf16.msra.mxu1 %v2846_v9 }
 0x107   :  { %v972_v38 = vadd.f32 %v3479_v32, %v709_v25  ;;  %v41_v32 = vld [vmem:[%s4606_s0 + $0xb8] sm:$0xff]  ;;  %v404_v4 = vadd.f32 %v403_v41, %v3342_v50 }
 0x108   :  { %v63_v31 = vpack.c.bf16 %v41_v32, %v40_v46 }
 0x109   :  { %v1158_v62 = vpop.f32.mrf.mxu0  ;;  %v3581_v53 = vadd.f32 %v1156_v16, %v972_v38  ;;  %v1047_v38 = vpack.c.bf16 %v1025_v30, %v1024_v20 }
 0x10b   :  { %4612 = vst [vmem:[#allocation4_spill] sm:$0xff] %v3581_v53  ;;  %v2854_v53 = vld [vmem:[%s4605_s1 + $0xe0] sm:$0xff] }
 0x10c   :  { %v632_v29 = vpop.f32.mrf.mxu2  ;;  %1933 = vmatpush.bf16.msra.mxu3 %v2854_v53 }
 0x10d   :  { %v710_v16 = vadd.f32 %v632_v29, %v404_v4  ;;  %v767_v29 = vld [vmem:[%s4606_s0 + $0x322] sm:$0xff] }
 0x10e   :  { %v406_v25 = vpop.f32.mrf.mxu1  ;;  %v3618_v4 = vpop.f32.mrf.mxu3 }
 0x10f   :  { %v973_v50 = vadd.f32 %v3486_v58, %v710_v16  ;;  %v407_v58 = vadd.f32 %v406_v25, %v3377_v5  ;;  %v768_v5 = vld [vmem:[%s4606_s0 + $0x32a] sm:$0xff]  ;;  %v42_v16 = vld [vmem:[%s4606_s0 + $0xc0] sm:$0xff] }
 0x110   :  { %v787_v53 = vpack.c.bf16 %v768_v5, %v767_v29  ;;  %v501_v25 = vld [vmem:[%s4606_s0 + $0xc9] sm:$0xff] }
 0x111   :  { %v1161_v41 = vpop.f32.mrf.mxu0  ;;  %2533 = vmatmul.msk.bf16.gmra.mxu1 %vm161_vm0, %v63_v31  ;;  %2574 = vmatmul.msk.bf16.gmra.mxu2 %vm161_vm0, %v521_v59  ;;  %v3614_v46 = vadd.f32 %v1158_v62, %v973_v50  ;;  %v2858_v62 = vld [vmem:[%s4605_s1 + $0x100] sm:$0xff]  ;;  %v43_v31 = vld [vmem:[%s4606_s0 + $0xc8] sm:$0xff] }
 0x112   :  { %2196 = vmatpush.bf16.msra.mxu0 %v2858_v62  ;;  %v500_v59 = vld [vmem:[%s4606_s0 + $0xc1] sm:$0xff] }
 0x113   :  { %v1026_v50 = vld [vmem:[%s4606_s0 + $0x423] sm:$0xff] }
 0x114   :  { %2656 = vmatmul.msk.bf16.gmra.mxu0 %vm161_vm0, %v1047_v38  ;;  %v635_v32 = vpop.f32.mrf.mxu2  ;;  %2618 = vmatmul.msk.bf16.gmra.mxu3 %vm161_vm0, %v787_v53 }
 0x115   :  { %v711_v14 = vadd.f32 %v635_v32, %v407_v58  ;;  %v64_v58 = vpack.c.bf16 %v43_v31, %v42_v16  ;;  %v522_v32 = vpack.c.bf16 %v501_v25, %v500_v59 }
 0x116   :  { %v408_v6 = vpop.f32.mrf.mxu1  ;;  %v3652_v62 = vpop.f32.mrf.mxu3 }
 0x117   :  { %v974_v20 = vadd.f32 %v3519_v1, %v711_v14  ;;  %v409_v38 = vadd.f32 %v408_v6, %v3389_v13 }
 0x119   :  { %v1163_v30 = vpop.f32.mrf.mxu0  ;;  %v3633_v1 = vadd.f32 %v1161_v41, %v974_v20  ;;  %v1027_v41 = vld [vmem:[%s4606_s0 + $0x42b] sm:$0xff] }
 0x11a   :  { %v1048_v20 = vpack.c.bf16 %v1027_v41, %v1026_v50 }
 0x11c   :  { %v637_v12 = vpop.f32.mrf.mxu2 }
 0x11d   :  { %v712_v9 = vadd.f32 %v637_v12, %v409_v38  ;;  %v502_v12 = vld [vmem:[%s4606_s0 + $0xd1] sm:$0xff] }
 0x11e   :  { %v411_v14 = vpop.f32.mrf.mxu1  ;;  %v3661_v59 = vpop.f32.mrf.mxu3 }
 0x11f   :  { %v975_v13 = vadd.f32 %v3529_v17, %v712_v9  ;;  %v412_v5 = vadd.f32 %v411_v14, %v3430_v44  ;;  %v769_v17 = vld [vmem:[%s4606_s0 + $0x332] sm:$0xff]  ;;  %v1029_v14 = vld [vmem:[%s4606_s0 + $0x43b] sm:$0xff] }
 0x120   :  { %v44_v44 = vld [vmem:[%s4606_s0 + $0xd0] sm:$0xff]  ;;  %v503_v9 = vld [vmem:[%s4606_s0 + $0xd9] sm:$0xff] }
 0x121   :  { %v1166_v6 = vpop.f32.mrf.mxu0  ;;  %2534 = vmatmul.msk.bf16.gmra.mxu1 %vm161_vm0, %v64_v58  ;;  %2575 = vmatmul.msk.bf16.gmra.mxu2 %vm161_vm0, %v522_v32  ;;  %v3657_v29 = vadd.f32 %v1163_v30, %v975_v13  ;;  %v770_v30 = vld [vmem:[%s4606_s0 + $0x33a] sm:$0xff] }
 0x122   :  { %v788_v50 = vpack.c.bf16 %v770_v30, %v769_v17  ;;  %v1028_v32 = vld [vmem:[%s4606_s0 + $0x433] sm:$0xff] }
 0x124   :  { %2657 = vmatmul.msk.bf16.gmra.mxu0 %vm161_vm0, %v1048_v20  ;;  %v640_v53 = vpop.f32.mrf.mxu2  ;;  %2619 = vmatmul.msk.bf16.gmra.mxu3 %vm161_vm0, %v788_v50 }
 0x125   :  { %v713_v16 = vadd.f32 %v640_v53, %v412_v5  ;;  %v523_v5 = vpack.c.bf16 %v503_v9, %v502_v12 }
 0x126   :  { %v413_v31 = vpop.f32.mrf.mxu1 }
 0x127   :  { %v976_v25 = vadd.f32 %v3560_v60, %v713_v16  ;;  %v45_v60 = vld [vmem:[%s4606_s0 + $0xd8] sm:$0xff]  ;;  %v414_v58 = vadd.f32 %v413_v31, %v3448_v57  ;;  %v1049_v16 = vpack.c.bf16 %v1029_v14, %v1028_v32 }
 0x129   :  { %v1168_v38 = vpop.f32.mrf.mxu0  ;;  %v3673_v41 = vadd.f32 %v1166_v6, %v976_v25  ;;  %v65_v6 = vpack.c.bf16 %v45_v60, %v44_v44  ;;  %v3692_v25 = vpop.f32.mrf.mxu3 }
 0x12c   :  { %v642_v20 = vpop.f32.mrf.mxu2 }
 0x12d   :  { %v714_v13 = vadd.f32 %v642_v20, %v414_v58  ;;  %v504_v20 = vld [vmem:[%s4606_s0 + $0xe1] sm:$0xff] }
 0x12e   :  { %v416_v53 = vpop.f32.mrf.mxu1 }
 0x12f   :  { %v977_v57 = vadd.f32 %v3569_v35, %v714_v13  ;;  %v417_v30 = vadd.f32 %v416_v53, %v3233_v3  ;;  %v771_v35 = vld [vmem:[%s4606_s0 + $0x342] sm:$0xff]  ;;  %v1031_v53 = vld [vmem:[%s4606_s0 + $0x44b] sm:$0xff] }
 0x130   :  { %v46_v3 = vld [vmem:[%s4606_s0 + $0xe0] sm:$0xff]  ;;  %v505_v13 = vld [vmem:[%s4606_s0 + $0xe9] sm:$0xff] }
 0x131   :  { %v1171_v31 = vpop.f32.mrf.mxu0  ;;  %2535 = vmatmul.msk.bf16.gmra.mxu1 %vm161_vm0, %v65_v6  ;;  %2576 = vmatmul.msk.bf16.gmra.mxu2 %vm161_vm0, %v523_v5  ;;  %v3697_v17 = vadd.f32 %v1168_v38, %v977_v57  ;;  %v3701_v12 = vpop.f32.mrf.mxu3  ;;  %v772_v38 = vld [vmem:[%s4606_s0 + $0x34a] sm:$0xff] }
 0x132   :  { %v789_v32 = vpack.c.bf16 %v772_v38, %v771_v35  ;;  %v1030_v5 = vld [vmem:[%s4606_s0 + $0x443] sm:$0xff] }
 0x134   :  { %2658 = vmatmul.msk.bf16.gmra.mxu0 %vm161_vm0, %v1049_v16  ;;  %v645_v50 = vpop.f32.mrf.mxu2  ;;  %2620 = vmatmul.msk.bf16.gmra.mxu3 %vm161_vm0, %v789_v32 }
 0x135   :  { %v715_v44 = vadd.f32 %v645_v50, %v417_v30  ;;  %v524_v30 = vpack.c.bf16 %v505_v13, %v504_v20 }
 0x136   :  { %v418_v60 = vpop.f32.mrf.mxu1 }
 0x137   :  { %v978_v9 = vadd.f32 %v3600_v56, %v715_v44  ;;  %v47_v56 = vld [vmem:[%s4606_s0 + $0xe8] sm:$0xff]  ;;  %v419_v6 = vadd.f32 %v418_v60, %v3246_v8  ;;  %v1050_v44 = vpack.c.bf16 %v1031_v53, %v1030_v5 }
 0x139   :  { %v1173_v58 = vpop.f32.mrf.mxu0  ;;  %v3713_v14 = vadd.f32 %v1171_v31, %v978_v9  ;;  %v66_v31 = vpack.c.bf16 %v47_v56, %v46_v3  ;;  %v3732_v9 = vpop.f32.mrf.mxu3 }
 0x13c   :  { %v647_v16 = vpop.f32.mrf.mxu2 }
 0x13d   :  { %v716_v57 = vadd.f32 %v647_v16, %v419_v6  ;;  %v506_v16 = vld [vmem:[%s4606_s0 + $0xf1] sm:$0xff] }
 0x13e   :  { %v421_v50 = vpop.f32.mrf.mxu1 }
 0x13f   :  { %v979_v8 = vadd.f32 %v3618_v4, %v716_v57  ;;  %v422_v38 = vadd.f32 %v421_v50, %v3279_v22  ;;  %v1791_v4 = vld [vmem:[%s4606_s0 + $0x132] sm:$0xff]  ;;  %v1033_v50 = vld [vmem:[%s4606_s0 + $0x45b] sm:$0xff] }
 0x140   :  { %v48_v22 = vld [vmem:[%s4606_s0 + $0xf0] sm:$0xff]  ;;  %v507_v57 = vld [vmem:[%s4606_s0 + $0xf9] sm:$0xff] }
 0x141   :  { %v1176_v60 = vpop.f32.mrf.mxu0  ;;  %2536 = vmatmul.msk.bf16.gmra.mxu1 %vm161_vm0, %v66_v31  ;;  %2577 = vmatmul.msk.bf16.gmra.mxu2 %vm161_vm0, %v524_v30  ;;  %v3737_v35 = vadd.f32 %v1173_v58, %v979_v8  ;;  %v3741_v20 = vpop.f32.mrf.mxu3  ;;  %v1792_v58 = vld [vmem:[%s4606_s0 + $0x13a] sm:$0xff] }
 0x142   :  { %v1825_v5 = vpack.c.bf16 %v1792_v58, %v1791_v4  ;;  %v1032_v30 = vld [vmem:[%s4606_s0 + $0x453] sm:$0xff] }
 0x144   :  { %2659 = vmatmul.msk.bf16.gmra.mxu0 %vm161_vm0, %v1050_v44  ;;  %v650_v32 = vpop.f32.mrf.mxu2  ;;  %2768 = vmatmul.msk.bf16.vlgmr.msra.gmra.mxu3 %vm161_vm0, %v1825_v5 }
 0x145   :  { %v717_v3 = vadd.f32 %v650_v32, %v422_v38  ;;  %v525_v38 = vpack.c.bf16 %v507_v57, %v506_v16 }
 0x146   :  { %v423_v56 = vpop.f32.mrf.mxu1 }
 0x147   :  { %v980_v13 = vadd.f32 %v3652_v62, %v717_v3  ;;  %v49_v62 = vld [vmem:[%s4606_s0 + $0xf8] sm:$0xff]  ;;  %v424_v31 = vadd.f32 %v423_v56, %v3291_v27  ;;  %v1051_v3 = vpack.c.bf16 %v1033_v50, %v1032_v30 }
 0x149   :  { %v1178_v6 = vpop.f32.mrf.mxu0  ;;  %v3753_v53 = vadd.f32 %v1176_v60, %v980_v13  ;;  %v67_v60 = vpack.c.bf16 %v49_v62, %v48_v22  ;;  %v3772_v13 = vpop.f32.mrf.mxu3 }
 0x14c   :  { %v652_v44 = vpop.f32.mrf.mxu2 }
 0x14d   :  { %v718_v8 = vadd.f32 %v652_v44, %v424_v31  ;;  %v508_v44 = vld [vmem:[%s4606_s0 + $0x101] sm:$0xff] }
 0x14e   :  { %v426_v32 = vpop.f32.mrf.mxu1 }
 0x14f   :  { %v981_v27 = vadd.f32 %v3661_v59, %v718_v8  ;;  %v427_v58 = vadd.f32 %v426_v32, %v3326_v43  ;;  %v1793_v59 = vld [vmem:[%s4606_s0 + $0x142] sm:$0xff]  ;;  %v1035_v32 = vld [vmem:[%s4606_s0 + $0x46b] sm:$0xff] }
 0x150   :  { %v50_v43 = vld [vmem:[%s4606_s0 + $0x100] sm:$0xff]  ;;  %v509_v8 = vld [vmem:[%s4606_s0 + $0x109] sm:$0xff] }
 0x151   :  { %v1181_v56 = vpop.f32.mrf.mxu0  ;;  %2537 = vmatmul.msk.bf16.gmra.mxu1 %vm161_vm0, %v67_v60  ;;  %2578 = vmatmul.msk.bf16.gmra.mxu2 %vm161_vm0, %v525_v38  ;;  %v3777_v4 = vadd.f32 %v1178_v6, %v981_v27  ;;  %v3781_v16 = vpop.f32.mrf.mxu3  ;;  %v1794_v6 = vld [vmem:[%s4606_s0 + $0x14a] sm:$0xff] }
 0x152   :  { %v1826_v30 = vpack.c.bf16 %v1794_v6, %v1793_v59  ;;  %v1034_v38 = vld [vmem:[%s4606_s0 + $0x463] sm:$0xff] }
 0x154   :  { %2660 = vmatmul.msk.bf16.gmra.mxu0 %vm161_vm0, %v1051_v3  ;;  %v655_v5 = vpop.f32.mrf.mxu2  ;;  %2769 = vmatmul.msk.bf16.gmra.mxu3 %vm161_vm0, %v1826_v30 }
 0x155   :  { %v719_v22 = vadd.f32 %v655_v5, %v427_v58  ;;  %v526_v58 = vpack.c.bf16 %v509_v8, %v508_v44 }
 0x156   :  { %v428_v62 = vpop.f32.mrf.mxu1 }
 0x157   :  { %v982_v57 = vadd.f32 %v3692_v25, %v719_v22  ;;  %v51_v25 = vld [vmem:[%s4606_s0 + $0x108] sm:$0xff]  ;;  %v429_v60 = vadd.f32 %v428_v62, %v3338_v48  ;;  %v1052_v22 = vpack.c.bf16 %v1035_v32, %v1034_v38 }
 0x159   :  { %v1183_v31 = vpop.f32.mrf.mxu0  ;;  %v3793_v50 = vadd.f32 %v1181_v56, %v982_v57  ;;  %v68_v56 = vpack.c.bf16 %v51_v25, %v50_v43  ;;  %v3812_v57 = vpop.f32.mrf.mxu3 }
 0x15c   :  { %v657_v3 = vpop.f32.mrf.mxu2 }
 0x15d   :  { %v720_v27 = vadd.f32 %v657_v3, %v429_v60 }
 0x15e   :  { %v431_v5 = vpop.f32.mrf.mxu1 }
 0x15f   :  { %v983_v48 = vadd.f32 %v3701_v12, %v720_v27  ;;  %v432_v6 = vadd.f32 %v431_v5, %v3373_v0  ;;  %v1795_v12 = vld [vmem:[%s4606_s0 + $0x152] sm:$0xff]  ;;  %v1265_v0 = vld [vmem:[%s4606_s0 + $0x243] sm:$0xff] }
 0x160   :  { %v2054_v27 = vld [vmem:[%s4606_s0 + $0x12] sm:$0xff] }
 0x161   :  { %v1186_v62 = vpop.f32.mrf.mxu0  ;;  %2538 = vmatmul.msk.bf16.gmra.mxu1 %vm161_vm0, %v68_v56  ;;  %2579 = vmatmul.msk.bf16.gmra.mxu2 %vm161_vm0, %v526_v58  ;;  %v3817_v59 = vadd.f32 %v1183_v31, %v983_v48  ;;  %v3821_v44 = vpop.f32.mrf.mxu3  ;;  %v1796_v31 = vld [vmem:[%s4606_s0 + $0x15a] sm:$0xff] }
 0x162   :  { %v1827_v38 = vpack.c.bf16 %v1796_v31, %v1795_v12  ;;  %v2055_v56 = vld [vmem:[%s4606_s0 + $0x1a] sm:$0xff] }
 0x164   :  { %2661 = vmatmul.msk.bf16.gmra.mxu0 %vm161_vm0, %v1052_v22  ;;  %v660_v30 = vpop.f32.mrf.mxu2  ;;  %2770 = vmatmul.msk.bf16.gmra.mxu3 %vm161_vm0, %v1827_v38 }
 0x165   :  { %v721_v43 = vadd.f32 %v660_v30, %v432_v6 }
 0x166   :  { %v433_v25 = vpop.f32.mrf.mxu1 }
 0x167   :  { %v984_v8 = vadd.f32 %v3732_v9, %v721_v43  ;;  %v1266_v9 = vld [vmem:[%s4606_s0 + $0x24b] sm:$0xff]  ;;  %v434_v3 = vadd.f32 %v433_v25, %v3385_v11 }
 0x168   :  { %v1299_v22 = vpack.c.bf16 %v1266_v9, %v1265_v0  ;;  %v1797_v9 = vld [vmem:[%s4606_s0 + $0x162] sm:$0xff] }
 0x169   :  { %v1188_v60 = vpop.f32.mrf.mxu0  ;;  %v3830_v32 = vadd.f32 %v1186_v62, %v984_v8  ;;  %v2088_v62 = vpack.c.bf16 %v2055_v56, %v2054_v27  ;;  %v3846_v6 = vpop.f32.mrf.mxu3  ;;  %v2056_v56 = vld [vmem:[%s4606_s0 + $0x22] sm:$0xff] }
 0x16c   :  { %v662_v58 = vpop.f32.mrf.mxu2 }
 0x16d   :  { %v722_v5 = vadd.f32 %v662_v58, %v434_v3  ;;  %v2057_v58 = vld [vmem:[%s4606_s0 + $0x2a] sm:$0xff] }
 0x16e   :  { %v436_v48 = vpop.f32.mrf.mxu1 }
 0x16f   :  { %v985_v30 = vadd.f32 %v3741_v20, %v722_v5  ;;  %v437_v25 = vadd.f32 %v436_v48, %v3426_v37  ;;  %v1267_v37 = vld [vmem:[%s4606_s0 + $0x253] sm:$0xff] }
 0x171   :  { %v1191_v11 = vpop.f32.mrf.mxu0  ;;  %2686 = vmatmul.msk.bf16.vlgmr.msra.gmra.mxu1 %vm161_vm0, %v1299_v22  ;;  %2727 = vmatmul.msk.bf16.vlgmr.msra.gmra.mxu2 %vm161_vm0, %v3160_v39  ;;  %v3852_v43 = vadd.f32 %v1188_v60, %v985_v30  ;;  %v3856_v38 = vpop.f32.mrf.mxu3  ;;  %v1798_v39 = vld [vmem:[%s4606_s0 + $0x16a] sm:$0xff]  ;;  %v2089_v30 = vpack.c.bf16 %v2057_v58, %v2056_v56  ;;  %v2058_v56 = vld [vmem:[%s4606_s0 + $0x32] sm:$0xff]  ;;  %v2059_v58 = vld [vmem:[%s4606_s0 + $0x3a] sm:$0xff] }
 0x172   :  { %v1828_v60 = vpack.c.bf16 %v1798_v39, %v1797_v9 }
 0x174   :  { %2809 = vmatmul.msk.bf16.vlgmr.msra.gmra.mxu0 %vm161_vm0, %v2088_v62  ;;  %v665_v8 = vpop.f32.mrf.mxu2  ;;  %2771 = vmatmul.msk.bf16.gmra.mxu3 %vm161_vm0, %v1828_v60 }
 0x175   :  { %v723_v12 = vadd.f32 %v665_v8, %v437_v25 }
 0x176   :  { %v438_v31 = vpop.f32.mrf.mxu1 }
 0x177   :  { %v986_v0 = vadd.f32 %v3772_v13, %v723_v12  ;;  %v1268_v13 = vld [vmem:[%s4606_s0 + $0x25b] sm:$0xff]  ;;  %v439_v27 = vadd.f32 %v438_v31, %v3444_v55 }
 0x178   :  { %v1300_v48 = vpack.c.bf16 %v1268_v13, %v1267_v37  ;;  %v1799_v37 = vld [vmem:[%s4606_s0 + $0x172] sm:$0xff] }
 0x179   :  { %v1193_v20 = vpop.f32.mrf.mxu0  ;;  %v3865_v3 = vadd.f32 %v1191_v11, %v986_v0  ;;  %v3881_v11 = vpop.f32.mrf.mxu3 }
 0x17c   :  { %v667_v5 = vpop.f32.mrf.mxu2 }
 0x17d   :  { %v724_v22 = vadd.f32 %v667_v5, %v439_v27 }
 0x17e   :  { %v441_v62 = vpop.f32.mrf.mxu1 }
 0x17f   :  { %v987_v25 = vadd.f32 %v3781_v16, %v724_v22  ;;  %v442_v12 = vadd.f32 %v441_v62, %v3244_v7  ;;  %v1269_v7 = vld [vmem:[%s4606_s0 + $0x263] sm:$0xff] }
 0x181   :  { %v1196_v55 = vpop.f32.mrf.mxu0  ;;  %2687 = vmatmul.msk.bf16.gmra.mxu1 %vm161_vm0, %v1300_v48  ;;  %2728 = vmatmul.msk.bf16.gmra.mxu2 %vm161_vm0, %v3191_v51  ;;  %v3887_v8 = vadd.f32 %v1193_v20, %v987_v25  ;;  %v3891_v39 = vpop.f32.mrf.mxu3  ;;  %v1800_v51 = vld [vmem:[%s4606_s0 + $0x17a] sm:$0xff] }
 0x182   :  { %v1829_v20 = vpack.c.bf16 %v1800_v51, %v1799_v37 }
 0x184   :  { %2810 = vmatmul.msk.bf16.gmra.mxu0 %vm161_vm0, %v2089_v30  ;;  %v670_v31 = vpop.f32.mrf.mxu2  ;;  %2772 = vmatmul.msk.bf16.gmra.mxu3 %vm161_vm0, %v1829_v20  ;;  %v2090_v30 = vpack.c.bf16 %v2059_v58, %v2058_v56  ;;  %v1801_v20 = vld [vmem:[%s4606_s0 + $0x182] sm:$0xff]  ;;  %v2061_v56 = vld [vmem:[%s4606_s0 + $0x4a] sm:$0xff] }
 0x185   :  { %v725_v0 = vadd.f32 %v670_v31, %v442_v12 }
 0x186   :  { %v443_v9 = vpop.f32.mrf.mxu1 }
 0x187   :  { %v988_v60 = vadd.f32 %v3812_v57, %v725_v0  ;;  %v1270_v57 = vld [vmem:[%s4606_s0 + $0x26b] sm:$0xff]  ;;  %v444_v27 = vadd.f32 %v443_v9, %v3275_v19 }
 0x188   :  { %v1301_v48 = vpack.c.bf16 %v1270_v57, %v1269_v7 }
 0x189   :  { %v1198_v16 = vpop.f32.mrf.mxu0  ;;  %v3900_v13 = vadd.f32 %v1196_v55, %v988_v60  ;;  %v3916_v25 = vpop.f32.mrf.mxu3 }
 0x18c   :  { %v672_v5 = vpop.f32.mrf.mxu2 }
 0x18d   :  { %v726_v22 = vadd.f32 %v672_v5, %v444_v27  ;;  %v2060_v27 = vld [vmem:[%s4606_s0 + $0x42] sm:$0xff] }
 0x18e   :  { %v446_v62 = vpop.f32.mrf.mxu1 }
 0x18f   :  { %v989_v55 = vadd.f32 %v3821_v44, %v726_v22  ;;  %v447_v31 = vadd.f32 %v446_v62, %v3289_v26  ;;  %v1271_v26 = vld [vmem:[%s4606_s0 + $0x273] sm:$0xff]  ;;  %v2091_v62 = vpack.c.bf16 %v2061_v56, %v2060_v27 }
 0x191   :  { %v1201_v19 = vpop.f32.mrf.mxu0  ;;  %2688 = vmatmul.msk.bf16.gmra.mxu1 %vm161_vm0, %v1301_v48  ;;  %2729 = vmatmul.msk.bf16.gmra.mxu2 %vm161_vm0, %v3231_v2  ;;  %v3922_v12 = vadd.f32 %v1198_v16, %v989_v55  ;;  %v3926_v37 = vpop.f32.mrf.mxu3  ;;  %v1802_v2 = vld [vmem:[%s4606_s0 + $0x18a] sm:$0xff] }
 0x192   :  { %v1830_v16 = vpack.c.bf16 %v1802_v2, %v1801_v20  ;;  %v1803_v2 = vld [vmem:[%s4606_s0 + $0x192] sm:$0xff] }
 0x194   :  { %2811 = vmatmul.msk.bf16.gmra.mxu0 %vm161_vm0, %v2090_v30  ;;  %v675_v0 = vpop.f32.mrf.mxu2  ;;  %2773 = vmatmul.msk.bf16.gmra.mxu3 %vm161_vm0, %v1830_v16 }
 0x195   :  { %v727_v9 = vadd.f32 %v675_v0, %v447_v31 }
 0x196   :  { %v448_v60 = vpop.f32.mrf.mxu1 }
 0x197   :  { %v990_v51 = vadd.f32 %v3846_v6, %v727_v9  ;;  %v1272_v6 = vld [vmem:[%s4606_s0 + $0x27b] sm:$0xff]  ;;  %v449_v57 = vadd.f32 %v448_v60, %v3322_v40 }
 0x198   :  { %v1302_v22 = vpack.c.bf16 %v1272_v6, %v1271_v26  ;;  %v2062_v6 = vld [vmem:[%s4606_s0 + $0x52] sm:$0xff] }
 0x199   :  { %v1203_v44 = vpop.f32.mrf.mxu0  ;;  %v3935_v7 = vadd.f32 %v1201_v19, %v990_v51  ;;  %v3951_v30 = vpop.f32.mrf.mxu3 }
 0x19c   :  { %v677_v58 = vpop.f32.mrf.mxu2 }
 0x19d   :  { %v728_v5 = vadd.f32 %v677_v58, %v449_v57  ;;  %v2063_v57 = vld [vmem:[%s4606_s0 + $0x5a] sm:$0xff] }
 0x19e   :  { %v451_v48 = vpop.f32.mrf.mxu1 }
 0x19f   :  { %v991_v55 = vadd.f32 %v3856_v38, %v728_v5  ;;  %v452_v31 = vadd.f32 %v451_v48, %v3336_v47  ;;  %v1273_v47 = vld [vmem:[%s4606_s0 + $0x283] sm:$0xff] }
 0x1a1   :  { %v1206_v40 = vpop.f32.mrf.mxu0  ;;  %2689 = vmatmul.msk.bf16.gmra.mxu1 %vm161_vm0, %v1302_v22  ;;  %2730 = vmatmul.msk.bf16.gmra.mxu2 %vm161_vm0, %v3277_v21  ;;  %v3957_v19 = vadd.f32 %v1203_v44, %v991_v55  ;;  %v3961_v51 = vpop.f32.mrf.mxu3  ;;  %v1804_v21 = vld [vmem:[%s4606_s0 + $0x19a] sm:$0xff]  ;;  %v2092_v22 = vpack.c.bf16 %v2063_v57, %v2062_v6 }
 0x1a2   :  { %v1831_v44 = vpack.c.bf16 %v1804_v21, %v1803_v2  ;;  %v1805_v2 = vld [vmem:[%s4606_s0 + $0x1a2] sm:$0xff] }
 0x1a4   :  { %2812 = vmatmul.msk.bf16.gmra.mxu0 %vm161_vm0, %v2091_v62  ;;  %v680_v0 = vpop.f32.mrf.mxu2  ;;  %2774 = vmatmul.msk.bf16.gmra.mxu3 %vm161_vm0, %v1831_v44 }
 0x1a5   :  { %v729_v9 = vadd.f32 %v680_v0, %v452_v31 }
 0x1a6   :  { %v453_v60 = vpop.f32.mrf.mxu1 }
 0x1a7   :  { %v992_v20 = vadd.f32 %v3881_v11, %v729_v9  ;;  %v1274_v11 = vld [vmem:[%s4606_s0 + $0x28b] sm:$0xff]  ;;  %v454_v26 = vadd.f32 %v453_v60, %v3369_v61 }
 0x1a8   :  { %v1303_v58 = vpack.c.bf16 %v1274_v11, %v1273_v47  ;;  %v2064_v47 = vld [vmem:[%s4606_s0 + $0x62] sm:$0xff]  ;;  %v2065_v11 = vld [vmem:[%s4606_s0 + $0x6a] sm:$0xff] }
 0x1a9   :  { %v1208_v38 = vpop.f32.mrf.mxu0  ;;  %v3970_v16 = vadd.f32 %v1206_v40, %v992_v20  ;;  %v3986_v48 = vpop.f32.mrf.mxu3 }
 0x1ac   :  { %v682_v27 = vpop.f32.mrf.mxu2 }
 0x1ad   :  { %v730_v56 = vadd.f32 %v682_v27, %v454_v26 }
 0x1ae   :  { %v456_v5 = vpop.f32.mrf.mxu1 }
 0x1af   :  { %v993_v62 = vadd.f32 %v3891_v39, %v730_v56  ;;  %v457_v40 = vadd.f32 %v456_v5, %v3383_v10  ;;  %v1275_v10 = vld [vmem:[%s4606_s0 + $0x293] sm:$0xff]  ;;  %v2093_v56 = vpack.c.bf16 %v2065_v11, %v2064_v47 }
 0x1b1   :  { %v1211_v61 = vpop.f32.mrf.mxu0  ;;  %2690 = vmatmul.msk.bf16.gmra.mxu1 %vm161_vm0, %v1303_v58  ;;  %2731 = vmatmul.msk.bf16.gmra.mxu2 %vm161_vm0, %v3324_v42  ;;  %v3992_v55 = vadd.f32 %v1208_v38, %v993_v62  ;;  %v3996_v60 = vpop.f32.mrf.mxu3  ;;  %v1806_v42 = vld [vmem:[%s4606_s0 + $0x1aa] sm:$0xff] }
 0x1b2   :  { %v1832_v38 = vpack.c.bf16 %v1806_v42, %v1805_v2 }
 0x1b4   :  { %2813 = vmatmul.msk.bf16.gmra.mxu0 %vm161_vm0, %v2092_v22  ;;  %v685_v31 = vpop.f32.mrf.mxu2  ;;  %2775 = vmatmul.msk.bf16.gmra.mxu3 %vm161_vm0, %v1832_v38  ;;  %v2066_v38 = vld [vmem:[%s4606_s0 + $0x72] sm:$0xff] }
 0x1b5   :  { %v731_v0 = vadd.f32 %v685_v31, %v457_v40 }
 0x1b6   :  { %v458_v9 = vpop.f32.mrf.mxu1 }
 0x1b7   :  { %v994_v20 = vadd.f32 %v3916_v25, %v731_v0  ;;  %v1276_v25 = vld [vmem:[%s4606_s0 + $0x29b] sm:$0xff]  ;;  %v459_v44 = vadd.f32 %v458_v9, %v3422_v34 }
 0x1b8   :  { %v1304_v57 = vpack.c.bf16 %v1276_v25, %v1275_v10  ;;  %v2067_v10 = vld [vmem:[%s4606_s0 + $0x7a] sm:$0xff] }
 0x1b9   :  { %v1213_v39 = vpop.f32.mrf.mxu0  ;;  %v4005_v21 = vadd.f32 %v1211_v61, %v994_v20  ;;  %v4021_v58 = vpop.f32.mrf.mxu3  ;;  %v1807_v20 = vld [vmem:[%s4606_s0 + $0x1b2] sm:$0xff] }
 0x1bc   :  { %v687_v26 = vpop.f32.mrf.mxu2 }
 0x1bd   :  { %v732_v6 = vadd.f32 %v687_v26, %v459_v44  ;;  %v2094_v26 = vpack.c.bf16 %v2067_v10, %v2066_v38 }
 0x1be   :  { %v461_v27 = vpop.f32.mrf.mxu1 }
 0x1bf   :  { %v995_v5 = vadd.f32 %v3926_v37, %v732_v6  ;;  %v462_v62 = vadd.f32 %v461_v27, %v3442_v54  ;;  %v1277_v54 = vld [vmem:[%s4606_s0 + $0x2a3] sm:$0xff] }
 0x1c1   :  { %v1216_v34 = vpop.f32.mrf.mxu0  ;;  %2691 = vmatmul.msk.bf16.gmra.mxu1 %vm161_vm0, %v1304_v57  ;;  %2732 = vmatmul.msk.bf16.gmra.mxu2 %vm161_vm0, %v3371_v63  ;;  %v4027_v22 = vadd.f32 %v1213_v39, %v995_v5  ;;  %v4031_v0 = vpop.f32.mrf.mxu3  ;;  %v1808_v63 = vld [vmem:[%s4606_s0 + $0x1ba] sm:$0xff] }
 0x1c2   :  { %v1833_v39 = vpack.c.bf16 %v1808_v63, %v1807_v20  ;;  %v2068_v63 = vld [vmem:[%s4606_s0 + $0x82] sm:$0xff] }
 0x1c4   :  { %2814 = vmatmul.msk.bf16.gmra.mxu0 %vm161_vm0, %v2093_v56  ;;  %v690_v61 = vpop.f32.mrf.mxu2  ;;  %2776 = vmatmul.msk.bf16.gmra.mxu3 %vm161_vm0, %v1833_v39  ;;  %v2069_v39 = vld [vmem:[%s4606_s0 + $0x8a] sm:$0xff] }
 0x1c5   :  { %v733_v40 = vadd.f32 %v690_v61, %v462_v62  ;;  %v2095_v10 = vpack.c.bf16 %v2069_v39, %v2068_v63 }
 0x1c6   :  { %v463_v31 = vpop.f32.mrf.mxu1 }
 0x1c7   :  { %v996_v9 = vadd.f32 %v3951_v30, %v733_v40  ;;  %v1278_v30 = vld [vmem:[%s4606_s0 + $0x2ab] sm:$0xff]  ;;  %v464_v42 = vadd.f32 %v463_v31, %v3475_v18  ;;  %v1809_v31 = vld [vmem:[%s4606_s0 + $0x1c2] sm:$0xff] }
 0x1c8   :  { %v1305_v47 = vpack.c.bf16 %v1278_v30, %v1277_v54 }
 0x1c9   :  { %v1218_v37 = vpop.f32.mrf.mxu0  ;;  %v4040_v2 = vadd.f32 %v1216_v34, %v996_v9  ;;  %v4056_v6 = vpop.f32.mrf.mxu3 }
 0x1cc   :  { %v692_v25 = vpop.f32.mrf.mxu2 }
 0x1cd   :  { %v734_v44 = vadd.f32 %v692_v25, %v464_v42 }
 0x1ce   :  { %v466_v11 = vpop.f32.mrf.mxu1 }
 0x1cf   :  { %v997_v57 = vadd.f32 %v3961_v51, %v734_v44  ;;  %v467_v56 = vadd.f32 %v466_v11, %v3281_v24  ;;  %v1279_v24 = vld [vmem:[%s4606_s0 + $0x2b3] sm:$0xff] }
 0x1d1   :  { %v1221_v18 = vpop.f32.mrf.mxu0  ;;  %2692 = vmatmul.msk.bf16.gmra.mxu1 %vm161_vm0, %v1305_v47  ;;  %2733 = vmatmul.msk.bf16.gmra.mxu2 %vm161_vm0, %v3424_v36  ;;  %v4062_v27 = vadd.f32 %v1218_v37, %v997_v57  ;;  %v4066_v61 = vpop.f32.mrf.mxu3  ;;  %v1810_v36 = vld [vmem:[%s4606_s0 + $0x1ca] sm:$0xff] }
 0x1d2   :  { %v1834_v9 = vpack.c.bf16 %v1810_v36, %v1809_v31  ;;  %v2070_v31 = vld [vmem:[%s4606_s0 + $0x92] sm:$0xff]  ;;  %v2071_v36 = vld [vmem:[%s4606_s0 + $0x9a] sm:$0xff] }
 0x1d3   :  { %v2096_v63 = vpack.c.bf16 %v2071_v36, %v2070_v31  ;;  %v2072_v31 = vld [vmem:[%s4606_s0 + $0xa2] sm:$0xff]  ;;  %v2073_v36 = vld [vmem:[%s4606_s0 + $0xaa] sm:$0xff] }
 0x1d4   :  { %2815 = vmatmul.msk.bf16.gmra.mxu0 %vm161_vm0, %v2094_v26  ;;  %v695_v5 = vpop.f32.mrf.mxu2  ;;  %2777 = vmatmul.msk.bf16.gmra.mxu3 %vm161_vm0, %v1834_v9 }
 0x1d5   :  { %v735_v34 = vadd.f32 %v695_v5, %v467_v56 }
 0x1d6   :  { %v468_v62 = vpop.f32.mrf.mxu1 }
 0x1d7   :  { %v998_v40 = vadd.f32 %v3986_v48, %v735_v34  ;;  %v1280_v48 = vld [vmem:[%s4606_s0 + $0x2bb] sm:$0xff]  ;;  %v469_v20 = vadd.f32 %v468_v62, %v3293_v28  ;;  %v1811_v34 = vld [vmem:[%s4606_s0 + $0x1d2] sm:$0xff] }
 0x1d8   :  { %v1306_v42 = vpack.c.bf16 %v1280_v48, %v1279_v24 }
 0x1d9   :  { %v1223_v51 = vpop.f32.mrf.mxu0  ;;  %v4075_v37 = vadd.f32 %v1221_v18, %v998_v40  ;;  %v4091_v25 = vpop.f32.mrf.mxu3 }
 0x1dc   :  { %v697_v54 = vpop.f32.mrf.mxu2 }
 0x1dd   :  { %v736_v30 = vadd.f32 %v697_v54, %v469_v20 }
 0x1de   :  { %v471_v38 = vpop.f32.mrf.mxu1 }
 0x1df   :  { %v999_v44 = vadd.f32 %v3996_v60, %v736_v30  ;;  %v472_v11 = vadd.f32 %v471_v38, %v3328_v45  ;;  %v1281_v45 = vld [vmem:[%s4606_s0 + $0x2c3] sm:$0xff] }
 0x1e1   :  { %v1226_v28 = vpop.f32.mrf.mxu0  ;;  %2693 = vmatmul.msk.bf16.gmra.mxu1 %vm161_vm0, %v1306_v42  ;;  %2734 = vmatmul.msk.bf16.gmra.mxu2 %vm161_vm0, %v3477_v23  ;;  %v4097_v47 = vadd.f32 %v1223_v51, %v999_v44  ;;  %v4101_v56 = vpop.f32.mrf.mxu3  ;;  %v1812_v23 = vld [vmem:[%s4606_s0 + $0x1da] sm:$0xff] }
 0x1e2   :  { %v1835_v62 = vpack.c.bf16 %v1812_v23, %v1811_v34  ;;  %v4613_v42 = vld [vmem:[#allocation2_spill] sm:$0xff] }
 0x1e3   :  { %v1284_v23 = vld [vmem:[%s4606_s0 + $0x2db] sm:$0xff] }
 0x1e4   :  { %2816 = vmatmul.msk.bf16.gmra.mxu0 %vm161_vm0, %v2095_v10  ;;  %v700_v26 = vpop.f32.mrf.mxu2  ;;  %2778 = vmatmul.msk.bf16.gmra.mxu3 %vm161_vm0, %v1835_v62  ;;  %v1546_v62 = vld [vmem:[%s4606_s0 + $0xa1] sm:$0xff] }
 0x1e5   :  { %v737_v57 = vadd.f32 %v700_v26, %v472_v11 }
 0x1e6   :  { %v473_v18 = vpop.f32.mrf.mxu1 }
 0x1e7   :  { %v1000_v5 = vadd.f32 %v4021_v58, %v737_v57  ;;  %v1282_v58 = vld [vmem:[%s4606_s0 + $0x2cb] sm:$0xff]  ;;  %v474_v51 = vadd.f32 %v473_v18, %v3340_v49 }
 0x1e8   :  { %v1307_v48 = vpack.c.bf16 %v1282_v58, %v1281_v45  ;;  %v1814_v18 = vld [vmem:[%s4606_s0 + $0x1ea] sm:$0xff] }
 0x1e9   :  { %v1228_v60 = vpop.f32.mrf.mxu0  ;;  %v4110_v40 = vadd.f32 %v1226_v28, %v1000_v5  ;;  %v4126_v39 = vpop.f32.mrf.mxu3  ;;  %v1547_v45 = vld [vmem:[%s4606_s0 + $0xa9] sm:$0xff] }
 0x1ec   :  { %v702_v9 = vpop.f32.mrf.mxu2 }
 0x1ed   :  { %v738_v24 = vadd.f32 %v702_v9, %v474_v51 }
 0x1ee   :  { %v1409_v20 = vpop.f32.mrf.mxu1 }
 0x1ef   :  { %v1001_v54 = vadd.f32 %v4031_v0, %v738_v24  ;;  %v1494_v38 = vadd.f32 %v1409_v20, %v4613_v42  ;;  %v4142_v0 = vld [vmem:[%s4607_s2] ss:$0 sm:$0xff] }
 0x1f1   :  { %v2198_v49 = vpop.f32.mrf.mxu0  ;;  %2694 = vmatmul.msk.bf16.gmra.mxu1 %vm161_vm0, %v1307_v48  ;;  %2735 = vmatmul.msk.bf16.gmra.mxu2 %vm161_vm0, %v3517_v52  ;;  %v4132_v30 = vadd.f32 %v1228_v60, %v1001_v54  ;;  %v4136_v11 = vpop.f32.mrf.mxu3  ;;  %v1813_v52 = vld [vmem:[%s4606_s0 + $0x1e2] sm:$0xff]  ;;  %v4153_v60 = vld [vmem:[%s4608_s3] ss:$0 sm:$0xff] }
 0x1f2   :  { %v1836_v34 = vpack.c.bf16 %v1814_v18, %v1813_v52 }
 0x1f4   :  { %2817 = vmatmul.msk.bf16.gmra.mxu0 %vm161_vm0, %v2096_v63  ;;  %v1672_v10 = vpop.f32.mrf.mxu2  ;;  %2779 = vmatmul.msk.bf16.gmra.mxu3 %vm161_vm0, %v1836_v34  ;;  %v1571_v63 = vpack.c.bf16 %v1547_v45, %v1546_v62  ;;  %v1815_v45 = vld [vmem:[%s4606_s0 + $0x1f2] sm:$0xff] }
 0x1f5   :  { %v1757_v44 = vadd.f32 %v1672_v10, %v1494_v38 }
 0x1f6   :  { %v1411_v28 = vpop.f32.mrf.mxu1 }
 0x1f7   :  { %v2020_v26 = vadd.f32 %v4056_v6, %v1757_v44  ;;  %v1283_v6 = vld [vmem:[%s4606_s0 + $0x2d3] sm:$0xff]  ;;  %v1495_v51 = vadd.f32 %v1411_v28, %v3525_v15 }
 0x1f8   :  { %v1308_v20 = vpack.c.bf16 %v1284_v23, %v1283_v6 }
 0x1f9   :  { %v2200_v57 = vpop.f32.mrf.mxu0  ;;  %v2283_v5 = vadd.f32 %v2198_v49, %v2020_v26  ;;  %v2097_v49 = vpack.c.bf16 %v2073_v36, %v2072_v31  ;;  %v4177_v42 = vpop.f32.mrf.mxu3  ;;  %v4614_v26 = vld [vmem:[#allocation3_spill] sm:$0xff] }
 0x1fa   :  { %v1285_v31 = vld [vmem:[%s4606_s0 + $0x2e3] sm:$0xff] }
 0x1fb   :  { %v2321_v58 = vmul.f32 %v4142_v0, %v2283_v5 }
 0x1fc   :  { %v1674_v9 = vpop.f32.mrf.mxu2 }
 0x1fd   :  { %v2359_v24 = vadd.f32 %v4153_v60, %v2321_v58  ;;  %v1758_v48 = vadd.f32 %v1674_v9, %v1495_v51  ;;  %v1816_v58 = vld [vmem:[%s4606_s0 + $0x1fa] sm:$0xff]  ;;  %v1548_v9 = vld [vmem:[%s4606_s0 + $0xb1] sm:$0xff] }
 0x1fe   :  { %v1414_v54 = vpop.f32.mrf.mxu1  ;;  %v1837_v36 = vpack.c.bf16 %v1816_v58, %v1815_v45 }
 0x1ff   :  { %v2393_v15 = vmax.f32 %v2359_v24, 0.0  ;;  %v2021_v38 = vadd.f32 %v4066_v61, %v1758_v48  ;;  %v1496_v52 = vadd.f32 %v1414_v54, %v4614_v26  ;;  %v1549_v24 = vld [vmem:[%s4606_s0 + $0xb9] sm:$0xff] }
 0x200   :  { %v2075_v54 = vld [vmem:[%s4606_s0 + $0xba] sm:$0xff] }
 0x201   :  { %v2203_v10 = vpop.f32.mrf.mxu0  ;;  %2427 = vst [vmem:[%s4609_s4] sm:$0xff] %v2393_v15  ;;  %v2284_v44 = vadd.f32 %v2200_v57, %v2021_v38  ;;  %2695 = vmatmul.msk.bf16.gmra.mxu1 %vm161_vm0, %v1308_v20  ;;  %2736 = vmatmul.msk.bf16.gmra.mxu2 %vm161_vm0, %v1571_v63  ;;  %v4189_v34 = vpop.f32.mrf.mxu3  ;;  %v2074_v63 = vld [vmem:[%s4606_s0 + $0xb2] sm:$0xff] }
 0x202   :  { %v2098_v26 = vpack.c.bf16 %v2075_v54, %v2074_v63  ;;  %v1550_v54 = vld [vmem:[%s4606_s0 + $0xc1] sm:$0xff] }
 0x203   :  { %v2322_v28 = vmul.f32 %v4142_v0, %v2284_v44  ;;  %v1572_v44 = vpack.c.bf16 %v1549_v24, %v1548_v9  ;;  %v1817_v9 = vld [vmem:[%s4606_s0 + $0x202] sm:$0xff]  ;;  %v1818_v24 = vld [vmem:[%s4606_s0 + $0x20a] sm:$0xff] }
 0x204   :  { %2818 = vmatmul.msk.bf16.gmra.mxu0 %vm161_vm0, %v2097_v49  ;;  %v1677_v18 = vpop.f32.mrf.mxu2  ;;  %2780 = vmatmul.msk.bf16.gmra.mxu3 %vm161_vm0, %v1837_v36  ;;  %v1838_v63 = vpack.c.bf16 %v1818_v24, %v1817_v9 }
 0x205   :  { %v2360_v5 = vadd.f32 %v4153_v60, %v2322_v28  ;;  %v1759_v61 = vadd.f32 %v1677_v18, %v1496_v52 }
 0x206   :  { %v1416_v6 = vpop.f32.mrf.mxu1 }
 0x207   :  { %v2394_v23 = vmax.f32 %v2360_v5, 0.0  ;;  %v2022_v57 = vadd.f32 %v4091_v25, %v1759_v61  ;;  %v1286_v25 = vld [vmem:[%s4606_s0 + $0x2eb] sm:$0xff]  ;;  %v1497_v20 = vadd.f32 %v1416_v6, %v3565_v33 }
 0x209   :  { %v2205_v62 = vpop.f32.mrf.mxu0  ;;  %2428 = vst [vmem:[%s4609_s4 + $0x8] sm:$0xff] %v2394_v23  ;;  %v2285_v51 = vadd.f32 %v2203_v10, %v2022_v57  ;;  %v1309_v10 = vpack.c.bf16 %v1286_v25, %v1285_v31  ;;  %v4223_v52 = vpop.f32.mrf.mxu3  ;;  %v4615_v23 = vld [vmem:[#allocation4_spill] sm:$0xff] }
 0x20b   :  { %v2323_v48 = vmul.f32 %v4142_v0, %v2285_v51 }
 0x20c   :  { %v1679_v49 = vpop.f32.mrf.mxu2 }
 0x20d   :  { %v2361_v15 = vadd.f32 %v4153_v60, %v2323_v48  ;;  %v1760_v38 = vadd.f32 %v1679_v49, %v1497_v20  ;;  %v1287_v20 = vld [vmem:[%s4606_s0 + $0x2f3] sm:$0xff]  ;;  %v1551_v49 = vld [vmem:[%s4606_s0 + $0xc9] sm:$0xff] }
 0x20e   :  { %v1419_v28 = vpop.f32.mrf.mxu1 }
 0x20f   :  { %v2395_v33 = vmax.f32 %v2361_v15, 0.0  ;;  %v2023_v18 = vadd.f32 %v4101_v56, %v1760_v38  ;;  %v1498_v57 = vadd.f32 %v1419_v28, %v4615_v23 }
 0x211   :  { %v2208_v5 = vpop.f32.mrf.mxu0  ;;  %2429 = vst [vmem:[%s4609_s4 + $0x10] sm:$0xff] %v2395_v33  ;;  %v2286_v61 = vadd.f32 %v2205_v62, %v2023_v18  ;;  %2696 = vmatmul.msk.bf16.gmra.mxu1 %vm161_vm0, %v1309_v10  ;;  %2737 = vmatmul.msk.bf16.gmra.mxu2 %vm161_vm0, %v1572_v44  ;;  %v4235_v31 = vpop.f32.mrf.mxu3  ;;  %v2076_v10 = vld [vmem:[%s4606_s0 + $0xc2] sm:$0xff]  ;;  %v2077_v44 = vld [vmem:[%s4606_s0 + $0xca] sm:$0xff] }
 0x213   :  { %v2324_v6 = vmul.f32 %v4142_v0, %v2286_v61 }
 0x214   :  { %2819 = vmatmul.msk.bf16.gmra.mxu0 %vm161_vm0, %v2098_v26  ;;  %v1682_v45 = vpop.f32.mrf.mxu2  ;;  %2781 = vmatmul.msk.bf16.gmra.mxu3 %vm161_vm0, %v1838_v63  ;;  %v1819_v63 = vld [vmem:[%s4606_s0 + $0x212] sm:$0xff] }
 0x215   :  { %v2362_v58 = vadd.f32 %v4153_v60, %v2324_v6  ;;  %v1761_v56 = vadd.f32 %v1682_v45, %v1498_v57  ;;  %v2099_v6 = vpack.c.bf16 %v2077_v44, %v2076_v10 }
 0x216   :  { %v1421_v51 = vpop.f32.mrf.mxu1 }
 0x217   :  { %v2396_v36 = vmax.f32 %v2362_v58, 0.0  ;;  %v2024_v62 = vadd.f32 %v4126_v39, %v1761_v56  ;;  %v1288_v39 = vld [vmem:[%s4606_s0 + $0x2fb] sm:$0xff]  ;;  %v1499_v38 = vadd.f32 %v1421_v51, %v3614_v46 }
 0x218   :  { %v1310_v18 = vpack.c.bf16 %v1288_v39, %v1287_v20  ;;  %v1820_v39 = vld [vmem:[%s4606_s0 + $0x21a] sm:$0xff] }
 0x219   :  { %v2210_v25 = vpop.f32.mrf.mxu0  ;;  %2430 = vst [vmem:[%s4609_s4 + $0x18] sm:$0xff] %v2396_v36  ;;  %v2287_v48 = vadd.f32 %v2208_v5, %v2024_v62  ;;  %v1573_v5 = vpack.c.bf16 %v1551_v49, %v1550_v54  ;;  %v4269_v23 = vpop.f32.mrf.mxu3  ;;  %v1289_v54 = vld [vmem:[%s4606_s0 + $0x303] sm:$0xff]  ;;  %v1839_v49 = vpack.c.bf16 %v1820_v39, %v1819_v63 }
 0x21b   :  { %v2325_v15 = vmul.f32 %v4142_v0, %v2287_v48 }
 0x21c   :  { %v1684_v28 = vpop.f32.mrf.mxu2 }
 0x21d   :  { %v2363_v26 = vadd.f32 %v4153_v60, %v2325_v15  ;;  %v1762_v33 = vadd.f32 %v1684_v28, %v1499_v38  ;;  %v1552_v15 = vld [vmem:[%s4606_s0 + $0xd1] sm:$0xff]  ;;  %v1553_v38 = vld [vmem:[%s4606_s0 + $0xd9] sm:$0xff] }
 0x21e   :  { %v1424_v61 = vpop.f32.mrf.mxu1  ;;  %v2078_v28 = vld [vmem:[%s4606_s0 + $0xd2] sm:$0xff] }
 0x21f   :  { %v2397_v46 = vmax.f32 %v2363_v26, 0.0  ;;  %v2025_v57 = vadd.f32 %v4136_v11, %v1762_v33  ;;  %v1500_v51 = vadd.f32 %v1424_v61, %v3633_v1  ;;  %v2079_v26 = vld [vmem:[%s4606_s0 + $0xda] sm:$0xff] }
 0x221   :  { %v2213_v45 = vpop.f32.mrf.mxu0  ;;  %2431 = vst [vmem:[%s4609_s4 + $0x20] sm:$0xff] %v2397_v46  ;;  %v2288_v58 = vadd.f32 %v2210_v25, %v2025_v57  ;;  %2697 = vmatmul.msk.bf16.gmra.mxu1 %vm161_vm0, %v1310_v18  ;;  %2738 = vmatmul.msk.bf16.gmra.mxu2 %vm161_vm0, %v1573_v5  ;;  %v4281_v24 = vpop.f32.mrf.mxu3  ;;  %v2100_v57 = vpack.c.bf16 %v2079_v26, %v2078_v28  ;;  %v2080_v28 = vld [vmem:[%s4606_s0 + $0xe2] sm:$0xff]  ;;  %v2081_v26 = vld [vmem:[%s4606_s0 + $0xea] sm:$0xff] }
 0x223   :  { %v2326_v56 = vmul.f32 %v4142_v0, %v2288_v58 }
 0x224   :  { %2820 = vmatmul.msk.bf16.gmra.mxu0 %vm161_vm0, %v2099_v6  ;;  %v1687_v36 = vpop.f32.mrf.mxu2  ;;  %2782 = vmatmul.msk.bf16.gmra.mxu3 %vm161_vm0, %v1839_v49  ;;  %v1574_v6 = vpack.c.bf16 %v1553_v38, %v1552_v15  ;;  %v1291_v49 = vld [vmem:[%s4606_s0 + $0x313] sm:$0xff]  ;;  %v1554_v15 = vld [vmem:[%s4606_s0 + $0xe1] sm:$0xff]  ;;  %v1555_v38 = vld [vmem:[%s4606_s0 + $0xe9] sm:$0xff] }
 0x225   :  { %v2364_v62 = vadd.f32 %v4153_v60, %v2326_v56  ;;  %v1763_v11 = vadd.f32 %v1687_v36, %v1500_v51 }
 0x226   :  { %v1426_v9 = vpop.f32.mrf.mxu1 }
 0x227   :  { %v2398_v48 = vmax.f32 %v2364_v62, 0.0  ;;  %v2026_v25 = vadd.f32 %v4177_v42, %v1763_v11  ;;  %v1290_v42 = vld [vmem:[%s4606_s0 + $0x30b] sm:$0xff]  ;;  %v1501_v44 = vadd.f32 %v1426_v9, %v3657_v29 }
 0x228   :  { %v1311_v61 = vpack.c.bf16 %v1290_v42, %v1289_v54  ;;  %v1822_v54 = vld [vmem:[%s4606_s0 + $0x22a] sm:$0xff] }
 0x229   :  { %v2215_v20 = vpop.f32.mrf.mxu0  ;;  %2432 = vst [vmem:[%s4609_s4 + $0x28] sm:$0xff] %v2398_v48  ;;  %v2289_v1 = vadd.f32 %v2213_v45, %v2026_v25  ;;  %v4315_v45 = vpop.f32.mrf.mxu3 }
 0x22b   :  { %v2327_v10 = vmul.f32 %v4142_v0, %v2289_v1  ;;  %v1821_v1 = vld [vmem:[%s4606_s0 + $0x222] sm:$0xff] }
 0x22c   :  { %v1689_v33 = vpop.f32.mrf.mxu2  ;;  %v1840_v42 = vpack.c.bf16 %v1822_v54, %v1821_v1  ;;  %v1824_v1 = vld [vmem:[%s4606_s0 + $0x23a] sm:$0xff]  ;;  %v1293_v54 = vld [vmem:[%s4606_s0 + $0x323] sm:$0xff] }
 0x22d   :  { %v2365_v18 = vadd.f32 %v4153_v60, %v2327_v10  ;;  %v1764_v5 = vadd.f32 %v1689_v33, %v1501_v44 }
 0x22e   :  { %v1429_v46 = vpop.f32.mrf.mxu1 }
 0x22f   :  { %v2399_v29 = vmax.f32 %v2365_v18, 0.0  ;;  %v2027_v58 = vadd.f32 %v4189_v34, %v1764_v5  ;;  %v1502_v62 = vadd.f32 %v1429_v46, %v3673_v41 }
 0x231   :  { %v2218_v56 = vpop.f32.mrf.mxu0  ;;  %2433 = vst [vmem:[%s4609_s4 + $0x30] sm:$0xff] %v2399_v29  ;;  %v2290_v51 = vadd.f32 %v2215_v20, %v2027_v58  ;;  %2698 = vmatmul.msk.bf16.gmra.mxu1 %vm161_vm0, %v1311_v61  ;;  %2739 = vmatmul.msk.bf16.gmra.mxu2 %vm161_vm0, %v1574_v6  ;;  %v4327_v25 = vpop.f32.mrf.mxu3  ;;  %v1575_v6 = vpack.c.bf16 %v1555_v38, %v1554_v15 }
 0x233   :  { %v2328_v36 = vmul.f32 %v4142_v0, %v2290_v51 }
 0x234   :  { %2821 = vmatmul.msk.bf16.gmra.mxu0 %vm161_vm0, %v2100_v57  ;;  %v1692_v11 = vpop.f32.mrf.mxu2  ;;  %2783 = vmatmul.msk.bf16.gmra.mxu3 %vm161_vm0, %v1840_v42  ;;  %v2101_v57 = vpack.c.bf16 %v2081_v26, %v2080_v28  ;;  %v1557_v42 = vld [vmem:[%s4606_s0 + $0xf9] sm:$0xff] }
 0x235   :  { %v2366_v9 = vadd.f32 %v4153_v60, %v2328_v36  ;;  %v1765_v34 = vadd.f32 %v1692_v11, %v1502_v62 }
 0x236   :  { %v1431_v48 = vpop.f32.mrf.mxu1 }
 0x237   :  { %v2400_v63 = vmax.f32 %v2366_v9, 0.0  ;;  %v2028_v20 = vadd.f32 %v4223_v52, %v1765_v34  ;;  %v1292_v52 = vld [vmem:[%s4606_s0 + $0x31b] sm:$0xff]  ;;  %v1503_v44 = vadd.f32 %v1431_v48, %v3697_v17 }
 0x238   :  { %v1312_v61 = vpack.c.bf16 %v1292_v52, %v1291_v49  ;;  %v1556_v49 = vld [vmem:[%s4606_s0 + $0xf1] sm:$0xff] }
 0x239   :  { %v2220_v39 = vpop.f32.mrf.mxu0  ;;  %2434 = vst [vmem:[%s4609_s4 + $0x38] sm:$0xff] %v2400_v63  ;;  %v2291_v41 = vadd.f32 %v2218_v56, %v2028_v20  ;;  %v4362_v56 = vpop.f32.mrf.mxu3 }
 0x23b   :  { %v2329_v10 = vmul.f32 %v4142_v0, %v2291_v41 }
 0x23c   :  { %v1694_v33 = vpop.f32.mrf.mxu2 }
 0x23d   :  { %v2367_v18 = vadd.f32 %v4153_v60, %v2329_v10  ;;  %v1766_v5 = vadd.f32 %v1694_v33, %v1503_v44  ;;  %v2082_v10 = vld [vmem:[%s4606_s0 + $0xf2] sm:$0xff]  ;;  %v2083_v44 = vld [vmem:[%s4606_s0 + $0xfa] sm:$0xff] }
 0x23e   :  { %v1434_v46 = vpop.f32.mrf.mxu1 }
 0x23f   :  { %v2401_v29 = vmax.f32 %v2367_v18, 0.0  ;;  %v2029_v17 = vadd.f32 %v4235_v31, %v1766_v5  ;;  %v1504_v62 = vadd.f32 %v1434_v46, %v3713_v14  ;;  %v1576_v5 = vpack.c.bf16 %v1557_v42, %v1556_v49 }
 0x241   :  { %v2223_v58 = vpop.f32.mrf.mxu0  ;;  %2435 = vst [vmem:[%s4609_s4 + $0x40] sm:$0xff] %v2401_v29  ;;  %v2292_v51 = vadd.f32 %v2220_v39, %v2029_v17  ;;  %2699 = vmatmul.msk.bf16.gmra.mxu1 %vm161_vm0, %v1312_v61  ;;  %2740 = vmatmul.msk.bf16.gmra.mxu2 %vm161_vm0, %v1575_v6  ;;  %v1823_v39 = vld [vmem:[%s4606_s0 + $0x232] sm:$0xff]  ;;  %v4395_v52 = vpop.f32.mrf.mxu3  ;;  %v2102_v6 = vpack.c.bf16 %v2083_v44, %v2082_v10 }
 0x242   :  { %v1841_v41 = vpack.c.bf16 %v1824_v1, %v1823_v39 }
 0x243   :  { %v2330_v36 = vmul.f32 %v4142_v0, %v2292_v51 }
 0x244   :  { %2822 = vmatmul.msk.bf16.gmra.mxu0 %vm161_vm0, %v2101_v57  ;;  %v1697_v11 = vpop.f32.mrf.mxu2  ;;  %2784 = vmatmul.msk.bf16.gmra.mxu3 %vm161_vm0, %v1841_v41 }
 0x245   :  { %v2368_v31 = vadd.f32 %v4153_v60, %v2330_v36  ;;  %v1767_v9 = vadd.f32 %v1697_v11, %v1504_v62 }
 0x246   :  { %v1436_v34 = vpop.f32.mrf.mxu1 }
 0x247   :  { %v2402_v48 = vmax.f32 %v2368_v31, 0.0  ;;  %v2030_v63 = vadd.f32 %v4269_v23, %v1767_v9  ;;  %v1294_v23 = vld [vmem:[%s4606_s0 + $0x32b] sm:$0xff]  ;;  %v1505_v38 = vadd.f32 %v1436_v34, %v3737_v35 }
 0x248   :  { %v1313_v18 = vpack.c.bf16 %v1294_v23, %v1293_v54  ;;  %v2085_v54 = vld [vmem:[%s4606_s0 + $0x10a] sm:$0xff] }
 0x249   :  { %v2225_v20 = vpop.f32.mrf.mxu0  ;;  %2436 = vst [vmem:[%s4609_s4 + $0x48] sm:$0xff] %v2402_v48  ;;  %v2293_v14 = vadd.f32 %v2223_v58, %v2030_v63  ;;  %v4416_v36 = vpop.f32.mrf.mxu3  ;;  %v1296_v63 = vld [vmem:[%s4606_s0 + $0x33b] sm:$0xff] }
 0x24b   :  { %v2331_v15 = vmul.f32 %v4142_v0, %v2293_v14  ;;  %v2084_v14 = vld [vmem:[%s4606_s0 + $0x102] sm:$0xff] }
 0x24c   :  { %v1699_v28 = vpop.f32.mrf.mxu2  ;;  %v2103_v10 = vpack.c.bf16 %v2085_v54, %v2084_v14 }
 0x24d   :  { %v2369_v26 = vadd.f32 %v4153_v60, %v2331_v15  ;;  %v1768_v33 = vadd.f32 %v1699_v28, %v1505_v38 }
 0x24e   :  { %v1439_v61 = vpop.f32.mrf.mxu1 }
 0x24f   :  { %v2403_v46 = vmax.f32 %v2369_v26, 0.0  ;;  %v2031_v35 = vadd.f32 %v4281_v24, %v1768_v33  ;;  %v1506_v58 = vadd.f32 %v1439_v61, %v3753_v53  ;;  %v1295_v53 = vld [vmem:[%s4606_s0 + $0x333] sm:$0xff] }
 0x250   :  { %v1314_v42 = vpack.c.bf16 %v1296_v63, %v1295_v53 }
 0x251   :  { %v2228_v57 = vpop.f32.mrf.mxu0  ;;  %2437 = vst [vmem:[%s4609_s4 + $0x50] sm:$0xff] %v2403_v46  ;;  %v2294_v29 = vadd.f32 %v2225_v20, %v2031_v35  ;;  %2700 = vmatmul.msk.bf16.gmra.mxu1 %vm161_vm0, %v1313_v18  ;;  %2741 = vmatmul.msk.bf16.gmra.mxu2 %vm161_vm0, %v1576_v5  ;;  %v1558_v20 = vld [vmem:[%s4606_s0 + $0x101] sm:$0xff]  ;;  %v4444_v44 = vpop.f32.mrf.mxu3 }
 0x253   :  { %v2332_v17 = vmul.f32 %v4142_v0, %v2294_v29 }
 0x254   :  { %2823 = vmatmul.msk.bf16.gmra.mxu0 %vm161_vm0, %v2102_v6  ;;  %v1702_v51 = vpop.f32.mrf.mxu2 }
 0x255   :  { %v2370_v24 = vadd.f32 %v4153_v60, %v2332_v17  ;;  %v1769_v62 = vadd.f32 %v1702_v51, %v1506_v58  ;;  %v1297_v51 = vld [vmem:[%s4606_s0 + $0x343] sm:$0xff] }
 0x256   :  { %v1441_v11 = vpop.f32.mrf.mxu1 }
 0x257   :  { %v2404_v31 = vmax.f32 %v2370_v24, 0.0  ;;  %v2032_v9 = vadd.f32 %v4315_v45, %v1769_v62  ;;  %v1559_v45 = vld [vmem:[%s4606_s0 + $0x109] sm:$0xff]  ;;  %v1507_v1 = vadd.f32 %v1441_v11, %v3777_v4  ;;  %v1560_v24 = vld [vmem:[%s4606_s0 + $0x111] sm:$0xff] }
 0x258   :  { %v1577_v15 = vpack.c.bf16 %v1559_v45, %v1558_v20 }
 0x259   :  { %v2230_v34 = vpop.f32.mrf.mxu0  ;;  %2438 = vst [vmem:[%s4609_s4 + $0x58] sm:$0xff] %v2404_v31  ;;  %v2295_v48 = vadd.f32 %v2228_v57, %v2032_v9  ;;  %v1980_v17 = vpop.f32.mrf.mxu3  ;;  %v2086_v31 = vld [vmem:[%s4606_s0 + $0x112] sm:$0xff]  ;;  %v2087_v9 = vld [vmem:[%s4606_s0 + $0x11a] sm:$0xff] }
 0x25b   :  { %v2333_v39 = vmul.f32 %v4142_v0, %v2295_v48 }
 0x25c   :  { %v1704_v41 = vpop.f32.mrf.mxu2 }
 0x25d   :  { %v2371_v23 = vadd.f32 %v4153_v60, %v2333_v39  ;;  %v1770_v49 = vadd.f32 %v1704_v41, %v1507_v1  ;;  %v2104_v39 = vpack.c.bf16 %v2087_v9, %v2086_v31 }
 0x25e   :  { %v1444_v38 = vpop.f32.mrf.mxu1 }
 0x25f   :  { %v2405_v28 = vmax.f32 %v2371_v23, 0.0  ;;  %v2033_v4 = vadd.f32 %v4327_v25, %v1770_v49  ;;  %v1508_v5 = vadd.f32 %v1444_v38, %v3793_v50  ;;  %v1298_v50 = vld [vmem:[%s4606_s0 + $0x34b] sm:$0xff] }
 0x260   :  { %v1315_v63 = vpack.c.bf16 %v1298_v50, %v1297_v51 }
 0x261   :  { %v2233_v26 = vpop.f32.mrf.mxu0  ;;  %2439 = vst [vmem:[%s4609_s4 + $0x60] sm:$0xff] %v2405_v28  ;;  %v2296_v33 = vadd.f32 %v2230_v34, %v2033_v4  ;;  %2701 = vmatmul.msk.bf16.gmra.mxu1 %vm161_vm0, %v1314_v42  ;;  %2742 = vmatmul.msk.bf16.gmra.mxu2 %vm161_vm0, %v1577_v15  ;;  %v1982_v41 = vpop.f32.mrf.mxu3 }
 0x263   :  { %v2334_v18 = vmul.f32 %v4142_v0, %v2296_v33 }
 0x264   :  { %2824 = vmatmul.msk.bf16.gmra.mxu0 %vm161_vm0, %v2103_v10  ;;  %v1707_v61 = vpop.f32.mrf.mxu2 }
 0x265   :  { %v2372_v6 = vadd.f32 %v4153_v60, %v2334_v18  ;;  %v1771_v25 = vadd.f32 %v1707_v61, %v1508_v5 }
 0x266   :  { %v1446_v46 = vpop.f32.mrf.mxu1 }
 0x267   :  { %v2406_v35 = vmax.f32 %v2372_v6, 0.0  ;;  %v2034_v57 = vadd.f32 %v4362_v56, %v1771_v25  ;;  %v1561_v56 = vld [vmem:[%s4606_s0 + $0x119] sm:$0xff]  ;;  %v1509_v11 = vadd.f32 %v1446_v46, %v3817_v59 }
 0x268   :  { %v1578_v20 = vpack.c.bf16 %v1561_v56, %v1560_v24 }
 0x269   :  { %v2235_v29 = vpop.f32.mrf.mxu0  ;;  %2440 = vst [vmem:[%s4609_s4 + $0x68] sm:$0xff] %v2406_v35  ;;  %v2297_v58 = vadd.f32 %v2233_v26, %v2034_v57 }
 0x26b   :  { %v2335_v62 = vmul.f32 %v4142_v0, %v2297_v58 }
 0x26c   :  { %v1709_v34 = vpop.f32.mrf.mxu2 }
 0x26d   :  { %v2373_v48 = vadd.f32 %v4153_v60, %v2335_v62  ;;  %v1772_v53 = vadd.f32 %v1709_v34, %v1509_v11 }
 0x26e   :  { %v1449_v45 = vpop.f32.mrf.mxu1 }
 0x26f   :  { %v2407_v1 = vmax.f32 %v2373_v48, 0.0  ;;  %v2035_v14 = vadd.f32 %v4395_v52, %v1772_v53  ;;  %v1510_v49 = vadd.f32 %v1449_v45, %v3830_v32  ;;  %v1985_v32 = vpop.f32.mrf.mxu3 }
 0x271   :  { %v2238_v59 = vpop.f32.mrf.mxu0  ;;  %2441 = vst [vmem:[%s4609_s4 + $0x70] sm:$0xff] %v2407_v1  ;;  %v2298_v54 = vadd.f32 %v2235_v29, %v2035_v14  ;;  %2702 = vmatmul.msk.bf16.gmra.mxu1 %vm161_vm0, %v1315_v63  ;;  %2743 = vmatmul.msk.bf16.gmra.mxu2 %vm161_vm0, %v1578_v20 }
 0x273   :  { %v2336_v23 = vmul.f32 %v4142_v0, %v2298_v54 }
 0x274   :  { %2825 = vmatmul.msk.bf16.gmra.mxu0 %vm161_vm0, %v2104_v39  ;;  %v1712_v42 = vpop.f32.mrf.mxu2 }
 0x275   :  { %v2374_v52 = vadd.f32 %v4153_v60, %v2336_v23  ;;  %v1773_v15 = vadd.f32 %v1712_v42, %v1510_v49 }
 0x276   :  { %v1451_v38 = vpop.f32.mrf.mxu1 }
 0x277   :  { %v2408_v10 = vmax.f32 %v2374_v52, 0.0  ;;  %v2036_v28 = vadd.f32 %v4416_v36, %v1773_v15  ;;  %v1511_v18 = vadd.f32 %v1451_v38, %v3852_v43  ;;  %v1987_v56 = vpop.f32.mrf.mxu3 }
 0x279   :  { %v2240_v4 = vpop.f32.mrf.mxu0  ;;  %2442 = vst [vmem:[%s4609_s4 + $0x78] sm:$0xff] %v2408_v10  ;;  %v2299_v26 = vadd.f32 %v2238_v59, %v2036_v28 }
 0x27b   :  { %v2337_v33 = vmul.f32 %v4142_v0, %v2299_v26 }
 0x27c   :  { %v1714_v5 = vpop.f32.mrf.mxu2 }
 0x27d   :  { %v2375_v61 = vadd.f32 %v4153_v60, %v2337_v33  ;;  %v1774_v6 = vadd.f32 %v1714_v5, %v1511_v18 }
 0x27e   :  { %v1454_v25 = vpop.f32.mrf.mxu1 }
 0x27f   :  { %v2409_v46 = vmax.f32 %v2375_v61, 0.0  ;;  %v2037_v35 = vadd.f32 %v4444_v44, %v1774_v6  ;;  %v1512_v58 = vadd.f32 %v1454_v25, %v3865_v3  ;;  %v1990_v1 = vpop.f32.mrf.mxu3 }
 0x281   :  { %v2243_v36 = vpop.f32.mrf.mxu0  ;;  %2443 = vst [vmem:[%s4609_s4 + $0x80] sm:$0xff] %v2409_v46  ;;  %v2300_v57 = vadd.f32 %v2240_v4, %v2037_v35 }
 0x283   :  { %v2338_v29 = vmul.f32 %v4142_v0, %v2300_v57 }
 0x284   :  { %v1717_v43 = vpop.f32.mrf.mxu2 }
 0x285   :  { %v2376_v51 = vadd.f32 %v4153_v60, %v2338_v29  ;;  %v1775_v50 = vadd.f32 %v1717_v43, %v1512_v58 }
 0x286   :  { %v1456_v24 = vpop.f32.mrf.mxu1 }
 0x287   :  { %v2410_v62 = vmax.f32 %v2376_v51, 0.0  ;;  %v2038_v11 = vadd.f32 %v1980_v17, %v1775_v50  ;;  %v1513_v34 = vadd.f32 %v1456_v24, %v3887_v8  ;;  %v1992_v38 = vpop.f32.mrf.mxu3 }
 0x289   :  { %v2245_v31 = vpop.f32.mrf.mxu0  ;;  %2444 = vst [vmem:[%s4609_s4 + $0x88] sm:$0xff] %v2410_v62  ;;  %v2301_v44 = vadd.f32 %v2243_v36, %v2038_v11 }
 0x28b   :  { %v2339_v9 = vmul.f32 %v4142_v0, %v2301_v44 }
 0x28c   :  { %v1719_v48 = vpop.f32.mrf.mxu2 }
 0x28d   :  { %v2377_v3 = vadd.f32 %v4153_v60, %v2339_v9  ;;  %v1776_v53 = vadd.f32 %v1719_v48, %v1513_v34 }
 0x28e   :  { %v1459_v63 = vpop.f32.mrf.mxu1 }
 0x28f   :  { %v2411_v20 = vmax.f32 %v2377_v3, 0.0  ;;  %v2039_v45 = vadd.f32 %v1982_v41, %v1776_v53  ;;  %v1514_v59 = vadd.f32 %v1459_v63, %v3900_v13  ;;  %v1995_v35 = vpop.f32.mrf.mxu3 }
 0x291   :  { %v2248_v39 = vpop.f32.mrf.mxu0  ;;  %2445 = vst [vmem:[%s4609_s4 + $0x90] sm:$0xff] %v2411_v20  ;;  %v2302_v17 = vadd.f32 %v2245_v31, %v2039_v45 }
 0x293   :  { %v2340_v14 = vmul.f32 %v4142_v0, %v2302_v17 }
 0x294   :  { %v1722_v54 = vpop.f32.mrf.mxu2 }
 0x295   :  { %v2378_v8 = vadd.f32 %v4153_v60, %v2340_v14  ;;  %v1777_v23 = vadd.f32 %v1722_v54, %v1514_v59 }
 0x296   :  { %v1461_v49 = vpop.f32.mrf.mxu1 }
 0x297   :  { %v2412_v42 = vmax.f32 %v2378_v8, 0.0  ;;  %v2040_v52 = vadd.f32 %v1985_v32, %v1777_v23  ;;  %v1515_v28 = vadd.f32 %v1461_v49, %v3922_v12  ;;  %v1997_v31 = vpop.f32.mrf.mxu3 }
 0x299   :  { %v2250_v15 = vpop.f32.mrf.mxu0  ;;  %2446 = vst [vmem:[%s4609_s4 + $0x98] sm:$0xff] %v2412_v42  ;;  %v2303_v41 = vadd.f32 %v2248_v39, %v2040_v52 }
 0x29b   :  { %v2341_v10 = vmul.f32 %v4142_v0, %v2303_v41 }
 0x29c   :  { %v1724_v4 = vpop.f32.mrf.mxu2 }
 0x29d   :  { %v2379_v13 = vadd.f32 %v4153_v60, %v2341_v10  ;;  %v1778_v26 = vadd.f32 %v1724_v4, %v1515_v28 }
 0x29e   :  { %v1464_v33 = vpop.f32.mrf.mxu1 }
 0x29f   :  { %v2413_v18 = vmax.f32 %v2379_v13, 0.0  ;;  %v2041_v5 = vadd.f32 %v1987_v56, %v1778_v26  ;;  %v1516_v25 = vadd.f32 %v1464_v33, %v3935_v7  ;;  %v2000_v14 = vpop.f32.mrf.mxu3 }
 0x2a1   :  { %v2253_v61 = vpop.f32.mrf.mxu0  ;;  %2447 = vst [vmem:[%s4609_s4 + $0xa0] sm:$0xff] %v2413_v18  ;;  %v2304_v32 = vadd.f32 %v2250_v15, %v2041_v5 }
 0x2a3   :  { %v2342_v6 = vmul.f32 %v4142_v0, %v2304_v32 }
 0x2a4   :  { %v1727_v46 = vpop.f32.mrf.mxu2 }
 0x2a5   :  { %v2380_v12 = vadd.f32 %v4153_v60, %v2342_v6  ;;  %v1779_v36 = vadd.f32 %v1727_v46, %v1516_v25 }
 0x2a6   :  { %v1466_v57 = vpop.f32.mrf.mxu1 }
 0x2a7   :  { %v2414_v29 = vmax.f32 %v2380_v12, 0.0  ;;  %v2042_v58 = vadd.f32 %v1990_v1, %v1779_v36  ;;  %v1517_v24 = vadd.f32 %v1466_v57, %v3957_v19  ;;  %v2002_v10 = vpop.f32.mrf.mxu3 }
 0x2a9   :  { %v2255_v43 = vpop.f32.mrf.mxu0  ;;  %2448 = vst [vmem:[%s4609_s4 + $0xa8] sm:$0xff] %v2414_v29  ;;  %v2305_v51 = vadd.f32 %v2253_v61, %v2042_v58 }
 0x2ab   :  { %v2343_v50 = vmul.f32 %v4142_v0, %v2305_v51 }
 0x2ac   :  { %v1729_v56 = vpop.f32.mrf.mxu2 }
 0x2ad   :  { %v2381_v7 = vadd.f32 %v4153_v60, %v2343_v50  ;;  %v1780_v62 = vadd.f32 %v1729_v56, %v1517_v24 }
 0x2ae   :  { %v1469_v11 = vpop.f32.mrf.mxu1 }
 0x2af   :  { %v2415_v44 = vmax.f32 %v2381_v7, 0.0  ;;  %v2043_v9 = vadd.f32 %v1992_v38, %v1780_v62  ;;  %v1518_v53 = vadd.f32 %v1469_v11, %v3970_v16 }
 0x2b1   :  { %v2258_v34 = vpop.f32.mrf.mxu0  ;;  %2449 = vst [vmem:[%s4609_s4 + $0xb0] sm:$0xff] %v2415_v44  ;;  %v2306_v48 = vadd.f32 %v2255_v43, %v2043_v9 }
 0x2b3   :  { %v2344_v3 = vmul.f32 %v4142_v0, %v2306_v48 }
 0x2b4   :  { %v1732_v63 = vpop.f32.mrf.mxu2 }
 0x2b5   :  { %v2382_v19 = vadd.f32 %v4153_v60, %v2344_v3  ;;  %v1781_v20 = vadd.f32 %v1732_v63, %v1518_v53 }
 0x2b6   :  { %v1471_v45 = vpop.f32.mrf.mxu1 }
 0x2b7   :  { %v2416_v39 = vmax.f32 %v2382_v19, 0.0  ;;  %v2044_v1 = vadd.f32 %v1995_v35, %v1781_v20  ;;  %v1519_v8 = vadd.f32 %v1471_v45, %v3992_v55  ;;  %v2005_v35 = vpop.f32.mrf.mxu3 }
 0x2b9   :  { %v2260_v17 = vpop.f32.mrf.mxu0  ;;  %2450 = vst [vmem:[%s4609_s4 + $0xb8] sm:$0xff] %v2416_v39  ;;  %v2307_v59 = vadd.f32 %v2258_v34, %v2044_v1 }
 0x2bb   :  { %v2345_v54 = vmul.f32 %v4142_v0, %v2307_v59 }
 0x2bc   :  { %v1734_v23 = vpop.f32.mrf.mxu2 }
 0x2bd   :  { %v2383_v16 = vadd.f32 %v4153_v60, %v2345_v54  ;;  %v1782_v49 = vadd.f32 %v1734_v23, %v1519_v8 }
 0x2be   :  { %v1474_v42 = vpop.f32.mrf.mxu1 }
 0x2bf   :  { %v2417_v52 = vmax.f32 %v2383_v16, 0.0  ;;  %v2045_v15 = vadd.f32 %v1997_v31, %v1782_v49  ;;  %v1520_v4 = vadd.f32 %v1474_v42, %v4005_v21  ;;  %v2007_v62 = vpop.f32.mrf.mxu3 }
 0x2c1   :  { %v2263_v41 = vpop.f32.mrf.mxu0  ;;  %2451 = vst [vmem:[%s4609_s4 + $0xc0] sm:$0xff] %v2417_v52  ;;  %v2308_v38 = vadd.f32 %v2260_v17, %v2045_v15 }
 0x2c3   :  { %v2346_v28 = vmul.f32 %v4142_v0, %v2308_v38 }
 0x2c4   :  { %v1737_v13 = vpop.f32.mrf.mxu2 }
 0x2c5   :  { %v2384_v55 = vadd.f32 %v4153_v60, %v2346_v28  ;;  %v1783_v26 = vadd.f32 %v1737_v13, %v1520_v4 }
 0x2c6   :  { %v1476_v33 = vpop.f32.mrf.mxu1 }
 0x2c7   :  { %v2418_v18 = vmax.f32 %v2384_v55, 0.0  ;;  %v2046_v5 = vadd.f32 %v2000_v14, %v1783_v26  ;;  %v1521_v25 = vadd.f32 %v1476_v33, %v4027_v22  ;;  %v2010_v45 = vpop.f32.mrf.mxu3 }
 0x2c9   :  { %v2265_v61 = vpop.f32.mrf.mxu0  ;;  %2452 = vst [vmem:[%s4609_s4 + $0xc8] sm:$0xff] %v2418_v18  ;;  %v2309_v32 = vadd.f32 %v2263_v41, %v2046_v5 }
 0x2cb   :  { %v2347_v6 = vmul.f32 %v4142_v0, %v2309_v32 }
 0x2cc   :  { %v1739_v46 = vpop.f32.mrf.mxu2 }
 0x2cd   :  { %v2385_v21 = vadd.f32 %v4153_v60, %v2347_v6  ;;  %v1784_v12 = vadd.f32 %v1739_v46, %v1521_v25 }
 0x2ce   :  { %v1479_v36 = vpop.f32.mrf.mxu1 }
 0x2cf   :  { %v2419_v57 = vmax.f32 %v2385_v21, 0.0  ;;  %v2047_v29 = vadd.f32 %v2002_v10, %v1784_v12  ;;  %v1522_v50 = vadd.f32 %v1479_v36, %v4040_v2  ;;  %v2012_v42 = vpop.f32.mrf.mxu3 }
 0x2d1   :  { %v2268_v58 = vpop.f32.mrf.mxu0  ;;  %2453 = vst [vmem:[%s4609_s4 + $0xd0] sm:$0xff] %v2419_v57  ;;  %v2310_v43 = vadd.f32 %v2265_v61, %v2047_v29 }
 0x2d3   :  { %v2348_v51 = vmul.f32 %v4142_v0, %v2310_v43 }
 0x2d4   :  { %v1742_v24 = vpop.f32.mrf.mxu2 }
 0x2d5   :  { %v2386_v22 = vadd.f32 %v4153_v60, %v2348_v51  ;;  %v1785_v56 = vadd.f32 %v1742_v24, %v1522_v50  ;;  %v2876_v24 = vld [vmem:[%s4607_s2] ss:$0 sm:$0xff] }
 0x2d6   :  { %v1481_v7 = vpop.f32.mrf.mxu1 }
 0x2d7   :  { %v2420_v11 = vmax.f32 %v2386_v22, 0.0  ;;  %v2048_v31 = vadd.f32 %v2005_v35, %v1785_v56  ;;  %v1523_v48 = vadd.f32 %v1481_v7, %v4062_v27  ;;  %v2015_v18 = vpop.f32.mrf.mxu3 }
 0x2d9   :  { %v2270_v44 = vpop.f32.mrf.mxu0  ;;  %2454 = vst [vmem:[%s4609_s4 + $0xd8] sm:$0xff] %v2420_v11  ;;  %v2311_v9 = vadd.f32 %v2268_v58, %v2048_v31 }
 0x2db   :  { %v2349_v34 = vmul.f32 %v4142_v0, %v2311_v9 }
 0x2dc   :  { %v1744_v3 = vpop.f32.mrf.mxu2 }
 0x2dd   :  { %v2387_v2 = vadd.f32 %v4153_v60, %v2349_v34  ;;  %v1786_v53 = vadd.f32 %v1744_v3, %v1523_v48 }
 0x2de   :  { %v1484_v63 = vpop.f32.mrf.mxu1 }
 0x2df   :  { %v2421_v19 = vmax.f32 %v2387_v2, 0.0  ;;  %v2049_v20 = vadd.f32 %v2007_v62, %v1786_v53  ;;  %v1524_v14 = vadd.f32 %v1484_v63, %v4075_v37  ;;  %v2017_v29 = vpop.f32.mrf.mxu3 }
 0x2e1   :  { %2455 = vst [vmem:[%s4609_s4 + $0xe0] sm:$0xff] %v2421_v19  ;;  %v2312_v39 = vadd.f32 %v2270_v44, %v2049_v20  ;;  %v2273_v1 = vpop.f32.mrf.mxu0 }
 0x2e3   :  { %v2350_v17 = vmul.f32 %v4142_v0, %v2312_v39 }
 0x2e4   :  { %v1747_v59 = vpop.f32.mrf.mxu2 }
 0x2e5   :  { %v2388_v27 = vadd.f32 %v4153_v60, %v2350_v17  ;;  %v1787_v54 = vadd.f32 %v1747_v59, %v1524_v14 }
 0x2e6   :  { %v1486_v8 = vpop.f32.mrf.mxu1 }
 0x2e7   :  { %v2422_v23 = vmax.f32 %v2388_v27, 0.0  ;;  %v2050_v16 = vadd.f32 %v2010_v45, %v1787_v54  ;;  %v1525_v15 = vadd.f32 %v1486_v8, %v4097_v47 }
 0x2e9   :  { %2456 = vst [vmem:[%s4609_s4 + $0xe8] sm:$0xff] %v2422_v23  ;;  %v2313_v49 = vadd.f32 %v2273_v1, %v2050_v16  ;;  %v2275_v41 = vpop.f32.mrf.mxu0 }
 0x2eb   :  { %v2351_v52 = vmul.f32 %v4142_v0, %v2313_v49 }
 0x2ec   :  { %v1749_v38 = vpop.f32.mrf.mxu2 }
 0x2ed   :  { %v2389_v37 = vadd.f32 %v4153_v60, %v2351_v52  ;;  %v1788_v10 = vadd.f32 %v1749_v38, %v1525_v15 }
 0x2ee   :  { %v1489_v28 = vpop.f32.mrf.mxu1 }
 0x2ef   :  { %v2423_v4 = vmax.f32 %v2389_v37, 0.0  ;;  %v2051_v13 = vadd.f32 %v2012_v42, %v1788_v10  ;;  %v1526_v33 = vadd.f32 %v1489_v28, %v4110_v40 }
 0x2f1   :  { %2457 = vst [vmem:[%s4609_s4 + $0xf0] sm:$0xff] %v2423_v4  ;;  %v2314_v55 = vadd.f32 %v2275_v41, %v2051_v13  ;;  %v2278_v32 = vpop.f32.mrf.mxu0 }
 0x2f3   :  { %v2352_v26 = vmul.f32 %v4142_v0, %v2314_v55 }
 0x2f4   :  { %v1752_v5 = vpop.f32.mrf.mxu2 }
 0x2f5   :  { %v2390_v47 = vadd.f32 %v4153_v60, %v2352_v26  ;;  %v1789_v61 = vadd.f32 %v1752_v5, %v1526_v33 }
 0x2f6   :  { %v1491_v46 = vpop.f32.mrf.mxu1 }
 0x2f7   :  { %v2424_v6 = vmax.f32 %v2390_v47, 0.0  ;;  %v2052_v25 = vadd.f32 %v2015_v18, %v1789_v61  ;;  %v1527_v12 = vadd.f32 %v1491_v46, %v4132_v30 }
 0x2f9   :  { %2458 = vst [vmem:[%s4609_s4 + $0xf8] sm:$0xff] %v2424_v6  ;;  %v2315_v35 = vadd.f32 %v2278_v32, %v2052_v25  ;;  %v2280_v51 = vpop.f32.mrf.mxu0 }
 0x2fb   :  { %v2353_v21 = vmul.f32 %v4142_v0, %v2315_v35 }
 0x2fc   :  { %v1754_v36 = vpop.f32.mrf.mxu2 }
 0x2fd   :  { %v2391_v40 = vadd.f32 %v4153_v60, %v2353_v21  ;;  %v1790_v57 = vadd.f32 %v1754_v36, %v1527_v12 }
 0x2ff   :  { %v2425_v58 = vmax.f32 %v2391_v40, 0.0  ;;  %v2053_v43 = vadd.f32 %v2017_v29, %v1790_v57 }
 0x301   :  { %2459 = vst [vmem:[%s4609_s4 + $0x100] sm:$0xff] %v2425_v58  ;;  %v2316_v50 = vadd.f32 %v2280_v51, %v2053_v43 }
 0x303   :  { %v2354_v0 = vmul.f32 %v2876_v24, %v2316_v50 }
 0x305   :  { %v2392_v30 = vadd.f32 %v4153_v60, %v2354_v0 }
 0x307   :  { %v2426_v22 = vmax.f32 %v2392_v30, 0.0 }
 0x309   :  { %2460 = vst [vmem:[%s4609_s4 + $0x108] sm:$0xff] %v2426_v22 }

// kernel: graphfeat_forward.10
= control target key start
LH: loop header
LB: loop body
LE: loop exit
PB: predicated region body
PF: predicated region fallthrough
CT: control target
= control target key end

     0   :  { %vm87_vm0 = vcmask 523264   ;;  %s1802_s1 = inlined_call_operand.vmem [shape: bf16[9,64,128], index: 1, kind: input, shape index: {}]   ;;  %s1803_s0 = inlined_call_operand.vmem [shape: f32[324,64], index: 0, kind: input, shape index: {}]   ;;  %s1804_s2 = inlined_call_operand.vmem [shape: f32[1,128], index: 2, kind: input, shape index: {}]   ;;  %s1805_s3 = inlined_call_operand.vmem [shape: f32[1,128], index: 3, kind: input, shape index: {}]   ;;  %s1806_s4 = inlined_call_operand.vmem [shape: f32[72,128], index: 4, kind: output, shape index: {}]  }
   0x1   :  { %v1244_v0 = vld [vmem:[%s1802_s1 + $0x38] sm:$0xff]  ;;  %v1243_v1 = vld [vmem:[%s1802_s1 + $0x30] sm:$0xff]  ;;  %v1242_v2 = vld [vmem:[%s1802_s1 + $0x28] sm:$0xff] }
   0x2   :  { %1273 = vmatpush.bf16.msra.mxu1 %v1244_v0  ;;  %1274 = vmatpush.bf16.msra.mxu2 %v1244_v0  ;;  %v1241_v3 = vld [vmem:[%s1802_s1 + $0x20] sm:$0xff]  ;;  %v43_v5 = vld [vmem:[%s1803_s0 + $0x69] sm:$0xff]  ;;  %v44_v6 = vld [vmem:[%s1803_s0 + $0x71] sm:$0xff] }
   0x3   :  { %1275 = vmatpush.bf16.msra.mxu3 %v1244_v0  ;;  %107 = vmatpush.bf16.msra.mxu0 %v1244_v0  ;;  %v42_v4 = vld [vmem:[%s1803_s0 + $0x61] sm:$0xff]  ;;  %v45_v7 = vld [vmem:[%s1803_s0 + $0x79] sm:$0xff]  ;;  %v48_v12 = vld [vmem:[%s1803_s0 + $0x91] sm:$0xff] }
   0x4   :  { %v1248_v8 = vld [vmem:[%s1802_s1 + $0x58] sm:$0xff]  ;;  %v50_v10 = vpack.c.bf16 %v43_v5, %v42_v4  ;;  %v51_v11 = vpack.c.bf16 %v45_v7, %v44_v6  ;;  %v1239_v17 = vld [vmem:[%s1802_s1 + $0x10] sm:$0xff]  ;;  %v53_v19 = vpack.c.bf16 %v48_v12, %v48_v12  ;;  %v1238_v23 = vld [vmem:[%s1802_s1 + $0x8] sm:$0xff] }
   0x5   :  { %v1240_v9 = vld [vmem:[%s1802_s1 + $0x18] sm:$0xff]  ;;  %v1247_v18 = vld [vmem:[%s1802_s1 + $0x50] sm:$0xff]  ;;  %v1246_v24 = vld [vmem:[%s1802_s1 + $0x48] sm:$0xff] }
   0x6   :  { %1276 = vmatpush.bf16.msra.mxu1 %v1243_v1  ;;  %1277 = vmatpush.bf16.msra.mxu2 %v1243_v1  ;;  %v40_v13 = vld [vmem:[%s1803_s0 + $0x51] sm:$0xff]  ;;  %v41_v14 = vld [vmem:[%s1803_s0 + $0x59] sm:$0xff]  ;;  %v1250_v25 = vld [vmem:[%s1802_s1 + $0x68] sm:$0xff] }
   0x7   :  { %1278 = vmatpush.bf16.msra.mxu3 %v1243_v1  ;;  %108 = vmatpush.bf16.msra.mxu0 %v1243_v1  ;;  %v1252_v15 = vld [vmem:[%s1802_s1 + $0x78] sm:$0xff]  ;;  %v49_v20 = vpack.c.bf16 %v41_v14, %v40_v13  ;;  %v1251_v21 = vld [vmem:[%s1802_s1 + $0x70] sm:$0xff]  ;;  %v1254_v26 = vld [vmem:[%s1802_s1 + $0x88] sm:$0xff] }
   0x8   :  { %v1256_v16 = vld [vmem:[%s1802_s1 + $0x98] sm:$0xff]  ;;  %v1255_v22 = vld [vmem:[%s1802_s1 + $0x90] sm:$0xff]  ;;  %v1237_v27 = vld [vmem:[%s1802_s1] sm:$0xff] }
   0x9   :  { %v1245_v28 = vld [vmem:[%s1802_s1 + $0x40] sm:$0xff]  ;;  %v1264_v29 = vld [vmem:[%s1802_s1 + $0xd8] sm:$0xff]  ;;  %v47_v32 = vld [vmem:[%s1803_s0 + $0x89] sm:$0xff] }
   0xa   :  { %1279 = vmatpush.bf16.msra.mxu1 %v1242_v2  ;;  %1280 = vmatpush.bf16.msra.mxu2 %v1242_v2  ;;  %v1260_v30 = vld [vmem:[%s1802_s1 + $0xb8] sm:$0xff]  ;;  %v46_v31 = vld [vmem:[%s1803_s0 + $0x81] sm:$0xff]  ;;  %v313_v42 = vld [vmem:[%s1803_s0 + $0xaa] sm:$0xff] }
   0xb   :  { %1281 = vmatpush.bf16.msra.mxu3 %v1242_v2  ;;  %109 = vmatpush.bf16.msra.mxu0 %v1242_v2  ;;  %v18_v33 = vld [vmem:[%s1803_s0] sm:$0xff]  ;;  %v19_v34 = vld [vmem:[%s1803_s0 + $0x8] sm:$0xff]  ;;  %v1268_v37 = vld [vmem:[%s1802_s1 + $0xf8] sm:$0xff]  ;;  %v52_v40 = vpack.c.bf16 %v47_v32, %v46_v31 }
   0xc   :  { %v1249_v35 = vld [vmem:[%s1802_s1 + $0x60] sm:$0xff]  ;;  %v1272_v38 = vld [vmem:[%s1802_s1 + $0x118] sm:$0xff]  ;;  %v27_v41 = vpack.c.bf16 %v19_v34, %v18_v33  ;;  %v1263_v47 = vld [vmem:[%s1802_s1 + $0xd0] sm:$0xff] }
   0xd   :  { %v1253_v36 = vld [vmem:[%s1802_s1 + $0x80] sm:$0xff]  ;;  %v416_v43 = vld [vmem:[%s1803_s0 + $0xf3] sm:$0xff]  ;;  %v1461_v54 = vld [vmem:[%s1803_s0 + $0x9] sm:$0xff] }
   0xe   :  { %1282 = vmatpush.bf16.msra.mxu1 %v1241_v3  ;;  %1283 = vmatpush.bf16.msra.mxu2 %v1241_v3  ;;  %v312_v39 = vld [vmem:[%s1803_s0 + $0xa2] sm:$0xff]  ;;  %v1267_v48 = vld [vmem:[%s1802_s1 + $0xf0] sm:$0xff]  ;;  %v21_v52 = vld [vmem:[%s1803_s0 + $0x18] sm:$0xff] }
   0xf   :  { %1284 = vmatpush.bf16.msra.mxu3 %v1241_v3  ;;  %110 = vmatpush.bf16.msra.mxu0 %v1241_v3  ;;  %v417_v44 = vld [vmem:[%s1803_s0 + $0xfb] sm:$0xff]  ;;  %v321_v45 = vpack.c.bf16 %v313_v42, %v312_v39  ;;  %v1259_v49 = vld [vmem:[%s1802_s1 + $0xb0] sm:$0xff]  ;;  %v418_v59 = vld [vmem:[%s1803_s0 + $0x103] sm:$0xff] }
  0x10   :  { %v425_v46 = vpack.c.bf16 %v417_v44, %v416_v43  ;;  %v1271_v50 = vld [vmem:[%s1802_s1 + $0x110] sm:$0xff]  ;;  %v208_v53 = vld [vmem:[%s1803_s0 + $0x1] sm:$0xff]  ;;  %v1503_v5 = vld [vmem:[%s1803_s0 + $0x19] sm:$0xff] }
  0x11   :  { %1009 = vmatmul.msk.bf16.vlgmr.msra.gmra.mxu1 %vm87_vm0, %v50_v10  ;;  %1010 = vmatmul.msk.bf16.vlgmr.msra.gmra.mxu2 %vm87_vm0, %v51_v11  ;;  %v20_v51 = vld [vmem:[%s1803_s0 + $0x10] sm:$0xff]  ;;  %v217_v57 = vpack.c.bf16 %v1461_v54, %v208_v53  ;;  %v315_v58 = vld [vmem:[%s1803_s0 + $0xba] sm:$0xff]  ;;  %v1262_v63 = vld [vmem:[%s1802_s1 + $0xc8] sm:$0xff] }
  0x12   :  { %274 = vmatpush.bf16.msrb.mxu2 %v1248_v8  ;;  %179 = vmatpush.bf16.msrb.mxu1 %v1240_v9  ;;  %v314_v55 = vld [vmem:[%s1803_s0 + $0xb2] sm:$0xff]  ;;  %v28_v56 = vpack.c.bf16 %v21_v52, %v20_v51  ;;  %v1266_v0 = vld [vmem:[%s1802_s1 + $0xe8] sm:$0xff]  ;;  %v22_v2 = vld [vmem:[%s1803_s0 + $0x20] sm:$0xff] }
  0x13   :  { %378 = vmatpush.bf16.msrb.mxu3 %v1252_v15  ;;  %482 = vmatpush.bf16.msrb.mxu0 %v1256_v16  ;;  %v419_v60 = vld [vmem:[%s1803_s0 + $0x10b] sm:$0xff]  ;;  %v322_v61 = vpack.c.bf16 %v315_v58, %v314_v55  ;;  %v316_v6 = vld [vmem:[%s1803_s0 + $0xc2] sm:$0xff]  ;;  %v420_v10 = vld [vmem:[%s1803_s0 + $0x113] sm:$0xff] }
  0x14   :  { %1012 = vmatmul.msk.bf16.vlgmr.msra.gmra.mxu3 %vm87_vm0, %v53_v19  ;;  %1008 = vmatmul.msk.bf16.vlgmr.msra.gmra.mxu0 %vm87_vm0, %v49_v20  ;;  %v426_v62 = vpack.c.bf16 %v419_v60, %v418_v59  ;;  %v1258_v1 = vld [vmem:[%s1802_s1 + $0xa8] sm:$0xff]  ;;  %v1498_v4 = vld [vmem:[%s1803_s0 + $0x11] sm:$0xff]  ;;  %v421_v11 = vld [vmem:[%s1803_s0 + $0x11b] sm:$0xff] }
  0x15   :  { %v23_v3 = vld [vmem:[%s1803_s0 + $0x28] sm:$0xff]  ;;  %v218_v8 = vpack.c.bf16 %v1503_v5, %v1498_v4  ;;  %v427_v13 = vpack.c.bf16 %v421_v11, %v420_v10  ;;  %v1261_v15 = vld [vmem:[%s1802_s1 + $0xc0] sm:$0xff]  ;;  %v25_v19 = vld [vmem:[%s1803_s0 + $0x38] sm:$0xff] }
  0x16   :  { %180 = vmatpush.bf16.msrb.mxu1 %v1239_v17  ;;  %275 = vmatpush.bf16.msrb.mxu2 %v1247_v18  ;;  %v29_v7 = vpack.c.bf16 %v23_v3, %v22_v2  ;;  %v317_v9 = vld [vmem:[%s1803_s0 + $0xca] sm:$0xff]  ;;  %v1257_v16 = vld [vmem:[%s1802_s1 + $0xa0] sm:$0xff]  ;;  %v522_v51 = vld [vmem:[%s1803_s0 + $0xb3] sm:$0xff] }
  0x17   :  { %379 = vmatpush.bf16.msrb.mxu3 %v1251_v21  ;;  %483 = vmatpush.bf16.msrb.mxu0 %v1255_v22  ;;  %v323_v12 = vpack.c.bf16 %v317_v9, %v316_v6  ;;  %v1270_v14 = vld [vmem:[%s1802_s1 + $0x108] sm:$0xff]  ;;  %v1265_v17 = vld [vmem:[%s1802_s1 + $0xe0] sm:$0xff]  ;;  %v24_v18 = vld [vmem:[%s1803_s0 + $0x30] sm:$0xff] }
  0x18   :  { %v1544_v20 = vld [vmem:[%s1803_s0 + $0x21] sm:$0xff]  ;;  %v1549_v21 = vld [vmem:[%s1803_s0 + $0x29] sm:$0xff]  ;;  %v318_v22 = vld [vmem:[%s1803_s0 + $0xd2] sm:$0xff] }
  0x19   :  { %v26_v31 = vld [vmem:[%s1803_s0 + $0x40] sm:$0xff]  ;;  %v1578_v32 = vld [vmem:[%s1803_s0 + $0x31] sm:$0xff] }
  0x1a   :  { %181 = vmatpush.bf16.msrb.mxu1 %v1238_v23  ;;  %276 = vmatpush.bf16.msrb.mxu2 %v1246_v24  ;;  %v30_v23 = vpack.c.bf16 %v25_v19, %v24_v18  ;;  %v219_v24 = vpack.c.bf16 %v1549_v21, %v1544_v20  ;;  %v1583_v33 = vld [vmem:[%s1803_s0 + $0x39] sm:$0xff]  ;;  %v31_v34 = vpack.c.bf16 %v26_v31, %v26_v31  ;;  %v521_v42 = vld [vmem:[%s1803_s0 + $0xab] sm:$0xff]  ;;  %v835_v59 = vld [vmem:[%s1803_s0 + $0x22] sm:$0xff] }
  0x1b   :  { %380 = vmatpush.bf16.msrb.mxu3 %v1250_v25  ;;  %484 = vmatpush.bf16.msrb.mxu0 %v1254_v26  ;;  %v319_v25 = vld [vmem:[%s1803_s0 + $0xda] sm:$0xff]  ;;  %v422_v26 = vld [vmem:[%s1803_s0 + $0x123] sm:$0xff]  ;;  %v635_v18 = vpack.c.bf16 %v1578_v32, %v1549_v21  ;;  %v735_v19 = vld [vmem:[%s1803_s0 + $0x92] sm:$0xff] }
  0x1c   :  { %v728_v43 = vld [vmem:[%s1803_s0 + $0x5a] sm:$0xff]  ;;  %v730_v53 = vld [vmem:[%s1803_s0 + $0x6a] sm:$0xff]  ;;  %v733_v2 = vld [vmem:[%s1803_s0 + $0x82] sm:$0xff] }
  0x1d   :  { %v523_v52 = vld [vmem:[%s1803_s0 + $0xbb] sm:$0xff]  ;;  %v836_v3 = vld [vmem:[%s1803_s0 + $0x2a] sm:$0xff] }
  0x1e   :  { %182 = vmatpush.bf16.msrb.mxu1 %v1237_v27  ;;  %277 = vmatpush.bf16.msrb.mxu2 %v1245_v28  ;;  %v423_v27 = vld [vmem:[%s1803_s0 + $0x12b] sm:$0xff]  ;;  %v324_v28 = vpack.c.bf16 %v319_v25, %v318_v22  ;;  %v530_v55 = vpack.c.bf16 %v523_v52, %v522_v51  ;;  %v834_v58 = vld [vmem:[%s1803_s0 + $0x1a] sm:$0xff]  ;;  %v839_v22 = vld [vmem:[%s1803_s0 + $0x42] sm:$0xff] }
  0x1f   :  { %381 = vmatpush.bf16.msrb.mxu3 %v1249_v35  ;;  %485 = vmatpush.bf16.msrb.mxu0 %v1253_v36  ;;  %v220_v35 = vpack.c.bf16 %v1583_v33, %v1578_v32  ;;  %v320_v36 = vld [vmem:[%s1803_s0 + $0xe2] sm:$0xff] }
  0x21   :  { %1011 = vmatmul.msk.bf16.gmra.mxu2 %vm87_vm0, %v52_v40  ;;  %1029 = vmatmul.msk.bf16.vlgmr.msrb.gmra.mxu1 %vm87_vm0, %v27_v41  ;;  %v1600_v40 = vld [vmem:[%s1803_s0 + $0x41] sm:$0xff] }
  0x22   :  { %690 = vmatpush.bf16.msra.mxu2 %v1264_v29  ;;  %586 = vmatpush.bf16.msra.mxu1 %v1260_v30  ;;  %v428_v29 = vpack.c.bf16 %v423_v27, %v422_v26  ;;  %v1269_v30 = vld [vmem:[%s1802_s1 + $0x100] sm:$0xff]  ;;  %v221_v44 = vpack.c.bf16 %v1600_v40, %v1600_v40 }
  0x23   :  { %794 = vmatpush.bf16.msra.mxu3 %v1268_v37  ;;  %898 = vmatpush.bf16.msra.mxu0 %v1272_v38  ;;  %v424_v37 = vld [vmem:[%s1803_s0 + $0x133] sm:$0xff]  ;;  %v325_v38 = vpack.c.bf16 %v320_v36, %v320_v36  ;;  %v520_v41 = vld [vmem:[%s1803_s0 + $0xa3] sm:$0xff] }
  0x24   :  { %1087 = vmatmul.msk.bf16.vlgmr.msrb.gmra.mxu3 %vm87_vm0, %v321_v45  ;;  %1116 = vmatmul.msk.bf16.vlgmr.msrb.gmra.mxu0 %vm87_vm0, %v425_v46  ;;  %v429_v39 = vpack.c.bf16 %v424_v37, %v424_v37  ;;  %v529_v45 = vpack.c.bf16 %v521_v42, %v520_v41  ;;  %v729_v46 = vld [vmem:[%s1803_s0 + $0x62] sm:$0xff]  ;;  %v636_v37 = vpack.c.bf16 %v1600_v40, %v1583_v33 }
  0x26   :  { %691 = vmatpush.bf16.msra.mxu2 %v1263_v47  ;;  %587 = vmatpush.bf16.msra.mxu1 %v1259_v49  ;;  %v832_v47 = vld [vmem:[%s1803_s0 + $0xa] sm:$0xff]  ;;  %v737_v49 = vpack.c.bf16 %v729_v46, %v728_v43 }
  0x27   :  { %795 = vmatpush.bf16.msra.mxu3 %v1267_v48  ;;  %899 = vmatpush.bf16.msra.mxu0 %v1271_v50  ;;  %v833_v48 = vld [vmem:[%s1803_s0 + $0x12] sm:$0xff] }
  0x28   :  { %v841_v50 = vpack.c.bf16 %v833_v48, %v832_v47 }
  0x2a   :  { %692 = vmatpush.bf16.msra.mxu2 %v1262_v63  ;;  %588 = vmatpush.bf16.msra.mxu1 %v1258_v1  ;;  %v732_v63 = vld [vmem:[%s1803_s0 + $0x7a] sm:$0xff]  ;;  %v634_v1 = vpack.c.bf16 %v1544_v20, %v1503_v5 }
  0x2b   :  { %796 = vmatpush.bf16.msra.mxu3 %v1266_v0  ;;  %900 = vmatpush.bf16.msra.mxu0 %v1270_v14  ;;  %v527_v14 = vld [vmem:[%s1803_s0 + $0xdb] sm:$0xff] }
  0x2c   :  { %v838_v20 = vld [vmem:[%s1803_s0 + $0x3a] sm:$0xff] }
  0x2d   :  { %v844_v27 = vpack.c.bf16 %v839_v22, %v838_v20 }
  0x2e   :  { %693 = vmatpush.bf16.msra.mxu2 %v1261_v15  ;;  %589 = vmatpush.bf16.msra.mxu1 %v1257_v16  ;;  %v734_v16 = vld [vmem:[%s1803_s0 + $0x8a] sm:$0xff] }
  0x2f   :  { %797 = vmatpush.bf16.msra.mxu3 %v1265_v17  ;;  %901 = vmatpush.bf16.msra.mxu0 %v1269_v30  ;;  %v740_v26 = vpack.c.bf16 %v735_v19, %v734_v16 }
  0x31   :  { %1030 = vmatmul.msk.bf16.gmra.mxu1 %vm87_vm0, %v28_v56  ;;  %1058 = vmatmul.msk.bf16.vlgmr.msrb.gmra.mxu2 %vm87_vm0, %v217_v57  ;;  %v633_v56 = vpack.c.bf16 %v1498_v4, %v1461_v54  ;;  %v731_v57 = vld [vmem:[%s1803_s0 + $0x72] sm:$0xff]  ;;  %v524_v54 = vld [vmem:[%s1803_s0 + $0xc3] sm:$0xff] }
  0x32   :  { %v738_v60 = vpack.c.bf16 %v731_v57, %v730_v53  ;;  %v837_v4 = vld [vmem:[%s1803_s0 + $0x32] sm:$0xff]  ;;  %v632_v53 = vld [vmem:[%s1803_s0 + $0x49] sm:$0xff] }
  0x33   :  { %v637_v57 = vpack.c.bf16 %v632_v53, %v632_v53 }
  0x34   :  { %1088 = vmatmul.msk.bf16.gmra.mxu3 %vm87_vm0, %v322_v61  ;;  %1117 = vmatmul.msk.bf16.gmra.mxu0 %vm87_vm0, %v426_v62  ;;  %v842_v61 = vpack.c.bf16 %v835_v59, %v834_v58  ;;  %v525_v62 = vld [vmem:[%s1803_s0 + $0xcb] sm:$0xff] }
  0x35   :  { %v531_v0 = vpack.c.bf16 %v525_v62, %v524_v54 }
  0x41   :  { %1031 = vmatmul.msk.bf16.gmra.mxu1 %vm87_vm0, %v29_v7  ;;  %1059 = vmatmul.msk.bf16.gmra.mxu2 %vm87_vm0, %v218_v8  ;;  %v739_v7 = vpack.c.bf16 %v733_v2, %v732_v63  ;;  %v843_v8 = vpack.c.bf16 %v837_v4, %v836_v3 }
  0x44   :  { %1089 = vmatmul.msk.bf16.gmra.mxu3 %vm87_vm0, %v323_v12  ;;  %1118 = vmatmul.msk.bf16.gmra.mxu0 %vm87_vm0, %v427_v13  ;;  %v526_v13 = vld [vmem:[%s1803_s0 + $0xd3] sm:$0xff] }
  0x45   :  { %v532_v17 = vpack.c.bf16 %v527_v14, %v526_v13 }
  0x51   :  { %1032 = vmatmul.msk.bf16.gmra.mxu1 %vm87_vm0, %v30_v23  ;;  %1060 = vmatmul.msk.bf16.gmra.mxu2 %vm87_vm0, %v219_v24 }
  0x54   :  { %1090 = vmatmul.msk.bf16.gmra.mxu3 %vm87_vm0, %v324_v28  ;;  %1119 = vmatmul.msk.bf16.gmra.mxu0 %vm87_vm0, %v428_v29 }
  0x61   :  { %1033 = vmatmul.msk.bf16.gmra.mxu1 %vm87_vm0, %v31_v34  ;;  %1061 = vmatmul.msk.bf16.gmra.mxu2 %vm87_vm0, %v220_v35  ;;  %v528_v34 = vld [vmem:[%s1803_s0 + $0xe3] sm:$0xff] }
  0x62   :  { %v533_v36 = vpack.c.bf16 %v528_v34, %v528_v34 }
  0x64   :  { %1091 = vmatmul.msk.bf16.gmra.mxu3 %vm87_vm0, %v325_v38  ;;  %1120 = vmatmul.msk.bf16.gmra.mxu0 %vm87_vm0, %v429_v39  ;;  %v736_v38 = vld [vmem:[%s1803_s0 + $0x9a] sm:$0xff]  ;;  %v840_v39 = vld [vmem:[%s1803_s0 + $0x4a] sm:$0xff] }
  0x71   :  { %1062 = vmatmul.msk.bf16.gmra.mxu2 %vm87_vm0, %v221_v44  ;;  %1145 = vmatmul.msk.bf16.vlgmr.msra.gmra.mxu1 %vm87_vm0, %v529_v45  ;;  %v741_v44 = vpack.c.bf16 %v736_v38, %v736_v38  ;;  %v845_v45 = vpack.c.bf16 %v840_v39, %v840_v39 }
  0x74   :  { %1203 = vmatmul.msk.bf16.vlgmr.msra.gmra.mxu3 %vm87_vm0, %v737_v49  ;;  %1232 = vmatmul.msk.bf16.vlgmr.msra.gmra.mxu0 %vm87_vm0, %v841_v50 }
  0x81   :  { %1146 = vmatmul.msk.bf16.gmra.mxu1 %vm87_vm0, %v530_v55  ;;  %1174 = vmatmul.msk.bf16.vlgmr.msra.gmra.mxu2 %vm87_vm0, %v633_v56 }
  0x84   :  { %1204 = vmatmul.msk.bf16.gmra.mxu3 %vm87_vm0, %v738_v60  ;;  %1233 = vmatmul.msk.bf16.gmra.mxu0 %vm87_vm0, %v842_v61 }
  0x8e   :  { %v117_v6 = vpop.f32.mrf.mxu1 }
  0x91   :  { %1147 = vmatmul.msk.bf16.gmra.mxu1 %vm87_vm0, %v531_v0  ;;  %1175 = vmatmul.msk.bf16.gmra.mxu2 %vm87_vm0, %v634_v1  ;;  %v112_v5 = vpop.f32.mrf.mxu0 }
  0x94   :  { %v122_v9 = vpop.f32.mrf.mxu2  ;;  %1205 = vmatmul.msk.bf16.gmra.mxu3 %vm87_vm0, %v739_v7  ;;  %1234 = vmatmul.msk.bf16.gmra.mxu0 %vm87_vm0, %v843_v8 }
  0x96   :  { %v119_v10 = vpop.f32.mrf.mxu1 }
  0x97   :  { %v1674_v11 = vpop.f32.mrf.mxu3 }
  0x99   :  { %v114_v12 = vpop.f32.mrf.mxu0 }
  0x9c   :  { %v124_v15 = vpop.f32.mrf.mxu2 }
  0x9e   :  { %v184_v23 = vpop.f32.mrf.mxu1 }
  0x9f   :  { %v185_v24 = vadd.f32 %v184_v23, %v112_v5  ;;  %v134_v25 = vpop.f32.mrf.mxu3 }
  0xa1   :  { %1148 = vmatmul.msk.bf16.gmra.mxu1 %vm87_vm0, %v532_v17  ;;  %1176 = vmatmul.msk.bf16.gmra.mxu2 %vm87_vm0, %v635_v18  ;;  %v487_v21 = vpop.f32.mrf.mxu0 }
  0xa4   :  { %v127_v28 = vpop.f32.mrf.mxu2  ;;  %1206 = vmatmul.msk.bf16.gmra.mxu3 %vm87_vm0, %v740_v26  ;;  %1235 = vmatmul.msk.bf16.gmra.mxu0 %vm87_vm0, %v844_v27 }
  0xa6   :  { %v186_v29 = vpop.f32.mrf.mxu1 }
  0xa7   :  { %v187_v30 = vadd.f32 %v186_v29, %v114_v12  ;;  %v383_v31 = vpop.f32.mrf.mxu3 }
  0xa9   :  { %v489_v32 = vpop.f32.mrf.mxu0 }
  0xac   :  { %v129_v35 = vpop.f32.mrf.mxu2 }
  0xae   :  { %v189_v41 = vpop.f32.mrf.mxu1 }
  0xaf   :  { %v190_v42 = vadd.f32 %v189_v41, %v117_v6  ;;  %v385_v43 = vpop.f32.mrf.mxu3 }
  0xb1   :  { %1149 = vmatmul.msk.bf16.gmra.mxu1 %vm87_vm0, %v533_v36  ;;  %1177 = vmatmul.msk.bf16.gmra.mxu2 %vm87_vm0, %v636_v37  ;;  %v492_v46 = vpop.f32.mrf.mxu0 }
  0xb4   :  { %v279_v47 = vpop.f32.mrf.mxu2  ;;  %1207 = vmatmul.msk.bf16.gmra.mxu3 %vm87_vm0, %v741_v44  ;;  %1236 = vmatmul.msk.bf16.gmra.mxu0 %vm87_vm0, %v845_v45 }
  0xb5   :  { %v303_v33 = vadd.f32 %v279_v47, %v185_v24 }
  0xb6   :  { %v191_v40 = vpop.f32.mrf.mxu1 }
  0xb7   :  { %v407_v48 = vadd.f32 %v383_v31, %v303_v33  ;;  %v192_v49 = vadd.f32 %v191_v40, %v119_v10  ;;  %v388_v50 = vpop.f32.mrf.mxu3 }
  0xb9   :  { %v494_v51 = vpop.f32.mrf.mxu0  ;;  %v1715_v52 = vadd.f32 %v487_v21, %v407_v48 }
  0xbc   :  { %v281_v55 = vpop.f32.mrf.mxu2 }
  0xbd   :  { %v304_v56 = vadd.f32 %v281_v55, %v187_v30 }
  0xbe   :  { %v194_v58 = vpop.f32.mrf.mxu1 }
  0xbf   :  { %v408_v59 = vadd.f32 %v385_v43, %v304_v56  ;;  %v195_v60 = vadd.f32 %v194_v58, %v122_v9  ;;  %v390_v61 = vpop.f32.mrf.mxu3 }
  0xc1   :  { %1178 = vmatmul.msk.bf16.gmra.mxu2 %vm87_vm0, %v637_v57  ;;  %v497_v54 = vpop.f32.mrf.mxu0  ;;  %v1721_v62 = vadd.f32 %v489_v32, %v408_v59 }
  0xc4   :  { %v284_v63 = vpop.f32.mrf.mxu2 }
  0xc5   :  { %v305_v0 = vadd.f32 %v284_v63, %v190_v42  ;;  %v1742_v63 = vld [vmem:[%s1804_s2] ss:$0 sm:$0xff] }
  0xc6   :  { %v196_v1 = vpop.f32.mrf.mxu1 }
  0xc7   :  { %v409_v2 = vadd.f32 %v388_v50, %v305_v0  ;;  %v197_v3 = vadd.f32 %v196_v1, %v124_v15  ;;  %v393_v4 = vpop.f32.mrf.mxu3 }
  0xc9   :  { %v499_v6 = vpop.f32.mrf.mxu0  ;;  %v1723_v7 = vadd.f32 %v492_v46, %v409_v2  ;;  %v1747_v2 = vld [vmem:[%s1805_s3] ss:$0 sm:$0xff] }
  0xcc   :  { %v286_v8 = vpop.f32.mrf.mxu2 }
  0xcd   :  { %v306_v5 = vadd.f32 %v286_v8, %v192_v49 }
  0xce   :  { %v199_v10 = vpop.f32.mrf.mxu1 }
  0xcf   :  { %v410_v12 = vadd.f32 %v390_v61, %v306_v5  ;;  %v200_v9 = vadd.f32 %v199_v10, %v127_v28  ;;  %v395_v13 = vpop.f32.mrf.mxu3 }
  0xd1   :  { %v502_v14 = vpop.f32.mrf.mxu0  ;;  %v1725_v16 = vadd.f32 %v494_v51, %v410_v12 }
  0xd4   :  { %v289_v17 = vpop.f32.mrf.mxu2 }
  0xd5   :  { %v307_v18 = vadd.f32 %v289_v17, %v195_v60 }
  0xd6   :  { %v201_v19 = vpop.f32.mrf.mxu1 }
  0xd7   :  { %v411_v20 = vadd.f32 %v393_v4, %v307_v18  ;;  %v202_v22 = vadd.f32 %v201_v19, %v129_v35  ;;  %v398_v23 = vpop.f32.mrf.mxu3 }
  0xd9   :  { %v504_v15 = vpop.f32.mrf.mxu0  ;;  %v1727_v24 = vadd.f32 %v497_v54, %v411_v20 }
  0xdc   :  { %v291_v25 = vpop.f32.mrf.mxu2 }
  0xdd   :  { %v308_v26 = vadd.f32 %v291_v25, %v197_v3 }
  0xde   :  { %v204_v27 = vpop.f32.mrf.mxu1 }
  0xdf   :  { %v412_v21 = vadd.f32 %v395_v13, %v308_v26  ;;  %v205_v29 = vadd.f32 %v204_v27, %v1674_v11  ;;  %v400_v28 = vpop.f32.mrf.mxu3 }
  0xe1   :  { %v507_v30 = vpop.f32.mrf.mxu0  ;;  %v1730_v31 = vadd.f32 %v499_v6, %v412_v21 }
  0xe4   :  { %v294_v32 = vpop.f32.mrf.mxu2 }
  0xe5   :  { %v309_v34 = vadd.f32 %v294_v32, %v200_v9 }
  0xe6   :  { %v206_v36 = vpop.f32.mrf.mxu1 }
  0xe7   :  { %v413_v37 = vadd.f32 %v398_v23, %v309_v34  ;;  %v403_v38 = vpop.f32.mrf.mxu3 }
  0xe9   :  { %v509_v35 = vpop.f32.mrf.mxu0  ;;  %v1732_v39 = vadd.f32 %v502_v14, %v413_v37 }
  0xec   :  { %v296_v41 = vpop.f32.mrf.mxu2 }
  0xed   :  { %v310_v42 = vadd.f32 %v296_v41, %v202_v22 }
  0xee   :  { %v591_v43 = vpop.f32.mrf.mxu1 }
  0xef   :  { %v414_v44 = vadd.f32 %v400_v28, %v310_v42  ;;  %v405_v45 = vpop.f32.mrf.mxu3  ;;  %v615_v58 = vadd.f32 %v591_v43, %v1715_v52 }
  0xf1   :  { %v903_v46 = vpop.f32.mrf.mxu0  ;;  %v1734_v47 = vadd.f32 %v504_v15, %v414_v44 }
  0xf4   :  { %v299_v11 = vpop.f32.mrf.mxu2 }
  0xf5   :  { %v311_v33 = vadd.f32 %v299_v11, %v205_v29 }
  0xf6   :  { %v593_v40 = vpop.f32.mrf.mxu1 }
  0xf7   :  { %v415_v48 = vadd.f32 %v403_v38, %v311_v33  ;;  %v799_v49 = vpop.f32.mrf.mxu3  ;;  %v616_v4 = vadd.f32 %v593_v40, %v1721_v62 }
  0xf9   :  { %v905_v50 = vpop.f32.mrf.mxu0  ;;  %v1736_v51 = vadd.f32 %v507_v30, %v415_v48 }
  0xfc   :  { %v301_v53 = vpop.f32.mrf.mxu2 }
  0xfe   :  { %v596_v55 = vpop.f32.mrf.mxu1 }
  0xff   :  { %v801_v56 = vpop.f32.mrf.mxu3  ;;  %v617_v18 = vadd.f32 %v596_v55, %v1723_v7 }
 0x101   :  { %v908_v57 = vpop.f32.mrf.mxu0 }
 0x104   :  { %v695_v59 = vpop.f32.mrf.mxu2 }
 0x105   :  { %v719_v60 = vadd.f32 %v695_v59, %v615_v58 }
 0x106   :  { %v598_v61 = vpop.f32.mrf.mxu1 }
 0x107   :  { %v823_v54 = vadd.f32 %v799_v49, %v719_v60  ;;  %v804_v0 = vpop.f32.mrf.mxu3  ;;  %v618_v29 = vadd.f32 %v598_v61, %v1725_v16 }
 0x109   :  { %v927_v1 = vadd.f32 %v903_v46, %v823_v54  ;;  %v910_v3 = vpop.f32.mrf.mxu0 }
 0x10b   :  { %v940_v52 = vmul.f32 %v1742_v63, %v927_v1 }
 0x10c   :  { %v697_v6 = vpop.f32.mrf.mxu2 }
 0x10d   :  { %v953_v8 = vadd.f32 %v1747_v2, %v940_v52  ;;  %v720_v5 = vadd.f32 %v697_v6, %v616_v4 }
 0x10e   :  { %v601_v10 = vpop.f32.mrf.mxu1 }
 0x10f   :  { %v962_v12 = vmax.f32 %v953_v8, 0.0  ;;  %v824_v9 = vadd.f32 %v801_v56, %v720_v5  ;;  %v806_v13 = vpop.f32.mrf.mxu3  ;;  %v619_v42 = vadd.f32 %v601_v10, %v1727_v24 }
 0x111   :  { %971 = vst [vmem:[%s1806_s4] sm:$0xff] %v962_v12  ;;  %v928_v14 = vadd.f32 %v905_v50, %v824_v9  ;;  %v913_v17 = vpop.f32.mrf.mxu0 }
 0x113   :  { %v941_v62 = vmul.f32 %v1742_v63, %v928_v14 }
 0x114   :  { %v700_v19 = vpop.f32.mrf.mxu2 }
 0x115   :  { %v954_v20 = vadd.f32 %v1747_v2, %v941_v62  ;;  %v721_v22 = vadd.f32 %v700_v19, %v617_v18 }
 0x116   :  { %v603_v23 = vpop.f32.mrf.mxu1 }
 0x117   :  { %v963_v15 = vmax.f32 %v954_v20, 0.0  ;;  %v825_v25 = vadd.f32 %v804_v0, %v721_v22  ;;  %v809_v26 = vpop.f32.mrf.mxu3  ;;  %v620_v50 = vadd.f32 %v603_v23, %v1730_v31 }
 0x119   :  { %972 = vst [vmem:[%s1806_s4 + $0x8] sm:$0xff] %v963_v15  ;;  %v929_v27 = vadd.f32 %v908_v57, %v825_v25  ;;  %v915_v21 = vpop.f32.mrf.mxu0 }
 0x11b   :  { %v942_v7 = vmul.f32 %v1742_v63, %v929_v27 }
 0x11c   :  { %v702_v28 = vpop.f32.mrf.mxu2 }
 0x11d   :  { %v955_v30 = vadd.f32 %v1747_v2, %v942_v7  ;;  %v722_v32 = vadd.f32 %v702_v28, %v618_v29 }
 0x11e   :  { %v606_v34 = vpop.f32.mrf.mxu1 }
 0x11f   :  { %v964_v36 = vmax.f32 %v955_v30, 0.0  ;;  %v826_v37 = vadd.f32 %v806_v13, %v722_v32  ;;  %v811_v38 = vpop.f32.mrf.mxu3  ;;  %v621_v0 = vadd.f32 %v606_v34, %v1732_v39 }
 0x121   :  { %973 = vst [vmem:[%s1806_s4 + $0x10] sm:$0xff] %v964_v36  ;;  %v930_v35 = vadd.f32 %v910_v3, %v826_v37  ;;  %v918_v41 = vpop.f32.mrf.mxu0 }
 0x123   :  { %v943_v16 = vmul.f32 %v1742_v63, %v930_v35 }
 0x124   :  { %v705_v43 = vpop.f32.mrf.mxu2 }
 0x125   :  { %v956_v44 = vadd.f32 %v1747_v2, %v943_v16  ;;  %v723_v45 = vadd.f32 %v705_v43, %v619_v42 }
 0x126   :  { %v608_v46 = vpop.f32.mrf.mxu1 }
 0x127   :  { %v965_v11 = vmax.f32 %v956_v44, 0.0  ;;  %v827_v33 = vadd.f32 %v809_v26, %v723_v45  ;;  %v814_v40 = vpop.f32.mrf.mxu3  ;;  %v622_v9 = vadd.f32 %v608_v46, %v1734_v47 }
 0x129   :  { %974 = vst [vmem:[%s1806_s4 + $0x18] sm:$0xff] %v965_v11  ;;  %v931_v48 = vadd.f32 %v913_v17, %v827_v33  ;;  %v920_v49 = vpop.f32.mrf.mxu0 }
 0x12b   :  { %v944_v24 = vmul.f32 %v1742_v63, %v931_v48 }
 0x12c   :  { %v707_v53 = vpop.f32.mrf.mxu2 }
 0x12d   :  { %v957_v55 = vadd.f32 %v1747_v2, %v944_v24  ;;  %v724_v56 = vadd.f32 %v707_v53, %v620_v50 }
 0x12e   :  { %v611_v57 = vpop.f32.mrf.mxu1 }
 0x12f   :  { %v966_v58 = vmax.f32 %v957_v55, 0.0  ;;  %v828_v59 = vadd.f32 %v811_v38, %v724_v56  ;;  %v816_v60 = vpop.f32.mrf.mxu3  ;;  %v623_v22 = vadd.f32 %v611_v57, %v1736_v51 }
 0x131   :  { %975 = vst [vmem:[%s1806_s4 + $0x20] sm:$0xff] %v966_v58  ;;  %v932_v61 = vadd.f32 %v915_v21, %v828_v59  ;;  %v923_v54 = vpop.f32.mrf.mxu0 }
 0x133   :  { %v945_v31 = vmul.f32 %v1742_v63, %v932_v61 }
 0x134   :  { %v710_v1 = vpop.f32.mrf.mxu2 }
 0x135   :  { %v958_v3 = vadd.f32 %v1747_v2, %v945_v31  ;;  %v725_v4 = vadd.f32 %v710_v1, %v621_v0 }
 0x136   :  { %v613_v52 = vpop.f32.mrf.mxu1 }
 0x137   :  { %v967_v6 = vmax.f32 %v958_v3, 0.0  ;;  %v829_v8 = vadd.f32 %v814_v40, %v725_v4  ;;  %v819_v5 = vpop.f32.mrf.mxu3 }
 0x139   :  { %976 = vst [vmem:[%s1806_s4 + $0x28] sm:$0xff] %v967_v6  ;;  %v933_v10 = vadd.f32 %v918_v41, %v829_v8  ;;  %v925_v12 = vpop.f32.mrf.mxu0 }
 0x13b   :  { %v946_v39 = vmul.f32 %v1742_v63, %v933_v10 }
 0x13c   :  { %v712_v13 = vpop.f32.mrf.mxu2 }
 0x13d   :  { %v959_v14 = vadd.f32 %v1747_v2, %v946_v39  ;;  %v726_v17 = vadd.f32 %v712_v13, %v622_v9 }
 0x13f   :  { %v968_v18 = vmax.f32 %v959_v14, 0.0  ;;  %v830_v62 = vadd.f32 %v816_v60, %v726_v17  ;;  %v821_v19 = vpop.f32.mrf.mxu3 }
 0x141   :  { %977 = vst [vmem:[%s1806_s4 + $0x30] sm:$0xff] %v968_v18  ;;  %v934_v20 = vadd.f32 %v920_v49, %v830_v62 }
 0x143   :  { %v947_v23 = vmul.f32 %v1742_v63, %v934_v20 }
 0x144   :  { %v715_v15 = vpop.f32.mrf.mxu2 }
 0x145   :  { %v960_v47 = vadd.f32 %v1747_v2, %v947_v23  ;;  %v727_v25 = vadd.f32 %v715_v15, %v623_v22 }
 0x147   :  { %v969_v26 = vmax.f32 %v960_v47, 0.0  ;;  %v831_v27 = vadd.f32 %v819_v5, %v727_v25 }
 0x149   :  { %978 = vst [vmem:[%s1806_s4 + $0x38] sm:$0xff] %v969_v26  ;;  %v935_v21 = vadd.f32 %v923_v54, %v831_v27 }
 0x14b   :  { %v948_v29 = vmul.f32 %v1742_v63, %v935_v21 }
 0x14c   :  { %v717_v7 = vpop.f32.mrf.mxu2 }
 0x14d   :  { %v961_v28 = vadd.f32 %v1747_v2, %v948_v29 }
 0x14f   :  { %v970_v30 = vmax.f32 %v961_v28, 0.0 }
 0x151   :  { %979 = vst [vmem:[%s1806_s4 + $0x40] sm:$0xff] %v970_v30 }

// kernel: graphfeat_forward.11
= control target key start
LH: loop header
LB: loop body
LE: loop exit
PB: predicated region body
PF: predicated region fallthrough
CT: control target
= control target key end

     0   :  { %vm69_vm0 = vcmask 523264   ;;  %s1136_s1 = inlined_call_operand.vmem [shape: bf16[9,64,128], index: 1, kind: input, shape index: {}]   ;;  %s1137_s0 = inlined_call_operand.vmem [shape: f32[100,64], index: 0, kind: input, shape index: {}]   ;;  %s1138_s2 = inlined_call_operand.vmem [shape: f32[1,128], index: 2, kind: input, shape index: {}]   ;;  %s1139_s3 = inlined_call_operand.vmem [shape: f32[1,128], index: 3, kind: input, shape index: {}]   ;;  %s1140_s4 = inlined_call_operand.vmem [shape: f32[24,128], index: 4, kind: output, shape index: {}]  }
   0x1   :  { %v854_v0 = vld [vmem:[%s1136_s1 + $0x38] sm:$0xff]  ;;  %v853_v3 = vld [vmem:[%s1136_s1 + $0x30] sm:$0xff]  ;;  %v852_v6 = vld [vmem:[%s1136_s1 + $0x28] sm:$0xff] }
   0x2   :  { %v858_v1 = vld [vmem:[%s1136_s1 + $0x58] sm:$0xff]  ;;  %80 = vmatpush.bf16.msra.mxu0 %v854_v0  ;;  %883 = vmatpush.bf16.msra.mxu1 %v854_v0  ;;  %v857_v4 = vld [vmem:[%s1136_s1 + $0x50] sm:$0xff]  ;;  %v856_v7 = vld [vmem:[%s1136_s1 + $0x48] sm:$0xff] }
   0x3   :  { %v862_v2 = vld [vmem:[%s1136_s1 + $0x78] sm:$0xff]  ;;  %190 = vmatpush.bf16.msra.mxu2 %v858_v1  ;;  %v861_v5 = vld [vmem:[%s1136_s1 + $0x70] sm:$0xff]  ;;  %v860_v8 = vld [vmem:[%s1136_s1 + $0x68] sm:$0xff] }
   0x4   :  { %255 = vmatpush.bf16.msra.mxu3 %v862_v2  ;;  %v851_v9 = vld [vmem:[%s1136_s1 + $0x20] sm:$0xff]  ;;  %v33_v12 = vld [vmem:[%s1137_s0 + $0x29] sm:$0xff]  ;;  %v850_v13 = vld [vmem:[%s1136_s1 + $0x18] sm:$0xff] }
   0x5   :  { %v31_v10 = vld [vmem:[%s1137_s0 + $0x19] sm:$0xff]  ;;  %v32_v11 = vld [vmem:[%s1137_s0 + $0x21] sm:$0xff]  ;;  %v143_v17 = vld [vmem:[%s1137_s0 + $0x9] sm:$0xff]  ;;  %v35_v22 = vpack.c.bf16 %v33_v12, %v33_v12 }
   0x6   :  { %81 = vmatpush.bf16.msra.mxu0 %v853_v3  ;;  %884 = vmatpush.bf16.msra.mxu1 %v853_v3  ;;  %v855_v14 = vld [vmem:[%s1136_s1 + $0x40] sm:$0xff]  ;;  %v866_v15 = vld [vmem:[%s1136_s1 + $0x98] sm:$0xff]  ;;  %v34_v21 = vpack.c.bf16 %v32_v11, %v31_v10  ;;  %v849_v25 = vld [vmem:[%s1136_s1 + $0x10] sm:$0xff] }
   0x7   :  { %191 = vmatpush.bf16.msra.mxu2 %v857_v4  ;;  %v142_v16 = vld [vmem:[%s1137_s0 + $0x1] sm:$0xff]  ;;  %v207_v19 = vld [vmem:[%s1137_s0 + $0x32] sm:$0xff] }
   0x8   :  { %256 = vmatpush.bf16.msra.mxu3 %v861_v5  ;;  %v859_v18 = vld [vmem:[%s1136_s1 + $0x60] sm:$0xff]  ;;  %v145_v23 = vpack.c.bf16 %v143_v17, %v142_v16  ;;  %v878_v24 = vld [vmem:[%s1136_s1 + $0xf8] sm:$0xff]  ;;  %v865_v27 = vld [vmem:[%s1136_s1 + $0x90] sm:$0xff] }
   0x9   :  { %v208_v20 = vld [vmem:[%s1137_s0 + $0x3a] sm:$0xff]  ;;  %v877_v29 = vld [vmem:[%s1136_s1 + $0xf0] sm:$0xff]  ;;  %v848_v30 = vld [vmem:[%s1136_s1 + $0x8] sm:$0xff] }
   0xa   :  { %82 = vmatpush.bf16.msra.mxu0 %v852_v6  ;;  %885 = vmatpush.bf16.msra.mxu1 %v852_v6  ;;  %v210_v26 = vpack.c.bf16 %v208_v20, %v207_v19  ;;  %v874_v28 = vld [vmem:[%s1136_s1 + $0xd8] sm:$0xff]  ;;  %v864_v31 = vld [vmem:[%s1136_s1 + $0x88] sm:$0xff]  ;;  %v873_v32 = vld [vmem:[%s1136_s1 + $0xd0] sm:$0xff] }
   0xb   :  { %192 = vmatpush.bf16.msra.mxu2 %v856_v7  ;;  %v876_v33 = vld [vmem:[%s1136_s1 + $0xe8] sm:$0xff]  ;;  %v847_v34 = vld [vmem:[%s1136_s1] sm:$0xff]  ;;  %v870_v37 = vld [vmem:[%s1136_s1 + $0xb8] sm:$0xff] }
   0xc   :  { %257 = vmatpush.bf16.msra.mxu3 %v860_v8  ;;  %v863_v35 = vld [vmem:[%s1136_s1 + $0x80] sm:$0xff]  ;;  %v19_v38 = vld [vmem:[%s1137_s0 + $0x8] sm:$0xff]  ;;  %v882_v39 = vld [vmem:[%s1136_s1 + $0x118] sm:$0xff] }
   0xd   :  { %v18_v36 = vld [vmem:[%s1137_s0] sm:$0xff]  ;;  %v872_v40 = vld [vmem:[%s1136_s1 + $0xc8] sm:$0xff]  ;;  %v273_v42 = vld [vmem:[%s1137_s0 + $0x53] sm:$0xff] }
   0xe   :  { %83 = vmatpush.bf16.msra.mxu0 %v851_v9  ;;  %886 = vmatpush.bf16.msra.mxu1 %v851_v9  ;;  %v272_v41 = vld [vmem:[%s1137_s0 + $0x4b] sm:$0xff]  ;;  %v875_v43 = vld [vmem:[%s1136_s1 + $0xe0] sm:$0xff]  ;;  %v21_v47 = vpack.c.bf16 %v19_v38, %v18_v36  ;;  %v337_v3 = vld [vmem:[%s1137_s0 + $0x33] sm:$0xff] }
   0xf   :  { %193 = vmatpush.bf16.msra.mxu2 %v855_v14  ;;  %v144_v44 = vld [vmem:[%s1137_s0 + $0x11] sm:$0xff]  ;;  %v209_v45 = vld [vmem:[%s1137_s0 + $0x42] sm:$0xff]  ;;  %v275_v48 = vpack.c.bf16 %v273_v42, %v272_v41 }
  0x10   :  { %258 = vmatpush.bf16.msra.mxu3 %v859_v18  ;;  %v869_v46 = vld [vmem:[%s1136_s1 + $0xb0] sm:$0xff]  ;;  %v146_v49 = vpack.c.bf16 %v144_v44, %v144_v44  ;;  %v211_v51 = vpack.c.bf16 %v209_v45, %v209_v45  ;;  %v871_v52 = vld [vmem:[%s1136_s1 + $0xc0] sm:$0xff]  ;;  %v868_v53 = vld [vmem:[%s1136_s1 + $0xa8] sm:$0xff] }
  0x11   :  { %645 = vmatmul.msk.bf16.vlgmr.msra.gmra.mxu0 %vm69_vm0, %v34_v21  ;;  %646 = vmatmul.msk.bf16.vlgmr.msra.gmra.mxu1 %vm69_vm0, %v35_v22  ;;  %v881_v50 = vld [vmem:[%s1136_s1 + $0x110] sm:$0xff]  ;;  %v880_v54 = vld [vmem:[%s1136_s1 + $0x108] sm:$0xff]  ;;  %v867_v55 = vld [vmem:[%s1136_s1 + $0xa0] sm:$0xff] }
  0x12   :  { %128 = vmatpush.bf16.msrb.mxu1 %v850_v13  ;;  %320 = vmatpush.bf16.msrb.mxu0 %v866_v15  ;;  %v879_v56 = vld [vmem:[%s1136_s1 + $0x100] sm:$0xff]  ;;  %v20_v57 = vld [vmem:[%s1137_s0 + $0x10] sm:$0xff] }
  0x13   :  { %689 = vmatmul.msk.bf16.vlgmr.msra.gmra.mxu2 %vm69_vm0, %v145_v23  ;;  %715 = vmatmul.msk.bf16.vlgmr.msra.gmra.mxu3 %vm69_vm0, %v210_v26  ;;  %v274_v58 = vld [vmem:[%s1137_s0 + $0x5b] sm:$0xff]  ;;  %v402_v59 = vld [vmem:[%s1137_s0 + $0x5] sm:$0xff]  ;;  %v403_v60 = vld [vmem:[%s1137_s0 + $0xd] sm:$0xff]  ;;  %v22_v63 = vpack.c.bf16 %v20_v57, %v20_v57 }
  0x14   :  { %515 = vmatpush.bf16.msrb.mxu3 %v878_v24  ;;  %450 = vmatpush.bf16.msrb.mxu2 %v874_v28  ;;  %v467_v61 = vld [vmem:[%s1137_s0 + $0x1e] sm:$0xff]  ;;  %v468_v62 = vld [vmem:[%s1137_s0 + $0x26] sm:$0xff]  ;;  %v276_v0 = vpack.c.bf16 %v274_v58, %v274_v58  ;;  %v405_v1 = vpack.c.bf16 %v403_v60, %v402_v59  ;;  %v533_v6 = vld [vmem:[%s1137_s0 + $0xe] sm:$0xff] }
  0x15   :  { %v470_v2 = vpack.c.bf16 %v468_v62, %v467_v61  ;;  %v338_v4 = vld [vmem:[%s1137_s0 + $0x3b] sm:$0xff]  ;;  %v532_v5 = vld [vmem:[%s1137_s0 + $0x6] sm:$0xff]  ;;  %v469_v8 = vld [vmem:[%s1137_s0 + $0x2e] sm:$0xff] }
  0x16   :  { %129 = vmatpush.bf16.msrb.mxu1 %v849_v25  ;;  %321 = vmatpush.bf16.msrb.mxu0 %v865_v27  ;;  %v404_v7 = vld [vmem:[%s1137_s0 + $0x15] sm:$0xff]  ;;  %v340_v9 = vpack.c.bf16 %v338_v4, %v337_v3  ;;  %v535_v10 = vpack.c.bf16 %v533_v6, %v532_v5  ;;  %v471_v12 = vpack.c.bf16 %v469_v8, %v469_v8  ;;  %v339_v13 = vld [vmem:[%s1137_s0 + $0x43] sm:$0xff]  ;;  %v888_v58 = vld [vmem:[%s1139_s3] ss:$0 sm:$0xff] }
  0x17   :  { %v406_v11 = vpack.c.bf16 %v404_v7, %v404_v7  ;;  %v534_v14 = vld [vmem:[%s1137_s0 + $0x16] sm:$0xff]  ;;  %v341_v15 = vpack.c.bf16 %v339_v13, %v339_v13 }
  0x18   :  { %516 = vmatpush.bf16.msrb.mxu3 %v877_v29  ;;  %451 = vmatpush.bf16.msrb.mxu2 %v873_v32  ;;  %v536_v16 = vpack.c.bf16 %v534_v14, %v534_v14 }
  0x1a   :  { %130 = vmatpush.bf16.msrb.mxu1 %v848_v30  ;;  %322 = vmatpush.bf16.msrb.mxu0 %v864_v31 }
  0x1c   :  { %517 = vmatpush.bf16.msrb.mxu3 %v876_v33  ;;  %452 = vmatpush.bf16.msrb.mxu2 %v872_v40 }
  0x1e   :  { %131 = vmatpush.bf16.msrb.mxu1 %v847_v34  ;;  %323 = vmatpush.bf16.msrb.mxu0 %v863_v35 }
  0x20   :  { %518 = vmatpush.bf16.msrb.mxu3 %v875_v43  ;;  %453 = vmatpush.bf16.msrb.mxu2 %v871_v52 }
  0x21   :  { %663 = vmatmul.msk.bf16.vlgmr.msrb.gmra.mxu1 %vm69_vm0, %v21_v47  ;;  %741 = vmatmul.msk.bf16.vlgmr.msrb.gmra.mxu0 %vm69_vm0, %v275_v48 }
  0x22   :  { %385 = vmatpush.bf16.msra.mxu1 %v870_v37  ;;  %580 = vmatpush.bf16.msra.mxu0 %v882_v39 }
  0x23   :  { %690 = vmatmul.msk.bf16.gmra.mxu2 %vm69_vm0, %v146_v49  ;;  %716 = vmatmul.msk.bf16.gmra.mxu3 %vm69_vm0, %v211_v51 }
  0x26   :  { %386 = vmatpush.bf16.msra.mxu1 %v869_v46  ;;  %581 = vmatpush.bf16.msra.mxu0 %v881_v50 }
  0x2a   :  { %387 = vmatpush.bf16.msra.mxu1 %v868_v53  ;;  %582 = vmatpush.bf16.msra.mxu0 %v880_v54  ;;  %v887_v54 = vld [vmem:[%s1138_s2] ss:$0 sm:$0xff] }
  0x2e   :  { %388 = vmatpush.bf16.msra.mxu1 %v867_v55  ;;  %583 = vmatpush.bf16.msra.mxu0 %v879_v56 }
  0x31   :  { %664 = vmatmul.msk.bf16.gmra.mxu1 %vm69_vm0, %v22_v63  ;;  %742 = vmatmul.msk.bf16.gmra.mxu0 %vm69_vm0, %v276_v0 }
  0x33   :  { %793 = vmatmul.msk.bf16.vlgmr.msrb.gmra.mxu2 %vm69_vm0, %v405_v1  ;;  %819 = vmatmul.msk.bf16.vlgmr.msrb.gmra.mxu3 %vm69_vm0, %v470_v2 }
  0x41   :  { %767 = vmatmul.msk.bf16.vlgmr.msra.gmra.mxu1 %vm69_vm0, %v340_v9  ;;  %845 = vmatmul.msk.bf16.vlgmr.msra.gmra.mxu0 %vm69_vm0, %v535_v10 }
  0x43   :  { %794 = vmatmul.msk.bf16.gmra.mxu2 %vm69_vm0, %v406_v11  ;;  %820 = vmatmul.msk.bf16.gmra.mxu3 %vm69_vm0, %v471_v12 }
  0x51   :  { %768 = vmatmul.msk.bf16.gmra.mxu1 %vm69_vm0, %v341_v15  ;;  %846 = vmatmul.msk.bf16.gmra.mxu0 %vm69_vm0, %v536_v16 }
  0x8e   :  { %v85_v17 = vpop.f32.mrf.mxu0  ;;  %v90_v18 = vpop.f32.mrf.mxu1 }
  0x96   :  { %v195_v19 = vpop.f32.mrf.mxu2  ;;  %v87_v20 = vpop.f32.mrf.mxu0 }
  0x97   :  { %v92_v21 = vpop.f32.mrf.mxu1  ;;  %v260_v22 = vpop.f32.mrf.mxu3 }
  0x9e   :  { %v197_v23 = vpop.f32.mrf.mxu2  ;;  %v325_v25 = vpop.f32.mrf.mxu0 }
  0x9f   :  { %v133_v24 = vpop.f32.mrf.mxu1  ;;  %v262_v26 = vpop.f32.mrf.mxu3 }
  0xa0   :  { %v134_v35 = vadd.f32 %v133_v24, %v85_v17 }
  0xa2   :  { %v204_v36 = vadd.f32 %v195_v19, %v134_v35 }
  0xa4   :  { %v269_v41 = vadd.f32 %v260_v22, %v204_v36 }
  0xa6   :  { %v200_v27 = vpop.f32.mrf.mxu2  ;;  %v327_v29 = vpop.f32.mrf.mxu0  ;;  %v334_v43 = vadd.f32 %v325_v25, %v269_v41 }
  0xa7   :  { %v135_v28 = vpop.f32.mrf.mxu1  ;;  %v265_v30 = vpop.f32.mrf.mxu3 }
  0xa8   :  { %v136_v42 = vadd.f32 %v135_v28, %v87_v20 }
  0xaa   :  { %v205_v44 = vadd.f32 %v197_v23, %v136_v42 }
  0xac   :  { %v270_v50 = vadd.f32 %v262_v26, %v205_v44 }
  0xae   :  { %v202_v31 = vpop.f32.mrf.mxu2  ;;  %v330_v33 = vpop.f32.mrf.mxu0  ;;  %v335_v55 = vadd.f32 %v327_v29, %v270_v50 }
  0xaf   :  { %v138_v32 = vpop.f32.mrf.mxu1  ;;  %v267_v34 = vpop.f32.mrf.mxu3 }
  0xb0   :  { %v139_v51 = vadd.f32 %v138_v32, %v90_v18 }
  0xb2   :  { %v206_v56 = vadd.f32 %v200_v27, %v139_v51 }
  0xb4   :  { %v271_v1 = vadd.f32 %v265_v30, %v206_v56 }
  0xb6   :  { %v455_v37 = vpop.f32.mrf.mxu2  ;;  %v332_v39 = vpop.f32.mrf.mxu0  ;;  %v336_v6 = vadd.f32 %v330_v33, %v271_v1 }
  0xb7   :  { %v140_v38 = vpop.f32.mrf.mxu1  ;;  %v520_v40 = vpop.f32.mrf.mxu3 }
  0xbe   :  { %v457_v45 = vpop.f32.mrf.mxu2  ;;  %v585_v47 = vpop.f32.mrf.mxu0 }
  0xbf   :  { %v390_v46 = vpop.f32.mrf.mxu1  ;;  %v522_v49 = vpop.f32.mrf.mxu3 }
  0xc0   :  { %v399_v48 = vadd.f32 %v390_v46, %v334_v43 }
  0xc2   :  { %v464_v52 = vadd.f32 %v455_v37, %v399_v48 }
  0xc4   :  { %v529_v53 = vadd.f32 %v520_v40, %v464_v52 }
  0xc6   :  { %v594_v57 = vadd.f32 %v585_v47, %v529_v53  ;;  %v460_v59 = vpop.f32.mrf.mxu2  ;;  %v587_v61 = vpop.f32.mrf.mxu0 }
  0xc7   :  { %v392_v60 = vpop.f32.mrf.mxu1  ;;  %v525_v0 = vpop.f32.mrf.mxu3 }
  0xc8   :  { %v601_v62 = vmul.f32 %v887_v54, %v594_v57  ;;  %v400_v63 = vadd.f32 %v392_v60, %v335_v55 }
  0xca   :  { %v608_v2 = vadd.f32 %v888_v58, %v601_v62  ;;  %v465_v3 = vadd.f32 %v457_v45, %v400_v63 }
  0xcc   :  { %v611_v4 = vmax.f32 %v608_v2, 0.0  ;;  %v530_v5 = vadd.f32 %v522_v49, %v465_v3 }
  0xce   :  { %614 = vst [vmem:[%s1140_s4] sm:$0xff] %v611_v4  ;;  %v595_v7 = vadd.f32 %v587_v61, %v530_v5  ;;  %v462_v8 = vpop.f32.mrf.mxu2  ;;  %v590_v10 = vpop.f32.mrf.mxu0 }
  0xcf   :  { %v395_v9 = vpop.f32.mrf.mxu1  ;;  %v527_v13 = vpop.f32.mrf.mxu3 }
  0xd0   :  { %v602_v11 = vmul.f32 %v887_v54, %v595_v7  ;;  %v401_v12 = vadd.f32 %v395_v9, %v336_v6 }
  0xd2   :  { %v609_v14 = vadd.f32 %v888_v58, %v602_v11  ;;  %v466_v15 = vadd.f32 %v460_v59, %v401_v12 }
  0xd4   :  { %v612_v16 = vmax.f32 %v609_v14, 0.0  ;;  %v531_v17 = vadd.f32 %v525_v0, %v466_v15 }
  0xd6   :  { %615 = vst [vmem:[%s1140_s4 + $0x8] sm:$0xff] %v612_v16  ;;  %v596_v18 = vadd.f32 %v590_v10, %v531_v17  ;;  %v592_v20 = vpop.f32.mrf.mxu0 }
  0xd7   :  { %v397_v19 = vpop.f32.mrf.mxu1 }
  0xd8   :  { %v603_v21 = vmul.f32 %v887_v54, %v596_v18 }
  0xda   :  { %v610_v22 = vadd.f32 %v888_v58, %v603_v21 }
  0xdc   :  { %v613_v23 = vmax.f32 %v610_v22, 0.0 }
  0xde   :  { %616 = vst [vmem:[%s1140_s4 + $0x10] sm:$0xff] %v613_v23 }

// kernel: graphfeat_forward.12
= control target key start
LH: loop header
LB: loop body
LE: loop exit
PB: predicated region body
PF: predicated region fallthrough
CT: control target
= control target key end

     0   :  { %s1526_s1 = inlined_call_operand.vmem [shape: bf16[9,128,128], index: 1, kind: input, shape index: {}]   ;;  %s1527_s0 = inlined_call_operand.vmem [shape: f32[36,128], index: 0, kind: input, shape index: {}]   ;;  %s1528_s2 = inlined_call_operand.vmem [shape: f32[1,128], index: 2, kind: input, shape index: {}]   ;;  %s1529_s3 = inlined_call_operand.vmem [shape: f32[1,128], index: 3, kind: input, shape index: {}]   ;;  %s1530_s4 = inlined_call_operand.vmem [shape: f32[8,128], index: 4, kind: output, shape index: {}]  }
   0x1   :  { %v1190_v0 = vld [vmem:[%s1526_s1 + $0x78] sm:$0xff]  ;;  %v1189_v4 = vld [vmem:[%s1526_s1 + $0x70] sm:$0xff]  ;;  %v1188_v8 = vld [vmem:[%s1526_s1 + $0x68] sm:$0xff] }
   0x2   :  { %v1198_v1 = vld [vmem:[%s1526_s1 + $0xb8] sm:$0xff]  ;;  %102 = vmatpush.bf16.msra.mxu0 %v1190_v0  ;;  %v1197_v5 = vld [vmem:[%s1526_s1 + $0xb0] sm:$0xff]  ;;  %v1196_v9 = vld [vmem:[%s1526_s1 + $0xa8] sm:$0xff] }
   0x3   :  { %v1206_v2 = vld [vmem:[%s1526_s1 + $0xf8] sm:$0xff]  ;;  %243 = vmatpush.bf16.msra.mxu2 %v1198_v1  ;;  %v1205_v6 = vld [vmem:[%s1526_s1 + $0xf0] sm:$0xff]  ;;  %v1204_v10 = vld [vmem:[%s1526_s1 + $0xe8] sm:$0xff] }
   0x4   :  { %v1182_v3 = vld [vmem:[%s1526_s1 + $0x38] sm:$0xff]  ;;  %324 = vmatpush.bf16.msra.mxu3 %v1206_v2  ;;  %v1181_v7 = vld [vmem:[%s1526_s1 + $0x30] sm:$0xff]  ;;  %v1180_v11 = vld [vmem:[%s1526_s1 + $0x28] sm:$0xff] }
   0x5   :  { %163 = vmatpush.bf16.msra.mxu1 %v1182_v3  ;;  %v1187_v12 = vld [vmem:[%s1526_s1 + $0x60] sm:$0xff]  ;;  %v1186_v16 = vld [vmem:[%s1526_s1 + $0x58] sm:$0xff]  ;;  %v1185_v20 = vld [vmem:[%s1526_s1 + $0x50] sm:$0xff] }
   0x6   :  { %103 = vmatpush.bf16.msra.mxu0 %v1189_v4  ;;  %v1195_v13 = vld [vmem:[%s1526_s1 + $0xa0] sm:$0xff]  ;;  %v1194_v17 = vld [vmem:[%s1526_s1 + $0x98] sm:$0xff]  ;;  %v1193_v21 = vld [vmem:[%s1526_s1 + $0x90] sm:$0xff] }
   0x7   :  { %244 = vmatpush.bf16.msra.mxu2 %v1197_v5  ;;  %v1203_v14 = vld [vmem:[%s1526_s1 + $0xe0] sm:$0xff]  ;;  %v1202_v18 = vld [vmem:[%s1526_s1 + $0xd8] sm:$0xff]  ;;  %v1201_v22 = vld [vmem:[%s1526_s1 + $0xd0] sm:$0xff] }
   0x8   :  { %325 = vmatpush.bf16.msra.mxu3 %v1205_v6  ;;  %v1179_v15 = vld [vmem:[%s1526_s1 + $0x20] sm:$0xff]  ;;  %v1178_v19 = vld [vmem:[%s1526_s1 + $0x18] sm:$0xff]  ;;  %v1177_v23 = vld [vmem:[%s1526_s1 + $0x10] sm:$0xff] }
   0x9   :  { %164 = vmatpush.bf16.msra.mxu1 %v1181_v7  ;;  %v1184_v24 = vld [vmem:[%s1526_s1 + $0x48] sm:$0xff]  ;;  %v1183_v28 = vld [vmem:[%s1526_s1 + $0x40] sm:$0xff]  ;;  %v1214_v30 = vld [vmem:[%s1526_s1 + $0x138] sm:$0xff] }
   0xa   :  { %104 = vmatpush.bf16.msra.mxu0 %v1188_v8  ;;  %v1192_v25 = vld [vmem:[%s1526_s1 + $0x88] sm:$0xff]  ;;  %v1191_v29 = vld [vmem:[%s1526_s1 + $0x80] sm:$0xff]  ;;  %v1230_v31 = vld [vmem:[%s1526_s1 + $0x1b8] sm:$0xff] }
   0xb   :  { %245 = vmatpush.bf16.msra.mxu2 %v1196_v9  ;;  %v1200_v26 = vld [vmem:[%s1526_s1 + $0xc8] sm:$0xff]  ;;  %v1199_v34 = vld [vmem:[%s1526_s1 + $0xc0] sm:$0xff]  ;;  %v1238_v35 = vld [vmem:[%s1526_s1 + $0x1f8] sm:$0xff] }
   0xc   :  { %326 = vmatpush.bf16.msra.mxu3 %v1204_v10  ;;  %v1176_v27 = vld [vmem:[%s1526_s1 + $0x8] sm:$0xff]  ;;  %v1175_v36 = vld [vmem:[%s1526_s1] sm:$0xff]  ;;  %v1222_v37 = vld [vmem:[%s1526_s1 + $0x178] sm:$0xff] }
   0xd   :  { %165 = vmatpush.bf16.msra.mxu1 %v1180_v11  ;;  %v176_v32 = vld [vmem:[%s1527_s0 + $0x1] sm:$0xff]  ;;  %v35_v33 = vld [vmem:[%s1527_s0 + $0x9] sm:$0xff]  ;;  %v257_v38 = vld [vmem:[%s1527_s0 + $0x12] sm:$0xff] }
   0xe   :  { %105 = vmatpush.bf16.msra.mxu0 %v1187_v12  ;;  %v17_v39 = vld [vmem:[%s1527_s0] sm:$0xff]  ;;  %v177_v40 = vpack.c.bf16 %v176_v32, %v176_v32  ;;  %v36_v41 = vpack.c.bf16 %v35_v33, %v35_v33  ;;  %v1213_v42 = vld [vmem:[%s1526_s1 + $0x130] sm:$0xff]  ;;  %v258_v44 = vpack.c.bf16 %v257_v38, %v257_v38  ;;  %v1212_v48 = vld [vmem:[%s1526_s1 + $0x128] sm:$0xff] }
   0xf   :  { %246 = vmatpush.bf16.msra.mxu2 %v1195_v13  ;;  %v1229_v43 = vld [vmem:[%s1526_s1 + $0x1b0] sm:$0xff]  ;;  %v18_v45 = vpack.c.bf16 %v17_v39, %v17_v39  ;;  %v1228_v49 = vld [vmem:[%s1526_s1 + $0x1a8] sm:$0xff]  ;;  %v1211_v52 = vld [vmem:[%s1526_s1 + $0x120] sm:$0xff] }
  0x10   :  { %327 = vmatpush.bf16.msra.mxu3 %v1203_v14  ;;  %v1237_v46 = vld [vmem:[%s1526_s1 + $0x1f0] sm:$0xff]  ;;  %v1236_v50 = vld [vmem:[%s1526_s1 + $0x1e8] sm:$0xff]  ;;  %v1227_v53 = vld [vmem:[%s1526_s1 + $0x1a0] sm:$0xff] }
  0x11   :  { %166 = vmatpush.bf16.msra.mxu1 %v1179_v15  ;;  %v1221_v47 = vld [vmem:[%s1526_s1 + $0x170] sm:$0xff]  ;;  %v1220_v51 = vld [vmem:[%s1526_s1 + $0x168] sm:$0xff]  ;;  %v1235_v54 = vld [vmem:[%s1526_s1 + $0x1e0] sm:$0xff] }
  0x12   :  { %106 = vmatpush.bf16.msra.mxu0 %v1186_v16  ;;  %v1219_v55 = vld [vmem:[%s1526_s1 + $0x160] sm:$0xff]  ;;  %v1210_v56 = vld [vmem:[%s1526_s1 + $0x118] sm:$0xff]  ;;  %v1209_v60 = vld [vmem:[%s1526_s1 + $0x110] sm:$0xff] }
  0x13   :  { %247 = vmatpush.bf16.msra.mxu2 %v1194_v17  ;;  %v1226_v57 = vld [vmem:[%s1526_s1 + $0x198] sm:$0xff]  ;;  %v1225_v61 = vld [vmem:[%s1526_s1 + $0x190] sm:$0xff]  ;;  %v1208_v0 = vld [vmem:[%s1526_s1 + $0x108] sm:$0xff] }
  0x14   :  { %328 = vmatpush.bf16.msra.mxu3 %v1202_v18  ;;  %v1234_v58 = vld [vmem:[%s1526_s1 + $0x1d8] sm:$0xff]  ;;  %v1233_v62 = vld [vmem:[%s1526_s1 + $0x1d0] sm:$0xff]  ;;  %v1224_v1 = vld [vmem:[%s1526_s1 + $0x188] sm:$0xff] }
  0x15   :  { %167 = vmatpush.bf16.msra.mxu1 %v1178_v19  ;;  %v1218_v59 = vld [vmem:[%s1526_s1 + $0x158] sm:$0xff]  ;;  %v1217_v63 = vld [vmem:[%s1526_s1 + $0x150] sm:$0xff]  ;;  %v1232_v2 = vld [vmem:[%s1526_s1 + $0x1c8] sm:$0xff] }
  0x16   :  { %107 = vmatpush.bf16.msra.mxu0 %v1185_v20  ;;  %v1216_v3 = vld [vmem:[%s1526_s1 + $0x148] sm:$0xff]  ;;  %v1207_v4 = vld [vmem:[%s1526_s1 + $0x100] sm:$0xff]  ;;  %v1246_v8 = vld [vmem:[%s1526_s1 + $0x238] sm:$0xff] }
  0x17   :  { %248 = vmatpush.bf16.msra.mxu2 %v1193_v21  ;;  %v1223_v5 = vld [vmem:[%s1526_s1 + $0x180] sm:$0xff]  ;;  %v581_v11 = vld [vmem:[%s1527_s0 + $0xc] sm:$0xff]  ;;  %v1242_v20 = vld [vmem:[%s1526_s1 + $0x218] sm:$0xff] }
  0x18   :  { %329 = vmatpush.bf16.msra.mxu3 %v1201_v22  ;;  %v500_v6 = vld [vmem:[%s1527_s0 + $0x3] sm:$0xff]  ;;  %v338_v7 = vld [vmem:[%s1527_s0 + $0x1b] sm:$0xff]  ;;  %v419_v14 = vld [vmem:[%s1527_s0 + $0x13] sm:$0xff]  ;;  %v582_v16 = vpack.c.bf16 %v581_v11, %v581_v11 }
  0x19   :  { %168 = vmatpush.bf16.msra.mxu1 %v1177_v23  ;;  %v1231_v9 = vld [vmem:[%s1526_s1 + $0x1c0] sm:$0xff]  ;;  %v501_v12 = vpack.c.bf16 %v500_v6, %v500_v6  ;;  %v339_v13 = vpack.c.bf16 %v338_v7, %v338_v7  ;;  %v1245_v15 = vld [vmem:[%s1526_s1 + $0x230] sm:$0xff]  ;;  %v420_v17 = vpack.c.bf16 %v419_v14, %v419_v14  ;;  %v1244_v18 = vld [vmem:[%s1526_s1 + $0x228] sm:$0xff] }
  0x1a   :  { %108 = vmatpush.bf16.msra.mxu0 %v1184_v24  ;;  %v1215_v10 = vld [vmem:[%s1526_s1 + $0x140] sm:$0xff]  ;;  %v1241_v21 = vld [vmem:[%s1526_s1 + $0x210] sm:$0xff]  ;;  %v1240_v22 = vld [vmem:[%s1526_s1 + $0x208] sm:$0xff] }
  0x1b   :  { %249 = vmatpush.bf16.msra.mxu2 %v1192_v25  ;;  %v1243_v19 = vld [vmem:[%s1526_s1 + $0x220] sm:$0xff] }
  0x1c   :  { %330 = vmatpush.bf16.msra.mxu3 %v1200_v26  ;;  %v1239_v23 = vld [vmem:[%s1526_s1 + $0x200] sm:$0xff] }
  0x1d   :  { %169 = vmatpush.bf16.msra.mxu1 %v1176_v27  ;;  %v662_v24 = vld [vmem:[%s1527_s0 + $0x4] sm:$0xff] }
  0x1e   :  { %109 = vmatpush.bf16.msra.mxu0 %v1183_v28  ;;  %v663_v25 = vpack.c.bf16 %v662_v24, %v662_v24 }
  0x1f   :  { %250 = vmatpush.bf16.msra.mxu2 %v1191_v29 }
  0x20   :  { %331 = vmatpush.bf16.msra.mxu3 %v1199_v34 }
  0x21   :  { %170 = vmatpush.bf16.msra.mxu1 %v1175_v36  ;;  %110 = vmatmul.bf16.vlgmr.msra.gmra.mxu0 %v36_v41 }
  0x22   :  { %405 = vmatpush.bf16.msrb.mxu0 %v1214_v30  ;;  %251 = vmatmul.bf16.vlgmr.msra.gmra.mxu2 %v177_v40 }
  0x23   :  { %567 = vmatpush.bf16.msrb.mxu2 %v1230_v31  ;;  %332 = vmatmul.bf16.vlgmr.msra.gmra.mxu3 %v258_v44 }
  0x24   :  { %648 = vmatpush.bf16.msrb.mxu3 %v1238_v35  ;;  %171 = vmatmul.bf16.vlgmr.msra.gmra.mxu1 %v18_v45 }
  0x25   :  { %486 = vmatpush.bf16.msrb.mxu1 %v1222_v37 }
  0x26   :  { %406 = vmatpush.bf16.msrb.mxu0 %v1213_v42 }
  0x27   :  { %568 = vmatpush.bf16.msrb.mxu2 %v1229_v43 }
  0x28   :  { %649 = vmatpush.bf16.msrb.mxu3 %v1237_v46 }
  0x29   :  { %487 = vmatpush.bf16.msrb.mxu1 %v1221_v47 }
  0x2a   :  { %407 = vmatpush.bf16.msrb.mxu0 %v1212_v48 }
  0x2b   :  { %569 = vmatpush.bf16.msrb.mxu2 %v1228_v49  ;;  %v1247_v49 = vld [vmem:[%s1528_s2] ss:$0 sm:$0xff] }
  0x2c   :  { %650 = vmatpush.bf16.msrb.mxu3 %v1236_v50 }
  0x2d   :  { %488 = vmatpush.bf16.msrb.mxu1 %v1220_v51 }
  0x2e   :  { %408 = vmatpush.bf16.msrb.mxu0 %v1211_v52  ;;  %v1248_v52 = vld [vmem:[%s1529_s3] ss:$0 sm:$0xff] }
  0x2f   :  { %570 = vmatpush.bf16.msrb.mxu2 %v1227_v53 }
  0x30   :  { %651 = vmatpush.bf16.msrb.mxu3 %v1235_v54 }
  0x31   :  { %489 = vmatpush.bf16.msrb.mxu1 %v1219_v55 }
  0x32   :  { %409 = vmatpush.bf16.msrb.mxu0 %v1210_v56 }
  0x33   :  { %571 = vmatpush.bf16.msrb.mxu2 %v1226_v57 }
  0x34   :  { %652 = vmatpush.bf16.msrb.mxu3 %v1234_v58 }
  0x35   :  { %490 = vmatpush.bf16.msrb.mxu1 %v1218_v59 }
  0x36   :  { %410 = vmatpush.bf16.msrb.mxu0 %v1209_v60 }
  0x37   :  { %572 = vmatpush.bf16.msrb.mxu2 %v1225_v61 }
  0x38   :  { %653 = vmatpush.bf16.msrb.mxu3 %v1233_v62 }
  0x39   :  { %491 = vmatpush.bf16.msrb.mxu1 %v1217_v63 }
  0x3a   :  { %411 = vmatpush.bf16.msrb.mxu0 %v1208_v0 }
  0x3b   :  { %573 = vmatpush.bf16.msrb.mxu2 %v1224_v1 }
  0x3c   :  { %654 = vmatpush.bf16.msrb.mxu3 %v1232_v2 }
  0x3d   :  { %492 = vmatpush.bf16.msrb.mxu1 %v1216_v3 }
  0x3e   :  { %412 = vmatpush.bf16.msrb.mxu0 %v1207_v4 }
  0x3f   :  { %574 = vmatpush.bf16.msrb.mxu2 %v1223_v5 }
  0x40   :  { %655 = vmatpush.bf16.msrb.mxu3 %v1231_v9 }
  0x41   :  { %493 = vmatpush.bf16.msrb.mxu1 %v1215_v10  ;;  %413 = vmatmul.bf16.vlgmr.msrb.gmra.mxu0 %v339_v13 }
  0x42   :  { %729 = vmatpush.bf16.msra.mxu0 %v1246_v8  ;;  %575 = vmatmul.bf16.vlgmr.msrb.gmra.mxu2 %v501_v12 }
  0x43   :  { %656 = vmatmul.bf16.vlgmr.msrb.gmra.mxu3 %v582_v16 }
  0x44   :  { %494 = vmatmul.bf16.vlgmr.msrb.gmra.mxu1 %v420_v17 }
  0x46   :  { %730 = vmatpush.bf16.msra.mxu0 %v1245_v15 }
  0x4a   :  { %731 = vmatpush.bf16.msra.mxu0 %v1244_v18 }
  0x4e   :  { %732 = vmatpush.bf16.msra.mxu0 %v1243_v19 }
  0x52   :  { %733 = vmatpush.bf16.msra.mxu0 %v1242_v20 }
  0x56   :  { %734 = vmatpush.bf16.msra.mxu0 %v1241_v21 }
  0x5a   :  { %735 = vmatpush.bf16.msra.mxu0 %v1240_v22 }
  0x5e   :  { %736 = vmatpush.bf16.msra.mxu0 %v1239_v23 }
  0x61   :  { %737 = vmatmul.bf16.vlgmr.msra.gmra.mxu0 %v663_v25 }
  0x9e   :  { %v111_v26 = vpop.f32.mrf.mxu0 }
  0xa1   :  { %v172_v27 = vpop.f32.mrf.mxu1 }
  0xa2   :  { %v173_v36 = vadd.f32 %v172_v27, %v111_v26 }
  0xa5   :  { %v252_v28 = vpop.f32.mrf.mxu2 }
  0xa6   :  { %v333_v29 = vpop.f32.mrf.mxu3  ;;  %v113_v30 = vpop.f32.mrf.mxu0  ;;  %v256_v38 = vadd.f32 %v252_v28, %v173_v36 }
  0xa8   :  { %v337_v42 = vadd.f32 %v333_v29, %v256_v38 }
  0xa9   :  { %v174_v31 = vpop.f32.mrf.mxu1 }
  0xad   :  { %v254_v32 = vpop.f32.mrf.mxu2 }
  0xae   :  { %v335_v33 = vpop.f32.mrf.mxu3 }
  0xbe   :  { %v414_v34 = vpop.f32.mrf.mxu0 }
  0xbf   :  { %v418_v44 = vadd.f32 %v414_v34, %v337_v42 }
  0xc1   :  { %v495_v35 = vpop.f32.mrf.mxu1 }
  0xc2   :  { %v499_v46 = vadd.f32 %v495_v35, %v418_v44 }
  0xc5   :  { %v576_v37 = vpop.f32.mrf.mxu2 }
  0xc6   :  { %v657_v39 = vpop.f32.mrf.mxu3  ;;  %v416_v40 = vpop.f32.mrf.mxu0  ;;  %v580_v47 = vadd.f32 %v576_v37, %v499_v46 }
  0xc8   :  { %v661_v48 = vadd.f32 %v657_v39, %v580_v47 }
  0xc9   :  { %v497_v41 = vpop.f32.mrf.mxu1 }
  0xcd   :  { %v578_v43 = vpop.f32.mrf.mxu2 }
  0xce   :  { %v659_v45 = vpop.f32.mrf.mxu3 }
  0xde   :  { %v738_v50 = vpop.f32.mrf.mxu0 }
  0xdf   :  { %v742_v51 = vadd.f32 %v738_v50, %v661_v48 }
  0xe1   :  { %v747_v53 = vmul.f32 %v1247_v49, %v742_v51 }
  0xe3   :  { %v752_v54 = vadd.f32 %v1248_v52, %v747_v53 }
  0xe5   :  { %v753_v55 = vmax.f32 %v752_v54, 0.0 }
  0xe6   :  { %v740_v56 = vpop.f32.mrf.mxu0 }
  0xe7   :  { %754 = vst [vmem:[%s1530_s4] sm:$0xff] %v753_v55 }

// kernel: graphfeat_forward.13
= control target key start
LH: loop header
LB: loop body
LE: loop exit
PB: predicated region body
PF: predicated region fallthrough
CT: control target
= control target key end

     0   :  { %s1562_s1 = inlined_call_operand.vmem [shape: bf16[9,128,128], index: 1, kind: input, shape index: {}]   ;;  %s1563_s0 = inlined_call_operand.vmem [shape: f32[18,128], index: 0, kind: input, shape index: {}]   ;;  %s1564_s2 = inlined_call_operand.vmem [shape: f32[1,128], index: 2, kind: input, shape index: {}]   ;;  %s1565_s3 = inlined_call_operand.vmem [shape: f32[1,128], index: 3, kind: input, shape index: {}]   ;;  %s1566_s4 = inlined_call_operand.vmem [shape: f32[8,128], index: 4, kind: input, shape index: {}]   ;;  %s1567_s5 = inlined_call_operand.vmem [shape: f32[8,128], index: 5, kind: output, shape index: {}]  }
   0x1   :  { %v1214_v0 = vld [vmem:[%s1562_s1 + $0x78] sm:$0xff]  ;;  %v1213_v4 = vld [vmem:[%s1562_s1 + $0x70] sm:$0xff]  ;;  %v1212_v8 = vld [vmem:[%s1562_s1 + $0x68] sm:$0xff] }
   0x2   :  { %v1222_v1 = vld [vmem:[%s1562_s1 + $0xb8] sm:$0xff]  ;;  %105 = vmatpush.bf16.msra.mxu0 %v1214_v0  ;;  %v1221_v5 = vld [vmem:[%s1562_s1 + $0xb0] sm:$0xff]  ;;  %v1220_v9 = vld [vmem:[%s1562_s1 + $0xa8] sm:$0xff] }
   0x3   :  { %v1230_v2 = vld [vmem:[%s1562_s1 + $0xf8] sm:$0xff]  ;;  %246 = vmatpush.bf16.msra.mxu2 %v1222_v1  ;;  %v1229_v6 = vld [vmem:[%s1562_s1 + $0xf0] sm:$0xff]  ;;  %v1228_v10 = vld [vmem:[%s1562_s1 + $0xe8] sm:$0xff] }
   0x4   :  { %v1206_v3 = vld [vmem:[%s1562_s1 + $0x38] sm:$0xff]  ;;  %327 = vmatpush.bf16.msra.mxu3 %v1230_v2  ;;  %v1205_v7 = vld [vmem:[%s1562_s1 + $0x30] sm:$0xff]  ;;  %v1204_v11 = vld [vmem:[%s1562_s1 + $0x28] sm:$0xff] }
   0x5   :  { %166 = vmatpush.bf16.msra.mxu1 %v1206_v3  ;;  %v1211_v12 = vld [vmem:[%s1562_s1 + $0x60] sm:$0xff]  ;;  %v1210_v16 = vld [vmem:[%s1562_s1 + $0x58] sm:$0xff]  ;;  %v1209_v20 = vld [vmem:[%s1562_s1 + $0x50] sm:$0xff] }
   0x6   :  { %106 = vmatpush.bf16.msra.mxu0 %v1213_v4  ;;  %v1219_v13 = vld [vmem:[%s1562_s1 + $0xa0] sm:$0xff]  ;;  %v1218_v17 = vld [vmem:[%s1562_s1 + $0x98] sm:$0xff]  ;;  %v1217_v21 = vld [vmem:[%s1562_s1 + $0x90] sm:$0xff] }
   0x7   :  { %247 = vmatpush.bf16.msra.mxu2 %v1221_v5  ;;  %v1227_v14 = vld [vmem:[%s1562_s1 + $0xe0] sm:$0xff]  ;;  %v1226_v18 = vld [vmem:[%s1562_s1 + $0xd8] sm:$0xff]  ;;  %v1225_v22 = vld [vmem:[%s1562_s1 + $0xd0] sm:$0xff] }
   0x8   :  { %328 = vmatpush.bf16.msra.mxu3 %v1229_v6  ;;  %v1203_v15 = vld [vmem:[%s1562_s1 + $0x20] sm:$0xff]  ;;  %v1202_v19 = vld [vmem:[%s1562_s1 + $0x18] sm:$0xff]  ;;  %v1201_v23 = vld [vmem:[%s1562_s1 + $0x10] sm:$0xff] }
   0x9   :  { %167 = vmatpush.bf16.msra.mxu1 %v1205_v7  ;;  %v1208_v24 = vld [vmem:[%s1562_s1 + $0x48] sm:$0xff]  ;;  %v1207_v28 = vld [vmem:[%s1562_s1 + $0x40] sm:$0xff]  ;;  %v1238_v30 = vld [vmem:[%s1562_s1 + $0x138] sm:$0xff] }
   0xa   :  { %107 = vmatpush.bf16.msra.mxu0 %v1212_v8  ;;  %v1216_v25 = vld [vmem:[%s1562_s1 + $0x88] sm:$0xff]  ;;  %v1215_v29 = vld [vmem:[%s1562_s1 + $0x80] sm:$0xff]  ;;  %v1254_v31 = vld [vmem:[%s1562_s1 + $0x1b8] sm:$0xff] }
   0xb   :  { %248 = vmatpush.bf16.msra.mxu2 %v1220_v9  ;;  %v1224_v26 = vld [vmem:[%s1562_s1 + $0xc8] sm:$0xff]  ;;  %v1223_v34 = vld [vmem:[%s1562_s1 + $0xc0] sm:$0xff]  ;;  %v1262_v35 = vld [vmem:[%s1562_s1 + $0x1f8] sm:$0xff] }
   0xc   :  { %329 = vmatpush.bf16.msra.mxu3 %v1228_v10  ;;  %v1200_v27 = vld [vmem:[%s1562_s1 + $0x8] sm:$0xff]  ;;  %v1199_v36 = vld [vmem:[%s1562_s1] sm:$0xff]  ;;  %v1246_v37 = vld [vmem:[%s1562_s1 + $0x178] sm:$0xff] }
   0xd   :  { %168 = vmatpush.bf16.msra.mxu1 %v1204_v11  ;;  %v179_v32 = vld [vmem:[%s1563_s0 + $0x2] sm:$0xff]  ;;  %v1237_v42 = vld [vmem:[%s1562_s1 + $0x130] sm:$0xff]  ;;  %v1234_v56 = vld [vmem:[%s1562_s1 + $0x118] sm:$0xff] }
   0xe   :  { %108 = vmatpush.bf16.msra.mxu0 %v1211_v12  ;;  %v38_v33 = vld [vmem:[%s1563_s0 + $0x1] sm:$0xff]  ;;  %v180_v40 = vpack.c.bf16 %v179_v32, %v179_v32  ;;  %v1253_v43 = vld [vmem:[%s1562_s1 + $0x1b0] sm:$0xff]  ;;  %v1250_v57 = vld [vmem:[%s1562_s1 + $0x198] sm:$0xff] }
   0xf   :  { %249 = vmatpush.bf16.msra.mxu2 %v1219_v13  ;;  %v260_v38 = vld [vmem:[%s1563_s0 + $0x4] sm:$0xff]  ;;  %v39_v41 = vpack.c.bf16 %v38_v33, %v38_v33  ;;  %v1261_v46 = vld [vmem:[%s1562_s1 + $0x1f0] sm:$0xff]  ;;  %v1258_v58 = vld [vmem:[%s1562_s1 + $0x1d8] sm:$0xff] }
  0x10   :  { %330 = vmatpush.bf16.msra.mxu3 %v1227_v14  ;;  %v20_v39 = vld [vmem:[%s1563_s0] sm:$0xff]  ;;  %v261_v44 = vpack.c.bf16 %v260_v38, %v260_v38  ;;  %v1245_v47 = vld [vmem:[%s1562_s1 + $0x170] sm:$0xff]  ;;  %v1236_v48 = vld [vmem:[%s1562_s1 + $0x128] sm:$0xff] }
  0x11   :  { %169 = vmatpush.bf16.msra.mxu1 %v1203_v15  ;;  %v21_v45 = vpack.c.bf16 %v20_v39, %v20_v39  ;;  %v1252_v49 = vld [vmem:[%s1562_s1 + $0x1a8] sm:$0xff]  ;;  %v1235_v52 = vld [vmem:[%s1562_s1 + $0x120] sm:$0xff]  ;;  %v1242_v59 = vld [vmem:[%s1562_s1 + $0x158] sm:$0xff] }
  0x12   :  { %109 = vmatpush.bf16.msra.mxu0 %v1210_v16  ;;  %v1260_v50 = vld [vmem:[%s1562_s1 + $0x1e8] sm:$0xff]  ;;  %v1251_v53 = vld [vmem:[%s1562_s1 + $0x1a0] sm:$0xff]  ;;  %v1233_v60 = vld [vmem:[%s1562_s1 + $0x110] sm:$0xff] }
  0x13   :  { %250 = vmatpush.bf16.msra.mxu2 %v1218_v17  ;;  %v1244_v51 = vld [vmem:[%s1562_s1 + $0x168] sm:$0xff]  ;;  %v1259_v54 = vld [vmem:[%s1562_s1 + $0x1e0] sm:$0xff]  ;;  %v1249_v61 = vld [vmem:[%s1562_s1 + $0x190] sm:$0xff] }
  0x14   :  { %331 = vmatpush.bf16.msra.mxu3 %v1226_v18  ;;  %v1243_v55 = vld [vmem:[%s1562_s1 + $0x160] sm:$0xff]  ;;  %v1257_v62 = vld [vmem:[%s1562_s1 + $0x1d0] sm:$0xff]  ;;  %v1232_v0 = vld [vmem:[%s1562_s1 + $0x108] sm:$0xff] }
  0x15   :  { %170 = vmatpush.bf16.msra.mxu1 %v1202_v19  ;;  %v1241_v63 = vld [vmem:[%s1562_s1 + $0x150] sm:$0xff]  ;;  %v1248_v1 = vld [vmem:[%s1562_s1 + $0x188] sm:$0xff]  ;;  %v1231_v4 = vld [vmem:[%s1562_s1 + $0x100] sm:$0xff] }
  0x16   :  { %110 = vmatpush.bf16.msra.mxu0 %v1209_v20  ;;  %v1256_v2 = vld [vmem:[%s1562_s1 + $0x1c8] sm:$0xff]  ;;  %v1247_v5 = vld [vmem:[%s1562_s1 + $0x180] sm:$0xff]  ;;  %v1270_v8 = vld [vmem:[%s1562_s1 + $0x238] sm:$0xff] }
  0x17   :  { %251 = vmatpush.bf16.msra.mxu2 %v1217_v21  ;;  %v1240_v3 = vld [vmem:[%s1562_s1 + $0x148] sm:$0xff]  ;;  %v1255_v9 = vld [vmem:[%s1562_s1 + $0x1c0] sm:$0xff]  ;;  %v1269_v15 = vld [vmem:[%s1562_s1 + $0x230] sm:$0xff] }
  0x18   :  { %332 = vmatpush.bf16.msra.mxu3 %v1225_v22  ;;  %v503_v6 = vld [vmem:[%s1563_s0 + $0x8] sm:$0xff]  ;;  %v1239_v10 = vld [vmem:[%s1562_s1 + $0x140] sm:$0xff]  ;;  %v1266_v20 = vld [vmem:[%s1562_s1 + $0x218] sm:$0xff] }
  0x19   :  { %171 = vmatpush.bf16.msra.mxu1 %v1201_v23  ;;  %v341_v7 = vld [vmem:[%s1563_s0 + $0x5] sm:$0xff]  ;;  %v504_v12 = vpack.c.bf16 %v503_v6, %v503_v6  ;;  %v1265_v21 = vld [vmem:[%s1562_s1 + $0x210] sm:$0xff] }
  0x1a   :  { %111 = vmatpush.bf16.msra.mxu0 %v1208_v24  ;;  %v584_v11 = vld [vmem:[%s1563_s0 + $0x9] sm:$0xff]  ;;  %v342_v13 = vpack.c.bf16 %v341_v7, %v341_v7  ;;  %v1267_v19 = vld [vmem:[%s1562_s1 + $0x220] sm:$0xff] }
  0x1b   :  { %252 = vmatpush.bf16.msra.mxu2 %v1216_v25  ;;  %v422_v14 = vld [vmem:[%s1563_s0 + $0x6] sm:$0xff]  ;;  %v585_v16 = vpack.c.bf16 %v584_v11, %v584_v11 }
  0x1c   :  { %333 = vmatpush.bf16.msra.mxu3 %v1224_v26  ;;  %v423_v17 = vpack.c.bf16 %v422_v14, %v422_v14  ;;  %v1268_v18 = vld [vmem:[%s1562_s1 + $0x228] sm:$0xff]  ;;  %v1263_v23 = vld [vmem:[%s1562_s1 + $0x200] sm:$0xff] }
  0x1d   :  { %172 = vmatpush.bf16.msra.mxu1 %v1200_v27  ;;  %v1264_v22 = vld [vmem:[%s1562_s1 + $0x208] sm:$0xff] }
  0x1e   :  { %112 = vmatpush.bf16.msra.mxu0 %v1207_v28  ;;  %v665_v24 = vld [vmem:[%s1563_s0 + $0xa] sm:$0xff] }
  0x1f   :  { %253 = vmatpush.bf16.msra.mxu2 %v1215_v29  ;;  %v666_v25 = vpack.c.bf16 %v665_v24, %v665_v24 }
  0x20   :  { %334 = vmatpush.bf16.msra.mxu3 %v1223_v34 }
  0x21   :  { %173 = vmatpush.bf16.msra.mxu1 %v1199_v36  ;;  %113 = vmatmul.bf16.vlgmr.msra.gmra.mxu0 %v39_v41 }
  0x22   :  { %408 = vmatpush.bf16.msrb.mxu0 %v1238_v30  ;;  %254 = vmatmul.bf16.vlgmr.msra.gmra.mxu2 %v180_v40 }
  0x23   :  { %570 = vmatpush.bf16.msrb.mxu2 %v1254_v31  ;;  %335 = vmatmul.bf16.vlgmr.msra.gmra.mxu3 %v261_v44 }
  0x24   :  { %651 = vmatpush.bf16.msrb.mxu3 %v1262_v35  ;;  %174 = vmatmul.bf16.vlgmr.msra.gmra.mxu1 %v21_v45 }
  0x25   :  { %489 = vmatpush.bf16.msrb.mxu1 %v1246_v37 }
  0x26   :  { %409 = vmatpush.bf16.msrb.mxu0 %v1237_v42 }
  0x27   :  { %571 = vmatpush.bf16.msrb.mxu2 %v1253_v43 }
  0x28   :  { %652 = vmatpush.bf16.msrb.mxu3 %v1261_v46 }
  0x29   :  { %490 = vmatpush.bf16.msrb.mxu1 %v1245_v47 }
  0x2a   :  { %410 = vmatpush.bf16.msrb.mxu0 %v1236_v48 }
  0x2b   :  { %572 = vmatpush.bf16.msrb.mxu2 %v1252_v49  ;;  %v1271_v49 = vld [vmem:[%s1564_s2] ss:$0 sm:$0xff] }
  0x2c   :  { %653 = vmatpush.bf16.msrb.mxu3 %v1260_v50 }
  0x2d   :  { %491 = vmatpush.bf16.msrb.mxu1 %v1244_v51 }
  0x2e   :  { %411 = vmatpush.bf16.msrb.mxu0 %v1235_v52  ;;  %v1272_v52 = vld [vmem:[%s1565_s3] ss:$0 sm:$0xff] }
  0x2f   :  { %573 = vmatpush.bf16.msrb.mxu2 %v1251_v53 }
  0x30   :  { %654 = vmatpush.bf16.msrb.mxu3 %v1259_v54 }
  0x31   :  { %492 = vmatpush.bf16.msrb.mxu1 %v1243_v55 }
  0x32   :  { %412 = vmatpush.bf16.msrb.mxu0 %v1234_v56 }
  0x33   :  { %574 = vmatpush.bf16.msrb.mxu2 %v1250_v57 }
  0x34   :  { %655 = vmatpush.bf16.msrb.mxu3 %v1258_v58 }
  0x35   :  { %493 = vmatpush.bf16.msrb.mxu1 %v1242_v59 }
  0x36   :  { %413 = vmatpush.bf16.msrb.mxu0 %v1233_v60 }
  0x37   :  { %575 = vmatpush.bf16.msrb.mxu2 %v1249_v61 }
  0x38   :  { %656 = vmatpush.bf16.msrb.mxu3 %v1257_v62 }
  0x39   :  { %494 = vmatpush.bf16.msrb.mxu1 %v1241_v63 }
  0x3a   :  { %414 = vmatpush.bf16.msrb.mxu0 %v1232_v0 }
  0x3b   :  { %576 = vmatpush.bf16.msrb.mxu2 %v1248_v1 }
  0x3c   :  { %657 = vmatpush.bf16.msrb.mxu3 %v1256_v2 }
  0x3d   :  { %495 = vmatpush.bf16.msrb.mxu1 %v1240_v3  ;;  %v775_v3 = vld [vmem:[%s1566_s4] sm:$0xff] }
  0x3e   :  { %415 = vmatpush.bf16.msrb.mxu0 %v1231_v4 }
  0x3f   :  { %577 = vmatpush.bf16.msrb.mxu2 %v1247_v5 }
  0x40   :  { %658 = vmatpush.bf16.msrb.mxu3 %v1255_v9 }
  0x41   :  { %496 = vmatpush.bf16.msrb.mxu1 %v1239_v10  ;;  %416 = vmatmul.bf16.vlgmr.msrb.gmra.mxu0 %v342_v13 }
  0x42   :  { %732 = vmatpush.bf16.msra.mxu0 %v1270_v8  ;;  %578 = vmatmul.bf16.vlgmr.msrb.gmra.mxu2 %v504_v12 }
  0x43   :  { %659 = vmatmul.bf16.vlgmr.msrb.gmra.mxu3 %v585_v16 }
  0x44   :  { %497 = vmatmul.bf16.vlgmr.msrb.gmra.mxu1 %v423_v17 }
  0x46   :  { %733 = vmatpush.bf16.msra.mxu0 %v1269_v15 }
  0x4a   :  { %734 = vmatpush.bf16.msra.mxu0 %v1268_v18 }
  0x4e   :  { %735 = vmatpush.bf16.msra.mxu0 %v1267_v19 }
  0x52   :  { %736 = vmatpush.bf16.msra.mxu0 %v1266_v20 }
  0x56   :  { %737 = vmatpush.bf16.msra.mxu0 %v1265_v21 }
  0x5a   :  { %738 = vmatpush.bf16.msra.mxu0 %v1264_v22 }
  0x5e   :  { %739 = vmatpush.bf16.msra.mxu0 %v1263_v23 }
  0x61   :  { %740 = vmatmul.bf16.vlgmr.msra.gmra.mxu0 %v666_v25 }
  0x9e   :  { %v114_v26 = vpop.f32.mrf.mxu0 }
  0xa1   :  { %v175_v27 = vpop.f32.mrf.mxu1 }
  0xa2   :  { %v176_v36 = vadd.f32 %v175_v27, %v114_v26 }
  0xa5   :  { %v255_v28 = vpop.f32.mrf.mxu2 }
  0xa6   :  { %v336_v29 = vpop.f32.mrf.mxu3  ;;  %v116_v30 = vpop.f32.mrf.mxu0  ;;  %v259_v38 = vadd.f32 %v255_v28, %v176_v36 }
  0xa8   :  { %v340_v42 = vadd.f32 %v336_v29, %v259_v38 }
  0xa9   :  { %v177_v31 = vpop.f32.mrf.mxu1 }
  0xad   :  { %v257_v32 = vpop.f32.mrf.mxu2 }
  0xae   :  { %v338_v33 = vpop.f32.mrf.mxu3 }
  0xbe   :  { %v417_v34 = vpop.f32.mrf.mxu0 }
  0xbf   :  { %v421_v44 = vadd.f32 %v417_v34, %v340_v42 }
  0xc1   :  { %v498_v35 = vpop.f32.mrf.mxu1 }
  0xc2   :  { %v502_v46 = vadd.f32 %v498_v35, %v421_v44 }
  0xc5   :  { %v579_v37 = vpop.f32.mrf.mxu2 }
  0xc6   :  { %v660_v39 = vpop.f32.mrf.mxu3  ;;  %v419_v40 = vpop.f32.mrf.mxu0  ;;  %v583_v47 = vadd.f32 %v579_v37, %v502_v46 }
  0xc8   :  { %v664_v48 = vadd.f32 %v660_v39, %v583_v47 }
  0xc9   :  { %v500_v41 = vpop.f32.mrf.mxu1 }
  0xcd   :  { %v581_v43 = vpop.f32.mrf.mxu2 }
  0xce   :  { %v662_v45 = vpop.f32.mrf.mxu3 }
  0xde   :  { %v741_v50 = vpop.f32.mrf.mxu0 }
  0xdf   :  { %v745_v51 = vadd.f32 %v741_v50, %v664_v48 }
  0xe1   :  { %v750_v53 = vmul.f32 %v1271_v49, %v745_v51 }
  0xe3   :  { %v755_v54 = vadd.f32 %v1272_v52, %v750_v53 }
  0xe5   :  { %v1198_v55 = vmul.f32 -1.442695, %v755_v54 }
  0xe6   :  { %v743_v56 = vpop.f32.mrf.mxu0 }
  0xe7   :  { %1273 = vpow2.f32 %v1198_v55 }
  0xed   :  { %v1274_v57 = vpop.eup %1273 }
  0xee   :  { %v759_v58 = vadd.f32 1.0, %v1274_v57 }
  0xf0   :  { %1275 = vrcp.f32 %v759_v58  ;;  %v771_v62 = vand.u32 2147483648, %v759_v58  ;;  %v769_v0 = vand.u32 2147483647, %v759_v58  ;;  %vm765_vm1 = vweird.f32 %v759_v58 }
  0xf2   :  { %v772_v2 = vor.u32 1.1754944e-38, %v771_v62  ;;  %vm770_vm3 = vcmp.eq.f32.partialorder %v769_v0, 8.507059e+37 }
  0xf6   :  { %v1276_v59 = vpop.eup %1275 }
  0xf7   :  { %v761_v60 = vmul.f32 %v1276_v59, %v759_v58  ;;  %vm766_vm0 = vweird.f32 %v1276_v59 }
  0xf8   :  { %vm767_vm2 = vmor %vm765_vm1, %vm766_vm0 }
  0xf9   :  { %v762_v61 = vsub.f32 1.0, %v761_v60 }
  0xfb   :  { %v763_v63 = vmul.f32 %v1276_v59, %v762_v61 }
  0xfd   :  { %v764_v1 = vadd.f32 %v1276_v59, %v763_v63 }
  0xff   :  { %v768_v4 = vsel %vm767_vm2, %v1276_v59, %v764_v1 }
 0x100   :  { %v773_v5 = vsel %vm770_vm3, %v772_v2, %v768_v4 }
 0x101   :  { %v776_v6 = vmul.f32 %v775_v3, %v773_v5 }
 0x103   :  { %777 = vst [vmem:[%s1567_s5] sm:$0xff] %v776_v6 }

// kernel: graphfeat_forward.14
= control target key start
LH: loop header
LB: loop body
LE: loop exit
PB: predicated region body
PF: predicated region fallthrough
CT: control target
= control target key end

     0   :  { %s3327_s3 = inlined_call_operand.vmem [shape: bf16[9,128,128], index: 3, kind: input, shape index: {}]   ;;  %s3328_s2 = inlined_call_operand.vmem [shape: bf16[9,128,128], index: 2, kind: input, shape index: {}]   ;;  %s3329_s1 = inlined_call_operand.vmem [shape: f32[38,128], index: 1, kind: input, shape index: {}]   ;;  %s3330_s0 = inlined_call_operand.vmem [shape: f32[38,128], index: 0, kind: input, shape index: {}]   ;;  %s3331_s4 = inlined_call_operand.vmem [shape: f32[1,128], index: 4, kind: input, shape index: {}]   ;;  %s3332_s5 = inlined_call_operand.vmem [shape: f32[1,128], index: 5, kind: input, shape index: {}]   ;;  %s3333_s6 = inlined_call_operand.vmem [shape: f32[24,128], index: 6, kind: output, shape index: {}]  }
   0x1   :  { %v2524_v0 = vld [vmem:[%s3327_s3 + $0x38] sm:$0xff]  ;;  %v2523_v4 = vld [vmem:[%s3327_s3 + $0x30] sm:$0xff]  ;;  %v2522_v8 = vld [vmem:[%s3327_s3 + $0x28] sm:$0xff] }
   0x2   :  { %v2516_v1 = vld [vmem:[%s3328_s2 + $0x38] sm:$0xff]  ;;  %113 = vmatpush.bf16.msra.mxu0 %v2524_v0  ;;  %v2515_v5 = vld [vmem:[%s3328_s2 + $0x30] sm:$0xff]  ;;  %v2514_v9 = vld [vmem:[%s3328_s2 + $0x28] sm:$0xff] }
   0x3   :  { %v2532_v2 = vld [vmem:[%s3328_s2 + $0x78] sm:$0xff]  ;;  %179 = vmatpush.bf16.msra.mxu1 %v2516_v1  ;;  %v2531_v6 = vld [vmem:[%s3328_s2 + $0x70] sm:$0xff]  ;;  %v2530_v10 = vld [vmem:[%s3328_s2 + $0x68] sm:$0xff] }
   0x4   :  { %v2540_v3 = vld [vmem:[%s3327_s3 + $0x78] sm:$0xff]  ;;  %267 = vmatpush.bf16.msra.mxu2 %v2532_v2  ;;  %v2539_v7 = vld [vmem:[%s3327_s3 + $0x70] sm:$0xff]  ;;  %v2538_v11 = vld [vmem:[%s3327_s3 + $0x68] sm:$0xff] }
   0x5   :  { %358 = vmatpush.bf16.msra.mxu3 %v2540_v3  ;;  %v2521_v12 = vld [vmem:[%s3327_s3 + $0x20] sm:$0xff]  ;;  %v2520_v16 = vld [vmem:[%s3327_s3 + $0x18] sm:$0xff]  ;;  %v2519_v20 = vld [vmem:[%s3327_s3 + $0x10] sm:$0xff] }
   0x6   :  { %114 = vmatpush.bf16.msra.mxu0 %v2523_v4  ;;  %v2513_v13 = vld [vmem:[%s3328_s2 + $0x20] sm:$0xff]  ;;  %v2512_v17 = vld [vmem:[%s3328_s2 + $0x18] sm:$0xff]  ;;  %v2511_v21 = vld [vmem:[%s3328_s2 + $0x10] sm:$0xff] }
   0x7   :  { %180 = vmatpush.bf16.msra.mxu1 %v2515_v5  ;;  %v2529_v14 = vld [vmem:[%s3328_s2 + $0x60] sm:$0xff]  ;;  %v2528_v18 = vld [vmem:[%s3328_s2 + $0x58] sm:$0xff]  ;;  %v2527_v22 = vld [vmem:[%s3328_s2 + $0x50] sm:$0xff] }
   0x8   :  { %268 = vmatpush.bf16.msra.mxu2 %v2531_v6  ;;  %v2537_v15 = vld [vmem:[%s3327_s3 + $0x60] sm:$0xff]  ;;  %v2536_v19 = vld [vmem:[%s3327_s3 + $0x58] sm:$0xff]  ;;  %v2535_v23 = vld [vmem:[%s3327_s3 + $0x50] sm:$0xff] }
   0x9   :  { %359 = vmatpush.bf16.msra.mxu3 %v2539_v7  ;;  %v2518_v24 = vld [vmem:[%s3327_s3 + $0x8] sm:$0xff]  ;;  %v2517_v28 = vld [vmem:[%s3327_s3] sm:$0xff]  ;;  %v2548_v40 = vld [vmem:[%s3328_s2 + $0xb8] sm:$0xff] }
   0xa   :  { %115 = vmatpush.bf16.msra.mxu0 %v2522_v8  ;;  %v2510_v25 = vld [vmem:[%s3328_s2 + $0x8] sm:$0xff]  ;;  %v2509_v29 = vld [vmem:[%s3328_s2] sm:$0xff]  ;;  %v2556_v41 = vld [vmem:[%s3327_s3 + $0xb8] sm:$0xff] }
   0xb   :  { %181 = vmatpush.bf16.msra.mxu1 %v2514_v9  ;;  %v2526_v26 = vld [vmem:[%s3328_s2 + $0x48] sm:$0xff]  ;;  %v2525_v30 = vld [vmem:[%s3328_s2 + $0x40] sm:$0xff]  ;;  %v2564_v46 = vld [vmem:[%s3328_s2 + $0xf8] sm:$0xff] }
   0xc   :  { %269 = vmatpush.bf16.msra.mxu2 %v2530_v10  ;;  %v2534_v27 = vld [vmem:[%s3327_s3 + $0x48] sm:$0xff]  ;;  %v2533_v31 = vld [vmem:[%s3327_s3 + $0x40] sm:$0xff]  ;;  %v2572_v47 = vld [vmem:[%s3327_s3 + $0xf8] sm:$0xff] }
   0xd   :  { %360 = vmatpush.bf16.msra.mxu3 %v2538_v11  ;;  %v44_v32 = vld [vmem:[%s3329_s1] sm:$0xff]  ;;  %v2808_v33 = vld [vmem:[%s3329_s1 + $0x8] sm:$0xff]  ;;  %v2547_v48 = vld [vmem:[%s3328_s2 + $0xb0] sm:$0xff] }
   0xe   :  { %116 = vmatpush.bf16.msra.mxu0 %v2521_v12  ;;  %v23_v34 = vld [vmem:[%s3330_s0] sm:$0xff]  ;;  %v2816_v35 = vld [vmem:[%s3330_s0 + $0x8] sm:$0xff]  ;;  %v47_v42 = vpack.c.bf16 %v2808_v33, %v44_v32  ;;  %v2555_v49 = vld [vmem:[%s3327_s3 + $0xb0] sm:$0xff] }
   0xf   :  { %182 = vmatpush.bf16.msra.mxu1 %v2513_v13  ;;  %v197_v36 = vld [vmem:[%s3330_s0 + $0x1] sm:$0xff]  ;;  %v198_v37 = vld [vmem:[%s3330_s0 + $0x9] sm:$0xff]  ;;  %v26_v43 = vpack.c.bf16 %v2816_v35, %v23_v34  ;;  %v199_v62 = vld [vmem:[%s3330_s0 + $0x11] sm:$0xff] }
  0x10   :  { %270 = vmatpush.bf16.msra.mxu2 %v2529_v14  ;;  %v288_v38 = vld [vmem:[%s3329_s1 + $0x1] sm:$0xff]  ;;  %v289_v39 = vld [vmem:[%s3329_s1 + $0x9] sm:$0xff]  ;;  %v200_v44 = vpack.c.bf16 %v198_v37, %v197_v36  ;;  %v290_v63 = vld [vmem:[%s3329_s1 + $0x11] sm:$0xff]  ;;  %v201_v4 = vpack.c.bf16 %v199_v62, %v199_v62 }
  0x11   :  { %361 = vmatpush.bf16.msra.mxu3 %v2537_v15  ;;  %v291_v45 = vpack.c.bf16 %v289_v39, %v288_v38  ;;  %v2563_v50 = vld [vmem:[%s3328_s2 + $0xf0] sm:$0xff]  ;;  %v2546_v52 = vld [vmem:[%s3328_s2 + $0xa8] sm:$0xff]  ;;  %v2545_v56 = vld [vmem:[%s3328_s2 + $0xa0] sm:$0xff]  ;;  %v292_v5 = vpack.c.bf16 %v290_v63, %v290_v63 }
  0x12   :  { %117 = vmatpush.bf16.msra.mxu0 %v2520_v16  ;;  %v2571_v51 = vld [vmem:[%s3327_s3 + $0xf0] sm:$0xff]  ;;  %v2554_v53 = vld [vmem:[%s3327_s3 + $0xa8] sm:$0xff]  ;;  %v2553_v57 = vld [vmem:[%s3327_s3 + $0xa0] sm:$0xff] }
  0x13   :  { %183 = vmatpush.bf16.msra.mxu1 %v2512_v17  ;;  %v2562_v54 = vld [vmem:[%s3328_s2 + $0xe8] sm:$0xff]  ;;  %v2561_v58 = vld [vmem:[%s3328_s2 + $0xe0] sm:$0xff]  ;;  %v2880_v59 = vld [vmem:[%s3329_s1 + $0x10] sm:$0xff] }
  0x14   :  { %271 = vmatpush.bf16.msra.mxu2 %v2528_v18  ;;  %v2570_v55 = vld [vmem:[%s3327_s3 + $0xe8] sm:$0xff]  ;;  %v2885_v60 = vld [vmem:[%s3330_s0 + $0x10] sm:$0xff]  ;;  %v2569_v61 = vld [vmem:[%s3327_s3 + $0xe0] sm:$0xff]  ;;  %v48_v2 = vpack.c.bf16 %v2880_v59, %v2880_v59 }
  0x15   :  { %362 = vmatpush.bf16.msra.mxu3 %v2536_v19  ;;  %v2544_v0 = vld [vmem:[%s3328_s2 + $0x98] sm:$0xff]  ;;  %v27_v3 = vpack.c.bf16 %v2885_v60, %v2885_v60  ;;  %v2543_v8 = vld [vmem:[%s3328_s2 + $0x90] sm:$0xff]  ;;  %v2542_v12 = vld [vmem:[%s3328_s2 + $0x88] sm:$0xff] }
  0x16   :  { %118 = vmatpush.bf16.msra.mxu0 %v2519_v20  ;;  %v2552_v1 = vld [vmem:[%s3327_s3 + $0x98] sm:$0xff]  ;;  %v2551_v9 = vld [vmem:[%s3327_s3 + $0x90] sm:$0xff]  ;;  %v2550_v13 = vld [vmem:[%s3327_s3 + $0x88] sm:$0xff] }
  0x17   :  { %184 = vmatpush.bf16.msra.mxu1 %v2511_v21  ;;  %v2560_v6 = vld [vmem:[%s3328_s2 + $0xd8] sm:$0xff]  ;;  %v2559_v10 = vld [vmem:[%s3328_s2 + $0xd0] sm:$0xff]  ;;  %v2558_v14 = vld [vmem:[%s3328_s2 + $0xc8] sm:$0xff] }
  0x18   :  { %272 = vmatpush.bf16.msra.mxu2 %v2527_v22  ;;  %v2568_v7 = vld [vmem:[%s3327_s3 + $0xd8] sm:$0xff]  ;;  %v2567_v11 = vld [vmem:[%s3327_s3 + $0xd0] sm:$0xff]  ;;  %v2566_v15 = vld [vmem:[%s3327_s3 + $0xc8] sm:$0xff] }
  0x19   :  { %363 = vmatpush.bf16.msra.mxu3 %v2535_v23  ;;  %v2541_v16 = vld [vmem:[%s3328_s2 + $0x80] sm:$0xff]  ;;  %v380_v21 = vld [vmem:[%s3330_s0 + $0xa] sm:$0xff]  ;;  %v2580_v22 = vld [vmem:[%s3328_s2 + $0x138] sm:$0xff] }
  0x1a   :  { %119 = vmatpush.bf16.msra.mxu0 %v2518_v24  ;;  %v2549_v17 = vld [vmem:[%s3327_s3 + $0x80] sm:$0xff]  ;;  %v2588_v23 = vld [vmem:[%s3327_s3 + $0x138] sm:$0xff]  ;;  %v2579_v38 = vld [vmem:[%s3328_s2 + $0x130] sm:$0xff] }
  0x1b   :  { %185 = vmatpush.bf16.msra.mxu1 %v2510_v25  ;;  %v379_v18 = vld [vmem:[%s3330_s0 + $0x2] sm:$0xff]  ;;  %v471_v25 = vld [vmem:[%s3329_s1 + $0xa] sm:$0xff] }
  0x1c   :  { %273 = vmatpush.bf16.msra.mxu2 %v2526_v26  ;;  %v2557_v19 = vld [vmem:[%s3328_s2 + $0xc0] sm:$0xff]  ;;  %v382_v32 = vpack.c.bf16 %v380_v21, %v379_v18  ;;  %v2587_v39 = vld [vmem:[%s3327_s3 + $0x130] sm:$0xff]  ;;  %v2628_v18 = vld [vmem:[%s3328_s2 + $0x1f8] sm:$0xff] }
  0x1d   :  { %364 = vmatpush.bf16.msra.mxu3 %v2534_v27  ;;  %v2565_v20 = vld [vmem:[%s3327_s3 + $0xc0] sm:$0xff]  ;;  %v2972_v27 = vld [vmem:[%s3330_s0 + $0xe] sm:$0xff] }
  0x1e   :  { %120 = vmatpush.bf16.msra.mxu0 %v2517_v28  ;;  %v470_v24 = vld [vmem:[%s3329_s1 + $0x2] sm:$0xff] }
  0x1f   :  { %186 = vmatpush.bf16.msra.mxu1 %v2509_v29  ;;  %v561_v26 = vld [vmem:[%s3330_s0 + $0x6] sm:$0xff]  ;;  %v2980_v29 = vld [vmem:[%s3329_s1 + $0xe] sm:$0xff]  ;;  %v473_v34 = vpack.c.bf16 %v471_v25, %v470_v24 }
  0x20   :  { %274 = vmatpush.bf16.msra.mxu2 %v2525_v30  ;;  %v652_v28 = vld [vmem:[%s3329_s1 + $0x6] sm:$0xff]  ;;  %v2596_v30 = vld [vmem:[%s3328_s2 + $0x178] sm:$0xff]  ;;  %v564_v36 = vpack.c.bf16 %v2972_v27, %v561_v26  ;;  %v2611_v24 = vld [vmem:[%s3328_s2 + $0x1b0] sm:$0xff] }
  0x21   :  { %365 = vmatpush.bf16.msra.mxu3 %v2533_v31  ;;  %121 = vmatmul.bf16.vlgmr.msra.gmra.mxu0 %v47_v42  ;;  %v2604_v31 = vld [vmem:[%s3327_s3 + $0x178] sm:$0xff]  ;;  %v655_v37 = vpack.c.bf16 %v2980_v29, %v652_v28  ;;  %v2578_v42 = vld [vmem:[%s3328_s2 + $0x128] sm:$0xff]  ;;  %v2619_v25 = vld [vmem:[%s3327_s3 + $0x1b0] sm:$0xff] }
  0x22   :  { %449 = vmatpush.bf16.msrb.mxu0 %v2548_v40  ;;  %187 = vmatmul.bf16.vlgmr.msra.gmra.mxu1 %v26_v43  ;;  %v2595_v40 = vld [vmem:[%s3328_s2 + $0x170] sm:$0xff]  ;;  %v2586_v43 = vld [vmem:[%s3327_s3 + $0x128] sm:$0xff] }
  0x23   :  { %540 = vmatpush.bf16.msrb.mxu1 %v2556_v41  ;;  %275 = vmatmul.bf16.vlgmr.msra.gmra.mxu2 %v200_v44  ;;  %v2603_v41 = vld [vmem:[%s3327_s3 + $0x170] sm:$0xff]  ;;  %v2594_v44 = vld [vmem:[%s3328_s2 + $0x168] sm:$0xff] }
  0x24   :  { %366 = vmatmul.bf16.vlgmr.msra.gmra.mxu3 %v291_v45  ;;  %631 = vmatpush.bf16.msrb.mxu2 %v2564_v46  ;;  %v2602_v45 = vld [vmem:[%s3327_s3 + $0x168] sm:$0xff]  ;;  %v2577_v46 = vld [vmem:[%s3328_s2 + $0x120] sm:$0xff]  ;;  %v2627_v26 = vld [vmem:[%s3328_s2 + $0x1f0] sm:$0xff] }
  0x25   :  { %722 = vmatpush.bf16.msrb.mxu3 %v2572_v47  ;;  %v2585_v47 = vld [vmem:[%s3327_s3 + $0x120] sm:$0xff]  ;;  %v2634_v28 = vld [vmem:[%s3327_s3 + $0x1e8] sm:$0xff] }
  0x26   :  { %450 = vmatpush.bf16.msrb.mxu0 %v2547_v48  ;;  %v2593_v48 = vld [vmem:[%s3328_s2 + $0x160] sm:$0xff] }
  0x27   :  { %541 = vmatpush.bf16.msrb.mxu1 %v2555_v49  ;;  %v2601_v49 = vld [vmem:[%s3327_s3 + $0x160] sm:$0xff] }
  0x28   :  { %632 = vmatpush.bf16.msrb.mxu2 %v2563_v50  ;;  %v381_v50 = vld [vmem:[%s3330_s0 + $0x12] sm:$0xff] }
  0x29   :  { %723 = vmatpush.bf16.msrb.mxu3 %v2571_v51  ;;  %v472_v51 = vld [vmem:[%s3329_s1 + $0x12] sm:$0xff] }
  0x2a   :  { %451 = vmatpush.bf16.msrb.mxu0 %v2546_v52  ;;  %v3035_v52 = vld [vmem:[%s3330_s0 + $0x16] sm:$0xff] }
  0x2b   :  { %542 = vmatpush.bf16.msrb.mxu1 %v2554_v53  ;;  %v3040_v53 = vld [vmem:[%s3329_s1 + $0x16] sm:$0xff]  ;;  %v565_v62 = vpack.c.bf16 %v3035_v52, %v3035_v52 }
  0x2c   :  { %633 = vmatpush.bf16.msrb.mxu2 %v2562_v54  ;;  %v2576_v54 = vld [vmem:[%s3328_s2 + $0x118] sm:$0xff]  ;;  %v656_v63 = vpack.c.bf16 %v3040_v53, %v3040_v53 }
  0x2d   :  { %724 = vmatpush.bf16.msrb.mxu3 %v2570_v55  ;;  %v2584_v55 = vld [vmem:[%s3327_s3 + $0x118] sm:$0xff] }
  0x2e   :  { %452 = vmatpush.bf16.msrb.mxu0 %v2545_v56  ;;  %v2592_v56 = vld [vmem:[%s3328_s2 + $0x158] sm:$0xff] }
  0x2f   :  { %543 = vmatpush.bf16.msrb.mxu1 %v2553_v57  ;;  %v2600_v57 = vld [vmem:[%s3327_s3 + $0x158] sm:$0xff] }
  0x30   :  { %634 = vmatpush.bf16.msrb.mxu2 %v2561_v58  ;;  %v383_v58 = vpack.c.bf16 %v381_v50, %v381_v50  ;;  %v2623_v50 = vld [vmem:[%s3328_s2 + $0x1d0] sm:$0xff] }
  0x31   :  { %725 = vmatpush.bf16.msrb.mxu3 %v2569_v61  ;;  %126 = vmatmul.bf16.gmra.mxu0 %v48_v2  ;;  %v474_v61 = vpack.c.bf16 %v472_v51, %v472_v51  ;;  %v2591_v2 = vld [vmem:[%s3328_s2 + $0x150] sm:$0xff] }
  0x32   :  { %453 = vmatpush.bf16.msrb.mxu0 %v2544_v0  ;;  %192 = vmatmul.bf16.gmra.mxu1 %v27_v3  ;;  %v2575_v0 = vld [vmem:[%s3328_s2 + $0x110] sm:$0xff] }
  0x33   :  { %544 = vmatpush.bf16.msrb.mxu1 %v2552_v1  ;;  %280 = vmatmul.bf16.gmra.mxu2 %v201_v4  ;;  %v2583_v1 = vld [vmem:[%s3327_s3 + $0x110] sm:$0xff]  ;;  %v2574_v4 = vld [vmem:[%s3328_s2 + $0x108] sm:$0xff] }
  0x34   :  { %371 = vmatmul.bf16.gmra.mxu3 %v292_v5  ;;  %635 = vmatpush.bf16.msrb.mxu2 %v2560_v6  ;;  %v2599_v3 = vld [vmem:[%s3327_s3 + $0x150] sm:$0xff]  ;;  %v2582_v5 = vld [vmem:[%s3327_s3 + $0x108] sm:$0xff] }
  0x35   :  { %726 = vmatpush.bf16.msrb.mxu3 %v2568_v7  ;;  %v2590_v6 = vld [vmem:[%s3328_s2 + $0x148] sm:$0xff]  ;;  %v2631_v51 = vld [vmem:[%s3327_s3 + $0x1d0] sm:$0xff] }
  0x36   :  { %454 = vmatpush.bf16.msrb.mxu0 %v2543_v8  ;;  %v2598_v7 = vld [vmem:[%s3327_s3 + $0x148] sm:$0xff]  ;;  %v2573_v8 = vld [vmem:[%s3328_s2 + $0x100] sm:$0xff] }
  0x37   :  { %545 = vmatpush.bf16.msrb.mxu1 %v2551_v9  ;;  %v2581_v9 = vld [vmem:[%s3327_s3 + $0x100] sm:$0xff] }
  0x38   :  { %636 = vmatpush.bf16.msrb.mxu2 %v2559_v10  ;;  %v2589_v10 = vld [vmem:[%s3328_s2 + $0x140] sm:$0xff] }
  0x39   :  { %727 = vmatpush.bf16.msrb.mxu3 %v2567_v11  ;;  %v2597_v11 = vld [vmem:[%s3327_s3 + $0x140] sm:$0xff] }
  0x3a   :  { %455 = vmatpush.bf16.msrb.mxu0 %v2542_v12  ;;  %v743_v12 = vld [vmem:[%s3330_s0 + $0x7] sm:$0xff] }
  0x3b   :  { %546 = vmatpush.bf16.msrb.mxu1 %v2550_v13  ;;  %v744_v13 = vld [vmem:[%s3330_s0 + $0xf] sm:$0xff] }
  0x3c   :  { %637 = vmatpush.bf16.msrb.mxu2 %v2558_v14  ;;  %v834_v14 = vld [vmem:[%s3329_s1 + $0x7] sm:$0xff] }
  0x3d   :  { %728 = vmatpush.bf16.msrb.mxu3 %v2566_v15  ;;  %v2612_v15 = vld [vmem:[%s3328_s2 + $0x1b8] sm:$0xff] }
  0x3e   :  { %456 = vmatpush.bf16.msrb.mxu0 %v2541_v16  ;;  %v2620_v16 = vld [vmem:[%s3327_s3 + $0x1b8] sm:$0xff] }
  0x3f   :  { %547 = vmatpush.bf16.msrb.mxu1 %v2549_v17  ;;  %v835_v17 = vld [vmem:[%s3329_s1 + $0xf] sm:$0xff] }
  0x40   :  { %638 = vmatpush.bf16.msrb.mxu2 %v2557_v19  ;;  %v2636_v19 = vld [vmem:[%s3327_s3 + $0x1f8] sm:$0xff]  ;;  %v837_v21 = vpack.c.bf16 %v835_v17, %v834_v14  ;;  %v2643_v14 = vld [vmem:[%s3328_s2 + $0x230] sm:$0xff]  ;;  %v2650_v17 = vld [vmem:[%s3327_s3 + $0x228] sm:$0xff] }
  0x41   :  { %729 = vmatpush.bf16.msrb.mxu3 %v2565_v20  ;;  %457 = vmatmul.bf16.vlgmr.msrb.gmra.mxu0 %v382_v32  ;;  %v746_v20 = vpack.c.bf16 %v744_v13, %v743_v12  ;;  %v2625_v32 = vld [vmem:[%s3328_s2 + $0x1e0] sm:$0xff] }
  0x42   :  { %813 = vmatpush.bf16.msra.mxu0 %v2580_v22  ;;  %548 = vmatmul.bf16.vlgmr.msrb.gmra.mxu1 %v473_v34  ;;  %v928_v22 = vpack.c.bf16 %v2885_v60, %v2816_v35  ;;  %v2635_v35 = vld [vmem:[%s3327_s3 + $0x1f0] sm:$0xff]  ;;  %v2626_v60 = vld [vmem:[%s3328_s2 + $0x1e8] sm:$0xff]  ;;  %v2633_v34 = vld [vmem:[%s3327_s3 + $0x1e0] sm:$0xff] }
  0x43   :  { %904 = vmatpush.bf16.msra.mxu1 %v2588_v23  ;;  %639 = vmatmul.bf16.vlgmr.msrb.gmra.mxu2 %v564_v36  ;;  %v1019_v23 = vpack.c.bf16 %v2880_v59, %v2808_v33  ;;  %v2610_v33 = vld [vmem:[%s3328_s2 + $0x1a8] sm:$0xff]  ;;  %v745_v36 = vld [vmem:[%s3330_s0 + $0x17] sm:$0xff] }
  0x44   :  { %995 = vmatpush.bf16.msra.mxu2 %v2596_v30  ;;  %730 = vmatmul.bf16.vlgmr.msrb.gmra.mxu3 %v655_v37  ;;  %v2618_v59 = vld [vmem:[%s3327_s3 + $0x1a8] sm:$0xff]  ;;  %v2609_v30 = vld [vmem:[%s3328_s2 + $0x1a0] sm:$0xff]  ;;  %v836_v37 = vld [vmem:[%s3329_s1 + $0x17] sm:$0xff] }
  0x45   :  { %1086 = vmatpush.bf16.msra.mxu3 %v2604_v31  ;;  %v2617_v31 = vld [vmem:[%s3327_s3 + $0x1a0] sm:$0xff] }
  0x46   :  { %814 = vmatpush.bf16.msra.mxu0 %v2579_v38  ;;  %v927_v38 = vld [vmem:[%s3330_s0 + $0x18] sm:$0xff] }
  0x47   :  { %905 = vmatpush.bf16.msra.mxu1 %v2587_v39  ;;  %v1018_v39 = vld [vmem:[%s3329_s1 + $0x18] sm:$0xff] }
  0x48   :  { %996 = vmatpush.bf16.msra.mxu2 %v2595_v40  ;;  %v2608_v40 = vld [vmem:[%s3328_s2 + $0x198] sm:$0xff] }
  0x49   :  { %1087 = vmatpush.bf16.msra.mxu3 %v2603_v41  ;;  %v2616_v41 = vld [vmem:[%s3327_s3 + $0x198] sm:$0xff] }
  0x4a   :  { %815 = vmatpush.bf16.msra.mxu0 %v2578_v42  ;;  %v2624_v42 = vld [vmem:[%s3328_s2 + $0x1d8] sm:$0xff] }
  0x4b   :  { %906 = vmatpush.bf16.msra.mxu1 %v2586_v43  ;;  %v2632_v43 = vld [vmem:[%s3327_s3 + $0x1d8] sm:$0xff] }
  0x4c   :  { %997 = vmatpush.bf16.msra.mxu2 %v2594_v44  ;;  %v747_v44 = vpack.c.bf16 %v745_v36, %v745_v36  ;;  %v1473_v36 = vld [vmem:[%s3330_s0 + $0x1e] sm:$0xff] }
  0x4d   :  { %1088 = vmatpush.bf16.msra.mxu3 %v2602_v45  ;;  %v838_v45 = vpack.c.bf16 %v836_v37, %v836_v37  ;;  %v1564_v37 = vld [vmem:[%s3329_s1 + $0x1e] sm:$0xff] }
  0x4e   :  { %816 = vmatpush.bf16.msra.mxu0 %v2577_v46  ;;  %v929_v46 = vpack.c.bf16 %v927_v38, %v927_v38  ;;  %v1474_v38 = vpack.c.bf16 %v3035_v52, %v2972_v27 }
  0x4f   :  { %907 = vmatpush.bf16.msra.mxu1 %v2585_v47  ;;  %v1020_v47 = vpack.c.bf16 %v1018_v39, %v1018_v39  ;;  %v1565_v39 = vpack.c.bf16 %v3040_v53, %v2980_v29 }
  0x50   :  { %998 = vmatpush.bf16.msra.mxu2 %v2593_v48  ;;  %v2607_v48 = vld [vmem:[%s3328_s2 + $0x190] sm:$0xff] }
  0x51   :  { %1089 = vmatpush.bf16.msra.mxu3 %v2601_v49  ;;  %462 = vmatmul.bf16.gmra.mxu0 %v383_v58  ;;  %v2615_v49 = vld [vmem:[%s3327_s3 + $0x190] sm:$0xff]  ;;  %v2605_v58 = vld [vmem:[%s3328_s2 + $0x180] sm:$0xff] }
  0x52   :  { %817 = vmatpush.bf16.msra.mxu0 %v2576_v54  ;;  %553 = vmatmul.bf16.gmra.mxu1 %v474_v61  ;;  %v2606_v54 = vld [vmem:[%s3328_s2 + $0x188] sm:$0xff]  ;;  %v2613_v61 = vld [vmem:[%s3327_s3 + $0x180] sm:$0xff] }
  0x53   :  { %908 = vmatpush.bf16.msra.mxu1 %v2584_v55  ;;  %644 = vmatmul.bf16.gmra.mxu2 %v565_v62  ;;  %v2614_v55 = vld [vmem:[%s3327_s3 + $0x188] sm:$0xff]  ;;  %v2621_v62 = vld [vmem:[%s3328_s2 + $0x1c0] sm:$0xff] }
  0x54   :  { %999 = vmatpush.bf16.msra.mxu2 %v2592_v56  ;;  %735 = vmatmul.bf16.gmra.mxu3 %v656_v63  ;;  %v2622_v56 = vld [vmem:[%s3328_s2 + $0x1c8] sm:$0xff]  ;;  %v2629_v63 = vld [vmem:[%s3327_s3 + $0x1c0] sm:$0xff] }
  0x55   :  { %1090 = vmatpush.bf16.msra.mxu3 %v2600_v57  ;;  %v2630_v57 = vld [vmem:[%s3327_s3 + $0x1c8] sm:$0xff] }
  0x56   :  { %818 = vmatpush.bf16.msra.mxu0 %v2575_v0  ;;  %v1107_v0 = vld [vmem:[%s3330_s0 + $0xc] sm:$0xff] }
  0x57   :  { %909 = vmatpush.bf16.msra.mxu1 %v2583_v1  ;;  %v1108_v1 = vld [vmem:[%s3330_s0 + $0x14] sm:$0xff] }
  0x58   :  { %1000 = vmatpush.bf16.msra.mxu2 %v2591_v2  ;;  %v1198_v2 = vld [vmem:[%s3329_s1 + $0xc] sm:$0xff] }
  0x59   :  { %1091 = vmatpush.bf16.msra.mxu3 %v2599_v3  ;;  %v2644_v3 = vld [vmem:[%s3328_s2 + $0x238] sm:$0xff] }
  0x5a   :  { %819 = vmatpush.bf16.msra.mxu0 %v2574_v4  ;;  %v1199_v4 = vld [vmem:[%s3329_s1 + $0x14] sm:$0xff] }
  0x5b   :  { %910 = vmatpush.bf16.msra.mxu1 %v2582_v5  ;;  %v1289_v5 = vld [vmem:[%s3330_s0 + $0xd] sm:$0xff] }
  0x5c   :  { %1001 = vmatpush.bf16.msra.mxu2 %v2590_v6  ;;  %v2652_v6 = vld [vmem:[%s3327_s3 + $0x238] sm:$0xff] }
  0x5d   :  { %1092 = vmatpush.bf16.msra.mxu3 %v2598_v7  ;;  %v1290_v7 = vld [vmem:[%s3330_s0 + $0x15] sm:$0xff] }
  0x5e   :  { %820 = vmatpush.bf16.msra.mxu0 %v2573_v8  ;;  %v1380_v8 = vld [vmem:[%s3329_s1 + $0xd] sm:$0xff]  ;;  %v1292_v12 = vpack.c.bf16 %v1290_v7, %v1289_v5 }
  0x5f   :  { %911 = vmatpush.bf16.msra.mxu1 %v2581_v9  ;;  %v1381_v9 = vld [vmem:[%s3329_s1 + $0x15] sm:$0xff] }
  0x60   :  { %1002 = vmatpush.bf16.msra.mxu2 %v2589_v10  ;;  %v1110_v10 = vpack.c.bf16 %v1108_v1, %v1107_v0  ;;  %v1383_v13 = vpack.c.bf16 %v1381_v9, %v1380_v8 }
  0x61   :  { %1093 = vmatpush.bf16.msra.mxu3 %v2597_v11  ;;  %821 = vmatmul.bf16.vlgmr.msra.gmra.mxu0 %v746_v20  ;;  %v1201_v11 = vpack.c.bf16 %v1199_v4, %v1198_v2  ;;  %v1109_v20 = vld [vmem:[%s3330_s0 + $0x1c] sm:$0xff] }
  0x62   :  { %1177 = vmatpush.bf16.msrb.mxu0 %v2612_v15  ;;  %912 = vmatmul.bf16.vlgmr.msra.gmra.mxu1 %v837_v21  ;;  %v2651_v15 = vld [vmem:[%s3327_s3 + $0x230] sm:$0xff]  ;;  %v1200_v21 = vld [vmem:[%s3329_s1 + $0x1c] sm:$0xff] }
  0x63   :  { %1268 = vmatpush.bf16.msrb.mxu1 %v2620_v16  ;;  %1003 = vmatmul.bf16.vlgmr.msra.gmra.mxu2 %v928_v22  ;;  %v2642_v16 = vld [vmem:[%s3328_s2 + $0x228] sm:$0xff]  ;;  %v1291_v22 = vld [vmem:[%s3330_s0 + $0x1d] sm:$0xff] }
  0x64   :  { %1359 = vmatpush.bf16.msrb.mxu2 %v2628_v18  ;;  %1094 = vmatmul.bf16.vlgmr.msra.gmra.mxu3 %v1019_v23  ;;  %v2641_v18 = vld [vmem:[%s3328_s2 + $0x220] sm:$0xff] }
  0x65   :  { %1450 = vmatpush.bf16.msrb.mxu3 %v2636_v19  ;;  %v2649_v19 = vld [vmem:[%s3327_s3 + $0x220] sm:$0xff] }
  0x66   :  { %1178 = vmatpush.bf16.msrb.mxu0 %v2611_v24  ;;  %v1382_v23 = vld [vmem:[%s3329_s1 + $0x1d] sm:$0xff] }
  0x67   :  { %1269 = vmatpush.bf16.msrb.mxu1 %v2619_v25  ;;  %v2640_v24 = vld [vmem:[%s3328_s2 + $0x218] sm:$0xff] }
  0x68   :  { %1360 = vmatpush.bf16.msrb.mxu2 %v2627_v26  ;;  %v2648_v25 = vld [vmem:[%s3327_s3 + $0x218] sm:$0xff]  ;;  %v1111_v26 = vpack.c.bf16 %v1109_v20, %v1109_v20 }
  0x69   :  { %1451 = vmatpush.bf16.msrb.mxu3 %v2635_v35  ;;  %v1202_v35 = vpack.c.bf16 %v1200_v21, %v1200_v21 }
  0x6a   :  { %1179 = vmatpush.bf16.msrb.mxu0 %v2610_v33  ;;  %v1293_v33 = vpack.c.bf16 %v1291_v22, %v1291_v22 }
  0x6b   :  { %1270 = vmatpush.bf16.msrb.mxu1 %v2618_v59  ;;  %v1384_v59 = vpack.c.bf16 %v1382_v23, %v1382_v23 }
  0x6c   :  { %1361 = vmatpush.bf16.msrb.mxu2 %v2626_v60  ;;  %v2639_v60 = vld [vmem:[%s3328_s2 + $0x210] sm:$0xff] }
  0x6d   :  { %1452 = vmatpush.bf16.msrb.mxu3 %v2634_v28  ;;  %v2647_v28 = vld [vmem:[%s3327_s3 + $0x210] sm:$0xff] }
  0x6e   :  { %1180 = vmatpush.bf16.msrb.mxu0 %v2609_v30  ;;  %v2638_v30 = vld [vmem:[%s3328_s2 + $0x208] sm:$0xff] }
  0x6f   :  { %1271 = vmatpush.bf16.msrb.mxu1 %v2617_v31  ;;  %v2646_v31 = vld [vmem:[%s3327_s3 + $0x208] sm:$0xff] }
  0x70   :  { %1362 = vmatpush.bf16.msrb.mxu2 %v2625_v32  ;;  %v2637_v32 = vld [vmem:[%s3328_s2 + $0x200] sm:$0xff] }
  0x71   :  { %1453 = vmatpush.bf16.msrb.mxu3 %v2633_v34  ;;  %826 = vmatmul.bf16.gmra.mxu0 %v747_v44  ;;  %v2645_v34 = vld [vmem:[%s3327_s3 + $0x200] sm:$0xff] }
  0x72   :  { %1181 = vmatpush.bf16.msrb.mxu0 %v2608_v40  ;;  %917 = vmatmul.bf16.gmra.mxu1 %v838_v45 }
  0x73   :  { %1272 = vmatpush.bf16.msrb.mxu1 %v2616_v41  ;;  %1008 = vmatmul.bf16.gmra.mxu2 %v929_v46 }
  0x74   :  { %1363 = vmatpush.bf16.msrb.mxu2 %v2624_v42  ;;  %1099 = vmatmul.bf16.gmra.mxu3 %v1020_v47  ;;  %v1475_v42 = vpack.c.bf16 %v1473_v36, %v1473_v36 }
  0x75   :  { %1454 = vmatpush.bf16.msrb.mxu3 %v2632_v43  ;;  %v1566_v43 = vpack.c.bf16 %v1564_v37, %v1564_v37 }
  0x76   :  { %1182 = vmatpush.bf16.msrb.mxu0 %v2607_v48 }
  0x77   :  { %1273 = vmatpush.bf16.msrb.mxu1 %v2615_v49 }
  0x78   :  { %1364 = vmatpush.bf16.msrb.mxu2 %v2623_v50 }
  0x79   :  { %1455 = vmatpush.bf16.msrb.mxu3 %v2631_v51 }
  0x7a   :  { %1183 = vmatpush.bf16.msrb.mxu0 %v2606_v54 }
  0x7b   :  { %1274 = vmatpush.bf16.msrb.mxu1 %v2614_v55 }
  0x7c   :  { %1365 = vmatpush.bf16.msrb.mxu2 %v2622_v56 }
  0x7d   :  { %1456 = vmatpush.bf16.msrb.mxu3 %v2630_v57 }
  0x7e   :  { %1184 = vmatpush.bf16.msrb.mxu0 %v2605_v58 }
  0x7f   :  { %1275 = vmatpush.bf16.msrb.mxu1 %v2613_v61 }
  0x80   :  { %1366 = vmatpush.bf16.msrb.mxu2 %v2621_v62 }
  0x81   :  { %1457 = vmatpush.bf16.msrb.mxu3 %v2629_v63  ;;  %1185 = vmatmul.bf16.vlgmr.msrb.gmra.mxu0 %v1110_v10 }
  0x82   :  { %1541 = vmatpush.bf16.msra.mxu0 %v2644_v3  ;;  %1276 = vmatmul.bf16.vlgmr.msrb.gmra.mxu1 %v1201_v11 }
  0x83   :  { %1632 = vmatpush.bf16.msra.mxu1 %v2652_v6  ;;  %1367 = vmatmul.bf16.vlgmr.msrb.gmra.mxu2 %v1292_v12 }
  0x84   :  { %2653 = vmatpush.bf16.msra.mxu2 %v2644_v3  ;;  %1458 = vmatmul.bf16.vlgmr.msrb.gmra.mxu3 %v1383_v13 }
  0x85   :  { %2661 = vmatpush.bf16.msra.mxu3 %v2652_v6 }
  0x86   :  { %1542 = vmatpush.bf16.msra.mxu0 %v2643_v14 }
  0x87   :  { %1633 = vmatpush.bf16.msra.mxu1 %v2651_v15 }
  0x88   :  { %2654 = vmatpush.bf16.msra.mxu2 %v2643_v14 }
  0x89   :  { %2662 = vmatpush.bf16.msra.mxu3 %v2651_v15 }
  0x8a   :  { %1543 = vmatpush.bf16.msra.mxu0 %v2642_v16 }
  0x8b   :  { %1634 = vmatpush.bf16.msra.mxu1 %v2650_v17 }
  0x8c   :  { %2655 = vmatpush.bf16.msra.mxu2 %v2642_v16 }
  0x8d   :  { %2663 = vmatpush.bf16.msra.mxu3 %v2650_v17 }
  0x8e   :  { %1544 = vmatpush.bf16.msra.mxu0 %v2641_v18 }
  0x8f   :  { %1635 = vmatpush.bf16.msra.mxu1 %v2649_v19 }
  0x90   :  { %2656 = vmatpush.bf16.msra.mxu2 %v2641_v18 }
  0x91   :  { %2664 = vmatpush.bf16.msra.mxu3 %v2649_v19  ;;  %1190 = vmatmul.bf16.gmra.mxu0 %v1111_v26 }
  0x92   :  { %1545 = vmatpush.bf16.msra.mxu0 %v2640_v24  ;;  %1281 = vmatmul.bf16.gmra.mxu1 %v1202_v35 }
  0x93   :  { %1636 = vmatpush.bf16.msra.mxu1 %v2648_v25  ;;  %1372 = vmatmul.bf16.gmra.mxu2 %v1293_v33 }
  0x94   :  { %2657 = vmatpush.bf16.msra.mxu2 %v2640_v24  ;;  %1463 = vmatmul.bf16.gmra.mxu3 %v1384_v59 }
  0x95   :  { %2665 = vmatpush.bf16.msra.mxu3 %v2648_v25 }
  0x96   :  { %1546 = vmatpush.bf16.msra.mxu0 %v2639_v60 }
  0x97   :  { %1637 = vmatpush.bf16.msra.mxu1 %v2647_v28 }
  0x98   :  { %2658 = vmatpush.bf16.msra.mxu2 %v2639_v60 }
  0x99   :  { %2666 = vmatpush.bf16.msra.mxu3 %v2647_v28 }
  0x9a   :  { %1547 = vmatpush.bf16.msra.mxu0 %v2638_v30 }
  0x9b   :  { %1638 = vmatpush.bf16.msra.mxu1 %v2646_v31 }
  0x9c   :  { %2659 = vmatpush.bf16.msra.mxu2 %v2638_v30 }
  0x9d   :  { %2667 = vmatpush.bf16.msra.mxu3 %v2646_v31 }
  0x9e   :  { %1548 = vmatpush.bf16.msra.mxu0 %v2637_v32  ;;  %v122_v40 = vpop.f32.mrf.mxu0 }
  0x9f   :  { %1639 = vmatpush.bf16.msra.mxu1 %v2645_v34  ;;  %v188_v41 = vpop.f32.mrf.mxu1 }
  0xa0   :  { %2660 = vmatpush.bf16.msra.mxu2 %v2637_v32  ;;  %v189_v44 = vadd.f32 %v188_v41, %v122_v40 }
  0xa1   :  { %2668 = vmatpush.bf16.msra.mxu3 %v2645_v34  ;;  %1549 = vmatmul.bf16.vlgmr.msra.gmra.mxu0 %v1474_v38 }
  0xa2   :  { %1640 = vmatmul.bf16.vlgmr.msra.gmra.mxu1 %v1565_v39 }
  0xa3   :  { %1554 = vmatmul.bf16.vlgmr.msra.gmra.mxu2 %v1475_v42 }
  0xa4   :  { %1645 = vmatmul.bf16.vlgmr.msra.gmra.mxu3 %v1566_v43 }
  0xa6   :  { %v276_v45 = vpop.f32.mrf.mxu2  ;;  %v124_v48 = vpop.f32.mrf.mxu0 }
  0xa7   :  { %v367_v46 = vpop.f32.mrf.mxu3  ;;  %v285_v47 = vadd.f32 %v276_v45, %v189_v44  ;;  %v190_v49 = vpop.f32.mrf.mxu1 }
  0xa8   :  { %v191_v50 = vadd.f32 %v190_v49, %v124_v48 }
  0xa9   :  { %v376_v51 = vadd.f32 %v367_v46, %v285_v47 }
  0xae   :  { %v278_v27 = vpop.f32.mrf.mxu2  ;;  %v127_v29 = vpop.f32.mrf.mxu0 }
  0xaf   :  { %v369_v52 = vpop.f32.mrf.mxu3  ;;  %v286_v54 = vadd.f32 %v278_v27, %v191_v50  ;;  %v193_v53 = vpop.f32.mrf.mxu1 }
  0xb0   :  { %v194_v55 = vadd.f32 %v193_v53, %v127_v29 }
  0xb1   :  { %v377_v56 = vadd.f32 %v369_v52, %v286_v54 }
  0xb6   :  { %v281_v57 = vpop.f32.mrf.mxu2  ;;  %v129_v62 = vpop.f32.mrf.mxu0 }
  0xb7   :  { %v372_v58 = vpop.f32.mrf.mxu3  ;;  %v287_v61 = vadd.f32 %v281_v57, %v194_v55  ;;  %v195_v63 = vpop.f32.mrf.mxu1 }
  0xb9   :  { %v378_v0 = vadd.f32 %v372_v58, %v287_v61 }
  0xbe   :  { %v283_v1 = vpop.f32.mrf.mxu2  ;;  %v458_v3 = vpop.f32.mrf.mxu0 }
  0xbf   :  { %v374_v2 = vpop.f32.mrf.mxu3  ;;  %v549_v4 = vpop.f32.mrf.mxu1  ;;  %v467_v5 = vadd.f32 %v458_v3, %v376_v51 }
  0xc1   :  { %v558_v6 = vadd.f32 %v549_v4, %v467_v5 }
  0xc6   :  { %v640_v7 = vpop.f32.mrf.mxu2  ;;  %v460_v10 = vpop.f32.mrf.mxu0 }
  0xc7   :  { %v731_v8 = vpop.f32.mrf.mxu3  ;;  %v649_v9 = vadd.f32 %v640_v7, %v558_v6  ;;  %v551_v11 = vpop.f32.mrf.mxu1  ;;  %v468_v12 = vadd.f32 %v460_v10, %v377_v56 }
  0xc9   :  { %v740_v13 = vadd.f32 %v731_v8, %v649_v9  ;;  %v559_v14 = vadd.f32 %v551_v11, %v468_v12 }
  0xce   :  { %v642_v15 = vpop.f32.mrf.mxu2  ;;  %v463_v18 = vpop.f32.mrf.mxu0 }
  0xcf   :  { %v733_v16 = vpop.f32.mrf.mxu3  ;;  %v650_v17 = vadd.f32 %v642_v15, %v559_v14  ;;  %v554_v19 = vpop.f32.mrf.mxu1  ;;  %v469_v20 = vadd.f32 %v463_v18, %v378_v0 }
  0xd1   :  { %v741_v21 = vadd.f32 %v733_v16, %v650_v17  ;;  %v560_v22 = vadd.f32 %v554_v19, %v469_v20 }
  0xd6   :  { %v645_v23 = vpop.f32.mrf.mxu2  ;;  %v465_v25 = vpop.f32.mrf.mxu0 }
  0xd7   :  { %v736_v24 = vpop.f32.mrf.mxu3  ;;  %v556_v26 = vpop.f32.mrf.mxu1  ;;  %v651_v27 = vadd.f32 %v645_v23, %v560_v22  ;;  %v2669_v22 = vld [vmem:[%s3331_s4] ss:$0 sm:$0xff] }
  0xd8   :  { %v2670_v26 = vld [vmem:[%s3332_s5] ss:$0 sm:$0xff] }
  0xd9   :  { %v742_v54 = vadd.f32 %v736_v24, %v651_v27 }
  0xde   :  { %v647_v35 = vpop.f32.mrf.mxu2  ;;  %v822_v59 = vpop.f32.mrf.mxu0 }
  0xdf   :  { %v738_v33 = vpop.f32.mrf.mxu3  ;;  %v913_v60 = vpop.f32.mrf.mxu1  ;;  %v831_v51 = vadd.f32 %v822_v59, %v740_v13 }
  0xe1   :  { %v922_v52 = vadd.f32 %v913_v60, %v831_v51 }
  0xe6   :  { %v1004_v28 = vpop.f32.mrf.mxu2  ;;  %v824_v31 = vpop.f32.mrf.mxu0 }
  0xe7   :  { %v1095_v30 = vpop.f32.mrf.mxu3  ;;  %v915_v32 = vpop.f32.mrf.mxu1  ;;  %v1013_v29 = vadd.f32 %v1004_v28, %v922_v52  ;;  %v832_v61 = vadd.f32 %v824_v31, %v741_v21 }
  0xe9   :  { %v1104_v62 = vadd.f32 %v1095_v30, %v1013_v29  ;;  %v923_v0 = vadd.f32 %v915_v32, %v832_v61 }
  0xee   :  { %v1006_v34 = vpop.f32.mrf.mxu2  ;;  %v827_v37 = vpop.f32.mrf.mxu0 }
  0xef   :  { %v1097_v36 = vpop.f32.mrf.mxu3  ;;  %v918_v38 = vpop.f32.mrf.mxu1  ;;  %v833_v56 = vadd.f32 %v827_v37, %v742_v54  ;;  %v1014_v3 = vadd.f32 %v1006_v34, %v923_v0 }
  0xf1   :  { %v924_v63 = vadd.f32 %v918_v38, %v833_v56  ;;  %v1105_v10 = vadd.f32 %v1097_v36, %v1014_v3 }
  0xf6   :  { %v1009_v39 = vpop.f32.mrf.mxu2  ;;  %v829_v41 = vpop.f32.mrf.mxu0 }
  0xf7   :  { %v1100_v40 = vpop.f32.mrf.mxu3  ;;  %v920_v42 = vpop.f32.mrf.mxu1  ;;  %v1015_v2 = vadd.f32 %v1009_v39, %v924_v63 }
  0xf9   :  { %v1106_v9 = vadd.f32 %v1100_v40, %v1015_v2 }
  0xfe   :  { %v1011_v43 = vpop.f32.mrf.mxu2  ;;  %v1186_v45 = vpop.f32.mrf.mxu0 }
  0xff   :  { %v1102_v44 = vpop.f32.mrf.mxu3  ;;  %v1277_v46 = vpop.f32.mrf.mxu1  ;;  %v1195_v1 = vadd.f32 %v1186_v45, %v1104_v62 }
 0x101   :  { %v1286_v8 = vadd.f32 %v1277_v46, %v1195_v1 }
 0x106   :  { %v1368_v47 = vpop.f32.mrf.mxu2  ;;  %v1188_v49 = vpop.f32.mrf.mxu0 }
 0x107   :  { %v1459_v48 = vpop.f32.mrf.mxu3  ;;  %v1279_v50 = vpop.f32.mrf.mxu1  ;;  %v1377_v11 = vadd.f32 %v1368_v47, %v1286_v8  ;;  %v1196_v13 = vadd.f32 %v1188_v49, %v1105_v10 }
 0x109   :  { %v1468_v14 = vadd.f32 %v1459_v48, %v1377_v11  ;;  %v1287_v20 = vadd.f32 %v1279_v50, %v1196_v13 }
 0x10e   :  { %v1370_v53 = vpop.f32.mrf.mxu2  ;;  %v1191_v57 = vpop.f32.mrf.mxu0 }
 0x10f   :  { %v1461_v55 = vpop.f32.mrf.mxu3  ;;  %v1282_v58 = vpop.f32.mrf.mxu1  ;;  %v1197_v12 = vadd.f32 %v1191_v57, %v1106_v9  ;;  %v1378_v24 = vadd.f32 %v1370_v53, %v1287_v20 }
 0x111   :  { %v1288_v17 = vadd.f32 %v1282_v58, %v1197_v12  ;;  %v1469_v59 = vadd.f32 %v1461_v55, %v1378_v24 }
 0x116   :  { %v1373_v4 = vpop.f32.mrf.mxu2  ;;  %v1193_v6 = vpop.f32.mrf.mxu0 }
 0x117   :  { %v1464_v5 = vpop.f32.mrf.mxu3  ;;  %v1284_v7 = vpop.f32.mrf.mxu1  ;;  %v1379_v23 = vadd.f32 %v1373_v4, %v1288_v17 }
 0x119   :  { %v1470_v33 = vadd.f32 %v1464_v5, %v1379_v23 }
 0x11e   :  { %v1375_v15 = vpop.f32.mrf.mxu2  ;;  %v1550_v18 = vpop.f32.mrf.mxu0 }
 0x11f   :  { %v1466_v16 = vpop.f32.mrf.mxu3  ;;  %v1641_v19 = vpop.f32.mrf.mxu1  ;;  %v1559_v21 = vadd.f32 %v1550_v18, %v1468_v14 }
 0x121   :  { %v1650_v25 = vadd.f32 %v1641_v19, %v1559_v21 }
 0x123   :  { %v1657_v35 = vmul.f32 %v2669_v22, %v1650_v25 }
 0x125   :  { %v1664_v60 = vadd.f32 %v2670_v26, %v1657_v35 }
 0x126   :  { %v1555_v28 = vpop.f32.mrf.mxu2  ;;  %v1552_v32 = vpop.f32.mrf.mxu0 }
 0x127   :  { %v1646_v30 = vpop.f32.mrf.mxu3  ;;  %v1561_v31 = vadd.f32 %v1555_v28, %v1470_v33  ;;  %v1667_v34 = vmax.f32 %v1664_v60, 0.0  ;;  %v1560_v36 = vadd.f32 %v1552_v32, %v1469_v59  ;;  %v1643_v38 = vpop.f32.mrf.mxu1 }
 0x129   :  { %v1652_v37 = vadd.f32 %v1646_v30, %v1561_v31  ;;  %1670 = vst [vmem:[%s3333_s6] sm:$0xff] %v1667_v34  ;;  %v1651_v39 = vadd.f32 %v1643_v38, %v1560_v36 }
 0x12b   :  { %v1659_v40 = vmul.f32 %v2669_v22, %v1652_v37  ;;  %v1658_v41 = vmul.f32 %v2669_v22, %v1651_v39 }
 0x12d   :  { %v1666_v42 = vadd.f32 %v2670_v26, %v1659_v40  ;;  %v1665_v43 = vadd.f32 %v2670_v26, %v1658_v41 }
 0x12e   :  { %v1557_v44 = vpop.f32.mrf.mxu2 }
 0x12f   :  { %v1648_v45 = vpop.f32.mrf.mxu3  ;;  %v1669_v46 = vmax.f32 %v1666_v42, 0.0  ;;  %v1668_v47 = vmax.f32 %v1665_v43, 0.0 }
 0x131   :  { %1672 = vst [vmem:[%s3333_s6 + $0x10] sm:$0xff] %v1669_v46 }
 0x132   :  { %1671 = vst [vmem:[%s3333_s6 + $0x8] sm:$0xff] %v1668_v47 }

// kernel: graphfeat_forward.15
= control target key start
LH: loop header
LB: loop body
LE: loop exit
PB: predicated region body
PF: predicated region fallthrough
CT: control target
= control target key end

     0   :  { %vm94_vm0 = vcmask 523264   ;;  %s3594_s3 = inlined_call_operand.vmem [shape: bf16[9,64,128], index: 3, kind: input, shape index: {}]   ;;  %s3595_s2 = inlined_call_operand.vmem [shape: bf16[9,64,128], index: 2, kind: input, shape index: {}]   ;;  %s3596_s1 = inlined_call_operand.vmem [shape: f32[102,64], index: 1, kind: input, shape index: {}]   ;;  %s3597_s0 = inlined_call_operand.vmem [shape: f32[102,64], index: 0, kind: input, shape index: {}]   ;;  %s3598_s4 = inlined_call_operand.vmem [shape: f32[1,128], index: 4, kind: input, shape index: {}]   ;;  %s3599_s5 = inlined_call_operand.vmem [shape: f32[1,128], index: 5, kind: input, shape index: {}]   ;;  %s3600_s6 = inlined_call_operand.vmem [shape: f32[80,128], index: 6, kind: output, shape index: {}]  }
   0x1   :  { %v2494_v0 = vld [vmem:[%s3594_s3 + $0x18] sm:$0xff]  ;;  %v2493_v2 = vld [vmem:[%s3594_s3 + $0x10] sm:$0xff]  ;;  %v2492_v4 = vld [vmem:[%s3594_s3 + $0x8] sm:$0xff] }
   0x2   :  { %v2490_v1 = vld [vmem:[%s3595_s2 + $0x18] sm:$0xff]  ;;  %114 = vmatpush.bf16.msra.mxu0 %v2494_v0  ;;  %2559 = vmatpush.bf16.msra.mxu2 %v2494_v0  ;;  %v2489_v3 = vld [vmem:[%s3595_s2 + $0x10] sm:$0xff]  ;;  %v2488_v5 = vld [vmem:[%s3595_s2 + $0x8] sm:$0xff] }
   0x3   :  { %187 = vmatpush.bf16.msra.mxu1 %v2490_v1  ;;  %2563 = vmatpush.bf16.msra.mxu3 %v2490_v1  ;;  %v2491_v6 = vld [vmem:[%s3594_s3] sm:$0xff]  ;;  %v48_v9 = vld [vmem:[%s3596_s1 + $0x8] sm:$0xff]  ;;  %v53_v10 = vld [vmem:[%s3596_s1 + $0x30] sm:$0xff] }
   0x4   :  { %v2487_v7 = vld [vmem:[%s3595_s2] sm:$0xff]  ;;  %v54_v11 = vld [vmem:[%s3596_s1 + $0x38] sm:$0xff]  ;;  %v25_v13 = vld [vmem:[%s3597_s0 + $0x8] sm:$0xff] }
   0x5   :  { %v47_v8 = vld [vmem:[%s3596_s1] sm:$0xff]  ;;  %v30_v14 = vld [vmem:[%s3597_s0 + $0x30] sm:$0xff]  ;;  %v31_v15 = vld [vmem:[%s3597_s0 + $0x38] sm:$0xff]  ;;  %v60_v19 = vpack.c.bf16 %v54_v11, %v53_v10 }
   0x6   :  { %115 = vmatpush.bf16.msra.mxu0 %v2493_v2  ;;  %2560 = vmatpush.bf16.msra.mxu2 %v2493_v2  ;;  %v24_v12 = vld [vmem:[%s3597_s0] sm:$0xff]  ;;  %v2506_v16 = vld [vmem:[%s3595_s2 + $0x58] sm:$0xff]  ;;  %v57_v18 = vpack.c.bf16 %v48_v9, %v47_v8  ;;  %v37_v21 = vpack.c.bf16 %v31_v15, %v30_v14  ;;  %v2505_v24 = vld [vmem:[%s3595_s2 + $0x50] sm:$0xff] }
   0x7   :  { %188 = vmatpush.bf16.msra.mxu1 %v2489_v3  ;;  %2564 = vmatpush.bf16.msra.mxu3 %v2489_v3  ;;  %v2510_v17 = vld [vmem:[%s3594_s3 + $0x58] sm:$0xff]  ;;  %v34_v20 = vpack.c.bf16 %v25_v13, %v24_v12  ;;  %v2509_v25 = vld [vmem:[%s3594_s3 + $0x50] sm:$0xff]  ;;  %v2504_v28 = vld [vmem:[%s3595_s2 + $0x48] sm:$0xff] }
   0x8   :  { %v2498_v22 = vld [vmem:[%s3595_s2 + $0x38] sm:$0xff]  ;;  %v2497_v26 = vld [vmem:[%s3595_s2 + $0x30] sm:$0xff]  ;;  %v2508_v29 = vld [vmem:[%s3594_s3 + $0x48] sm:$0xff] }
   0x9   :  { %v2502_v23 = vld [vmem:[%s3594_s3 + $0x38] sm:$0xff]  ;;  %v2501_v27 = vld [vmem:[%s3594_s3 + $0x30] sm:$0xff]  ;;  %v2496_v30 = vld [vmem:[%s3595_s2 + $0x28] sm:$0xff] }
   0xa   :  { %116 = vmatpush.bf16.msra.mxu0 %v2492_v4  ;;  %2561 = vmatpush.bf16.msra.mxu2 %v2492_v4  ;;  %v2500_v31 = vld [vmem:[%s3594_s3 + $0x28] sm:$0xff]  ;;  %v49_v32 = vld [vmem:[%s3596_s1 + $0x10] sm:$0xff]  ;;  %v2503_v33 = vld [vmem:[%s3595_s2 + $0x40] sm:$0xff] }
   0xb   :  { %189 = vmatpush.bf16.msra.mxu1 %v2488_v5  ;;  %2565 = vmatpush.bf16.msra.mxu3 %v2488_v5  ;;  %v2507_v34 = vld [vmem:[%s3594_s3 + $0x40] sm:$0xff]  ;;  %v50_v35 = vld [vmem:[%s3596_s1 + $0x18] sm:$0xff]  ;;  %v56_v37 = vld [vmem:[%s3596_s1 + $0x48] sm:$0xff] }
   0xc   :  { %v55_v36 = vld [vmem:[%s3596_s1 + $0x40] sm:$0xff]  ;;  %v26_v38 = vld [vmem:[%s3597_s0 + $0x10] sm:$0xff]  ;;  %v27_v39 = vld [vmem:[%s3597_s0 + $0x18] sm:$0xff]  ;;  %v58_v46 = vpack.c.bf16 %v50_v35, %v49_v32 }
   0xd   :  { %v32_v40 = vld [vmem:[%s3597_s0 + $0x40] sm:$0xff]  ;;  %v33_v41 = vld [vmem:[%s3597_s0 + $0x48] sm:$0xff]  ;;  %v2514_v44 = vld [vmem:[%s3595_s2 + $0x78] sm:$0xff]  ;;  %v61_v47 = vpack.c.bf16 %v56_v37, %v55_v36  ;;  %v35_v48 = vpack.c.bf16 %v27_v39, %v26_v38 }
   0xe   :  { %117 = vmatpush.bf16.msra.mxu0 %v2491_v6  ;;  %2562 = vmatpush.bf16.msra.mxu2 %v2491_v6  ;;  %v2495_v42 = vld [vmem:[%s3595_s2 + $0x20] sm:$0xff]  ;;  %v2518_v45 = vld [vmem:[%s3594_s3 + $0x78] sm:$0xff]  ;;  %v38_v49 = vpack.c.bf16 %v33_v41, %v32_v40  ;;  %v2513_v52 = vld [vmem:[%s3595_s2 + $0x70] sm:$0xff] }
   0xf   :  { %190 = vmatpush.bf16.msra.mxu1 %v2487_v7  ;;  %2566 = vmatpush.bf16.msra.mxu3 %v2487_v7  ;;  %v2499_v43 = vld [vmem:[%s3594_s3 + $0x20] sm:$0xff]  ;;  %v2522_v50 = vld [vmem:[%s3595_s2 + $0x98] sm:$0xff]  ;;  %v2517_v53 = vld [vmem:[%s3594_s3 + $0x70] sm:$0xff] }
  0x10   :  { %v2526_v51 = vld [vmem:[%s3594_s3 + $0x98] sm:$0xff]  ;;  %v51_v54 = vld [vmem:[%s3596_s1 + $0x20] sm:$0xff]  ;;  %v52_v55 = vld [vmem:[%s3596_s1 + $0x28] sm:$0xff] }
  0x11   :  { %1997 = vmatmul.msk.bf16.vlgmr.msra.gmra.mxu0 %vm94_vm0, %v57_v18  ;;  %2000 = vmatmul.msk.bf16.vlgmr.msra.gmra.mxu2 %vm94_vm0, %v60_v19  ;;  %v28_v56 = vld [vmem:[%s3597_s0 + $0x20] sm:$0xff]  ;;  %v218_v58 = vld [vmem:[%s3597_s0 + $0x9] sm:$0xff]  ;;  %v59_v62 = vpack.c.bf16 %v52_v55, %v51_v54  ;;  %v219_v5 = vld [vmem:[%s3597_s0 + $0x11] sm:$0xff] }
  0x12   :  { %498 = vmatpush.bf16.msrb.mxu0 %v2506_v16  ;;  %2018 = vmatmul.msk.bf16.vlgmr.msra.gmra.mxu1 %vm94_vm0, %v34_v20  ;;  %v217_v57 = vld [vmem:[%s3597_s0 + $0x1] sm:$0xff]  ;;  %v325_v61 = vld [vmem:[%s3596_s1 + $0x9] sm:$0xff]  ;;  %v220_v6 = vld [vmem:[%s3597_s0 + $0x19] sm:$0xff] }
  0x13   :  { %605 = vmatpush.bf16.msrb.mxu1 %v2510_v17  ;;  %2021 = vmatmul.msk.bf16.vlgmr.msra.gmra.mxu3 %vm94_vm0, %v37_v21  ;;  %v29_v59 = vld [vmem:[%s3597_s0 + $0x28] sm:$0xff]  ;;  %v227_v63 = vpack.c.bf16 %v218_v58, %v217_v57  ;;  %v2521_v2 = vld [vmem:[%s3595_s2 + $0x90] sm:$0xff]  ;;  %v327_v10 = vld [vmem:[%s3596_s1 + $0x19] sm:$0xff]  ;;  %v228_v13 = vpack.c.bf16 %v220_v6, %v219_v5 }
  0x14   :  { %284 = vmatpush.bf16.msrb.mxu2 %v2498_v22  ;;  %391 = vmatpush.bf16.msrb.mxu3 %v2502_v23  ;;  %v324_v60 = vld [vmem:[%s3596_s1 + $0x1] sm:$0xff]  ;;  %v36_v0 = vpack.c.bf16 %v29_v59, %v28_v56  ;;  %v2525_v3 = vld [vmem:[%s3594_s3 + $0x90] sm:$0xff]  ;;  %v224_v37 = vld [vmem:[%s3597_s0 + $0x39] sm:$0xff] }
  0x15   :  { %v334_v1 = vpack.c.bf16 %v325_v61, %v324_v60  ;;  %v2512_v4 = vld [vmem:[%s3595_s2 + $0x68] sm:$0xff]  ;;  %v326_v7 = vld [vmem:[%s3596_s1 + $0x11] sm:$0xff]  ;;  %v2511_v32 = vld [vmem:[%s3595_s2 + $0x60] sm:$0xff] }
  0x16   :  { %499 = vmatpush.bf16.msrb.mxu0 %v2505_v24  ;;  %v431_v8 = vld [vmem:[%s3597_s0 + $0x2] sm:$0xff]  ;;  %v2802_v9 = vld [vmem:[%s3597_s0 + $0xa] sm:$0xff]  ;;  %v335_v15 = vpack.c.bf16 %v327_v10, %v326_v7  ;;  %v2842_v23 = vld [vmem:[%s3597_s0 + $0x12] sm:$0xff] }
  0x17   :  { %606 = vmatpush.bf16.msrb.mxu1 %v2509_v25  ;;  %v538_v11 = vld [vmem:[%s3596_s1 + $0x2] sm:$0xff]  ;;  %v2813_v12 = vld [vmem:[%s3596_s1 + $0xa] sm:$0xff]  ;;  %v441_v14 = vpack.c.bf16 %v2802_v9, %v431_v8  ;;  %v2847_v24 = vld [vmem:[%s3597_s0 + $0x1a] sm:$0xff]  ;;  %v655_v6 = vpack.c.bf16 %v2842_v23, %v2802_v9 }
  0x18   :  { %285 = vmatpush.bf16.msrb.mxu2 %v2497_v26  ;;  %392 = vmatpush.bf16.msrb.mxu3 %v2501_v27  ;;  %v548_v16 = vpack.c.bf16 %v2813_v12, %v538_v11  ;;  %v2516_v17 = vld [vmem:[%s3594_s3 + $0x68] sm:$0xff]  ;;  %v2855_v26 = vld [vmem:[%s3596_s1 + $0x12] sm:$0xff]  ;;  %v2860_v27 = vld [vmem:[%s3596_s1 + $0x1a] sm:$0xff] }
  0x19   :  { %v2520_v18 = vld [vmem:[%s3595_s2 + $0x88] sm:$0xff]  ;;  %v2523_v35 = vld [vmem:[%s3594_s3 + $0x80] sm:$0xff]  ;;  %v223_v36 = vld [vmem:[%s3597_s0 + $0x31] sm:$0xff]  ;;  %v762_v8 = vpack.c.bf16 %v2855_v26, %v2813_v12 }
  0x1a   :  { %500 = vmatpush.bf16.msrb.mxu0 %v2504_v28  ;;  %v2524_v19 = vld [vmem:[%s3594_s3 + $0x88] sm:$0xff]  ;;  %v330_v38 = vld [vmem:[%s3596_s1 + $0x31] sm:$0xff]  ;;  %v331_v41 = vld [vmem:[%s3596_s1 + $0x39] sm:$0xff] }
  0x1b   :  { %607 = vmatpush.bf16.msrb.mxu1 %v2508_v29  ;;  %v221_v20 = vld [vmem:[%s3597_s0 + $0x21] sm:$0xff]  ;;  %v222_v21 = vld [vmem:[%s3597_s0 + $0x29] sm:$0xff]  ;;  %v442_v29 = vpack.c.bf16 %v2847_v24, %v2842_v23  ;;  %v2953_v56 = vld [vmem:[%s3596_s1 + $0x32] sm:$0xff] }
  0x1c   :  { %286 = vmatpush.bf16.msrb.mxu2 %v2496_v30  ;;  %393 = vmatpush.bf16.msrb.mxu3 %v2500_v31  ;;  %v328_v22 = vld [vmem:[%s3596_s1 + $0x21] sm:$0xff]  ;;  %v329_v25 = vld [vmem:[%s3596_s1 + $0x29] sm:$0xff]  ;;  %v229_v28 = vpack.c.bf16 %v222_v21, %v221_v20  ;;  %v549_v31 = vpack.c.bf16 %v2860_v27, %v2855_v26 }
  0x1d   :  { %v336_v30 = vpack.c.bf16 %v329_v25, %v328_v22  ;;  %v2894_v39 = vld [vmem:[%s3597_s0 + $0x22] sm:$0xff]  ;;  %v2899_v40 = vld [vmem:[%s3597_s0 + $0x2a] sm:$0xff]  ;;  %v2945_v54 = vld [vmem:[%s3597_s0 + $0x3a] sm:$0xff] }
  0x1e   :  { %501 = vmatpush.bf16.msrb.mxu0 %v2503_v33  ;;  %v2515_v33 = vld [vmem:[%s3594_s3 + $0x60] sm:$0xff]  ;;  %v333_v55 = vld [vmem:[%s3596_s1 + $0x49] sm:$0xff] }
  0x1f   :  { %608 = vmatpush.bf16.msrb.mxu1 %v2507_v34  ;;  %v2519_v34 = vld [vmem:[%s3595_s2 + $0x80] sm:$0xff]  ;;  %v2533_v10 = vld [vmem:[%s3594_s3 + $0xb0] sm:$0xff]  ;;  %v2528_v23 = vld [vmem:[%s3595_s2 + $0xa8] sm:$0xff] }
  0x20   :  { %287 = vmatpush.bf16.msrb.mxu2 %v2495_v42  ;;  %394 = vmatpush.bf16.msrb.mxu3 %v2499_v43  ;;  %v2907_v42 = vld [vmem:[%s3596_s1 + $0x22] sm:$0xff]  ;;  %v2912_v43 = vld [vmem:[%s3596_s1 + $0x2a] sm:$0xff]  ;;  %v2958_v57 = vld [vmem:[%s3596_s1 + $0x3a] sm:$0xff] }
  0x21   :  { %1998 = vmatmul.msk.bf16.gmra.mxu0 %vm94_vm0, %v58_v46  ;;  %2001 = vmatmul.msk.bf16.gmra.mxu2 %vm94_vm0, %v61_v47  ;;  %v337_v46 = vpack.c.bf16 %v331_v41, %v330_v38  ;;  %v550_v47 = vpack.c.bf16 %v2912_v43, %v2907_v42  ;;  %v551_v61 = vpack.c.bf16 %v2958_v57, %v2953_v56  ;;  %v2537_v9 = vld [vmem:[%s3595_s2 + $0xd0] sm:$0xff] }
  0x22   :  { %2019 = vmatmul.msk.bf16.gmra.mxu1 %vm94_vm0, %v35_v48  ;;  %926 = vmatpush.bf16.msra.mxu0 %v2522_v50  ;;  %v2530_v48 = vld [vmem:[%s3595_s2 + $0xb8] sm:$0xff]  ;;  %v225_v50 = vld [vmem:[%s3597_s0 + $0x41] sm:$0xff]  ;;  %v2541_v11 = vld [vmem:[%s3594_s3 + $0xd0] sm:$0xff] }
  0x23   :  { %2022 = vmatmul.msk.bf16.gmra.mxu3 %vm94_vm0, %v38_v49  ;;  %1033 = vmatpush.bf16.msra.mxu1 %v2526_v51  ;;  %v2534_v49 = vld [vmem:[%s3594_s3 + $0xb8] sm:$0xff]  ;;  %v226_v51 = vld [vmem:[%s3597_s0 + $0x49] sm:$0xff] }
  0x24   :  { %712 = vmatpush.bf16.msra.mxu2 %v2514_v44  ;;  %819 = vmatpush.bf16.msra.mxu3 %v2518_v45  ;;  %v230_v44 = vpack.c.bf16 %v224_v37, %v223_v36  ;;  %v443_v45 = vpack.c.bf16 %v2899_v40, %v2894_v39  ;;  %v231_v58 = vpack.c.bf16 %v226_v51, %v225_v50  ;;  %v859_v12 = vld [vmem:[%s3597_s0 + $0xb] sm:$0xff]  ;;  %v969_v36 = vld [vmem:[%s3596_s1 + $0x23] sm:$0xff] }
  0x26   :  { %927 = vmatpush.bf16.msra.mxu0 %v2521_v2  ;;  %v2985_v2 = vld [vmem:[%s3597_s0 + $0x4a] sm:$0xff] }
  0x27   :  { %1034 = vmatpush.bf16.msra.mxu1 %v2525_v3  ;;  %v2990_v3 = vld [vmem:[%s3596_s1 + $0x42] sm:$0xff] }
  0x28   :  { %713 = vmatpush.bf16.msra.mxu2 %v2513_v52  ;;  %820 = vmatpush.bf16.msra.mxu3 %v2517_v53  ;;  %v332_v52 = vld [vmem:[%s3596_s1 + $0x41] sm:$0xff]  ;;  %v2940_v53 = vld [vmem:[%s3597_s0 + $0x32] sm:$0xff] }
  0x29   :  { %v444_v59 = vpack.c.bf16 %v2945_v54, %v2940_v53  ;;  %v338_v60 = vpack.c.bf16 %v333_v55, %v332_v52 }
  0x2a   :  { %928 = vmatpush.bf16.msra.mxu0 %v2520_v18 }
  0x2b   :  { %1035 = vmatpush.bf16.msra.mxu1 %v2524_v19  ;;  %v763_v19 = vpack.c.bf16 %v2907_v42, %v2860_v27 }
  0x2c   :  { %714 = vmatpush.bf16.msra.mxu2 %v2512_v4  ;;  %821 = vmatpush.bf16.msra.mxu3 %v2516_v17  ;;  %v2995_v4 = vld [vmem:[%s3596_s1 + $0x4a] sm:$0xff] }
  0x2d   :  { %v552_v7 = vpack.c.bf16 %v2995_v4, %v2990_v3 }
  0x2e   :  { %929 = vmatpush.bf16.msra.mxu0 %v2519_v34  ;;  %v862_v34 = vld [vmem:[%s3597_s0 + $0x23] sm:$0xff] }
  0x2f   :  { %1036 = vmatpush.bf16.msra.mxu1 %v2523_v35  ;;  %v968_v35 = vld [vmem:[%s3596_s1 + $0x1b] sm:$0xff] }
  0x30   :  { %715 = vmatpush.bf16.msra.mxu2 %v2511_v32  ;;  %822 = vmatpush.bf16.msra.mxu3 %v2515_v33  ;;  %v2540_v32 = vld [vmem:[%s3594_s3 + $0xc8] sm:$0xff]  ;;  %v861_v33 = vld [vmem:[%s3597_s0 + $0x1b] sm:$0xff] }
  0x31   :  { %1999 = vmatmul.msk.bf16.gmra.mxu0 %vm94_vm0, %v59_v62  ;;  %2047 = vmatmul.msk.bf16.vlgmr.msrb.gmra.mxu2 %vm94_vm0, %v227_v63  ;;  %v2538_v62 = vld [vmem:[%s3595_s2 + $0xd8] sm:$0xff]  ;;  %v870_v41 = vpack.c.bf16 %v862_v34, %v861_v33 }
  0x32   :  { %2020 = vmatmul.msk.bf16.gmra.mxu1 %vm94_vm0, %v36_v0  ;;  %v2542_v63 = vld [vmem:[%s3594_s3 + $0xd8] sm:$0xff]  ;;  %v2529_v0 = vld [vmem:[%s3595_s2 + $0xb0] sm:$0xff] }
  0x33   :  { %2076 = vmatmul.msk.bf16.vlgmr.msrb.gmra.mxu3 %vm94_vm0, %v334_v1  ;;  %v2980_v1 = vld [vmem:[%s3597_s0 + $0x42] sm:$0xff] }
  0x34   :  { %1140 = vmatpush.bf16.msrb.mxu2 %v2530_v48  ;;  %1247 = vmatpush.bf16.msrb.mxu3 %v2534_v49  ;;  %v445_v5 = vpack.c.bf16 %v2985_v2, %v2980_v1 }
  0x38   :  { %1141 = vmatpush.bf16.msrb.mxu2 %v2529_v0  ;;  %1248 = vmatpush.bf16.msrb.mxu3 %v2533_v10 }
  0x3c   :  { %1142 = vmatpush.bf16.msrb.mxu2 %v2528_v23  ;;  %v973_v23 = vld [vmem:[%s3596_s1 + $0x43] sm:$0xff] }
  0x41   :  { %2048 = vmatmul.msk.bf16.gmra.mxu2 %vm94_vm0, %v228_v13  ;;  %2105 = vmatmul.msk.bf16.vlgmr.msrb.gmra.mxu0 %vm94_vm0, %v441_v14  ;;  %v860_v13 = vld [vmem:[%s3597_s0 + $0x13] sm:$0xff]  ;;  %v966_v14 = vld [vmem:[%s3596_s1 + $0xb] sm:$0xff] }
  0x42   :  { %2134 = vmatmul.msk.bf16.vlgmr.msrb.gmra.mxu1 %vm94_vm0, %v548_v16  ;;  %1354 = vmatpush.bf16.msrb.mxu0 %v2538_v62  ;;  %v656_v16 = vpack.c.bf16 %v2894_v39, %v2847_v24  ;;  %v869_v17 = vpack.c.bf16 %v860_v13, %v859_v12  ;;  %v2532_v24 = vld [vmem:[%s3594_s3 + $0xa8] sm:$0xff]  ;;  %v657_v39 = vpack.c.bf16 %v2940_v53, %v2899_v40  ;;  %v2527_v40 = vld [vmem:[%s3595_s2 + $0xa0] sm:$0xff] }
  0x43   :  { %2077 = vmatmul.msk.bf16.gmra.mxu3 %vm94_vm0, %v335_v15  ;;  %1461 = vmatpush.bf16.msrb.mxu1 %v2542_v63  ;;  %v967_v15 = vld [vmem:[%s3596_s1 + $0x13] sm:$0xff]  ;;  %v2531_v53 = vld [vmem:[%s3594_s3 + $0xa0] sm:$0xff]  ;;  %v658_v63 = vpack.c.bf16 %v2980_v1, %v2945_v54 }
  0x44   :  { %v976_v20 = vpack.c.bf16 %v967_v15, %v966_v14  ;;  %1249 = vmatpush.bf16.msrb.mxu3 %v2532_v24  ;;  %1143 = vmatpush.bf16.msrb.mxu2 %v2527_v40  ;;  %v2539_v54 = vld [vmem:[%s3594_s3 + $0xc0] sm:$0xff]  ;;  %v867_v40 = vld [vmem:[%s3597_s0 + $0x4b] sm:$0xff] }
  0x46   :  { %1355 = vmatpush.bf16.msrb.mxu0 %v2537_v9  ;;  %v2535_v9 = vld [vmem:[%s3595_s2 + $0xc0] sm:$0xff] }
  0x47   :  { %1462 = vmatpush.bf16.msrb.mxu1 %v2541_v11 }
  0x48   :  { %1250 = vmatpush.bf16.msrb.mxu3 %v2531_v53  ;;  %v975_v53 = vld [vmem:[%s3596_s1 + $0x53] sm:$0xff] }
  0x4b   :  { %1463 = vmatpush.bf16.msrb.mxu1 %v2540_v32 }
  0x4f   :  { %1464 = vmatpush.bf16.msrb.mxu1 %v2539_v54  ;;  %v2549_v54 = vld [vmem:[%s3594_s3 + $0xf0] sm:$0xff] }
  0x51   :  { %2049 = vmatmul.msk.bf16.gmra.mxu2 %vm94_vm0, %v229_v28  ;;  %2106 = vmatmul.msk.bf16.gmra.mxu0 %vm94_vm0, %v442_v29 }
  0x52   :  { %2135 = vmatmul.msk.bf16.gmra.mxu1 %vm94_vm0, %v549_v31  ;;  %v2536_v31 = vld [vmem:[%s3595_s2 + $0xc8] sm:$0xff] }
  0x53   :  { %2078 = vmatmul.msk.bf16.gmra.mxu3 %vm94_vm0, %v336_v30  ;;  %1356 = vmatpush.bf16.msrb.mxu0 %v2536_v31 }
  0x57   :  { %1357 = vmatpush.bf16.msrb.mxu0 %v2535_v9 }
  0x61   :  { %2050 = vmatmul.msk.bf16.gmra.mxu2 %vm94_vm0, %v230_v44  ;;  %2107 = vmatmul.msk.bf16.gmra.mxu0 %vm94_vm0, %v443_v45  ;;  %v764_v45 = vpack.c.bf16 %v2953_v56, %v2912_v43  ;;  %v863_v56 = vld [vmem:[%s3597_s0 + $0x2b] sm:$0xff] }
  0x62   :  { %2136 = vmatmul.msk.bf16.gmra.mxu1 %vm94_vm0, %v550_v47 }
  0x63   :  { %2079 = vmatmul.msk.bf16.gmra.mxu3 %vm94_vm0, %v337_v46  ;;  %v977_v46 = vpack.c.bf16 %v969_v36, %v968_v35 }
  0x71   :  { %2051 = vmatmul.msk.bf16.gmra.mxu2 %vm94_vm0, %v231_v58  ;;  %2108 = vmatmul.msk.bf16.gmra.mxu0 %vm94_vm0, %v444_v59  ;;  %v864_v58 = vld [vmem:[%s3597_s0 + $0x33] sm:$0xff]  ;;  %v970_v59 = vld [vmem:[%s3596_s1 + $0x2b] sm:$0xff] }
  0x72   :  { %2137 = vmatmul.msk.bf16.gmra.mxu1 %vm94_vm0, %v551_v61  ;;  %v871_v0 = vpack.c.bf16 %v864_v58, %v863_v56  ;;  %v1180_v56 = vld [vmem:[%s3596_s1 + $0xc] sm:$0xff]  ;;  %v1181_v58 = vld [vmem:[%s3596_s1 + $0x14] sm:$0xff] }
  0x73   :  { %2080 = vmatmul.msk.bf16.gmra.mxu3 %vm94_vm0, %v338_v60  ;;  %v971_v60 = vld [vmem:[%s3596_s1 + $0x33] sm:$0xff] }
  0x81   :  { %2109 = vmatmul.msk.bf16.gmra.mxu0 %vm94_vm0, %v445_v5  ;;  %2163 = vmatmul.msk.bf16.vlgmr.msra.gmra.mxu2 %vm94_vm0, %v655_v6 }
  0x82   :  { %2138 = vmatmul.msk.bf16.gmra.mxu1 %vm94_vm0, %v552_v7  ;;  %v765_v7 = vpack.c.bf16 %v2990_v3, %v2958_v57 }
  0x83   :  { %2192 = vmatmul.msk.bf16.vlgmr.msra.gmra.mxu3 %vm94_vm0, %v762_v8  ;;  %v978_v8 = vpack.c.bf16 %v971_v60, %v970_v59 }
  0x8e   :  { %v119_v18 = vpop.f32.mrf.mxu0 }
  0x8f   :  { %v192_v21 = vpop.f32.mrf.mxu1 }
  0x90   :  { %v3034_v22 = vadd.f32 %v192_v21, %v119_v18  ;;  %v654_v18 = vld [vmem:[%s3597_s0 + $0x52] sm:$0xff] }
  0x91   :  { %2164 = vmatmul.msk.bf16.gmra.mxu2 %vm94_vm0, %v656_v16  ;;  %2221 = vmatmul.msk.bf16.vlgmr.msra.gmra.mxu0 %vm94_vm0, %v869_v17  ;;  %v2546_v16 = vld [vmem:[%s3595_s2 + $0xf8] sm:$0xff] }
  0x92   :  { %2250 = vmatmul.msk.bf16.vlgmr.msra.gmra.mxu1 %vm94_vm0, %v976_v20  ;;  %v2550_v17 = vld [vmem:[%s3594_s3 + $0xf8] sm:$0xff]  ;;  %v866_v20 = vld [vmem:[%s3597_s0 + $0x43] sm:$0xff]  ;;  %1568 = vmatpush.bf16.msra.mxu2 %v2546_v16 }
  0x93   :  { %2193 = vmatmul.msk.bf16.gmra.mxu3 %vm94_vm0, %v763_v19  ;;  %v865_v19 = vld [vmem:[%s3597_s0 + $0x3b] sm:$0xff]  ;;  %v761_v21 = vld [vmem:[%s3596_s1 + $0x52] sm:$0xff] }
  0x94   :  { %v134_v25 = vpop.f32.mrf.mxu2  ;;  %1675 = vmatpush.bf16.msra.mxu3 %v2550_v17  ;;  %v766_v32 = vpack.c.bf16 %v761_v21, %v2995_v4  ;;  %v2558_v4 = vld [vmem:[%s3594_s3 + $0x118] sm:$0xff]  ;;  %v2553_v17 = vld [vmem:[%s3595_s2 + $0x110] sm:$0xff] }
  0x95   :  { %1889 = vmatpush.bf16.msra.mxu1 %v2558_v4  ;;  %v1182_v21 = vld [vmem:[%s3596_s1 + $0x1c] sm:$0xff] }
  0x96   :  { %v207_v26 = vpop.f32.mrf.mxu3  ;;  %v121_v28 = vpop.f32.mrf.mxu0 }
  0x97   :  { %v3046_v27 = vadd.f32 %v207_v26, %v134_v25  ;;  %v194_v29 = vpop.f32.mrf.mxu1 }
  0x98   :  { %v3048_v30 = vadd.f32 %v194_v29, %v121_v28  ;;  %v659_v28 = vpack.c.bf16 %v654_v18, %v2985_v2  ;;  %v872_v29 = vpack.c.bf16 %v866_v20, %v865_v19  ;;  %v2554_v2 = vld [vmem:[%s3595_s2 + $0x118] sm:$0xff]  ;;  %1676 = vmatpush.bf16.msra.mxu3 %v2549_v54  ;;  %v2557_v19 = vld [vmem:[%s3594_s3 + $0x110] sm:$0xff]  ;;  %v1076_v20 = vld [vmem:[%s3597_s0 + $0x24] sm:$0xff] }
  0x99   :  { %1782 = vmatpush.bf16.msra.mxu0 %v2554_v2  ;;  %1890 = vmatpush.bf16.msra.mxu1 %v2557_v19  ;;  %v2544_v2 = vld [vmem:[%s3595_s2 + $0xe8] sm:$0xff] }
  0x9c   :  { %v136_v37 = vpop.f32.mrf.mxu2 }
  0x9d   :  { %1783 = vmatpush.bf16.msra.mxu0 %v2553_v17  ;;  %v1187_v17 = vld [vmem:[%s3596_s1 + $0x44] sm:$0xff] }
  0x9e   :  { %v209_v38 = vpop.f32.mrf.mxu3  ;;  %v124_v44 = vpop.f32.mrf.mxu0 }
  0x9f   :  { %v3070_v42 = vadd.f32 %v209_v38, %v136_v37  ;;  %v197_v47 = vpop.f32.mrf.mxu1 }
  0xa0   :  { %v3074_v48 = vadd.f32 %v197_v47, %v124_v44 }
  0xa1   :  { %2165 = vmatmul.msk.bf16.gmra.mxu2 %vm94_vm0, %v657_v39  ;;  %2222 = vmatmul.msk.bf16.gmra.mxu0 %vm94_vm0, %v870_v41 }
  0xa2   :  { %2251 = vmatmul.msk.bf16.gmra.mxu1 %vm94_vm0, %v977_v46 }
  0xa3   :  { %2194 = vmatmul.msk.bf16.gmra.mxu3 %vm94_vm0, %v764_v45 }
  0xa4   :  { %v139_v49 = vpop.f32.mrf.mxu2 }
  0xa6   :  { %v212_v50 = vpop.f32.mrf.mxu3  ;;  %v126_v51 = vpop.f32.mrf.mxu0 }
  0xa7   :  { %v3083_v43 = vadd.f32 %v212_v50, %v139_v49  ;;  %v199_v52 = vpop.f32.mrf.mxu1  ;;  %v868_v49 = vld [vmem:[%s3597_s0 + $0x53] sm:$0xff] }
  0xa8   :  { %v3088_v55 = vadd.f32 %v199_v52, %v126_v51  ;;  %v2545_v50 = vld [vmem:[%s3595_s2 + $0xf0] sm:$0xff] }
  0xa9   :  { %v1073_v51 = vld [vmem:[%s3597_s0 + $0xc] sm:$0xff]  ;;  %v1074_v52 = vld [vmem:[%s3597_s0 + $0x14] sm:$0xff]  ;;  %1569 = vmatpush.bf16.msra.mxu2 %v2545_v50 }
  0xaa   :  { %v1077_v50 = vld [vmem:[%s3597_s0 + $0x2c] sm:$0xff] }
  0xac   :  { %v141_v61 = vpop.f32.mrf.mxu2 }
  0xad   :  { %1570 = vmatpush.bf16.msra.mxu2 %v2544_v2 }
  0xae   :  { %v214_v62 = vpop.f32.mrf.mxu3  ;;  %v129_v6 = vpop.f32.mrf.mxu0 }
  0xaf   :  { %v3104_v5 = vadd.f32 %v214_v62, %v141_v61  ;;  %v202_v10 = vpop.f32.mrf.mxu1  ;;  %v873_v62 = vpack.c.bf16 %v868_v49, %v867_v40  ;;  %v2552_v40 = vld [vmem:[%s3595_s2 + $0x108] sm:$0xff] }
  0xb0   :  { %v3111_v11 = vadd.f32 %v202_v10, %v129_v6  ;;  %v2556_v49 = vld [vmem:[%s3594_s3 + $0x108] sm:$0xff]  ;;  %1784 = vmatpush.bf16.msra.mxu0 %v2552_v40 }
  0xb1   :  { %2166 = vmatmul.msk.bf16.gmra.mxu2 %vm94_vm0, %v658_v63  ;;  %2223 = vmatmul.msk.bf16.gmra.mxu0 %vm94_vm0, %v871_v0  ;;  %v1083_v63 = vpack.c.bf16 %v1074_v52, %v1073_v51  ;;  %v1185_v51 = vld [vmem:[%s3596_s1 + $0x34] sm:$0xff] }
  0xb2   :  { %2252 = vmatmul.msk.bf16.gmra.mxu1 %vm94_vm0, %v978_v8 }
  0xb3   :  { %2195 = vmatmul.msk.bf16.gmra.mxu3 %vm94_vm0, %v765_v7  ;;  %v1190_v7 = vpack.c.bf16 %v1181_v58, %v1180_v56  ;;  %1891 = vmatpush.bf16.msra.mxu1 %v2556_v49 }
  0xb4   :  { %v289_v57 = vpop.f32.mrf.mxu2 }
  0xb5   :  { %v314_v1 = vadd.f32 %v289_v57, %v3034_v22  ;;  %v972_v22 = vld [vmem:[%s3596_s1 + $0x3b] sm:$0xff] }
  0xb6   :  { %v396_v3 = vpop.f32.mrf.mxu3  ;;  %v131_v12 = vpop.f32.mrf.mxu0  ;;  %v979_v33 = vpack.c.bf16 %v973_v23, %v972_v22  ;;  %v1183_v22 = vld [vmem:[%s3596_s1 + $0x24] sm:$0xff] }
  0xb7   :  { %v421_v13 = vadd.f32 %v396_v3, %v314_v1  ;;  %v204_v14 = vpop.f32.mrf.mxu1 }
  0xb8   :  { %v3121_v15 = vadd.f32 %v204_v14, %v131_v12 }
  0xbc   :  { %v291_v24 = vpop.f32.mrf.mxu2 }
  0xbd   :  { %v315_v25 = vadd.f32 %v291_v24, %v3048_v30 }
  0xbe   :  { %v398_v26 = vpop.f32.mrf.mxu3  ;;  %v503_v31 = vpop.f32.mrf.mxu0 }
  0xbf   :  { %v422_v34 = vadd.f32 %v398_v26, %v315_v25  ;;  %v528_v35 = vadd.f32 %v503_v31, %v421_v13  ;;  %v610_v36 = vpop.f32.mrf.mxu1  ;;  %v1191_v31 = vpack.c.bf16 %v1183_v22, %v1182_v21 }
  0xc1   :  { %v3150_v37 = vadd.f32 %v610_v36, %v528_v35  ;;  %2167 = vmatmul.msk.bf16.gmra.mxu2 %vm94_vm0, %v659_v28  ;;  %2224 = vmatmul.msk.bf16.gmra.mxu0 %vm94_vm0, %v872_v29 }
  0xc2   :  { %2253 = vmatmul.msk.bf16.gmra.mxu1 %vm94_vm0, %v979_v33 }
  0xc3   :  { %2196 = vmatmul.msk.bf16.gmra.mxu3 %vm94_vm0, %v766_v32  ;;  %v1404_v32 = vpack.c.bf16 %v1182_v21, %v1181_v58 }
  0xc4   :  { %v294_v30 = vpop.f32.mrf.mxu2 }
  0xc5   :  { %v316_v38 = vadd.f32 %v294_v30, %v3074_v48  ;;  %v974_v48 = vld [vmem:[%s3596_s1 + $0x4b] sm:$0xff] }
  0xc6   :  { %v401_v39 = vpop.f32.mrf.mxu3  ;;  %v505_v41 = vpop.f32.mrf.mxu0  ;;  %v980_v6 = vpack.c.bf16 %v975_v53, %v974_v48  ;;  %v1184_v48 = vld [vmem:[%s3596_s1 + $0x2c] sm:$0xff] }
  0xc7   :  { %v423_v44 = vadd.f32 %v401_v39, %v316_v38  ;;  %v529_v45 = vadd.f32 %v505_v41, %v422_v34  ;;  %v612_v46 = vpop.f32.mrf.mxu1 }
  0xc9   :  { %v3163_v47 = vadd.f32 %v612_v46, %v529_v45 }
  0xcc   :  { %v296_v59 = vpop.f32.mrf.mxu2 }
  0xcd   :  { %v317_v60 = vadd.f32 %v296_v59, %v3088_v55  ;;  %v1298_v59 = vpack.c.bf16 %v1077_v50, %v1076_v20 }
  0xce   :  { %v403_v61 = vpop.f32.mrf.mxu3  ;;  %v508_v0 = vpop.f32.mrf.mxu0 }
  0xcf   :  { %v424_v8 = vadd.f32 %v403_v61, %v317_v60  ;;  %v530_v10 = vadd.f32 %v508_v0, %v423_v44  ;;  %v615_v9 = vpop.f32.mrf.mxu1  ;;  %v1192_v61 = vpack.c.bf16 %v1185_v51, %v1184_v48 }
  0xd1   :  { %v3196_v57 = vadd.f32 %v615_v9, %v530_v10  ;;  %2225 = vmatmul.msk.bf16.gmra.mxu0 %vm94_vm0, %v873_v62  ;;  %2279 = vmatmul.msk.bf16.vlgmr.msrb.gmra.mxu2 %vm94_vm0, %v1083_v63  ;;  %v1405_v62 = vpack.c.bf16 %v1184_v48, %v1183_v22 }
  0xd2   :  { %2254 = vmatmul.msk.bf16.gmra.mxu1 %vm94_vm0, %v980_v6 }
  0xd3   :  { %2308 = vmatmul.msk.bf16.vlgmr.msrb.gmra.mxu3 %vm94_vm0, %v1190_v7 }
  0xd4   :  { %v299_v55 = vpop.f32.mrf.mxu2 }
  0xd5   :  { %v318_v1 = vadd.f32 %v299_v55, %v3111_v11  ;;  %v1075_v11 = vld [vmem:[%s3597_s0 + $0x1c] sm:$0xff] }
  0xd6   :  { %v406_v3 = vpop.f32.mrf.mxu3  ;;  %v510_v12 = vpop.f32.mrf.mxu0  ;;  %v1084_v26 = vpack.c.bf16 %v1076_v20, %v1075_v11  ;;  %v1297_v28 = vpack.c.bf16 %v1075_v11, %v1074_v52 }
  0xd7   :  { %v425_v13 = vadd.f32 %v406_v3, %v318_v1  ;;  %v531_v14 = vadd.f32 %v510_v12, %v424_v8  ;;  %v617_v16 = vpop.f32.mrf.mxu1  ;;  %v2547_v12 = vld [vmem:[%s3594_s3 + $0xe0] sm:$0xff] }
  0xd9   :  { %v3206_v18 = vadd.f32 %v617_v16, %v531_v14  ;;  %v1079_v14 = vld [vmem:[%s3597_s0 + $0x3c] sm:$0xff] }
  0xda   :  { %v1186_v16 = vld [vmem:[%s3596_s1 + $0x3c] sm:$0xff] }
  0xdc   :  { %v301_v23 = vpop.f32.mrf.mxu2 }
  0xdd   :  { %v319_v24 = vadd.f32 %v301_v23, %v3121_v15  ;;  %v2548_v15 = vld [vmem:[%s3594_s3 + $0xe8] sm:$0xff] }
  0xde   :  { %v408_v25 = vpop.f32.mrf.mxu3  ;;  %v513_v29 = vpop.f32.mrf.mxu0  ;;  %1677 = vmatpush.bf16.msra.mxu3 %v2548_v15 }
  0xdf   :  { %v426_v33 = vadd.f32 %v408_v25, %v319_v24  ;;  %v532_v34 = vadd.f32 %v513_v29, %v425_v13  ;;  %v620_v35 = vpop.f32.mrf.mxu1  ;;  %v1193_v24 = vpack.c.bf16 %v1187_v17, %v1186_v16  ;;  %v1406_v25 = vpack.c.bf16 %v1186_v16, %v1185_v51 }
  0xe1   :  { %v3224_v36 = vadd.f32 %v620_v35, %v532_v34  ;;  %2280 = vmatmul.msk.bf16.gmra.mxu2 %vm94_vm0, %v1084_v26  ;;  %2337 = vmatmul.msk.bf16.vlgmr.msrb.gmra.mxu0 %vm94_vm0, %v1297_v28 }
  0xe2   :  { %2366 = vmatmul.msk.bf16.vlgmr.msrb.gmra.mxu1 %vm94_vm0, %v1404_v32  ;;  %1678 = vmatpush.bf16.msra.mxu3 %v2547_v12 }
  0xe3   :  { %2309 = vmatmul.msk.bf16.gmra.mxu3 %vm94_vm0, %v1191_v31  ;;  %v2551_v31 = vld [vmem:[%s3595_s2 + $0x100] sm:$0xff] }
  0xe4   :  { %v304_v4 = vpop.f32.mrf.mxu2  ;;  %1785 = vmatpush.bf16.msra.mxu0 %v2551_v31 }
  0xe5   :  { %v320_v30 = vadd.f32 %v304_v4, %v3046_v27  ;;  %v1078_v27 = vld [vmem:[%s3597_s0 + $0x34] sm:$0xff] }
  0xe6   :  { %v411_v38 = vpop.f32.mrf.mxu3  ;;  %v515_v39 = vpop.f32.mrf.mxu0  ;;  %v1085_v58 = vpack.c.bf16 %v1078_v27, %v1077_v50  ;;  %v1299_v22 = vpack.c.bf16 %v1079_v14, %v1078_v27 }
  0xe7   :  { %v427_v41 = vadd.f32 %v411_v38, %v320_v30  ;;  %v533_v44 = vadd.f32 %v515_v39, %v426_v33  ;;  %v622_v45 = vpop.f32.mrf.mxu1  ;;  %v1081_v39 = vld [vmem:[%s3597_s0 + $0x4c] sm:$0xff] }
  0xe9   :  { %v3237_v46 = vadd.f32 %v622_v45, %v533_v44  ;;  %v1188_v44 = vld [vmem:[%s3596_s1 + $0x4c] sm:$0xff] }
  0xec   :  { %v306_v52 = vpop.f32.mrf.mxu2 }
  0xed   :  { %v321_v53 = vadd.f32 %v306_v52, %v3070_v42  ;;  %v2543_v42 = vld [vmem:[%s3595_s2 + $0xe0] sm:$0xff]  ;;  %v1407_v52 = vpack.c.bf16 %v1188_v44, %v1187_v17 }
  0xee   :  { %v413_v56 = vpop.f32.mrf.mxu3  ;;  %v518_v60 = vpop.f32.mrf.mxu0  ;;  %1571 = vmatpush.bf16.msra.mxu2 %v2543_v42 }
  0xef   :  { %v428_v63 = vadd.f32 %v413_v56, %v321_v53  ;;  %v534_v0 = vadd.f32 %v518_v60, %v427_v41  ;;  %v625_v6 = vpop.f32.mrf.mxu1  ;;  %v1082_v41 = vld [vmem:[%s3597_s0 + $0x54] sm:$0xff] }
  0xf0   :  { %v1087_v50 = vpack.c.bf16 %v1082_v41, %v1081_v39 }
  0xf1   :  { %v3258_v7 = vadd.f32 %v625_v6, %v534_v0  ;;  %2281 = vmatmul.msk.bf16.gmra.mxu2 %vm94_vm0, %v1085_v58  ;;  %2338 = vmatmul.msk.bf16.gmra.mxu0 %vm94_vm0, %v1298_v59 }
  0xf2   :  { %2367 = vmatmul.msk.bf16.gmra.mxu1 %vm94_vm0, %v1405_v62 }
  0xf3   :  { %2310 = vmatmul.msk.bf16.gmra.mxu3 %vm94_vm0, %v1192_v61 }
  0xf4   :  { %v309_v8 = vpop.f32.mrf.mxu2 }
  0xf5   :  { %v322_v10 = vadd.f32 %v309_v8, %v3083_v43  ;;  %v1080_v43 = vld [vmem:[%s3597_s0 + $0x44] sm:$0xff]  ;;  %v1296_v8 = vld [vmem:[%s3597_s0 + $0x5c] sm:$0xff] }
  0xf6   :  { %v416_v9 = vpop.f32.mrf.mxu3  ;;  %v520_v54 = vpop.f32.mrf.mxu0  ;;  %v1086_v21 = vpack.c.bf16 %v1080_v43, %v1079_v14  ;;  %v1300_v27 = vpack.c.bf16 %v1081_v39, %v1080_v43  ;;  %v1301_v14 = vpack.c.bf16 %v1296_v8, %v1082_v41  ;;  %v1613_v8 = vld [vmem:[%s3596_s1 + $0x3d] sm:$0xff] }
  0xf7   :  { %v429_v55 = vadd.f32 %v416_v9, %v322_v10  ;;  %v535_v1 = vadd.f32 %v520_v54, %v428_v63  ;;  %v627_v3 = vpop.f32.mrf.mxu1  ;;  %v1501_v10 = vld [vmem:[%s3597_s0 + $0x15] sm:$0xff]  ;;  %v1502_v9 = vld [vmem:[%s3597_s0 + $0x1d] sm:$0xff] }
  0xf8   :  { %v1608_v54 = vld [vmem:[%s3596_s1 + $0x15] sm:$0xff]  ;;  %v1511_v43 = vpack.c.bf16 %v1502_v9, %v1501_v10  ;;  %v1824_v10 = vld [vmem:[%s3596_s1 + $0x26] sm:$0xff] }
  0xf9   :  { %v3271_v13 = vadd.f32 %v627_v3, %v535_v1  ;;  %v1825_v9 = vld [vmem:[%s3596_s1 + $0x2e] sm:$0xff] }
  0xfc   :  { %v311_v19 = vpop.f32.mrf.mxu2 }
  0xfd   :  { %v323_v11 = vadd.f32 %v311_v19, %v3104_v5  ;;  %v2555_v5 = vld [vmem:[%s3594_s3 + $0x100] sm:$0xff] }
  0xfe   :  { %v418_v20 = vpop.f32.mrf.mxu3  ;;  %v523_v23 = vpop.f32.mrf.mxu0  ;;  %1892 = vmatpush.bf16.msra.mxu1 %v2555_v5  ;;  %v1503_v5 = vld [vmem:[%s3597_s0 + $0x25] sm:$0xff] }
  0xff   :  { %v430_v26 = vadd.f32 %v418_v20, %v323_v11  ;;  %v536_v28 = vadd.f32 %v523_v23, %v429_v55  ;;  %v630_v29 = vpop.f32.mrf.mxu1  ;;  %v1609_v55 = vld [vmem:[%s3596_s1 + $0x1d] sm:$0xff] }
 0x100   :  { %v1618_v19 = vpack.c.bf16 %v1609_v55, %v1608_v54 }
 0x101   :  { %v3289_v32 = vadd.f32 %v630_v29, %v536_v28  ;;  %2282 = vmatmul.msk.bf16.gmra.mxu2 %vm94_vm0, %v1086_v21  ;;  %2339 = vmatmul.msk.bf16.gmra.mxu0 %vm94_vm0, %v1299_v22 }
 0x102   :  { %2368 = vmatmul.msk.bf16.gmra.mxu1 %vm94_vm0, %v1406_v25 }
 0x103   :  { %2311 = vmatmul.msk.bf16.gmra.mxu3 %vm94_vm0, %v1193_v24 }
 0x104   :  { %v717_v33 = vpop.f32.mrf.mxu2 }
 0x105   :  { %v742_v34 = vadd.f32 %v717_v33, %v3150_v37  ;;  %v1189_v37 = vld [vmem:[%s3596_s1 + $0x54] sm:$0xff] }
 0x106   :  { %v824_v35 = vpop.f32.mrf.mxu3  ;;  %v525_v2 = vpop.f32.mrf.mxu0  ;;  %v1194_v51 = vpack.c.bf16 %v1189_v37, %v1188_v44  ;;  %v1504_v33 = vld [vmem:[%s3597_s0 + $0x2d] sm:$0xff] }
 0x107   :  { %v849_v15 = vadd.f32 %v824_v35, %v742_v34  ;;  %v537_v4 = vadd.f32 %v525_v2, %v430_v26  ;;  %v632_v30 = vpop.f32.mrf.mxu1  ;;  %v1610_v34 = vld [vmem:[%s3596_s1 + $0x25] sm:$0xff]  ;;  %v1611_v2 = vld [vmem:[%s3596_s1 + $0x2d] sm:$0xff]  ;;  %v1512_v44 = vpack.c.bf16 %v1504_v33, %v1503_v5 }
 0x108   :  { %v1716_v35 = vld [vmem:[%s3597_s0 + $0x1e] sm:$0xff] }
 0x109   :  { %v3299_v38 = vadd.f32 %v632_v30, %v537_v4  ;;  %v1823_v4 = vld [vmem:[%s3596_s1 + $0x1e] sm:$0xff] }
 0x10a   :  { %v1614_v5 = vld [vmem:[%s3596_s1 + $0x45] sm:$0xff] }
 0x10b   :  { %v1720_v33 = vld [vmem:[%s3597_s0 + $0x3e] sm:$0xff] }
 0x10c   :  { %v719_v45 = vpop.f32.mrf.mxu2 }
 0x10d   :  { %v743_v40 = vadd.f32 %v719_v45, %v3163_v47 }
 0x10e   :  { %v826_v49 = vpop.f32.mrf.mxu3  ;;  %v931_v48 = vpop.f32.mrf.mxu0 }
 0x10f   :  { %v850_v53 = vadd.f32 %v826_v49, %v743_v40  ;;  %v956_v56 = vadd.f32 %v931_v48, %v849_v15  ;;  %v1038_v58 = vpop.f32.mrf.mxu1  ;;  %v1822_v15 = vld [vmem:[%s3596_s1 + $0x16] sm:$0xff]  ;;  %v1619_v40 = vpack.c.bf16 %v1611_v2, %v1610_v34  ;;  %v1615_v34 = vld [vmem:[%s3596_s1 + $0x4d] sm:$0xff] }
 0x110   :  { %v1832_v49 = vpack.c.bf16 %v1823_v4, %v1822_v15 }
 0x111   :  { %v3314_v59 = vadd.f32 %v1038_v58, %v956_v56  ;;  %2283 = vmatmul.msk.bf16.gmra.mxu2 %vm94_vm0, %v1087_v50  ;;  %2340 = vmatmul.msk.bf16.gmra.mxu0 %vm94_vm0, %v1300_v27 }
 0x112   :  { %2369 = vmatmul.msk.bf16.gmra.mxu1 %vm94_vm0, %v1407_v52 }
 0x113   :  { %2312 = vmatmul.msk.bf16.gmra.mxu3 %vm94_vm0, %v1194_v51 }
 0x114   :  { %v722_v47 = vpop.f32.mrf.mxu2 }
 0x115   :  { %v744_v60 = vadd.f32 %v722_v47, %v3196_v57  ;;  %v1403_v57 = vld [vmem:[%s3596_s1 + $0x5c] sm:$0xff] }
 0x116   :  { %v829_v61 = vpop.f32.mrf.mxu3  ;;  %v933_v62 = vpop.f32.mrf.mxu0  ;;  %v1408_v17 = vpack.c.bf16 %v1403_v57, %v1189_v37 }
 0x117   :  { %v851_v63 = vadd.f32 %v829_v61, %v744_v60  ;;  %v957_v0 = vadd.f32 %v933_v62, %v850_v53  ;;  %v1040_v6 = vpop.f32.mrf.mxu1  ;;  %v1505_v62 = vld [vmem:[%s3597_s0 + $0x35] sm:$0xff] }
 0x119   :  { %v3321_v42 = vadd.f32 %v1040_v6, %v957_v0  ;;  %v1612_v0 = vld [vmem:[%s3596_s1 + $0x35] sm:$0xff] }
 0x11a   :  { %v1718_v6 = vld [vmem:[%s3597_s0 + $0x2e] sm:$0xff] }
 0x11c   :  { %v724_v1 = vpop.f32.mrf.mxu2 }
 0x11d   :  { %v745_v3 = vadd.f32 %v724_v1, %v3206_v18 }
 0x11e   :  { %v831_v12 = vpop.f32.mrf.mxu3  ;;  %v936_v16 = vpop.f32.mrf.mxu0 }
 0x11f   :  { %v852_v11 = vadd.f32 %v831_v12, %v745_v3  ;;  %v958_v20 = vadd.f32 %v936_v16, %v851_v63  ;;  %v1043_v21 = vpop.f32.mrf.mxu1  ;;  %v1506_v63 = vld [vmem:[%s3597_s0 + $0x3d] sm:$0xff] }
 0x120   :  { %v1513_v1 = vpack.c.bf16 %v1506_v63, %v1505_v62  ;;  %v1616_v62 = vld [vmem:[%s3596_s1 + $0x55] sm:$0xff] }
 0x121   :  { %v3342_v22 = vadd.f32 %v1043_v21, %v958_v20  ;;  %2341 = vmatmul.msk.bf16.gmra.mxu0 %vm94_vm0, %v1301_v14  ;;  %2395 = vmatmul.msk.bf16.vlgmr.msra.gmra.mxu2 %vm94_vm0, %v1511_v43  ;;  %v1620_v14 = vpack.c.bf16 %v1613_v8, %v1612_v0  ;;  %v1833_v43 = vpack.c.bf16 %v1825_v9, %v1824_v10  ;;  %v1722_v63 = vld [vmem:[%s3597_s0 + $0x4e] sm:$0xff]  ;;  %v1617_v0 = vld [vmem:[%s3596_s1 + $0x5d] sm:$0xff] }
 0x122   :  { %2370 = vmatmul.msk.bf16.gmra.mxu1 %vm94_vm0, %v1408_v17 }
 0x123   :  { %2424 = vmatmul.msk.bf16.vlgmr.msra.gmra.mxu3 %vm94_vm0, %v1618_v19 }
 0x124   :  { %v727_v18 = vpop.f32.mrf.mxu2 }
 0x125   :  { %v746_v23 = vadd.f32 %v727_v18, %v3224_v36  ;;  %v1715_v36 = vld [vmem:[%s3597_s0 + $0x16] sm:$0xff] }
 0x126   :  { %v834_v24 = vpop.f32.mrf.mxu3  ;;  %v938_v25 = vpop.f32.mrf.mxu0  ;;  %v1725_v37 = vpack.c.bf16 %v1716_v35, %v1715_v36  ;;  %v1826_v36 = vld [vmem:[%s3596_s1 + $0x36] sm:$0xff]  ;;  %v1827_v35 = vld [vmem:[%s3596_s1 + $0x3e] sm:$0xff] }
 0x127   :  { %v853_v26 = vadd.f32 %v834_v24, %v746_v23  ;;  %v959_v28 = vadd.f32 %v938_v25, %v852_v11  ;;  %v1045_v29 = vpop.f32.mrf.mxu1 }
 0x129   :  { %v3349_v31 = vadd.f32 %v1045_v29, %v959_v28  ;;  %v1507_v28 = vld [vmem:[%s3597_s0 + $0x45] sm:$0xff]  ;;  %v1508_v29 = vld [vmem:[%s3597_s0 + $0x4d] sm:$0xff] }
 0x12c   :  { %v729_v30 = vpop.f32.mrf.mxu2 }
 0x12d   :  { %v747_v39 = vadd.f32 %v729_v30, %v3237_v46  ;;  %v1514_v30 = vpack.c.bf16 %v1508_v29, %v1507_v28  ;;  %v1830_v28 = vld [vmem:[%s3596_s1 + $0x56] sm:$0xff] }
 0x12e   :  { %v836_v41 = vpop.f32.mrf.mxu3  ;;  %v941_v45 = vpop.f32.mrf.mxu0 }
 0x12f   :  { %v854_v50 = vadd.f32 %v836_v41, %v747_v39  ;;  %v960_v27 = vadd.f32 %v941_v45, %v853_v26  ;;  %v1048_v48 = vpop.f32.mrf.mxu1 }
 0x131   :  { %v3376_v51 = vadd.f32 %v1048_v48, %v960_v27  ;;  %2396 = vmatmul.msk.bf16.gmra.mxu2 %vm94_vm0, %v1512_v44  ;;  %2453 = vmatmul.msk.bf16.vlgmr.msra.gmra.mxu0 %vm94_vm0, %v1725_v37  ;;  %v1621_v44 = vpack.c.bf16 %v1615_v34, %v1614_v5  ;;  %v1834_v37 = vpack.c.bf16 %v1827_v35, %v1826_v36 }
 0x132   :  { %2482 = vmatmul.msk.bf16.vlgmr.msra.gmra.mxu1 %vm94_vm0, %v1832_v49 }
 0x133   :  { %2425 = vmatmul.msk.bf16.gmra.mxu3 %vm94_vm0, %v1619_v40 }
 0x134   :  { %v732_v46 = vpop.f32.mrf.mxu2 }
 0x135   :  { %v748_v52 = vadd.f32 %v732_v46, %v3258_v7  ;;  %v1717_v7 = vld [vmem:[%s3597_s0 + $0x26] sm:$0xff] }
 0x136   :  { %v839_v53 = vpop.f32.mrf.mxu3  ;;  %v943_v56 = vpop.f32.mrf.mxu0  ;;  %v1726_v3 = vpack.c.bf16 %v1718_v6, %v1717_v7  ;;  %v1828_v7 = vld [vmem:[%s3596_s1 + $0x46] sm:$0xff]  ;;  %v1829_v6 = vld [vmem:[%s3596_s1 + $0x4e] sm:$0xff] }
 0x137   :  { %v855_v58 = vadd.f32 %v839_v53, %v748_v52  ;;  %v961_v47 = vadd.f32 %v943_v56, %v854_v50  ;;  %v1050_v60 = vpop.f32.mrf.mxu1 }
 0x139   :  { %v3383_v61 = vadd.f32 %v1050_v60, %v961_v47  ;;  %v1509_v47 = vld [vmem:[%s3597_s0 + $0x55] sm:$0xff]  ;;  %v1510_v60 = vld [vmem:[%s3597_s0 + $0x5d] sm:$0xff] }
 0x13c   :  { %v734_v57 = vpop.f32.mrf.mxu2 }
 0x13d   :  { %v749_v54 = vadd.f32 %v734_v57, %v3271_v13  ;;  %v1515_v57 = vpack.c.bf16 %v1510_v60, %v1509_v47 }
 0x13e   :  { %v841_v55 = vpop.f32.mrf.mxu3  ;;  %v946_v12 = vpop.f32.mrf.mxu0 }
 0x13f   :  { %v856_v16 = vadd.f32 %v841_v55, %v749_v54  ;;  %v962_v17 = vadd.f32 %v946_v12, %v855_v58  ;;  %v1053_v19 = vpop.f32.mrf.mxu1 }
 0x141   :  { %v3410_v11 = vadd.f32 %v1053_v19, %v962_v17  ;;  %2397 = vmatmul.msk.bf16.gmra.mxu2 %vm94_vm0, %v1513_v1  ;;  %2454 = vmatmul.msk.bf16.gmra.mxu0 %vm94_vm0, %v1726_v3  ;;  %v1622_v1 = vpack.c.bf16 %v1617_v0, %v1616_v62  ;;  %v1835_v3 = vpack.c.bf16 %v1829_v6, %v1828_v7 }
 0x142   :  { %2483 = vmatmul.msk.bf16.gmra.mxu1 %vm94_vm0, %v1833_v43 }
 0x143   :  { %2426 = vmatmul.msk.bf16.gmra.mxu3 %vm94_vm0, %v1620_v14 }
 0x144   :  { %v737_v13 = vpop.f32.mrf.mxu2 }
 0x145   :  { %v750_v20 = vadd.f32 %v737_v13, %v3289_v32  ;;  %v1719_v32 = vld [vmem:[%s3597_s0 + $0x36] sm:$0xff] }
 0x146   :  { %v844_v21 = vpop.f32.mrf.mxu3  ;;  %v948_v18 = vpop.f32.mrf.mxu0  ;;  %v1727_v39 = vpack.c.bf16 %v1720_v33, %v1719_v32 }
 0x147   :  { %v857_v23 = vadd.f32 %v844_v21, %v750_v20  ;;  %v963_v24 = vadd.f32 %v948_v18, %v856_v16  ;;  %v1055_v25 = vpop.f32.mrf.mxu1 }
 0x149   :  { %v3417_v26 = vadd.f32 %v1055_v25, %v963_v24  ;;  %v1723_v24 = vld [vmem:[%s3597_s0 + $0x56] sm:$0xff]  ;;  %v1724_v25 = vld [vmem:[%s3597_s0 + $0x5e] sm:$0xff] }
 0x14a   :  { %v1729_v33 = vpack.c.bf16 %v1724_v25, %v1723_v24 }
 0x14c   :  { %v739_v2 = vpop.f32.mrf.mxu2 }
 0x14d   :  { %v751_v15 = vadd.f32 %v739_v2, %v3299_v38 }
 0x14e   :  { %v846_v4 = vpop.f32.mrf.mxu3  ;;  %v951_v41 = vpop.f32.mrf.mxu0 }
 0x14f   :  { %v858_v45 = vadd.f32 %v846_v4, %v751_v15  ;;  %v964_v40 = vadd.f32 %v951_v41, %v857_v23  ;;  %v1058_v49 = vpop.f32.mrf.mxu1 }
 0x151   :  { %v3444_v50 = vadd.f32 %v1058_v49, %v964_v40  ;;  %2398 = vmatmul.msk.bf16.gmra.mxu2 %vm94_vm0, %v1514_v30  ;;  %2455 = vmatmul.msk.bf16.gmra.mxu0 %vm94_vm0, %v1727_v39 }
 0x152   :  { %2484 = vmatmul.msk.bf16.gmra.mxu1 %vm94_vm0, %v1834_v37 }
 0x153   :  { %2427 = vmatmul.msk.bf16.gmra.mxu3 %vm94_vm0, %v1621_v44 }
 0x154   :  { %v1145_v38 = vpop.f32.mrf.mxu2 }
 0x155   :  { %v1170_v27 = vadd.f32 %v1145_v38, %v3314_v59  ;;  %v1721_v59 = vld [vmem:[%s3597_s0 + $0x46] sm:$0xff] }
 0x156   :  { %v1252_v48 = vpop.f32.mrf.mxu3  ;;  %v953_v46 = vpop.f32.mrf.mxu0  ;;  %v1728_v54 = vpack.c.bf16 %v1722_v63, %v1721_v59 }
 0x157   :  { %v1277_v52 = vadd.f32 %v1252_v48, %v1170_v27  ;;  %v965_v53 = vadd.f32 %v953_v46, %v858_v45  ;;  %v1060_v56 = vpop.f32.mrf.mxu1 }
 0x159   :  { %v3451_v58 = vadd.f32 %v1060_v56, %v965_v53 }
 0x15c   :  { %v1147_v8 = vpop.f32.mrf.mxu2 }
 0x15d   :  { %v1171_v10 = vadd.f32 %v1147_v8, %v3321_v42 }
 0x15e   :  { %v1254_v9 = vpop.f32.mrf.mxu3  ;;  %v1359_v55 = vpop.f32.mrf.mxu0 }
 0x15f   :  { %v1278_v12 = vadd.f32 %v1254_v9, %v1171_v10  ;;  %v1384_v14 = vadd.f32 %v1359_v55, %v1277_v52  ;;  %v1466_v43 = vpop.f32.mrf.mxu1 }
 0x161   :  { %v3478_v16 = vadd.f32 %v1466_v43, %v1384_v14  ;;  %2399 = vmatmul.msk.bf16.gmra.mxu2 %vm94_vm0, %v1515_v57  ;;  %2456 = vmatmul.msk.bf16.gmra.mxu0 %vm94_vm0, %v1728_v54 }
 0x162   :  { %2485 = vmatmul.msk.bf16.gmra.mxu1 %vm94_vm0, %v1835_v3 }
 0x163   :  { %2428 = vmatmul.msk.bf16.gmra.mxu3 %vm94_vm0, %v1622_v1 }
 0x164   :  { %v1150_v42 = vpop.f32.mrf.mxu2 }
 0x165   :  { %v1172_v17 = vadd.f32 %v1150_v42, %v3342_v22  ;;  %v1831_v22 = vld [vmem:[%s3596_s1 + $0x5e] sm:$0xff] }
 0x166   :  { %v1257_v19 = vpop.f32.mrf.mxu3  ;;  %v1361_v13 = vpop.f32.mrf.mxu0  ;;  %v1836_v36 = vpack.c.bf16 %v1831_v22, %v1830_v28 }
 0x167   :  { %v1279_v20 = vadd.f32 %v1257_v19, %v1172_v17  ;;  %v1385_v21 = vadd.f32 %v1361_v13, %v1278_v12  ;;  %v1468_v18 = vpop.f32.mrf.mxu1 }
 0x169   :  { %v3485_v23 = vadd.f32 %v1468_v18, %v1385_v21 }
 0x16c   :  { %v1152_v29 = vpop.f32.mrf.mxu2 }
 0x16d   :  { %v1173_v5 = vadd.f32 %v1152_v29, %v3349_v31 }
 0x16e   :  { %v1259_v32 = vpop.f32.mrf.mxu3  ;;  %v1364_v34 = vpop.f32.mrf.mxu0 }
 0x16f   :  { %v1280_v35 = vadd.f32 %v1259_v32, %v1173_v5  ;;  %v1386_v2 = vadd.f32 %v1364_v34, %v1279_v20  ;;  %v1471_v15 = vpop.f32.mrf.mxu1 }
 0x171   :  { %v3500_v4 = vadd.f32 %v1471_v15, %v1386_v2  ;;  %2457 = vmatmul.msk.bf16.gmra.mxu0 %vm94_vm0, %v1729_v33 }
 0x172   :  { %2486 = vmatmul.msk.bf16.gmra.mxu1 %vm94_vm0, %v1836_v36 }
 0x174   :  { %v1155_v30 = vpop.f32.mrf.mxu2 }
 0x175   :  { %v1174_v39 = vadd.f32 %v1155_v30, %v3376_v51  ;;  %v3528_v30 = vld [vmem:[%s3598_s4] ss:$0 sm:$0xff] }
 0x176   :  { %v1262_v41 = vpop.f32.mrf.mxu3  ;;  %v1366_v44 = vpop.f32.mrf.mxu0 }
 0x177   :  { %v1281_v37 = vadd.f32 %v1262_v41, %v1174_v39  ;;  %v1387_v31 = vadd.f32 %v1366_v44, %v1280_v35  ;;  %v1473_v45 = vpop.f32.mrf.mxu1 }
 0x179   :  { %v3505_v40 = vadd.f32 %v1473_v45, %v1387_v31 }
 0x17c   :  { %v1157_v49 = vpop.f32.mrf.mxu2 }
 0x17d   :  { %v1175_v38 = vadd.f32 %v1157_v49, %v3383_v61 }
 0x17e   :  { %v1264_v27 = vpop.f32.mrf.mxu3  ;;  %v1369_v48 = vpop.f32.mrf.mxu0 }
 0x17f   :  { %v1282_v46 = vadd.f32 %v1264_v27, %v1175_v38  ;;  %v1388_v52 = vadd.f32 %v1369_v48, %v1281_v37  ;;  %v1476_v53 = vpop.f32.mrf.mxu1 }
 0x181   :  { %v3508_v56 = vadd.f32 %v1476_v53, %v1388_v52 }
 0x184   :  { %v1160_v47 = vpop.f32.mrf.mxu2 }
 0x185   :  { %v1176_v51 = vadd.f32 %v1160_v47, %v3410_v11 }
 0x186   :  { %v1267_v60 = vpop.f32.mrf.mxu3  ;;  %v1371_v62 = vpop.f32.mrf.mxu0 }
 0x187   :  { %v1283_v59 = vadd.f32 %v1267_v60, %v1176_v51  ;;  %v1389_v63 = vadd.f32 %v1371_v62, %v1282_v46  ;;  %v1478_v0 = vpop.f32.mrf.mxu1 }
 0x189   :  { %v3511_v7 = vadd.f32 %v1478_v0, %v1389_v63 }
 0x18c   :  { %v1162_v6 = vpop.f32.mrf.mxu2 }
 0x18d   :  { %v1177_v61 = vadd.f32 %v1162_v6, %v3417_v26 }
 0x18e   :  { %v1269_v8 = vpop.f32.mrf.mxu3  ;;  %v1374_v10 = vpop.f32.mrf.mxu0 }
 0x18f   :  { %v1284_v9 = vadd.f32 %v1269_v8, %v1177_v61  ;;  %v1390_v57 = vadd.f32 %v1374_v10, %v1283_v59  ;;  %v1481_v54 = vpop.f32.mrf.mxu1 }
 0x191   :  { %v3514_v55 = vadd.f32 %v1481_v54, %v1390_v57 }
 0x194   :  { %v1165_v1 = vpop.f32.mrf.mxu2 }
 0x195   :  { %v1178_v11 = vadd.f32 %v1165_v1, %v3444_v50 }
 0x196   :  { %v1272_v3 = vpop.f32.mrf.mxu3  ;;  %v1376_v12 = vpop.f32.mrf.mxu0 }
 0x197   :  { %v1285_v14 = vadd.f32 %v1272_v3, %v1178_v11  ;;  %v1391_v43 = vadd.f32 %v1376_v12, %v1284_v9  ;;  %v1483_v42 = vpop.f32.mrf.mxu1 }
 0x199   :  { %v3517_v17 = vadd.f32 %v1483_v42, %v1391_v43 }
 0x19c   :  { %v1167_v19 = vpop.f32.mrf.mxu2 }
 0x19d   :  { %v1179_v26 = vadd.f32 %v1167_v19, %v3451_v58 }
 0x19e   :  { %v1274_v13 = vpop.f32.mrf.mxu3  ;;  %v1379_v20 = vpop.f32.mrf.mxu0 }
 0x19f   :  { %v1286_v21 = vadd.f32 %v1274_v13, %v1179_v26  ;;  %v1392_v18 = vadd.f32 %v1379_v20, %v1285_v14  ;;  %v1486_v24 = vpop.f32.mrf.mxu1 }
 0x1a1   :  { %v3520_v25 = vadd.f32 %v1486_v24, %v1392_v18 }
 0x1a4   :  { %v1573_v28 = vpop.f32.mrf.mxu2 }
 0x1a5   :  { %v1598_v32 = vadd.f32 %v1573_v28, %v3478_v16  ;;  %v3534_v16 = vld [vmem:[%s3599_s5] ss:$0 sm:$0xff] }
 0x1a6   :  { %v1680_v22 = vpop.f32.mrf.mxu3  ;;  %v1381_v50 = vpop.f32.mrf.mxu0 }
 0x1a7   :  { %v1393_v29 = vadd.f32 %v1381_v50, %v1286_v21  ;;  %v1488_v5 = vpop.f32.mrf.mxu1  ;;  %v1705_v36 = vadd.f32 %v1680_v22, %v1598_v32 }
 0x1a9   :  { %v3523_v33 = vadd.f32 %v1488_v5, %v1393_v29 }
 0x1ac   :  { %v1575_v34 = vpop.f32.mrf.mxu2 }
 0x1ad   :  { %v1599_v39 = vadd.f32 %v1575_v34, %v3485_v23 }
 0x1ae   :  { %v1682_v35 = vpop.f32.mrf.mxu3  ;;  %v1787_v58 = vpop.f32.mrf.mxu0 }
 0x1af   :  { %v1812_v2 = vadd.f32 %v1787_v58, %v1705_v36  ;;  %v1894_v15 = vpop.f32.mrf.mxu1  ;;  %v1706_v31 = vadd.f32 %v1682_v35, %v1599_v39 }
 0x1b1   :  { %v1919_v41 = vadd.f32 %v1894_v15, %v1812_v2 }
 0x1b3   :  { %v1933_v44 = vmul.f32 %v3528_v30, %v1919_v41 }
 0x1b4   :  { %v1578_v37 = vpop.f32.mrf.mxu2 }
 0x1b5   :  { %v1947_v45 = vadd.f32 %v3534_v16, %v1933_v44  ;;  %v1600_v23 = vadd.f32 %v1578_v37, %v3500_v4 }
 0x1b6   :  { %v1685_v49 = vpop.f32.mrf.mxu3  ;;  %v1789_v38 = vpop.f32.mrf.mxu0 }
 0x1b7   :  { %v1957_v27 = vmax.f32 %v1947_v45, 0.0  ;;  %v1813_v48 = vadd.f32 %v1789_v38, %v1706_v31  ;;  %v1896_v46 = vpop.f32.mrf.mxu1  ;;  %v1707_v51 = vadd.f32 %v1685_v49, %v1600_v23 }
 0x1b9   :  { %1967 = vst [vmem:[%s3600_s6] sm:$0xff] %v1957_v27  ;;  %v1920_v52 = vadd.f32 %v1896_v46, %v1813_v48 }
 0x1bb   :  { %v1934_v53 = vmul.f32 %v3528_v30, %v1920_v52 }
 0x1bc   :  { %v1580_v47 = vpop.f32.mrf.mxu2 }
 0x1bd   :  { %v1948_v60 = vadd.f32 %v3534_v16, %v1934_v53  ;;  %v1601_v61 = vadd.f32 %v1580_v47, %v3505_v40 }
 0x1be   :  { %v1687_v62 = vpop.f32.mrf.mxu3  ;;  %v1792_v59 = vpop.f32.mrf.mxu0 }
 0x1bf   :  { %v1958_v63 = vmax.f32 %v1948_v60, 0.0  ;;  %v1814_v0 = vadd.f32 %v1792_v59, %v1707_v51  ;;  %v1899_v6 = vpop.f32.mrf.mxu1  ;;  %v1708_v9 = vadd.f32 %v1687_v62, %v1601_v61 }
 0x1c1   :  { %1968 = vst [vmem:[%s3600_s6 + $0x8] sm:$0xff] %v1958_v63  ;;  %v1921_v8 = vadd.f32 %v1899_v6, %v1814_v0 }
 0x1c3   :  { %v1935_v4 = vmul.f32 %v3528_v30, %v1921_v8 }
 0x1c4   :  { %v1583_v10 = vpop.f32.mrf.mxu2 }
 0x1c5   :  { %v1949_v57 = vadd.f32 %v3534_v16, %v1935_v4  ;;  %v1602_v14 = vadd.f32 %v1583_v10, %v3508_v56 }
 0x1c6   :  { %v1690_v54 = vpop.f32.mrf.mxu3  ;;  %v1794_v1 = vpop.f32.mrf.mxu0 }
 0x1c7   :  { %v1959_v11 = vmax.f32 %v1949_v57, 0.0  ;;  %v1815_v3 = vadd.f32 %v1794_v1, %v1708_v9  ;;  %v1901_v12 = vpop.f32.mrf.mxu1  ;;  %v1709_v19 = vadd.f32 %v1690_v54, %v1602_v14 }
 0x1c9   :  { %1969 = vst [vmem:[%s3600_s6 + $0x10] sm:$0xff] %v1959_v11  ;;  %v1922_v43 = vadd.f32 %v1901_v12, %v1815_v3 }
 0x1cb   :  { %v1936_v40 = vmul.f32 %v3528_v30, %v1922_v43 }
 0x1cc   :  { %v1585_v42 = vpop.f32.mrf.mxu2 }
 0x1cd   :  { %v1950_v26 = vadd.f32 %v3534_v16, %v1936_v40  ;;  %v1603_v28 = vadd.f32 %v1585_v42, %v3511_v7 }
 0x1ce   :  { %v1692_v13 = vpop.f32.mrf.mxu3  ;;  %v1797_v20 = vpop.f32.mrf.mxu0 }
 0x1cf   :  { %v1960_v21 = vmax.f32 %v1950_v26, 0.0  ;;  %v1816_v18 = vadd.f32 %v1797_v20, %v1709_v19  ;;  %v1904_v24 = vpop.f32.mrf.mxu1  ;;  %v1710_v29 = vadd.f32 %v1692_v13, %v1603_v28 }
 0x1d1   :  { %1970 = vst [vmem:[%s3600_s6 + $0x18] sm:$0xff] %v1960_v21  ;;  %v1923_v22 = vadd.f32 %v1904_v24, %v1816_v18 }
 0x1d3   :  { %v1937_v56 = vmul.f32 %v3528_v30, %v1923_v22 }
 0x1d4   :  { %v1588_v50 = vpop.f32.mrf.mxu2 }
 0x1d5   :  { %v1951_v5 = vadd.f32 %v3534_v16, %v1937_v56  ;;  %v1604_v2 = vadd.f32 %v1588_v50, %v3514_v55 }
 0x1d6   :  { %v1695_v32 = vpop.f32.mrf.mxu3  ;;  %v1799_v34 = vpop.f32.mrf.mxu0 }
 0x1d7   :  { %v1961_v36 = vmax.f32 %v1951_v5, 0.0  ;;  %v1817_v35 = vadd.f32 %v1799_v34, %v1710_v29  ;;  %v1906_v58 = vpop.f32.mrf.mxu1  ;;  %v1711_v41 = vadd.f32 %v1695_v32, %v1604_v2 }
 0x1d9   :  { %1971 = vst [vmem:[%s3600_s6 + $0x20] sm:$0xff] %v1961_v36  ;;  %v1924_v15 = vadd.f32 %v1906_v58, %v1817_v35 }
 0x1db   :  { %v1938_v7 = vmul.f32 %v3528_v30, %v1924_v15 }
 0x1dc   :  { %v1590_v39 = vpop.f32.mrf.mxu2 }
 0x1dd   :  { %v1952_v44 = vadd.f32 %v3534_v16, %v1938_v7  ;;  %v1605_v27 = vadd.f32 %v1590_v39, %v3517_v17 }
 0x1de   :  { %v1802_v37 = vpop.f32.mrf.mxu0  ;;  %v1697_v38 = vpop.f32.mrf.mxu3 }
 0x1df   :  { %v1962_v31 = vmax.f32 %v1952_v44, 0.0  ;;  %v1818_v45 = vadd.f32 %v1802_v37, %v1711_v41  ;;  %v1909_v49 = vpop.f32.mrf.mxu1  ;;  %v1712_v23 = vadd.f32 %v1697_v38, %v1605_v27 }
 0x1e1   :  { %1972 = vst [vmem:[%s3600_s6 + $0x28] sm:$0xff] %v1962_v31  ;;  %v1925_v48 = vadd.f32 %v1909_v49, %v1818_v45 }
 0x1e3   :  { %v1939_v55 = vmul.f32 %v3528_v30, %v1925_v48 }
 0x1e4   :  { %v1593_v46 = vpop.f32.mrf.mxu2 }
 0x1e5   :  { %v1953_v52 = vadd.f32 %v3534_v16, %v1939_v55  ;;  %v1606_v62 = vadd.f32 %v1593_v46, %v3520_v25 }
 0x1e6   :  { %v1804_v53 = vpop.f32.mrf.mxu0  ;;  %v1700_v63 = vpop.f32.mrf.mxu3 }
 0x1e7   :  { %v1963_v47 = vmax.f32 %v1953_v52, 0.0  ;;  %v1819_v51 = vadd.f32 %v1804_v53, %v1712_v23  ;;  %v1911_v60 = vpop.f32.mrf.mxu1  ;;  %v1713_v0 = vadd.f32 %v1700_v63, %v1606_v62 }
 0x1e9   :  { %1973 = vst [vmem:[%s3600_s6 + $0x30] sm:$0xff] %v1963_v47  ;;  %v1926_v59 = vadd.f32 %v1911_v60, %v1819_v51 }
 0x1eb   :  { %v1940_v17 = vmul.f32 %v3528_v30, %v1926_v59 }
 0x1ec   :  { %v1595_v61 = vpop.f32.mrf.mxu2 }
 0x1ed   :  { %v1954_v6 = vadd.f32 %v3534_v16, %v1940_v17  ;;  %v1607_v57 = vadd.f32 %v1595_v61, %v3523_v33 }
 0x1ee   :  { %v1807_v8 = vpop.f32.mrf.mxu0  ;;  %v1702_v1 = vpop.f32.mrf.mxu3 }
 0x1ef   :  { %v1964_v4 = vmax.f32 %v1954_v6, 0.0  ;;  %v1820_v10 = vadd.f32 %v1807_v8, %v1713_v0  ;;  %v1914_v9 = vpop.f32.mrf.mxu1  ;;  %v1714_v11 = vadd.f32 %v1702_v1, %v1607_v57 }
 0x1f1   :  { %1974 = vst [vmem:[%s3600_s6 + $0x38] sm:$0xff] %v1964_v4  ;;  %v1927_v54 = vadd.f32 %v1914_v9, %v1820_v10 }
 0x1f3   :  { %v1941_v25 = vmul.f32 %v3528_v30, %v1927_v54 }
 0x1f5   :  { %v1955_v3 = vadd.f32 %v3534_v16, %v1941_v25 }
 0x1f6   :  { %v1809_v12 = vpop.f32.mrf.mxu0 }
 0x1f7   :  { %v1965_v14 = vmax.f32 %v1955_v3, 0.0  ;;  %v1821_v43 = vadd.f32 %v1809_v12, %v1714_v11  ;;  %v1916_v40 = vpop.f32.mrf.mxu1 }
 0x1f9   :  { %1975 = vst [vmem:[%s3600_s6 + $0x40] sm:$0xff] %v1965_v14  ;;  %v1928_v42 = vadd.f32 %v1916_v40, %v1821_v43 }
 0x1fb   :  { %v1942_v19 = vmul.f32 %v3528_v30, %v1928_v42 }
 0x1fd   :  { %v1956_v33 = vadd.f32 %v3534_v16, %v1942_v19 }
 0x1ff   :  { %v1966_v26 = vmax.f32 %v1956_v33, 0.0 }
 0x201   :  { %1976 = vst [vmem:[%s3600_s6 + $0x48] sm:$0xff] %v1966_v26 }

</bundles_post_ra>
